<compile_context>
chip_gen: v6e
topology: v6e:2x2x1
jax: 0.10.0
libtpu: 0.0.40
codegen_flags: <defaults>
</compile_context>

<pallas_src>
import jax
import jax.numpy as jnp
from jax.experimental import pallas as pl
from jax.experimental.pallas import tpu as pltpu


def _round_up(n, m):
    return ((n + m - 1) // m) * m


def _mlp_softplus_kernel(
    x_ref,
    w1_ref, b1_ref,
    w2_ref, b2_ref,
    w3_ref, b3_ref,
    w4_ref, b4_ref,
    w5_ref, b5_ref,
    o_ref,
):
    cdt = w1_ref.dtype  # matmul operand dtype (bf16 by default, f32 optional)

    x = x_ref[...].astype(cdt)

    # Layer 1: Linear(input_dim, input_dim) + ReLU (bias add / ReLU in f32)
    h = jnp.dot(x, w1_ref[...], preferred_element_type=jnp.float32) + b1_ref[...]
    h = jnp.maximum(h, 0.0)

    # Layer 2: Linear(input_dim, 512) + ReLU
    h = jnp.dot(h.astype(cdt), w2_ref[...], preferred_element_type=jnp.float32) + b2_ref[...]
    h = jnp.maximum(h, 0.0)

    # Layer 3: Linear(512, 128) + ReLU
    h = jnp.dot(h.astype(cdt), w3_ref[...], preferred_element_type=jnp.float32) + b3_ref[...]
    h = jnp.maximum(h, 0.0)

    # Layer 4: Linear(128, 32) + ReLU
    h = jnp.dot(h.astype(cdt), w4_ref[...], preferred_element_type=jnp.float32) + b4_ref[...]
    h = jnp.maximum(h, 0.0)

    # Layer 5: Linear(32, output_dim_padded)
    y = jnp.dot(h.astype(cdt), w5_ref[...], preferred_element_type=jnp.float32) + b5_ref[...]

    # Softplus (numerically stable, f32): max(y, 0) + log1p(exp(-|y|))
    sp = jnp.maximum(y, 0.0) + jnp.log1p(jnp.exp(-jnp.abs(y)))
    o_ref[...] = sp.astype(o_ref.dtype)


def estimate_rho_forward(x, params, *, tile_m=256, compute_dtype=jnp.bfloat16):
    """Pallas-backed forward of Estimate_rho.

    x: [B, input_dim] float32
    params: dict of w1..w5 ([in, out], f32) and b1..b5 ([1, out], f32)
    """
    B, in_dim = x.shape
    out_dim = params["w5"].shape[1]

    # --- pad final layer to a full 128-lane tile -> unmasked (lane-dense) output stores ---
    out_pad = _round_up(out_dim, 128)
    w5 = params["w5"]
    b5 = params["b5"]
    if out_pad != out_dim:
        w5 = jnp.pad(w5, ((0, 0), (0, out_pad - out_dim)))
        b5 = jnp.pad(b5, ((0, 0), (0, out_pad - out_dim)))

    ws = [params["w1"], params["w2"], params["w3"], params["w4"], w5]
    bs = [params["b1"], params["b2"], params["b3"], params["b4"], b5]
    ws = [w.astype(compute_dtype) for w in ws]   # MXU operands (bf16 by default)
    bs = [b.astype(jnp.float32) for b in bs]     # bias add stays f32

    # --- ragged batch: round tile to sublane quantum, pad rows, slice back at the end ---
    tile_m = _round_up(max(8, min(tile_m, _round_up(B, 8))), 8)
    B_pad = _round_up(B, tile_m)
    x_p = x if B_pad == B else jnp.pad(x, ((0, B_pad - B), (0, 0)))

    grid = (B_pad // tile_m,)

    flops = 2 * B_pad * sum(int(w.shape[0]) * int(w.shape[1]) for w in ws)
    bytes_accessed = (
        x_p.size * x_p.dtype.itemsize
        + sum(w.size * w.dtype.itemsize for w in ws)
        + sum(b.size * b.dtype.itemsize for b in bs)
        + B_pad * out_pad * 4
    )
    cost = pl.CostEstimate(
        flops=int(flops),
        transcendentals=int(2 * B_pad * out_pad),
        bytes_accessed=int(bytes_accessed),
    )

    def build(single_buffer_consts):
        def const_spec(shape):
            kwargs = {}
            if single_buffer_consts:
                # Constant index_map across the grid: no need to double-buffer.
                kwargs["pipeline_mode"] = pl.Buffered(1)
            return pl.BlockSpec(shape, lambda i: (0, 0), **kwargs)

        in_specs = [pl.BlockSpec((tile_m, in_dim), lambda i: (i, 0))]
        for w, b in zip(ws, bs):
            in_specs.append(const_spec(w.shape))
            in_specs.append(const_spec(b.shape))
        out_specs = pl.BlockSpec((tile_m, out_pad), lambda i: (i, 0))

        return pl.pallas_call(
            _mlp_softplus_kernel,
            out_shape=jax.ShapeDtypeStruct((B_pad, out_pad), jnp.float32),
            grid_spec=pltpu.PrefetchScalarGridSpec(
                num_scalar_prefetch=0,
                grid=grid,
                in_specs=in_specs,
                out_specs=out_specs,
            ),
            compiler_params=pltpu.CompilerParams(
                dimension_semantics=("parallel",),
                vmem_limit_bytes=32 * 1024 * 1024,
            ),
            cost_estimate=cost,
        )

    operands = [x_p]
    for w, b in zip(ws, bs):
        operands += [w, b]

    try:
        out_p = build(single_buffer_consts=True)(*operands)
    except Exception:
        # pipeline_mode=pl.Buffered(1) unavailable in this JAX build; fall back to
        # default double-buffered constant blocks (correctness unchanged).
        out_p = build(single_buffer_consts=False)(*operands)

    return out_p[:B, :out_dim]


def init_params(key, input_dim, output_dim):
    """Deterministic PyTorch-style (uniform +-1/sqrt(fan_in)) init, f32."""
    dims = [(input_dim, input_dim), (input_dim, 512), (512, 128),
            (128, 32), (32, output_dim)]
    params = {}
    keys = jax.random.split(key, 2 * len(dims))
    for idx, (fan_in, fan_out) in enumerate(dims):
        bound = 1.0 / jnp.sqrt(jnp.float32(fan_in))
        w = jax.random.uniform(keys[2 * idx], (fan_in, fan_out),
                               minval=-bound, maxval=bound, dtype=jnp.float32)
        b = jax.random.uniform(keys[2 * idx + 1], (1, fan_out),
                               minval=-bound, maxval=bound, dtype=jnp.float32)
        params[f"w{idx + 1}"] = w
        params[f"b{idx + 1}"] = b
    return params


def reference_forward(x, params):
    h = x
    for i in range(1, 5):
        h = jnp.maximum(h @ params[f"w{i}"] + params[f"b{i}"], 0.0)
    y = h @ params["w5"] + params["b5"]
    return jnp.maximum(y, 0.0) + jnp.log1p(jnp.exp(-jnp.abs(y)))


if __name__ == "__main__":
    input_dim = 32
    output_dim = 8
    batch = 300  # deliberately NOT a multiple of tile_m -> exercises the padding path

    key = jax.random.PRNGKey(0)
    k_x, k_p = jax.random.split(key)
    x = jax.random.normal(k_x, (batch, input_dim), dtype=jnp.float32)
    params = init_params(k_p, input_dim, output_dim)

    ref = reference_forward(x, params)

    # f32 run: validates exact forward semantics of the kernel.
    out_f32 = estimate_rho_forward(x, params, tile_m=256, compute_dtype=jnp.float32)
    out_f32 = jax.block_until_ready(out_f32)
    assert out_f32.shape == (batch, output_dim)
    assert jnp.allclose(out_f32, ref, atol=1e-4, rtol=1e-4), "f32 kernel mismatch vs reference"

    # bf16-operand run (default fast path): f32 accumulation, loose tolerance vs f32 ref.
    out_bf16 = estimate_rho_forward(x, params, tile_m=256)
    out_bf16 = jax.block_until_ready(out_bf16)
    assert out_bf16.shape == (batch, output_dim)
    max_err = float(jnp.max(jnp.abs(out_bf16 - ref)))
    assert max_err < 5e-2, f"bf16 kernel mismatch vs reference (max abs err {max_err})"

    print("KERNEL_OK")
</pallas_src>

<mosaic_0001>
module attributes {stable_mosaic.version = 11 : i64} {
  func.func @_mlp_softplus_kernel(%arg0: i32, %arg1: memref<256x32xf32, #tpu.memory_space<vmem>>, %arg2: memref<32x32xf32, #tpu.memory_space<vmem>>, %arg3: memref<1x32xf32, #tpu.memory_space<vmem>>, %arg4: memref<32x512xf32, #tpu.memory_space<vmem>>, %arg5: memref<1x512xf32, #tpu.memory_space<vmem>>, %arg6: memref<512x128xf32, #tpu.memory_space<vmem>>, %arg7: memref<1x128xf32, #tpu.memory_space<vmem>>, %arg8: memref<128x32xf32, #tpu.memory_space<vmem>>, %arg9: memref<1x32xf32, #tpu.memory_space<vmem>>, %arg10: memref<32x128xf32, #tpu.memory_space<vmem>>, %arg11: memref<1x128xf32, #tpu.memory_space<vmem>>, %arg12: memref<256x128xf32, #tpu.memory_space<vmem>>) attributes {dimension_semantics = [#tpu.dimension_semantics<parallel>], iteration_bounds = array<i64: 2>, scalar_prefetch = 0 : i64, scratch_operands = 0 : i64, tpu.core_type = #tpu.core_type<tc>, window_params = [{transform_indices = @transform_0, window_bounds = array<i64: 256, 32>}, {pipeline_mode = #tpu.pipeline_mode<synchronous>, transform_indices = @transform_1, window_bounds = array<i64: 32, 32>}, {pipeline_mode = #tpu.pipeline_mode<synchronous>, transform_indices = @transform_2, window_bounds = array<i64: 1, 32>}, {pipeline_mode = #tpu.pipeline_mode<synchronous>, transform_indices = @transform_3, window_bounds = array<i64: 32, 512>}, {pipeline_mode = #tpu.pipeline_mode<synchronous>, transform_indices = @transform_4, window_bounds = array<i64: 1, 512>}, {pipeline_mode = #tpu.pipeline_mode<synchronous>, transform_indices = @transform_5, window_bounds = array<i64: 512, 128>}, {pipeline_mode = #tpu.pipeline_mode<synchronous>, transform_indices = @transform_6, window_bounds = array<i64: 1, 128>}, {pipeline_mode = #tpu.pipeline_mode<synchronous>, transform_indices = @transform_7, window_bounds = array<i64: 128, 32>}, {pipeline_mode = #tpu.pipeline_mode<synchronous>, transform_indices = @transform_8, window_bounds = array<i64: 1, 32>}, {pipeline_mode = #tpu.pipeline_mode<synchronous>, transform_indices = @transform_9, window_bounds = array<i64: 32, 128>}, {pipeline_mode = #tpu.pipeline_mode<synchronous>, transform_indices = @transform_10, window_bounds = array<i64: 1, 128>}, {transform_indices = @transform_11, window_bounds = array<i64: 256, 128>}]} {
    %c0 = arith.constant 0 : index
    %c0_0 = arith.constant 0 : index
    %0 = vector.load %arg1[%c0, %c0_0] : memref<256x32xf32, #tpu.memory_space<vmem>>, vector<256x32xf32>
    %c0_1 = arith.constant 0 : index
    %c0_2 = arith.constant 0 : index
    %1 = vector.load %arg2[%c0_1, %c0_2] : memref<32x32xf32, #tpu.memory_space<vmem>>, vector<32x32xf32>
    %cst = arith.constant dense<0.000000e+00> : vector<256x32xf32>
    %2 = tpu.matmul %0, %1, %cst {dimension_numbers = #tpu.dot_dimension_numbers<[1], [0], [0], [1], [0, 0, 1, 1], [], []>} : vector<256x32xf32>, vector<32x32xf32>, vector<256x32xf32> -> vector<256x32xf32>
    %c0_3 = arith.constant 0 : index
    %c0_4 = arith.constant 0 : index
    %3 = vector.load %arg3[%c0_3, %c0_4] : memref<1x32xf32, #tpu.memory_space<vmem>>, vector<1x32xf32>
    %4 = vector.broadcast %3 : vector<1x32xf32> to vector<256x32xf32>
    %5 = arith.addf %2, %4 : vector<256x32xf32>
    %cst_5 = arith.constant 0.000000e+00 : f32
    %6 = vector.broadcast %cst_5 : f32 to vector<256x32xf32>
    %7 = arith.maximumf %5, %6 : vector<256x32xf32>
    %c0_6 = arith.constant 0 : index
    %c0_7 = arith.constant 0 : index
    %8 = vector.load %arg4[%c0_6, %c0_7] : memref<32x512xf32, #tpu.memory_space<vmem>>, vector<32x512xf32>
    %cst_8 = arith.constant dense<0.000000e+00> : vector<256x512xf32>
    %9 = tpu.matmul %7, %8, %cst_8 {dimension_numbers = #tpu.dot_dimension_numbers<[1], [0], [0], [1], [0, 0, 1, 1], [], []>} : vector<256x32xf32>, vector<32x512xf32>, vector<256x512xf32> -> vector<256x512xf32>
    %c0_9 = arith.constant 0 : index
    %c0_10 = arith.constant 0 : index
    %10 = vector.load %arg5[%c0_9, %c0_10] : memref<1x512xf32, #tpu.memory_space<vmem>>, vector<1x512xf32>
    %11 = vector.broadcast %10 : vector<1x512xf32> to vector<256x512xf32>
    %12 = arith.addf %9, %11 : vector<256x512xf32>
    %cst_11 = arith.constant 0.000000e+00 : f32
    %13 = vector.broadcast %cst_11 : f32 to vector<256x512xf32>
    %14 = arith.maximumf %12, %13 : vector<256x512xf32>
    %c0_12 = arith.constant 0 : index
    %c0_13 = arith.constant 0 : index
    %15 = vector.load %arg6[%c0_12, %c0_13] : memref<512x128xf32, #tpu.memory_space<vmem>>, vector<512x128xf32>
    %cst_14 = arith.constant dense<0.000000e+00> : vector<256x128xf32>
    %16 = tpu.matmul %14, %15, %cst_14 {dimension_numbers = #tpu.dot_dimension_numbers<[1], [0], [0], [1], [0, 0, 1, 1], [], []>} : vector<256x512xf32>, vector<512x128xf32>, vector<256x128xf32> -> vector<256x128xf32>
    %c0_15 = arith.constant 0 : index
    %c0_16 = arith.constant 0 : index
    %17 = vector.load %arg7[%c0_15, %c0_16] : memref<1x128xf32, #tpu.memory_space<vmem>>, vector<1x128xf32>
    %18 = vector.broadcast %17 : vector<1x128xf32> to vector<256x128xf32>
    %19 = arith.addf %16, %18 : vector<256x128xf32>
    %cst_17 = arith.constant 0.000000e+00 : f32
    %20 = vector.broadcast %cst_17 : f32 to vector<256x128xf32>
    %21 = arith.maximumf %19, %20 : vector<256x128xf32>
    %c0_18 = arith.constant 0 : index
    %c0_19 = arith.constant 0 : index
    %22 = vector.load %arg8[%c0_18, %c0_19] : memref<128x32xf32, #tpu.memory_space<vmem>>, vector<128x32xf32>
    %cst_20 = arith.constant dense<0.000000e+00> : vector<256x32xf32>
    %23 = tpu.matmul %21, %22, %cst_20 {dimension_numbers = #tpu.dot_dimension_numbers<[1], [0], [0], [1], [0, 0, 1, 1], [], []>} : vector<256x128xf32>, vector<128x32xf32>, vector<256x32xf32> -> vector<256x32xf32>
    %c0_21 = arith.constant 0 : index
    %c0_22 = arith.constant 0 : index
    %24 = vector.load %arg9[%c0_21, %c0_22] : memref<1x32xf32, #tpu.memory_space<vmem>>, vector<1x32xf32>
    %25 = vector.broadcast %24 : vector<1x32xf32> to vector<256x32xf32>
    %26 = arith.addf %23, %25 : vector<256x32xf32>
    %cst_23 = arith.constant 0.000000e+00 : f32
    %27 = vector.broadcast %cst_23 : f32 to vector<256x32xf32>
    %28 = arith.maximumf %26, %27 : vector<256x32xf32>
    %c0_24 = arith.constant 0 : index
    %c0_25 = arith.constant 0 : index
    %29 = vector.load %arg10[%c0_24, %c0_25] : memref<32x128xf32, #tpu.memory_space<vmem>>, vector<32x128xf32>
    %cst_26 = arith.constant dense<0.000000e+00> : vector<256x128xf32>
    %30 = tpu.matmul %28, %29, %cst_26 {dimension_numbers = #tpu.dot_dimension_numbers<[1], [0], [0], [1], [0, 0, 1, 1], [], []>} : vector<256x32xf32>, vector<32x128xf32>, vector<256x128xf32> -> vector<256x128xf32>
    %c0_27 = arith.constant 0 : index
    %c0_28 = arith.constant 0 : index
    %31 = vector.load %arg11[%c0_27, %c0_28] : memref<1x128xf32, #tpu.memory_space<vmem>>, vector<1x128xf32>
    %32 = vector.broadcast %31 : vector<1x128xf32> to vector<256x128xf32>
    %33 = arith.addf %30, %32 : vector<256x128xf32>
    %cst_29 = arith.constant 0.000000e+00 : f32
    %34 = vector.broadcast %cst_29 : f32 to vector<256x128xf32>
    %35 = arith.maximumf %33, %34 : vector<256x128xf32>
    %36 = math.absf %33 : vector<256x128xf32>
    %cst_30 = arith.constant 0.000000e+00 : f32
    %37 = vector.broadcast %cst_30 : f32 to vector<256x128xf32>
    %38 = arith.subf %37, %36 : vector<256x128xf32>
    %39 = math.exp %38 : vector<256x128xf32>
    %40 = math.log1p %39 : vector<256x128xf32>
    %41 = arith.addf %35, %40 : vector<256x128xf32>
    %c0_31 = arith.constant 0 : index
    %c0_32 = arith.constant 0 : index
    %42 = vector.load %arg12[%c0_31, %c0_32] : memref<256x128xf32, #tpu.memory_space<vmem>>, vector<256x128xf32>
    tpu.vector_store %arg12[%c0_31, %c0_32], %41 {strides = array<i32>} : memref<256x128xf32, #tpu.memory_space<vmem>>, vector<256x128xf32>,
    return
  }
  func.func @transform_0(%arg0: i32) -> (i32, i32) {
    %c0_i32 = arith.constant 0 : i32
    %c0_i32_0 = arith.constant 0 : i32
    return %arg0, %c0_i32 : i32, i32
  }
  func.func @transform_1(%arg0: i32) -> (i32, i32) {
    %c0_i32 = arith.constant 0 : i32
    %c0_i32_0 = arith.constant 0 : i32
    %c0_i32_1 = arith.constant 0 : i32
    return %c0_i32, %c0_i32_0 : i32, i32
  }
  func.func @transform_2(%arg0: i32) -> (i32, i32) {
    %c0_i32 = arith.constant 0 : i32
    %c0_i32_0 = arith.constant 0 : i32
    %c0_i32_1 = arith.constant 0 : i32
    return %c0_i32, %c0_i32_0 : i32, i32
  }
  func.func @transform_3(%arg0: i32) -> (i32, i32) {
    %c0_i32 = arith.constant 0 : i32
    %c0_i32_0 = arith.constant 0 : i32
    %c0_i32_1 = arith.constant 0 : i32
    return %c0_i32, %c0_i32_0 : i32, i32
  }
  func.func @transform_4(%arg0: i32) -> (i32, i32) {
    %c0_i32 = arith.constant 0 : i32
    %c0_i32_0 = arith.constant 0 : i32
    %c0_i32_1 = arith.constant 0 : i32
    return %c0_i32, %c0_i32_0 : i32, i32
  }
  func.func @transform_5(%arg0: i32) -> (i32, i32) {
    %c0_i32 = arith.constant 0 : i32
    %c0_i32_0 = arith.constant 0 : i32
    %c0_i32_1 = arith.constant 0 : i32
    return %c0_i32, %c0_i32_0 : i32, i32
  }
  func.func @transform_6(%arg0: i32) -> (i32, i32) {
    %c0_i32 = arith.constant 0 : i32
    %c0_i32_0 = arith.constant 0 : i32
    %c0_i32_1 = arith.constant 0 : i32
    return %c0_i32, %c0_i32_0 : i32, i32
  }
  func.func @transform_7(%arg0: i32) -> (i32, i32) {
    %c0_i32 = arith.constant 0 : i32
    %c0_i32_0 = arith.constant 0 : i32
    %c0_i32_1 = arith.constant 0 : i32
    return %c0_i32, %c0_i32_0 : i32, i32
  }
  func.func @transform_8(%arg0: i32) -> (i32, i32) {
    %c0_i32 = arith.constant 0 : i32
    %c0_i32_0 = arith.constant 0 : i32
    %c0_i32_1 = arith.constant 0 : i32
    return %c0_i32, %c0_i32_0 : i32, i32
  }
  func.func @transform_9(%arg0: i32) -> (i32, i32) {
    %c0_i32 = arith.constant 0 : i32
    %c0_i32_0 = arith.constant 0 : i32
    %c0_i32_1 = arith.constant 0 : i32
    return %c0_i32, %c0_i32_0 : i32, i32
  }
  func.func @transform_10(%arg0: i32) -> (i32, i32) {
    %c0_i32 = arith.constant 0 : i32
    %c0_i32_0 = arith.constant 0 : i32
    %c0_i32_1 = arith.constant 0 : i32
    return %c0_i32, %c0_i32_0 : i32, i32
  }
  func.func @transform_11(%arg0: i32) -> (i32, i32) {
    %c0_i32 = arith.constant 0 : i32
    %c0_i32_0 = arith.constant 0 : i32
    return %arg0, %c0_i32 : i32, i32
  }
}

module attributes {stable_mosaic.version = 11 : i64} {
  func.func @_mlp_softplus_kernel(%arg0: i32, %arg1: memref<256x32xf32, #tpu.memory_space<vmem>>, %arg2: memref<32x32xf32, #tpu.memory_space<vmem>>, %arg3: memref<1x32xf32, #tpu.memory_space<vmem>>, %arg4: memref<32x512xf32, #tpu.memory_space<vmem>>, %arg5: memref<1x512xf32, #tpu.memory_space<vmem>>, %arg6: memref<512x128xf32, #tpu.memory_space<vmem>>, %arg7: memref<1x128xf32, #tpu.memory_space<vmem>>, %arg8: memref<128x32xf32, #tpu.memory_space<vmem>>, %arg9: memref<1x32xf32, #tpu.memory_space<vmem>>, %arg10: memref<32x128xf32, #tpu.memory_space<vmem>>, %arg11: memref<1x128xf32, #tpu.memory_space<vmem>>, %arg12: memref<256x128xf32, #tpu.memory_space<vmem>>) attributes {dimension_semantics = [#tpu.dimension_semantics<parallel>], iteration_bounds = array<i64: 2>, scalar_prefetch = 0 : i64, scratch_operands = 0 : i64, tpu.core_type = #tpu.core_type<tc>, window_params = [{transform_indices = @transform_0, window_bounds = array<i64: 256, 32>}, {pipeline_mode = #tpu.pipeline_mode<synchronous>, transform_indices = @transform_1, window_bounds = array<i64: 32, 32>}, {pipeline_mode = #tpu.pipeline_mode<synchronous>, transform_indices = @transform_2, window_bounds = array<i64: 1, 32>}, {pipeline_mode = #tpu.pipeline_mode<synchronous>, transform_indices = @transform_3, window_bounds = array<i64: 32, 512>}, {pipeline_mode = #tpu.pipeline_mode<synchronous>, transform_indices = @transform_4, window_bounds = array<i64: 1, 512>}, {pipeline_mode = #tpu.pipeline_mode<synchronous>, transform_indices = @transform_5, window_bounds = array<i64: 512, 128>}, {pipeline_mode = #tpu.pipeline_mode<synchronous>, transform_indices = @transform_6, window_bounds = array<i64: 1, 128>}, {pipeline_mode = #tpu.pipeline_mode<synchronous>, transform_indices = @transform_7, window_bounds = array<i64: 128, 32>}, {pipeline_mode = #tpu.pipeline_mode<synchronous>, transform_indices = @transform_8, window_bounds = array<i64: 1, 32>}, {pipeline_mode = #tpu.pipeline_mode<synchronous>, transform_indices = @transform_9, window_bounds = array<i64: 32, 128>}, {pipeline_mode = #tpu.pipeline_mode<synchronous>, transform_indices = @transform_10, window_bounds = array<i64: 1, 128>}, {transform_indices = @transform_11, window_bounds = array<i64: 256, 128>}]} {
    %c0 = arith.constant 0 : index
    %c0_0 = arith.constant 0 : index
    %0 = vector.load %arg1[%c0, %c0_0] : memref<256x32xf32, #tpu.memory_space<vmem>>, vector<256x32xf32>
    %c0_1 = arith.constant 0 : index
    %c0_2 = arith.constant 0 : index
    %1 = vector.load %arg2[%c0_1, %c0_2] : memref<32x32xf32, #tpu.memory_space<vmem>>, vector<32x32xf32>
    %cst = arith.constant dense<0.000000e+00> : vector<256x32xf32>
    %2 = tpu.matmul %0, %1, %cst {dimension_numbers = #tpu.dot_dimension_numbers<[1], [0], [0], [1], [0, 0, 1, 1], [], []>} : vector<256x32xf32>, vector<32x32xf32>, vector<256x32xf32> -> vector<256x32xf32>
    %c0_3 = arith.constant 0 : index
    %c0_4 = arith.constant 0 : index
    %3 = vector.load %arg3[%c0_3, %c0_4] : memref<1x32xf32, #tpu.memory_space<vmem>>, vector<1x32xf32>
    %4 = vector.broadcast %3 : vector<1x32xf32> to vector<256x32xf32>
    %5 = arith.addf %2, %4 : vector<256x32xf32>
    %cst_5 = arith.constant 0.000000e+00 : f32
    %6 = vector.broadcast %cst_5 : f32 to vector<256x32xf32>
    %7 = arith.maximumf %5, %6 : vector<256x32xf32>
    %c0_6 = arith.constant 0 : index
    %c0_7 = arith.constant 0 : index
    %8 = vector.load %arg4[%c0_6, %c0_7] : memref<32x512xf32, #tpu.memory_space<vmem>>, vector<32x512xf32>
    %cst_8 = arith.constant dense<0.000000e+00> : vector<256x512xf32>
    %9 = tpu.matmul %7, %8, %cst_8 {dimension_numbers = #tpu.dot_dimension_numbers<[1], [0], [0], [1], [0, 0, 1, 1], [], []>} : vector<256x32xf32>, vector<32x512xf32>, vector<256x512xf32> -> vector<256x512xf32>
    %c0_9 = arith.constant 0 : index
    %c0_10 = arith.constant 0 : index
    %10 = vector.load %arg5[%c0_9, %c0_10] : memref<1x512xf32, #tpu.memory_space<vmem>>, vector<1x512xf32>
    %11 = vector.broadcast %10 : vector<1x512xf32> to vector<256x512xf32>
    %12 = arith.addf %9, %11 : vector<256x512xf32>
    %cst_11 = arith.constant 0.000000e+00 : f32
    %13 = vector.broadcast %cst_11 : f32 to vector<256x512xf32>
    %14 = arith.maximumf %12, %13 : vector<256x512xf32>
    %c0_12 = arith.constant 0 : index
    %c0_13 = arith.constant 0 : index
    %15 = vector.load %arg6[%c0_12, %c0_13] : memref<512x128xf32, #tpu.memory_space<vmem>>, vector<512x128xf32>
    %cst_14 = arith.constant dense<0.000000e+00> : vector<256x128xf32>
    %16 = tpu.matmul %14, %15, %cst_14 {dimension_numbers = #tpu.dot_dimension_numbers<[1], [0], [0], [1], [0, 0, 1, 1], [], []>} : vector<256x512xf32>, vector<512x128xf32>, vector<256x128xf32> -> vector<256x128xf32>
    %c0_15 = arith.constant 0 : index
    %c0_16 = arith.constant 0 : index
    %17 = vector.load %arg7[%c0_15, %c0_16] : memref<1x128xf32, #tpu.memory_space<vmem>>, vector<1x128xf32>
    %18 = vector.broadcast %17 : vector<1x128xf32> to vector<256x128xf32>
    %19 = arith.addf %16, %18 : vector<256x128xf32>
    %cst_17 = arith.constant 0.000000e+00 : f32
    %20 = vector.broadcast %cst_17 : f32 to vector<256x128xf32>
    %21 = arith.maximumf %19, %20 : vector<256x128xf32>
    %c0_18 = arith.constant 0 : index
    %c0_19 = arith.constant 0 : index
    %22 = vector.load %arg8[%c0_18, %c0_19] : memref<128x32xf32, #tpu.memory_space<vmem>>, vector<128x32xf32>
    %cst_20 = arith.constant dense<0.000000e+00> : vector<256x32xf32>
    %23 = tpu.matmul %21, %22, %cst_20 {dimension_numbers = #tpu.dot_dimension_numbers<[1], [0], [0], [1], [0, 0, 1, 1], [], []>} : vector<256x128xf32>, vector<128x32xf32>, vector<256x32xf32> -> vector<256x32xf32>
    %c0_21 = arith.constant 0 : index
    %c0_22 = arith.constant 0 : index
    %24 = vector.load %arg9[%c0_21, %c0_22] : memref<1x32xf32, #tpu.memory_space<vmem>>, vector<1x32xf32>
    %25 = vector.broadcast %24 : vector<1x32xf32> to vector<256x32xf32>
    %26 = arith.addf %23, %25 : vector<256x32xf32>
    %cst_23 = arith.constant 0.000000e+00 : f32
    %27 = vector.broadcast %cst_23 : f32 to vector<256x32xf32>
    %28 = arith.maximumf %26, %27 : vector<256x32xf32>
    %c0_24 = arith.constant 0 : index
    %c0_25 = arith.constant 0 : index
    %29 = vector.load %arg10[%c0_24, %c0_25] : memref<32x128xf32, #tpu.memory_space<vmem>>, vector<32x128xf32>
    %cst_26 = arith.constant dense<0.000000e+00> : vector<256x128xf32>
    %30 = tpu.matmul %28, %29, %cst_26 {dimension_numbers = #tpu.dot_dimension_numbers<[1], [0], [0], [1], [0, 0, 1, 1], [], []>} : vector<256x32xf32>, vector<32x128xf32>, vector<256x128xf32> -> vector<256x128xf32>
    %c0_27 = arith.constant 0 : index
    %c0_28 = arith.constant 0 : index
    %31 = vector.load %arg11[%c0_27, %c0_28] : memref<1x128xf32, #tpu.memory_space<vmem>>, vector<1x128xf32>
    %32 = vector.broadcast %31 : vector<1x128xf32> to vector<256x128xf32>
    %33 = arith.addf %30, %32 : vector<256x128xf32>
    %cst_29 = arith.constant 0.000000e+00 : f32
    %34 = vector.broadcast %cst_29 : f32 to vector<256x128xf32>
    %35 = arith.maximumf %33, %34 : vector<256x128xf32>
    %36 = math.absf %33 : vector<256x128xf32>
    %cst_30 = arith.constant 0.000000e+00 : f32
    %37 = vector.broadcast %cst_30 : f32 to vector<256x128xf32>
    %38 = arith.subf %37, %36 : vector<256x128xf32>
    %39 = math.exp %38 : vector<256x128xf32>
    %40 = math.log1p %39 : vector<256x128xf32>
    %41 = arith.addf %35, %40 : vector<256x128xf32>
    %c0_31 = arith.constant 0 : index
    %c0_32 = arith.constant 0 : index
    %42 = vector.load %arg12[%c0_31, %c0_32] : memref<256x128xf32, #tpu.memory_space<vmem>>, vector<256x128xf32>
    tpu.vector_store %arg12[%c0_31, %c0_32], %41 {strides = array<i32>} : memref<256x128xf32, #tpu.memory_space<vmem>>, vector<256x128xf32>,
    return
  }
  func.func @transform_0(%arg0: i32) -> (i32, i32) {
    %c0_i32 = arith.constant 0 : i32
    %c0_i32_0 = arith.constant 0 : i32
    return %arg0, %c0_i32 : i32, i32
  }
  func.func @transform_1(%arg0: i32) -> (i32, i32) {
    %c0_i32 = arith.constant 0 : i32
    %c0_i32_0 = arith.constant 0 : i32
    %c0_i32_1 = arith.constant 0 : i32
    return %c0_i32, %c0_i32_0 : i32, i32
  }
  func.func @transform_2(%arg0: i32) -> (i32, i32) {
    %c0_i32 = arith.constant 0 : i32
    %c0_i32_0 = arith.constant 0 : i32
    %c0_i32_1 = arith.constant 0 : i32
    return %c0_i32, %c0_i32_0 : i32, i32
  }
  func.func @transform_3(%arg0: i32) -> (i32, i32) {
    %c0_i32 = arith.constant 0 : i32
    %c0_i32_0 = arith.constant 0 : i32
    %c0_i32_1 = arith.constant 0 : i32
    return %c0_i32, %c0_i32_0 : i32, i32
  }
  func.func @transform_4(%arg0: i32) -> (i32, i32) {
    %c0_i32 = arith.constant 0 : i32
    %c0_i32_0 = arith.constant 0 : i32
    %c0_i32_1 = arith.constant 0 : i32
    return %c0_i32, %c0_i32_0 : i32, i32
  }
  func.func @transform_5(%arg0: i32) -> (i32, i32) {
    %c0_i32 = arith.constant 0 : i32
    %c0_i32_0 = arith.constant 0 : i32
    %c0_i32_1 = arith.constant 0 : i32
    return %c0_i32, %c0_i32_0 : i32, i32
  }
  func.func @transform_6(%arg0: i32) -> (i32, i32) {
    %c0_i32 = arith.constant 0 : i32
    %c0_i32_0 = arith.constant 0 : i32
    %c0_i32_1 = arith.constant 0 : i32
    return %c0_i32, %c0_i32_0 : i32, i32
  }
  func.func @transform_7(%arg0: i32) -> (i32, i32) {
    %c0_i32 = arith.constant 0 : i32
    %c0_i32_0 = arith.constant 0 : i32
    %c0_i32_1 = arith.constant 0 : i32
    return %c0_i32, %c0_i32_0 : i32, i32
  }
  func.func @transform_8(%arg0: i32) -> (i32, i32) {
    %c0_i32 = arith.constant 0 : i32
    %c0_i32_0 = arith.constant 0 : i32
    %c0_i32_1 = arith.constant 0 : i32
    return %c0_i32, %c0_i32_0 : i32, i32
  }
  func.func @transform_9(%arg0: i32) -> (i32, i32) {
    %c0_i32 = arith.constant 0 : i32
    %c0_i32_0 = arith.constant 0 : i32
    %c0_i32_1 = arith.constant 0 : i32
    return %c0_i32, %c0_i32_0 : i32, i32
  }
  func.func @transform_10(%arg0: i32) -> (i32, i32) {
    %c0_i32 = arith.constant 0 : i32
    %c0_i32_0 = arith.constant 0 : i32
    %c0_i32_1 = arith.constant 0 : i32
    return %c0_i32, %c0_i32_0 : i32, i32
  }
  func.func @transform_11(%arg0: i32) -> (i32, i32) {
    %c0_i32 = arith.constant 0 : i32
    %c0_i32_0 = arith.constant 0 : i32
    return %arg0, %c0_i32 : i32, i32
  }
}

</mosaic_0001>

<bundles_post_ra>
// kernel: tpu_custom_call.1
= control target key start
LH: loop header
LB: loop body
LE: loop exit
PB: predicated region body
PF: predicated region fallthrough
CT: control target
= control target key end

     0   :  { %s5450_s0 = inlined_call_operand.vmem [shape: f32[512,32], index: 0, kind: input, shape index: {}]   ;;  %s5451_s1 = inlined_call_operand.vmem [shape: f32[32,32], index: 1, kind: input, shape index: {}]   ;;  %s5452_s2 = inlined_call_operand.vmem [shape: f32[1,32], index: 2, kind: input, shape index: {}]   ;;  %s5453_s3 = inlined_call_operand.vmem [shape: f32[32,512], index: 3, kind: input, shape index: {}]   ;;  %s5454_s4 = inlined_call_operand.vmem [shape: f32[1,512], index: 4, kind: input, shape index: {}]   ;;  %s5455_s5 = inlined_call_operand.vmem [shape: f32[512,128], index: 5, kind: input, shape index: {}]   ;;  %s5456_s6 = inlined_call_operand.vmem [shape: f32[1,128], index: 6, kind: input, shape index: {}]   ;;  %s5457_s7 = inlined_call_operand.vmem [shape: f32[128,32], index: 7, kind: input, shape index: {}]   ;;  %s5458_s8 = inlined_call_operand.vmem [shape: f32[1,32], index: 8, kind: input, shape index: {}]   ;;  %s5459_s9 = inlined_call_operand.vmem [shape: f32[32,128], index: 9, kind: input, shape index: {}]   ;;  %s5460_s10 = inlined_call_operand.vmem [shape: f32[1,128], index: 10, kind: input, shape index: {}]   ;;  %s5461_s11 = inlined_call_operand.hbm [shape: f32[512,128], index: 11, kind: output, shape index: {}]  }
   0x1   :  { %5462 = sst [smem:[#allocation5_spill]] %s5450_s0 }
   0x2   :  { %16 = vsyncpa [#allocation3], 0 }
   0x3   :  { %18 = vsyncpa [#allocation3 + $0x1], 0  ;;  %s4075_s17 = smov 0   ;;  %s4077_s18 = smov 0  }
   0x4   :  { %s4079_s19 = smov 0   ;;  %s4081_s20 = smov 0  }
   0x5 LB: > { %s4096_s21 = sadd.s32 4294967295, %s4009_s20   ;;  %s3314_s22 = sadd.s32 4294967294, %s4009_s20   ;;  %s4009_s20 = sphi %s4081_s20, %s5489_s20   ;;  %s4005_s19 = sphi %s4079_s19, %s5488_s19   ;;  %s4001_s18 = sphi %s4077_s18, %s5487_s18   ;;  %s3997_s17 = sphi %s4075_s17, %s5486_s17  }
   0x6   : > { %s4100_s23 = sadd.s32 1, %s4009_s20   ;;  %s267_s24 = sadd.s32 1, %s4005_s19 }
   0x7   : > { %s264_s25 = ssub.s32 %s4009_s20, %s4100_s23  ;;  %p277_p0 = scmp.ne.s32.totalorder %s4005_s19, %s4001_s18 }
   0x8   : > { %p265_p1 = scmp.eq.s32.totalorder %s264_s25, 0  ;;  %p278_p2 = scmp.eq.s32.totalorder %s4096_s21, 1 }
   0x9   : > { %p283_p3 = scmp.ne.s32.totalorder %s4001_s18, %s3997_s17  ;;  %p284_p4 = scmp.eq.s32.totalorder %s3314_s22, 1 }
   0xa   : > { %s4111_s26 = scalar_select %p265_p1, %s4005_s19, %s267_s24  }
   0xb   : > { %p4113_p5 = por %p278_p2, %p277_p0  ;;  %p4117_p6 = por %p284_p4, %p283_p3 }
   0xc   : > { %p3317_p7 = scmp.ge.s32.totalorder %s4009_s20, 1  ;;  %p341_p8 = scmp.lt.s32.totalorder %s4009_s20, 3 }
   0xe   : > { %p342_p9 = pnand %p3317_p7, %p341_p8 }
   0xf   : > { %s3319_s14 = sshll.u32 (!%p342_p9), %s4096_s21, 5  ;;  %s5465_s0 = sld [smem:[#allocation5_spill]] (!%p342_p9) }
  0x10   : > { %345 = sbr.rel (%p342_p9) target bundleno = 1207 (0x4b7), region = 64  ;;  %p382_p10 = scmp.lt.s32.totalorder (!%p342_p9), %s3319_s14, 63 }
  0x11   : > { %s378_s16 = sand.u32 (!%p342_p9), 1, %s4001_s18   ;;  %s3458_s24 = sshll.u32 (!%p342_p9), %s4096_s21, 12 }
  0x12   : > { %s3318_s22 = sshll.u32 (!%p342_p9), %s378_s16, 8  ;;  %s5403_s13 = scalar_lea.hbm (!%p342_p9), %s5461_s11, %s3458_s24 }
  0x13   : > { %s5410_s21 = scalar_lea.sflag (!%p342_p9), [#allocation3], %s378_s16 }
  0x15   : > { %v423_v0 = vld [vmem:[%s5451_s1 + $0x18] sm:$0xff]  ;;  %v422_v1 = vld [vmem:[%s5451_s1 + $0x10] sm:$0xff]  ;;  %v421_v2 = vld [vmem:[%s5451_s1 + $0x8] sm:$0xff]  ;;  %s5491_s14 = smov (!%p382_p10, %s3319_s14), 63  ;;  %vm431_vm0 = vcmask 261120   ;;  %v4011_v52 = vmov 0.0  }
  0x16   : > { %3579 = vmatprep.subr.mxu0 %v423_v0  ;;  %3771 = vmatprep.subr.mxu1 %v423_v0  ;;  %v420_v3 = vld [vmem:[%s5451_s1] sm:$0xff]  ;;  %s3320_s25 = sshll.u32 %s5491_s14, 3  ;;  %v798_v4 = vld [vmem:[%s5453_s3 + $0x68] sm:$0xff]  ;;  %v800_v8 = vld [vmem:[%s5453_s3 + $0x78] sm:$0xff]  ;;  %s4012_s14 = smov [#allocation2]  }
  0x17   : > { %3580 = vmatpush3.msra.mxu0 %v423_v0  ;;  %3775 = vmatpush3.msra.mxu1 %v423_v0  ;;  %s4139_s12 = scalar_lea.vmem %s5465_s0, %s3320_s25  ;;  %v799_v9 = vld [vmem:[%s5453_s3 + $0x70] sm:$0xff]  ;;  %v797_v14 = vld [vmem:[%s5453_s3 + $0x60] sm:$0xff]  ;;  %v794_v16 = vld [vmem:[%s5453_s3 + $0x48] sm:$0xff] }
  0x18   : > { %3581 = vmatprep.subr.mxu0 %v422_v1  ;;  %3772 = vmatprep.subr.mxu1 %v422_v1  ;;  %v388_v5 = vld [vmem:[%s4139_s12] sm:$0xff]  ;;  %v389_v6 = vld [vmem:[%s4139_s12 + $0x8] sm:$0xff]  ;;  %v390_v7 = vld [vmem:[%s4139_s12 + $0x10] sm:$0xff] }
  0x19   : > { %3582 = vmatpush3.msra.mxu0 %v422_v1  ;;  %3776 = vmatpush3.msra.mxu1 %v422_v1  ;;  %v391_v10 = vld [vmem:[%s4139_s12 + $0x18] sm:$0xff]  ;;  %v392_v11 = vld [vmem:[%s4139_s12 + $0x20] sm:$0xff]  ;;  %v405_v13 = vld [vmem:[%s4139_s12 + $0x88] sm:$0xff] }
  0x1a   : > { %3583 = vmatprep.subr.mxu0 %v421_v2  ;;  %3773 = vmatprep.subr.mxu1 %v421_v2  ;;  %v404_v12 = vld [vmem:[%s4139_s12 + $0x80] sm:$0xff]  ;;  %v406_v15 = vld [vmem:[%s4139_s12 + $0x90] sm:$0xff]  ;;  %v796_v17 = vld [vmem:[%s5453_s3 + $0x58] sm:$0xff] }
  0x1b   : > { %3584 = vmatpush3.msra.mxu0 %v421_v2  ;;  %3777 = vmatpush3.msra.mxu1 %v421_v2  ;;  %v393_v18 = vld [vmem:[%s4139_s12 + $0x28] sm:$0xff]  ;;  %v793_v19 = vld [vmem:[%s5453_s3 + $0x40] sm:$0xff]  ;;  %v394_v20 = vld [vmem:[%s4139_s12 + $0x30] sm:$0xff] }
  0x1c   : > { %3585 = vmatprep.subr.mxu0 %v420_v3  ;;  %3774 = vmatprep.subr.mxu1 %v420_v3  ;;  %v407_v21 = vld [vmem:[%s4139_s12 + $0x98] sm:$0xff]  ;;  %v408_v22 = vld [vmem:[%s4139_s12 + $0xa0] sm:$0xff]  ;;  %v795_v23 = vld [vmem:[%s5453_s3 + $0x50] sm:$0xff] }
  0x1d   : > { %3586 = vmatpush3.msra.mxu0 %v420_v3  ;;  %3587 = vmatprep.mubr.msk.f32.mxu0 %vm431_vm0, %v388_v5  ;;  %v790_v24 = vld [vmem:[%s5453_s3 + $0x28] sm:$0xff]  ;;  %v792_v25 = vld [vmem:[%s5453_s3 + $0x38] sm:$0xff]  ;;  %v789_v27 = vld [vmem:[%s5453_s3 + $0x20] sm:$0xff] }
  0x1e   : > { %3588 = vmatmul.mubr.msk.f32.vlgmr.msra.gmra.mxu0 %vm431_vm0, %v389_v6  ;;  %3778 = vmatpush3.msra.mxu1 %v420_v3  ;;  %v395_v26 = vld [vmem:[%s4139_s12 + $0x38] sm:$0xff]  ;;  %v396_v28 = vld [vmem:[%s4139_s12 + $0x40] sm:$0xff]  ;;  %v409_v29 = vld [vmem:[%s4139_s12 + $0xa8] sm:$0xff] }
  0x1f   : > { %3590 = vmatprep.mubr.msk.f32.mxu0 %vm431_vm0, %v390_v7  ;;  %943 = vmatprep.subr.mxu1 %v798_v4  ;;  %v410_v30 = vld [vmem:[%s4139_s12 + $0xb0] sm:$0xff]  ;;  %v786_v32 = vld [vmem:[%s5453_s3 + $0x8] sm:$0xff]  ;;  %v785_v34 = vld [vmem:[%s5453_s3] sm:$0xff] }
  0x20   : > { %1200 = vmatprep.subr.mxu0 %v800_v8  ;;  %3611 = vmatprep.mubr.msk.f32.mxu1 %vm431_vm0, %v404_v12  ;;  %v791_v31 = vld [vmem:[%s5453_s3 + $0x30] sm:$0xff]  ;;  %v397_v33 = vld [vmem:[%s4139_s12 + $0x48] sm:$0xff]  ;;  %v411_v36 = vld [vmem:[%s4139_s12 + $0xb8] sm:$0xff] }
  0x21   : > { %1201 = vmatpush1.msra.mxu0 %v799_v9  ;;  %3612 = vmatmul.mubr.msk.f32.vlgmr.msra.gmra.mxu1 %vm431_vm0, %v405_v13  ;;  %v398_v35 = vld [vmem:[%s4139_s12 + $0x50] sm:$0xff]  ;;  %v412_v37 = vld [vmem:[%s4139_s12 + $0xc0] sm:$0xff]  ;;  %v399_v38 = vld [vmem:[%s4139_s12 + $0x58] sm:$0xff] }
  0x22   : > { %3591 = vmatmul.mubr.msk.f32.gmra.mxu0 %vm431_vm0, %v391_v10  ;;  %3614 = vmatprep.mubr.msk.f32.mxu1 %vm431_vm0, %v406_v15  ;;  %v400_v39 = vld [vmem:[%s4139_s12 + $0x60] sm:$0xff]  ;;  %v413_v40 = vld [vmem:[%s4139_s12 + $0xc8] sm:$0xff]  ;;  %v414_v41 = vld [vmem:[%s4139_s12 + $0xd0] sm:$0xff] }
  0x23   : > { %3593 = vmatprep.mubr.msk.f32.mxu0 %vm431_vm0, %v392_v11  ;;  %944 = vmatpush1.msra.mxu1 %v797_v14  ;;  %v401_v42 = vld [vmem:[%s4139_s12 + $0x68] sm:$0xff]  ;;  %v402_v43 = vld [vmem:[%s4139_s12 + $0x70] sm:$0xff]  ;;  %v415_v44 = vld [vmem:[%s4139_s12 + $0xd8] sm:$0xff] }
  0x24   : > { %945 = vmatprep.subr.mxu1 %v794_v16  ;;  %1202 = vmatprep.subr.mxu0 %v796_v17  ;;  %v416_v45 = vld [vmem:[%s4139_s12 + $0xe0] sm:$0xff]  ;;  %v403_v46 = vld [vmem:[%s4139_s12 + $0x78] sm:$0xff]  ;;  %v417_v47 = vld [vmem:[%s4139_s12 + $0xe8] sm:$0xff] }
  0x25   : > { %946 = vmatpush1.msra.mxu1 %v793_v19  ;;  %1203 = vmatpush1.msra.mxu0 %v795_v23  ;;  %v418_v48 = vld [vmem:[%s4139_s12 + $0xf0] sm:$0xff]  ;;  %v419_v49 = vld [vmem:[%s4139_s12 + $0xf8] sm:$0xff]  ;;  %v4260_v54 = vld [vmem:[%s5452_s2] ss:$0 sm:$0xff]  ;;  %s5051_s12 = scalar_lea.vmem [#allocation2], %s3318_s22  ;;  %s3953_s22 = sshll.u32 %s4012_s14, 4  ;;  %s3954_s22 = int_to_ptr.vmem [resolvable:$false] %s3953_s22 }
  0x26   : > { %3594 = vmatmul.mubr.msk.f32.gmra.mxu0 %vm431_vm0, %v393_v18  ;;  %3615 = vmatmul.mubr.msk.f32.gmra.mxu1 %vm431_vm0, %v407_v21  ;;  %v788_v50 = vld [vmem:[%s5453_s3 + $0x18] sm:$0xff]  ;;  %v787_v51 = vld [vmem:[%s5453_s3 + $0x10] sm:$0xff]  ;;  %v1574_v7 = vld [vmem:[%s5455_s5 + $0x68] sm:$0xff]  ;;  %s3252_s25 = sshll.u32 %s5051_s12, 4  ;;  %s3955_s24 = scalar_lea.vmem %s3954_s22, 8192  ;;  %s5405_s25 = int_to_ptr.vmem [resolvable:$true] %s3252_s25 }
  0x27   : > { %3596 = vmatprep.mubr.msk.f32.mxu0 %vm431_vm0, %v394_v20  ;;  %3617 = vmatprep.mubr.msk.f32.mxu1 %vm431_vm0, %v408_v22  ;;  %v1576_v61 = vld [vmem:[%s5455_s5 + $0x78] sm:$0xff]  ;;  %v1575_v2 = vld [vmem:[%s5455_s5 + $0x70] sm:$0xff]  ;;  %v1606_v8 = vld [vmem:[%s5455_s5 + $0x168] sm:$0xff]  ;;  %s3949_s15 = scalar_lea.vmem %s5405_s25, 4096  ;;  %p3956_p0 = scmp.lt.s32.totalorder %s5405_s25, %s3954_s22 }
  0x28   : > { %947 = vmatprep.subr.mxu1 %v790_v24  ;;  %1204 = vmatprep.subr.mxu0 %v792_v25  ;;  %v1608_v62 = vld [vmem:[%s5455_s5 + $0x178] sm:$0xff]  ;;  %v1607_v3 = vld [vmem:[%s5455_s5 + $0x170] sm:$0xff]  ;;  %v1573_v12 = vld [vmem:[%s5455_s5 + $0x60] sm:$0xff]  ;;  %p3950_p11 = scmp.ne.s32.totalorder %s5405_s25, %s3949_s15  ;;  %p3957_p1 = scmp.lt.s32.totalorder %s3955_s24, %s3949_s15 }
  0x29   : > { %948 = vmatpush1.msra.mxu1 %v789_v27  ;;  %1205 = vmatpush1.msra.mxu0 %v791_v31  ;;  %v1605_v13 = vld [vmem:[%s5455_s5 + $0x160] sm:$0xff]  ;;  %v1572_v17 = vld [vmem:[%s5455_s5 + $0x58] sm:$0xff]  ;;  %v1571_v22 = vld [vmem:[%s5455_s5 + $0x50] sm:$0xff] }
  0x2a   : > { %3597 = vmatmul.mubr.msk.f32.gmra.mxu0 %vm431_vm0, %v395_v26  ;;  %3618 = vmatmul.mubr.msk.f32.gmra.mxu1 %vm431_vm0, %v409_v29  ;;  %v1604_v18 = vld [vmem:[%s5455_s5 + $0x158] sm:$0xff]  ;;  %v1603_v23 = vld [vmem:[%s5455_s5 + $0x150] sm:$0xff]  ;;  %v1570_v27 = vld [vmem:[%s5455_s5 + $0x48] sm:$0xff]  ;;  %p3951_p12 = pnand %p3950_p11, %p4113_p5  ;;  %p3958_p2 = por %p3957_p1, %p3956_p0 }
  0x2b   : > { %3599 = vmatprep.mubr.msk.f32.mxu0 %vm431_vm0, %v396_v28  ;;  %3620 = vmatprep.mubr.msk.f32.mxu1 %vm431_vm0, %v410_v30  ;;  %v1602_v28 = vld [vmem:[%s5455_s5 + $0x148] sm:$0xff] }
  0x2c   : > { %949 = vmatprep.subr.mxu1 %v786_v32  ;;  %1206 = vmatprep.subr.mxu0 %v788_v50  ;;  %v1569_v32 = vld [vmem:[%s5455_s5 + $0x40] sm:$0xff]  ;;  %p3952_p13 = pneg %p3951_p12 }
  0x2d   : > { %950 = vmatpush1.msra.mxu1 %v785_v34  ;;  %1207 = vmatpush1.msra.mxu0 %v787_v51 }
  0x2e   : > { %3600 = vmatmul.mubr.msk.f32.gmra.mxu0 %vm431_vm0, %v397_v33  ;;  %3621 = vmatmul.mubr.msk.f32.gmra.mxu1 %vm431_vm0, %v411_v36  ;;  %v1601_v33 = vld [vmem:[%s5455_s5 + $0x140] sm:$0xff]  ;;  %p3959_p3 = pnand %p3958_p2, %p3952_p13 }
  0x2f   : > { %3602 = vmatprep.mubr.msk.f32.mxu0 %vm431_vm0, %v398_v35  ;;  %3623 = vmatprep.mubr.msk.f32.mxu1 %vm431_vm0, %v412_v37  ;;  %v1568_v37 = vld [vmem:[%s5455_s5 + $0x38] sm:$0xff] }
  0x30   : > { %1632 = vmatprep.subr.mxu1 %v4011_v52  ;;  %1857 = vmatprep.subr.mxu0 %v4011_v52 }
  0x32   : > { %3603 = vmatmul.mubr.msk.f32.gmra.mxu0 %vm431_vm0, %v399_v38  ;;  %3624 = vmatmul.mubr.msk.f32.gmra.mxu1 %vm431_vm0, %v413_v40  ;;  %v1600_v38 = vld [vmem:[%s5455_s5 + $0x138] sm:$0xff] }
  0x33   : > { %3605 = vmatprep.mubr.msk.f32.mxu0 %vm431_vm0, %v400_v39  ;;  %3626 = vmatprep.mubr.msk.f32.mxu1 %vm431_vm0, %v414_v41 }
  0x36   : > { %3606 = vmatmul.mubr.msk.f32.gmra.mxu0 %vm431_vm0, %v401_v42  ;;  %3627 = vmatmul.mubr.msk.f32.gmra.mxu1 %vm431_vm0, %v415_v44  ;;  %v1567_v42 = vld [vmem:[%s5455_s5 + $0x30] sm:$0xff] }
  0x37   : > { %3608 = vmatprep.mubr.msk.f32.mxu0 %vm431_vm0, %v402_v43  ;;  %3629 = vmatprep.mubr.msk.f32.mxu1 %vm431_vm0, %v416_v45  ;;  %v1599_v43 = vld [vmem:[%s5455_s5 + $0x130] sm:$0xff] }
  0x3a   : > { %3609 = vmatmul.mubr.msk.f32.gmra.mxu0 %vm431_vm0, %v403_v46  ;;  %3630 = vmatmul.mubr.msk.f32.gmra.mxu1 %vm431_vm0, %v417_v47  ;;  %v1566_v47 = vld [vmem:[%s5455_s5 + $0x28] sm:$0xff] }
  0x3b   : > { %3632 = vmatprep.mubr.msk.f32.mxu1 %vm431_vm0, %v418_v48  ;;  %1240 = vmatprep.mubr.f32.mxu0 %v4011_v52  ;;  %v1598_v48 = vld [vmem:[%s5455_s5 + $0x128] sm:$0xff] }
  0x3e   : > { %3633 = vmatmul.mubr.msk.f32.gmra.mxu1 %vm431_vm0, %v419_v49 }
  0x3f   : > { %983 = vmatprep.mubr.f32.mxu1 %v4011_v52 }
  0xde   : > { %v3589_v53 = vpop.f32.mrf.mxu0 }
  0xdf   : > { %v600_v58 = vadd.f32 %v3589_v53, %v4260_v54  ;;  %v1565_v53 = vld [vmem:[%s5455_s5 + $0x20] sm:$0xff] }
  0xe0   : > { %v594_v55 = vpop.f32.mrf.mxu0 }
  0xe1   : > { %v595_v56 = vadd.f32 %v4260_v54, %v594_v55  ;;  %v754_v63 = vmax.f32 %v600_v58, 0.0  ;;  %v1597_v55 = vld [vmem:[%s5455_s5 + $0x120] sm:$0xff] }
  0xe2   : > { %v3592_v57 = vpop.f32.mrf.mxu0 }
  0xe3   : > { %v753_v59 = vmax.f32 %v595_v56, 0.0  ;;  %v610_v4 = vadd.f32 %v3592_v57, %v4260_v54 }
  0xe4   : > { %v604_v60 = vpop.f32.mrf.mxu0 }
  0xe5   : > { %3354 = vmatmul.mubr.msk.f32.vlgmr.msra.gmra.mxu1 %vm431_vm0, %v753_v59  ;;  %3386 = vmatmul.mubr.msk.f32.vlgmr.msra.gmra.mxu0 %vm431_vm0, %v753_v59  ;;  %v605_v0 = vadd.f32 %v4260_v54, %v604_v60  ;;  %v756_v9 = vmax.f32 %v610_v4, 0.0  ;;  %v1564_v59 = vld [vmem:[%s5455_s5 + $0x18] sm:$0xff] }
  0xe6   : > { %989 = vmatprep.mubr.f32.mxu1 %v4011_v52  ;;  %1246 = vmatprep.mubr.f32.mxu0 %v4011_v52  ;;  %v3595_v1 = vpop.f32.mrf.mxu0  ;;  %v1596_v60 = vld [vmem:[%s5455_s5 + $0x118] sm:$0xff] }
  0xe7   : > { %1633 = vmatpush1.msra.mxu1 %v1576_v61  ;;  %1858 = vmatpush1.msra.mxu0 %v1608_v62  ;;  %v755_v5 = vmax.f32 %v605_v0, 0.0  ;;  %v620_v14 = vadd.f32 %v3595_v1, %v4260_v54  ;;  %v1563_v0 = vld [vmem:[%s5455_s5 + $0x10] sm:$0xff] }
  0xe8   : > { %1634 = vmatprep.subr.mxu1 %v4011_v52  ;;  %1859 = vmatprep.subr.mxu0 %v4011_v52  ;;  %v614_v6 = vpop.f32.mrf.mxu0  ;;  %v1595_v1 = vld [vmem:[%s5455_s5 + $0x110] sm:$0xff] }
  0xe9   : > { %3355 = vmatmul.mubr.msk.f32.gmra.mxu1 %vm431_vm0, %v754_v63  ;;  %3387 = vmatmul.mubr.msk.f32.gmra.mxu0 %vm431_vm0, %v754_v63  ;;  %v615_v10 = vadd.f32 %v4260_v54, %v614_v6  ;;  %v758_v19 = vmax.f32 %v620_v14, 0.0  ;;  %v3613_v63 = vpop.f32.mrf.mxu1  ;;  %v1594_v6 = vld [vmem:[%s5455_s5 + $0x108] sm:$0xff] }
  0xea   : > { %995 = vmatprep.mubr.f32.mxu1 %v4011_v52  ;;  %1252 = vmatprep.mubr.f32.mxu0 %v4011_v52  ;;  %v3598_v11 = vpop.f32.mrf.mxu0 }
  0xeb   : > { %1635 = vmatpush1.msra.mxu1 %v1575_v2  ;;  %1860 = vmatpush1.msra.mxu0 %v1607_v3  ;;  %v757_v15 = vmax.f32 %v615_v10, 0.0  ;;  %v630_v24 = vadd.f32 %v3598_v11, %v4260_v54  ;;  %v674_v4 = vpop.f32.mrf.mxu1  ;;  %v1561_v10 = vld [vmem:[%s5455_s5] sm:$0xff] }
  0xec   : > { %1636 = vmatprep.subr.mxu1 %v4011_v52  ;;  %1861 = vmatprep.subr.mxu0 %v4011_v52  ;;  %v624_v16 = vpop.f32.mrf.mxu0  ;;  %v1593_v11 = vld [vmem:[%s5455_s5 + $0x100] sm:$0xff] }
  0xed   : > { %3356 = vmatmul.mubr.msk.f32.gmra.mxu1 %vm431_vm0, %v755_v5  ;;  %3388 = vmatmul.mubr.msk.f32.gmra.mxu0 %vm431_vm0, %v755_v5  ;;  %v625_v20 = vadd.f32 %v4260_v54, %v624_v16  ;;  %v760_v29 = vmax.f32 %v630_v24, 0.0  ;;  %v1562_v5 = vld [vmem:[%s5455_s5 + $0x8] sm:$0xff]  ;;  %v1624_v16 = vld [vmem:[%s5455_s5 + $0x1f8] sm:$0xff] }
  0xee   : > { %1001 = vmatprep.mubr.f32.mxu1 %v4011_v52  ;;  %1258 = vmatprep.mubr.f32.mxu0 %v4011_v52  ;;  %v3601_v21 = vpop.f32.mrf.mxu0 }
  0xef   : > { %1637 = vmatpush1.msra.mxu1 %v1574_v7  ;;  %1862 = vmatpush1.msra.mxu0 %v1606_v8  ;;  %v759_v25 = vmax.f32 %v625_v20, 0.0  ;;  %v640_v34 = vadd.f32 %v3601_v21, %v4260_v54  ;;  %v675_v8 = vadd.f32 %v4260_v54, %v674_v4  ;;  %v1591_v20 = vld [vmem:[%s5455_s5 + $0xf0] sm:$0xff]  ;;  %v1614_v4 = vld [vmem:[%s5455_s5 + $0x1a8] sm:$0xff] }
  0xf0   : > { %1638 = vmatprep.subr.mxu1 %v4011_v52  ;;  %1863 = vmatprep.subr.mxu0 %v4011_v52  ;;  %v634_v26 = vpop.f32.mrf.mxu0  ;;  %v1623_v21 = vld [vmem:[%s5455_s5 + $0x1f0] sm:$0xff] }
  0xf1   : > { %3357 = vmatmul.mubr.msk.f32.gmra.mxu1 %vm431_vm0, %v756_v9  ;;  %3389 = vmatmul.mubr.msk.f32.gmra.mxu0 %vm431_vm0, %v756_v9  ;;  %v635_v30 = vadd.f32 %v4260_v54, %v634_v26  ;;  %v762_v39 = vmax.f32 %v640_v34, 0.0  ;;  %v3616_v9 = vpop.f32.mrf.mxu1  ;;  %v1622_v26 = vld [vmem:[%s5455_s5 + $0x1e8] sm:$0xff] }
  0xf2   : > { %1007 = vmatprep.mubr.f32.mxu1 %v4011_v52  ;;  %1264 = vmatprep.mubr.f32.mxu0 %v4011_v52  ;;  %v3604_v31 = vpop.f32.mrf.mxu0 }
  0xf3   : > { %1639 = vmatpush1.msra.mxu1 %v1573_v12  ;;  %1864 = vmatpush1.msra.mxu0 %v1605_v13  ;;  %v761_v35 = vmax.f32 %v635_v30, 0.0  ;;  %v650_v44 = vadd.f32 %v3604_v31, %v4260_v54  ;;  %v680_v12 = vadd.f32 %v3613_v63, %v4260_v54  ;;  %v769_v13 = vmax.f32 %v675_v8, 0.0  ;;  %v684_v14 = vpop.f32.mrf.mxu1  ;;  %v1589_v30 = vld [vmem:[%s5455_s5 + $0xe0] sm:$0xff]  ;;  %v1615_v63 = vld [vmem:[%s5455_s5 + $0x1b0] sm:$0xff] }
  0xf4   : > { %1640 = vmatprep.subr.mxu1 %v4011_v52  ;;  %1865 = vmatprep.subr.mxu0 %v4011_v52  ;;  %v644_v36 = vpop.f32.mrf.mxu0  ;;  %v1621_v31 = vld [vmem:[%s5455_s5 + $0x1e0] sm:$0xff] }
  0xf5   : > { %3358 = vmatmul.mubr.msk.f32.gmra.mxu1 %vm431_vm0, %v757_v15  ;;  %3390 = vmatmul.mubr.msk.f32.gmra.mxu0 %vm431_vm0, %v757_v15  ;;  %v645_v40 = vadd.f32 %v4260_v54, %v644_v36  ;;  %v764_v49 = vmax.f32 %v650_v44, 0.0  ;;  %v1592_v15 = vld [vmem:[%s5455_s5 + $0xf8] sm:$0xff]  ;;  %v1581_v8 = vld [vmem:[%s5455_s5 + $0xa0] sm:$0xff] }
  0xf6   : > { %1013 = vmatprep.mubr.f32.mxu1 %v4011_v52  ;;  %1270 = vmatprep.mubr.f32.mxu0 %v4011_v52  ;;  %v3607_v41 = vpop.f32.mrf.mxu0  ;;  %v1620_v36 = vld [vmem:[%s5455_s5 + $0x1d8] sm:$0xff] }
  0xf7   : > { %1641 = vmatpush1.msra.mxu1 %v1572_v17  ;;  %1866 = vmatpush1.msra.mxu0 %v1604_v18  ;;  %v763_v45 = vmax.f32 %v645_v40, 0.0  ;;  %v660_v56 = vadd.f32 %v3607_v41, %v4260_v54  ;;  %v770_v17 = vmax.f32 %v680_v12, 0.0  ;;  %v685_v18 = vadd.f32 %v4260_v54, %v684_v14  ;;  %v1587_v40 = vld [vmem:[%s5455_s5 + $0xd0] sm:$0xff]  ;;  %v1612_v14 = vld [vmem:[%s5455_s5 + $0x198] sm:$0xff] }
  0xf8   : > { %1642 = vmatprep.subr.mxu1 %v4011_v52  ;;  %1867 = vmatprep.subr.mxu0 %v4011_v52  ;;  %v654_v46 = vpop.f32.mrf.mxu0  ;;  %v1619_v41 = vld [vmem:[%s5455_s5 + $0x1d0] sm:$0xff] }
  0xf9   : > { %3359 = vmatmul.mubr.msk.f32.gmra.mxu1 %vm431_vm0, %v758_v19  ;;  %3391 = vmatmul.mubr.msk.f32.gmra.mxu0 %vm431_vm0, %v758_v19  ;;  %v655_v50 = vadd.f32 %v4260_v54, %v654_v46  ;;  %v766_v61 = vmax.f32 %v660_v56, 0.0  ;;  %v3619_v19 = vpop.f32.mrf.mxu1  ;;  %v1618_v46 = vld [vmem:[%s5455_s5 + $0x1c8] sm:$0xff] }
  0xfa   : > { %1019 = vmatprep.mubr.f32.mxu1 %v4011_v52  ;;  %1276 = vmatprep.mubr.f32.mxu0 %v4011_v52  ;;  %v3610_v51 = vpop.f32.mrf.mxu0 }
  0xfb   : > { %1643 = vmatpush1.msra.mxu1 %v1571_v22  ;;  %1868 = vmatpush1.msra.mxu0 %v1603_v23  ;;  %v765_v57 = vmax.f32 %v655_v50, 0.0  ;;  %v670_v2 = vadd.f32 %v3610_v51, %v4260_v54  ;;  %v690_v22 = vadd.f32 %v3616_v9, %v4260_v54  ;;  %v771_v23 = vmax.f32 %v685_v18, 0.0  ;;  %v694_v24 = vpop.f32.mrf.mxu1  ;;  %v1585_v50 = vld [vmem:[%s5455_s5 + $0xc0] sm:$0xff]  ;;  %v1611_v18 = vld [vmem:[%s5455_s5 + $0x190] sm:$0xff] }
  0xfc   : > { %1644 = vmatprep.subr.mxu1 %v4011_v52  ;;  %1869 = vmatprep.subr.mxu0 %v4011_v52  ;;  %v664_v58 = vpop.f32.mrf.mxu0  ;;  %v1617_v51 = vld [vmem:[%s5455_s5 + $0x1c0] sm:$0xff] }
  0xfd   : > { %3360 = vmatmul.mubr.msk.f32.gmra.mxu1 %vm431_vm0, %v759_v25  ;;  %3392 = vmatmul.mubr.msk.f32.gmra.mxu0 %vm431_vm0, %v759_v25  ;;  %v665_v62 = vadd.f32 %v4260_v54, %v664_v58  ;;  %v768_v7 = vmax.f32 %v670_v2, 0.0  ;;  %v1590_v25 = vld [vmem:[%s5455_s5 + $0xe8] sm:$0xff]  ;;  %v1616_v58 = vld [vmem:[%s5455_s5 + $0x1b8] sm:$0xff]  ;;  %v1613_v9 = vld [vmem:[%s5455_s5 + $0x1a0] sm:$0xff] }
  0xfe   : > { %1025 = vmatprep.mubr.f32.mxu1 %v4011_v52  ;;  %1282 = vmatprep.mubr.f32.mxu0 %v4011_v52 }
  0xff   : > { %1645 = vmatpush1.msra.mxu1 %v1570_v27  ;;  %1870 = vmatpush1.msra.mxu0 %v1602_v28  ;;  %v767_v3 = vmax.f32 %v665_v62, 0.0  ;;  %v772_v27 = vmax.f32 %v690_v22, 0.0  ;;  %v695_v28 = vadd.f32 %v4260_v54, %v694_v24  ;;  %v1583_v62 = vld [vmem:[%s5455_s5 + $0xb0] sm:$0xff]  ;;  %v1610_v22 = vld [vmem:[%s5455_s5 + $0x188] sm:$0xff]  ;;  %v1609_v24 = vld [vmem:[%s5455_s5 + $0x180] sm:$0xff] }
 0x100   : > { %1646 = vmatprep.subr.mxu1 %v4011_v52  ;;  %1871 = vmatprep.subr.mxu0 %v4011_v52 }
 0x101   : > { %3361 = vmatmul.mubr.msk.f32.gmra.mxu1 %vm431_vm0, %v760_v29  ;;  %3393 = vmatmul.mubr.msk.f32.gmra.mxu0 %vm431_vm0, %v760_v29  ;;  %v3622_v29 = vpop.f32.mrf.mxu1 }
 0x102   : > { %1031 = vmatprep.mubr.f32.mxu1 %v4011_v52  ;;  %1288 = vmatprep.mubr.f32.mxu0 %v4011_v52 }
 0x103   : > { %1647 = vmatpush1.msra.mxu1 %v1569_v32  ;;  %1872 = vmatpush1.msra.mxu0 %v1601_v33  ;;  %v700_v32 = vadd.f32 %v3619_v19, %v4260_v54  ;;  %v773_v33 = vmax.f32 %v695_v28, 0.0  ;;  %v704_v34 = vpop.f32.mrf.mxu1 }
 0x104   : > { %1648 = vmatprep.subr.mxu1 %v4011_v52  ;;  %1873 = vmatprep.subr.mxu0 %v4011_v52 }
 0x105   : > { %3362 = vmatmul.mubr.msk.f32.gmra.mxu1 %vm431_vm0, %v761_v35  ;;  %3394 = vmatmul.mubr.msk.f32.gmra.mxu0 %vm431_vm0, %v761_v35  ;;  %v1588_v35 = vld [vmem:[%s5455_s5 + $0xd8] sm:$0xff] }
 0x106   : > { %1037 = vmatprep.mubr.f32.mxu1 %v4011_v52  ;;  %1294 = vmatprep.mubr.f32.mxu0 %v4011_v52 }
 0x107   : > { %1649 = vmatpush1.msra.mxu1 %v1568_v37  ;;  %1874 = vmatpush1.msra.mxu0 %v1600_v38  ;;  %v774_v37 = vmax.f32 %v700_v32, 0.0  ;;  %v705_v38 = vadd.f32 %v4260_v54, %v704_v34 }
 0x108   : > { %1650 = vmatprep.subr.mxu1 %v4011_v52  ;;  %1875 = vmatprep.subr.mxu0 %v4011_v52 }
 0x109   : > { %3363 = vmatmul.mubr.msk.f32.gmra.mxu1 %vm431_vm0, %v762_v39  ;;  %3395 = vmatmul.mubr.msk.f32.gmra.mxu0 %vm431_vm0, %v762_v39  ;;  %v3625_v39 = vpop.f32.mrf.mxu1 }
 0x10a   : > { %1043 = vmatprep.mubr.f32.mxu1 %v4011_v52  ;;  %1300 = vmatprep.mubr.f32.mxu0 %v4011_v52 }
 0x10b   : > { %1651 = vmatpush1.msra.mxu1 %v1567_v42  ;;  %1876 = vmatpush1.msra.mxu0 %v1599_v43  ;;  %v710_v42 = vadd.f32 %v3622_v29, %v4260_v54  ;;  %v775_v43 = vmax.f32 %v705_v38, 0.0  ;;  %v714_v44 = vpop.f32.mrf.mxu1  ;;  %v801_v29 = vld [vmem:[%s5454_s4] sm:$0xf] }
 0x10c   : > { %1652 = vmatprep.subr.mxu1 %v4011_v52  ;;  %1877 = vmatprep.subr.mxu0 %v4011_v52 }
 0x10d   : > { %3364 = vmatmul.mubr.msk.f32.gmra.mxu1 %vm431_vm0, %v763_v45  ;;  %3396 = vmatmul.mubr.msk.f32.gmra.mxu0 %vm431_vm0, %v763_v45  ;;  %v1586_v45 = vld [vmem:[%s5455_s5 + $0xc8] sm:$0xff] }
 0x10e   : > { %1049 = vmatprep.mubr.f32.mxu1 %v4011_v52  ;;  %1306 = vmatprep.mubr.f32.mxu0 %v4011_v52 }
 0x10f   : > { %1653 = vmatpush1.msra.mxu1 %v1566_v47  ;;  %1878 = vmatpush1.msra.mxu0 %v1598_v48  ;;  %v776_v47 = vmax.f32 %v710_v42, 0.0  ;;  %v715_v48 = vadd.f32 %v4260_v54, %v714_v44 }
 0x110   : > { %1654 = vmatprep.subr.mxu1 %v4011_v52  ;;  %1879 = vmatprep.subr.mxu0 %v4011_v52 }
 0x111   : > { %3365 = vmatmul.mubr.msk.f32.gmra.mxu1 %vm431_vm0, %v764_v49  ;;  %3397 = vmatmul.mubr.msk.f32.gmra.mxu0 %vm431_vm0, %v764_v49  ;;  %v3628_v49 = vpop.f32.mrf.mxu1 }
 0x112   : > { %1055 = vmatprep.mubr.f32.mxu1 %v4011_v52  ;;  %1312 = vmatprep.mubr.f32.mxu0 %v4011_v52 }
 0x113   : > { %1655 = vmatpush1.msra.mxu1 %v1565_v53  ;;  %1880 = vmatpush1.msra.mxu0 %v1597_v55  ;;  %v720_v53 = vadd.f32 %v3625_v39, %v4260_v54  ;;  %v777_v55 = vmax.f32 %v715_v48, 0.0  ;;  %v724_v56 = vpop.f32.mrf.mxu1 }
 0x114   : > { %1656 = vmatprep.subr.mxu1 %v4011_v52  ;;  %1881 = vmatprep.subr.mxu0 %v4011_v52 }
 0x115   : > { %3366 = vmatmul.mubr.msk.f32.gmra.mxu1 %vm431_vm0, %v765_v57  ;;  %3398 = vmatmul.mubr.msk.f32.gmra.mxu0 %vm431_vm0, %v765_v57  ;;  %v1584_v57 = vld [vmem:[%s5455_s5 + $0xb8] sm:$0xff] }
 0x116   : > { %1061 = vmatprep.mubr.f32.mxu1 %v4011_v52  ;;  %1318 = vmatprep.mubr.f32.mxu0 %v4011_v52 }
 0x117   : > { %1657 = vmatpush1.msra.mxu1 %v1564_v59  ;;  %1882 = vmatpush1.msra.mxu0 %v1596_v60  ;;  %v778_v59 = vmax.f32 %v720_v53, 0.0  ;;  %v725_v60 = vadd.f32 %v4260_v54, %v724_v56 }
 0x118   : > { %1658 = vmatprep.subr.mxu1 %v4011_v52  ;;  %1883 = vmatprep.subr.mxu0 %v4011_v52 }
 0x119   : > { %3367 = vmatmul.mubr.msk.f32.gmra.mxu1 %vm431_vm0, %v766_v61  ;;  %3399 = vmatmul.mubr.msk.f32.gmra.mxu0 %vm431_vm0, %v766_v61  ;;  %v3631_v61 = vpop.f32.mrf.mxu1 }
 0x11a   : > { %1067 = vmatprep.mubr.f32.mxu1 %v4011_v52  ;;  %1324 = vmatprep.mubr.f32.mxu0 %v4011_v52 }
 0x11b   : > { %1659 = vmatpush1.msra.mxu1 %v1563_v0  ;;  %1884 = vmatpush1.msra.mxu0 %v1595_v1  ;;  %v730_v0 = vadd.f32 %v3628_v49, %v4260_v54  ;;  %v779_v1 = vmax.f32 %v725_v60, 0.0  ;;  %v734_v2 = vpop.f32.mrf.mxu1 }
 0x11c   : > { %1660 = vmatprep.subr.mxu1 %v4011_v52  ;;  %1885 = vmatprep.subr.mxu0 %v4011_v52 }
 0x11d   : > { %3368 = vmatmul.mubr.msk.f32.gmra.mxu1 %vm431_vm0, %v767_v3  ;;  %3400 = vmatmul.mubr.msk.f32.gmra.mxu0 %vm431_vm0, %v767_v3  ;;  %v1582_v3 = vld [vmem:[%s5455_s5 + $0xa8] sm:$0xff] }
 0x11e   : > { %1073 = vmatprep.mubr.f32.mxu1 %v4011_v52  ;;  %1330 = vmatprep.mubr.f32.mxu0 %v4011_v52 }
 0x11f   : > { %1661 = vmatpush1.msra.mxu1 %v1562_v5  ;;  %1886 = vmatpush1.msra.mxu0 %v1594_v6  ;;  %v780_v5 = vmax.f32 %v730_v0, 0.0  ;;  %v735_v6 = vadd.f32 %v4260_v54, %v734_v2 }
 0x120   : > { %1662 = vmatprep.subr.mxu1 %v4011_v52  ;;  %1887 = vmatprep.subr.mxu0 %v4011_v52 }
 0x121   : > { %3369 = vmatmul.mubr.msk.f32.gmra.mxu1 %vm431_vm0, %v768_v7  ;;  %3401 = vmatmul.mubr.msk.f32.gmra.mxu0 %vm431_vm0, %v768_v7  ;;  %v3634_v7 = vpop.f32.mrf.mxu1 }
 0x122   : > { %1079 = vmatprep.mubr.f32.mxu1 %v4011_v52  ;;  %1336 = vmatprep.mubr.f32.mxu0 %v4011_v52  ;;  %v750_v19 = vadd.f32 %v3634_v7, %v4260_v54  ;;  %v2127_v7 = vld [vmem:[%s5457_s7 + $0x68] sm:$0xff] }
 0x123   : > { %1663 = vmatpush1.msra.mxu1 %v1561_v10  ;;  %1888 = vmatpush1.msra.mxu0 %v1593_v11  ;;  %v740_v10 = vadd.f32 %v3631_v61, %v4260_v54  ;;  %v781_v11 = vmax.f32 %v735_v6, 0.0  ;;  %v744_v12 = vpop.f32.mrf.mxu1 }
 0x124   : > { %1664 = vmatprep.subr.mxu1 %v4011_v52  ;;  %1889 = vmatprep.subr.mxu0 %v4011_v52 }
 0x125   : > { %3370 = vmatmul.mubr.msk.f32.gmra.mxu1 %vm431_vm0, %v769_v13  ;;  %3402 = vmatmul.mubr.msk.f32.gmra.mxu0 %vm431_vm0, %v769_v13  ;;  %v1580_v13 = vld [vmem:[%s5455_s5 + $0x98] sm:$0xff] }
 0x126   : > { %1085 = vmatprep.mubr.f32.mxu1 %v4011_v52  ;;  %1342 = vmatprep.mubr.f32.mxu0 %v4011_v52 }
 0x127   : > { %1665 = vmatpush2.msra.mxu1 %v1592_v15  ;;  %1890 = vmatpush2.msra.mxu0 %v1624_v16  ;;  %v782_v15 = vmax.f32 %v740_v10, 0.0  ;;  %v745_v16 = vadd.f32 %v4260_v54, %v744_v12  ;;  %v784_v54 = vmax.f32 %v750_v19, 0.0 }
 0x128   : > { %1666 = vmatprep.subr.mxu1 %v4011_v52  ;;  %1891 = vmatprep.subr.mxu0 %v4011_v52 }
 0x129   : > { %3371 = vmatmul.mubr.msk.f32.gmra.mxu1 %vm431_vm0, %v770_v17  ;;  %3403 = vmatmul.mubr.msk.f32.gmra.mxu0 %vm431_vm0, %v770_v17  ;;  %v1579_v17 = vld [vmem:[%s5455_s5 + $0x90] sm:$0xff] }
 0x12a   : > { %1091 = vmatprep.mubr.f32.mxu1 %v4011_v52  ;;  %1348 = vmatprep.mubr.f32.mxu0 %v4011_v52 }
 0x12b   : > { %1667 = vmatpush2.msra.mxu1 %v1591_v20  ;;  %1892 = vmatpush2.msra.mxu0 %v1623_v21  ;;  %v783_v20 = vmax.f32 %v745_v16, 0.0  ;;  %v1578_v21 = vld [vmem:[%s5455_s5 + $0x88] sm:$0xff] }
 0x12c   : > { %1668 = vmatprep.subr.mxu1 %v4011_v52  ;;  %1893 = vmatprep.subr.mxu0 %v4011_v52 }
 0x12d   : > { %3372 = vmatmul.mubr.msk.f32.gmra.mxu1 %vm431_vm0, %v771_v23  ;;  %3404 = vmatmul.mubr.msk.f32.gmra.mxu0 %vm431_vm0, %v771_v23  ;;  %v1577_v23 = vld [vmem:[%s5455_s5 + $0x80] sm:$0xff] }
 0x12e   : > { %1097 = vmatprep.mubr.f32.mxu1 %v4011_v52  ;;  %1354 = vmatprep.mubr.f32.mxu0 %v4011_v52 }
 0x12f   : > { %1669 = vmatpush2.msra.mxu1 %v1590_v25  ;;  %1894 = vmatpush2.msra.mxu0 %v1622_v26  ;;  %v803_v25 = vlaneseq }
 0x130   : > { %1670 = vmatprep.subr.mxu1 %v4011_v52  ;;  %1895 = vmatprep.subr.mxu0 %v4011_v52 }
 0x131   : > { %3373 = vmatmul.mubr.msk.f32.gmra.mxu1 %vm431_vm0, %v772_v27  ;;  %3405 = vmatmul.mubr.msk.f32.gmra.mxu0 %vm431_vm0, %v772_v27  ;;  %v804_v26 = vshrl.u32 %v803_v25, 7 }
 0x132   : > { %1103 = vmatprep.mubr.f32.mxu1 %v4011_v52  ;;  %1360 = vmatprep.mubr.f32.mxu0 %v4011_v52 }
 0x133   : > { %1671 = vmatpush2.msra.mxu1 %v1589_v30  ;;  %1896 = vmatpush2.msra.mxu0 %v1621_v31  ;;  %v805_v27 = vsub.s32 0, %v804_v26  ;;  %v813_v28 = vsub.s32 2, %v804_v26  ;;  %v809_v30 = vsub.s32 1, %v804_v26  ;;  %v817_v31 = vsub.s32 3, %v804_v26 }
 0x134   : > { %1672 = vmatprep.subr.mxu1 %v4011_v52  ;;  %1897 = vmatprep.subr.mxu0 %v4011_v52 }
 0x135   : > { %3374 = vmatmul.mubr.msk.f32.gmra.mxu1 %vm431_vm0, %v773_v33  ;;  %3406 = vmatmul.mubr.msk.f32.gmra.mxu0 %vm431_vm0, %v773_v33  ;;  %v4677_v32 = vrot.slane %v801_v29, %v805_v27  ;;  %v4679_v33 = vrot.slane %v801_v29, %v813_v28  ;;  %v4683_v34 = vrot.slane %v801_v29, %v817_v31 }
 0x136   : > { %1109 = vmatprep.mubr.f32.mxu1 %v4011_v52  ;;  %1366 = vmatprep.mubr.f32.mxu0 %v4011_v52 }
 0x137   : > { %1673 = vmatpush2.msra.mxu1 %v1588_v35  ;;  %1898 = vmatpush2.msra.mxu0 %v1620_v36 }
 0x138   : > { %1674 = vmatprep.subr.mxu1 %v4011_v52  ;;  %1899 = vmatprep.subr.mxu0 %v4011_v52 }
 0x139   : > { %3375 = vmatmul.mubr.msk.f32.gmra.mxu1 %vm431_vm0, %v774_v37  ;;  %3407 = vmatmul.mubr.msk.f32.gmra.mxu0 %vm431_vm0, %v774_v37 }
 0x13a   : > { %1115 = vmatprep.mubr.f32.mxu1 %v4011_v52  ;;  %1372 = vmatprep.mubr.f32.mxu0 %v4011_v52 }
 0x13b   : > { %1675 = vmatpush2.msra.mxu1 %v1587_v40  ;;  %1900 = vmatpush2.msra.mxu0 %v1619_v41 }
 0x13c   : > { %1676 = vmatprep.subr.mxu1 %v4011_v52  ;;  %1901 = vmatprep.subr.mxu0 %v4011_v52 }
 0x13d   : > { %3376 = vmatmul.mubr.msk.f32.gmra.mxu1 %vm431_vm0, %v775_v43  ;;  %3408 = vmatmul.mubr.msk.f32.gmra.mxu0 %vm431_vm0, %v775_v43 }
 0x13e   : > { %1121 = vmatprep.mubr.f32.mxu1 %v4011_v52  ;;  %1378 = vmatprep.mubr.f32.mxu0 %v4011_v52 }
 0x13f   : > { %1677 = vmatpush2.msra.mxu1 %v1586_v45  ;;  %1902 = vmatpush2.msra.mxu0 %v1618_v46  ;;  %v2129_v45 = vld [vmem:[%s5457_s7 + $0x78] sm:$0xff] }
 0x140   : > { %1678 = vmatprep.subr.mxu1 %v4011_v52  ;;  %1903 = vmatprep.subr.mxu0 %v4011_v52 }
 0x141   : > { %3377 = vmatmul.mubr.msk.f32.gmra.mxu1 %vm431_vm0, %v776_v47  ;;  %3409 = vmatmul.mubr.msk.f32.gmra.mxu0 %vm431_vm0, %v776_v47 }
 0x142   : > { %1127 = vmatprep.mubr.f32.mxu1 %v4011_v52  ;;  %1384 = vmatprep.mubr.f32.mxu0 %v4011_v52 }
 0x143   : > { %1679 = vmatpush2.msra.mxu1 %v1585_v50  ;;  %1904 = vmatpush2.msra.mxu0 %v1617_v51 }
 0x144   : > { %1680 = vmatprep.subr.mxu1 %v4011_v52  ;;  %1905 = vmatprep.subr.mxu0 %v4011_v52 }
 0x145   : > { %3378 = vmatmul.mubr.msk.f32.gmra.mxu1 %vm431_vm0, %v777_v55  ;;  %3410 = vmatmul.mubr.msk.f32.gmra.mxu0 %vm431_vm0, %v777_v55 }
 0x146   : > { %1133 = vmatprep.mubr.f32.mxu1 %v4011_v52  ;;  %1390 = vmatprep.mubr.f32.mxu0 %v4011_v52 }
 0x147   : > { %1681 = vmatpush2.msra.mxu1 %v1584_v57  ;;  %1906 = vmatpush2.msra.mxu0 %v1616_v58  ;;  %v2128_v58 = vld [vmem:[%s5457_s7 + $0x70] sm:$0xff] }
 0x148   : > { %1682 = vmatprep.subr.mxu1 %v4011_v52  ;;  %1907 = vmatprep.subr.mxu0 %v4011_v52 }
 0x149   : > { %3379 = vmatmul.mubr.msk.f32.gmra.mxu1 %vm431_vm0, %v778_v59  ;;  %3411 = vmatmul.mubr.msk.f32.gmra.mxu0 %vm431_vm0, %v778_v59 }
 0x14a   : > { %1139 = vmatprep.mubr.f32.mxu1 %v4011_v52  ;;  %1396 = vmatprep.mubr.f32.mxu0 %v4011_v52 }
 0x14b   : > { %1683 = vmatpush2.msra.mxu1 %v1583_v62  ;;  %1908 = vmatpush2.msra.mxu0 %v1615_v63 }
 0x14c   : > { %1684 = vmatprep.subr.mxu1 %v4011_v52  ;;  %1909 = vmatprep.subr.mxu0 %v4011_v52 }
 0x14d   : > { %3380 = vmatmul.mubr.msk.f32.gmra.mxu1 %vm431_vm0, %v779_v1  ;;  %3412 = vmatmul.mubr.msk.f32.gmra.mxu0 %vm431_vm0, %v779_v1 }
 0x14e   : > { %1145 = vmatprep.mubr.f32.mxu1 %v4011_v52  ;;  %1402 = vmatprep.mubr.f32.mxu0 %v4011_v52 }
 0x14f   : > { %1685 = vmatpush2.msra.mxu1 %v1582_v3  ;;  %1910 = vmatpush2.msra.mxu0 %v1614_v4 }
 0x150   : > { %1686 = vmatprep.subr.mxu1 %v4011_v52  ;;  %1911 = vmatprep.subr.mxu0 %v4011_v52 }
 0x151   : > { %3381 = vmatmul.mubr.msk.f32.gmra.mxu1 %vm431_vm0, %v780_v5  ;;  %3413 = vmatmul.mubr.msk.f32.gmra.mxu0 %vm431_vm0, %v780_v5 }
 0x152   : > { %1151 = vmatprep.mubr.f32.mxu1 %v4011_v52  ;;  %1408 = vmatprep.mubr.f32.mxu0 %v4011_v52 }
 0x153   : > { %1687 = vmatpush2.msra.mxu1 %v1581_v8  ;;  %1912 = vmatpush2.msra.mxu0 %v1613_v9 }
 0x154   : > { %1688 = vmatprep.subr.mxu1 %v4011_v52  ;;  %1913 = vmatprep.subr.mxu0 %v4011_v52 }
 0x155   : > { %3382 = vmatmul.mubr.msk.f32.gmra.mxu1 %vm431_vm0, %v781_v11  ;;  %3414 = vmatmul.mubr.msk.f32.gmra.mxu0 %vm431_vm0, %v781_v11 }
 0x156   : > { %1157 = vmatprep.mubr.f32.mxu1 %v4011_v52  ;;  %1414 = vmatprep.mubr.f32.mxu0 %v4011_v52 }
 0x157   : > { %1689 = vmatpush2.msra.mxu1 %v1580_v13  ;;  %1914 = vmatpush2.msra.mxu0 %v1612_v14 }
 0x158   : > { %1690 = vmatprep.subr.mxu1 %v4011_v52  ;;  %1915 = vmatprep.subr.mxu0 %v4011_v52 }
 0x159   : > { %3383 = vmatmul.mubr.msk.f32.gmra.mxu1 %vm431_vm0, %v782_v15  ;;  %3415 = vmatmul.mubr.msk.f32.gmra.mxu0 %vm431_vm0, %v782_v15 }
 0x15a   : > { %1163 = vmatprep.mubr.f32.mxu1 %v4011_v52  ;;  %1420 = vmatprep.mubr.f32.mxu0 %v4011_v52 }
 0x15b   : > { %1691 = vmatpush2.msra.mxu1 %v1579_v17  ;;  %1916 = vmatpush2.msra.mxu0 %v1611_v18 }
 0x15c   : > { %1692 = vmatprep.subr.mxu1 %v4011_v52  ;;  %1917 = vmatprep.subr.mxu0 %v4011_v52 }
 0x15d   : > { %3384 = vmatmul.mubr.msk.f32.gmra.mxu1 %vm431_vm0, %v783_v20  ;;  %3416 = vmatmul.mubr.msk.f32.gmra.mxu0 %vm431_vm0, %v783_v20  ;;  %v2126_v20 = vld [vmem:[%s5457_s7 + $0x60] sm:$0xff] }
 0x15e   : > { %1169 = vmatprep.mubr.f32.mxu1 %v4011_v52  ;;  %1426 = vmatprep.mubr.f32.mxu0 %v4011_v52 }
 0x15f   : > { %1693 = vmatpush2.msra.mxu1 %v1578_v21  ;;  %1918 = vmatpush2.msra.mxu0 %v1610_v22 }
 0x160   : > { %1694 = vmatprep.subr.mxu1 %v4011_v52  ;;  %1919 = vmatprep.subr.mxu0 %v4011_v52  ;;  %v4681_v52 = vrot.slane %v801_v29, %v809_v30 }
 0x161   : > { %3385 = vmatmul.mubr.msk.f32.gmra.mxu1 %vm431_vm0, %v784_v54  ;;  %3417 = vmatmul.mubr.msk.f32.gmra.mxu0 %vm431_vm0, %v784_v54 }
 0x162   : > { %1695 = vmatpush2.msra.mxu1 %v1577_v23  ;;  %1920 = vmatpush2.msra.mxu0 %v1609_v24 }
 0x163   : > { %3635 = vmatprep.subr.mxu1 %v2129_v45 }
 0x1a5   : > { %v985_v35 = vpop.f32.mrf.mxu1  ;;  %v1242_v36 = vpop.f32.mrf.mxu0 }
 0x1a6   : > { %v986_v37 = vadd.f32 %v985_v35, %v4677_v32  ;;  %v1243_v38 = vadd.f32 %v1242_v36, %v4679_v33  ;;  %v2125_v35 = vld [vmem:[%s5457_s7 + $0x58] sm:$0xff] }
 0x1a7   : > { %v987_v39 = vpop.f32.mrf.mxu1  ;;  %v1244_v40 = vpop.f32.mrf.mxu0 }
 0x1a8   : > { %v988_v41 = vadd.f32 %v987_v39, %v4681_v52  ;;  %v1245_v42 = vadd.f32 %v1244_v40, %v4683_v34  ;;  %v1433_v48 = vmax.f32 %v986_v37, 0.0  ;;  %v1435_v49 = vmax.f32 %v1243_v38, 0.0 }
 0x1a9   : > { %v991_v43 = vpop.f32.mrf.mxu1  ;;  %v1248_v44 = vpop.f32.mrf.mxu0 }
 0x1aa   : > { %v1434_v46 = vmax.f32 %v988_v41, 0.0  ;;  %v1436_v47 = vmax.f32 %v1245_v42, 0.0  ;;  %v992_v50 = vadd.f32 %v991_v43, %v4677_v32  ;;  %v1249_v51 = vadd.f32 %v1248_v44, %v4679_v33 }
 0x1ab   : > { %v993_v53 = vpop.f32.mrf.mxu1  ;;  %v1250_v55 = vpop.f32.mrf.mxu0 }
 0x1ac   : > { %v994_v56 = vadd.f32 %v993_v53, %v4681_v52  ;;  %v1251_v57 = vadd.f32 %v1250_v55, %v4683_v34  ;;  %1696 = vmatprep.mubr.f32.mxu1 %v1434_v46  ;;  %1921 = vmatprep.mubr.f32.mxu0 %v1436_v47  ;;  %v1437_v63 = vmax.f32 %v992_v50, 0.0  ;;  %v1439_v0 = vmax.f32 %v1249_v51, 0.0 }
 0x1ad   : > { %v997_v59 = vpop.f32.mrf.mxu1  ;;  %v1254_v60 = vpop.f32.mrf.mxu0  ;;  %1697 = vmatmul.mubr.f32.vlgmr.msra.gmra.mxu1 %v1433_v48  ;;  %1922 = vmatmul.mubr.f32.vlgmr.msra.gmra.mxu0 %v1435_v49  ;;  %v2124_v48 = vld [vmem:[%s5457_s7 + $0x50] sm:$0xff] }
 0x1ae   : > { %v1438_v61 = vmax.f32 %v994_v56, 0.0  ;;  %v1440_v62 = vmax.f32 %v1251_v57, 0.0  ;;  %3636 = vmatpush3.msra.mxu1 %v2129_v45  ;;  %v998_v1 = vadd.f32 %v997_v59, %v4677_v32  ;;  %v1255_v2 = vadd.f32 %v1254_v60, %v4679_v33 }
 0x1af   : > { %v999_v3 = vpop.f32.mrf.mxu1  ;;  %v1256_v4 = vpop.f32.mrf.mxu0  ;;  %3637 = vmatprep.subr.mxu1 %v2128_v58 }
 0x1b0   : > { %v1000_v5 = vadd.f32 %v999_v3, %v4681_v52  ;;  %v1257_v6 = vadd.f32 %v1256_v4, %v4683_v34  ;;  %1701 = vmatprep.mubr.f32.mxu1 %v1438_v61  ;;  %1926 = vmatprep.mubr.f32.mxu0 %v1440_v62  ;;  %v1441_v12 = vmax.f32 %v998_v1, 0.0  ;;  %v1443_v13 = vmax.f32 %v1255_v2, 0.0 }
 0x1b1   : > { %v1003_v8 = vpop.f32.mrf.mxu1  ;;  %v1260_v9 = vpop.f32.mrf.mxu0  ;;  %1702 = vmatmul.mubr.f32.gmra.mxu1 %v1437_v63  ;;  %1927 = vmatmul.mubr.f32.gmra.mxu0 %v1439_v0  ;;  %v2123_v63 = vld [vmem:[%s5457_s7 + $0x48] sm:$0xff] }
 0x1b2   : > { %v1442_v10 = vmax.f32 %v1000_v5, 0.0  ;;  %v1444_v11 = vmax.f32 %v1257_v6, 0.0  ;;  %3638 = vmatpush3.msra.mxu1 %v2128_v58  ;;  %v1004_v14 = vadd.f32 %v1003_v8, %v4677_v32  ;;  %v1261_v15 = vadd.f32 %v1260_v9, %v4679_v33 }
 0x1b3   : > { %v1005_v16 = vpop.f32.mrf.mxu1  ;;  %v1262_v17 = vpop.f32.mrf.mxu0  ;;  %3639 = vmatprep.subr.mxu1 %v2127_v7 }
 0x1b4   : > { %v1006_v18 = vadd.f32 %v1005_v16, %v4681_v52  ;;  %v1263_v19 = vadd.f32 %v1262_v17, %v4683_v34  ;;  %1706 = vmatprep.mubr.f32.mxu1 %v1442_v10  ;;  %1931 = vmatprep.mubr.f32.mxu0 %v1444_v11  ;;  %v1445_v24 = vmax.f32 %v1004_v14, 0.0  ;;  %v1447_v25 = vmax.f32 %v1261_v15, 0.0 }
 0x1b5   : > { %v1009_v21 = vpop.f32.mrf.mxu1  ;;  %v1266_v22 = vpop.f32.mrf.mxu0  ;;  %1707 = vmatmul.mubr.f32.gmra.mxu1 %v1441_v12  ;;  %1932 = vmatmul.mubr.f32.gmra.mxu0 %v1443_v13  ;;  %v2122_v12 = vld [vmem:[%s5457_s7 + $0x40] sm:$0xff] }
 0x1b6   : > { %v1446_v54 = vmax.f32 %v1006_v18, 0.0  ;;  %v1448_v23 = vmax.f32 %v1263_v19, 0.0  ;;  %3640 = vmatpush3.msra.mxu1 %v2127_v7  ;;  %v1010_v26 = vadd.f32 %v1009_v21, %v4677_v32  ;;  %v1267_v27 = vadd.f32 %v1266_v22, %v4679_v33 }
 0x1b7   : > { %v1011_v28 = vpop.f32.mrf.mxu1  ;;  %v1268_v29 = vpop.f32.mrf.mxu0  ;;  %3641 = vmatprep.subr.mxu1 %v2126_v20 }
 0x1b8   : > { %v1012_v30 = vadd.f32 %v1011_v28, %v4681_v52  ;;  %v1269_v31 = vadd.f32 %v1268_v29, %v4683_v34  ;;  %1711 = vmatprep.mubr.f32.mxu1 %v1446_v54  ;;  %1936 = vmatprep.mubr.f32.mxu0 %v1448_v23  ;;  %v1449_v40 = vmax.f32 %v1010_v26, 0.0  ;;  %v1451_v41 = vmax.f32 %v1267_v27, 0.0 }
 0x1b9   : > { %v1015_v36 = vpop.f32.mrf.mxu1  ;;  %v1272_v37 = vpop.f32.mrf.mxu0  ;;  %1712 = vmatmul.mubr.f32.gmra.mxu1 %v1445_v24  ;;  %1937 = vmatmul.mubr.f32.gmra.mxu0 %v1447_v25  ;;  %v2121_v24 = vld [vmem:[%s5457_s7 + $0x38] sm:$0xff] }
 0x1ba   : > { %v1450_v38 = vmax.f32 %v1012_v30, 0.0  ;;  %v1452_v39 = vmax.f32 %v1269_v31, 0.0  ;;  %3642 = vmatpush3.msra.mxu1 %v2126_v20  ;;  %v1016_v42 = vadd.f32 %v1015_v36, %v4677_v32  ;;  %v1273_v43 = vadd.f32 %v1272_v37, %v4679_v33 }
 0x1bb   : > { %v1017_v44 = vpop.f32.mrf.mxu1  ;;  %v1274_v45 = vpop.f32.mrf.mxu0  ;;  %3643 = vmatprep.subr.mxu1 %v2125_v35 }
 0x1bc   : > { %v1018_v46 = vadd.f32 %v1017_v44, %v4681_v52  ;;  %v1275_v47 = vadd.f32 %v1274_v45, %v4683_v34  ;;  %1716 = vmatprep.mubr.f32.mxu1 %v1450_v38  ;;  %1941 = vmatprep.mubr.f32.mxu0 %v1452_v39  ;;  %v1453_v55 = vmax.f32 %v1016_v42, 0.0  ;;  %v1455_v56 = vmax.f32 %v1273_v43, 0.0 }
 0x1bd   : > { %v1021_v49 = vpop.f32.mrf.mxu1  ;;  %v1278_v50 = vpop.f32.mrf.mxu0  ;;  %1717 = vmatmul.mubr.f32.gmra.mxu1 %v1449_v40  ;;  %1942 = vmatmul.mubr.f32.gmra.mxu0 %v1451_v41  ;;  %v2120_v40 = vld [vmem:[%s5457_s7 + $0x30] sm:$0xff] }
 0x1be   : > { %v1454_v51 = vmax.f32 %v1018_v46, 0.0  ;;  %v1456_v53 = vmax.f32 %v1275_v47, 0.0  ;;  %3644 = vmatpush3.msra.mxu1 %v2125_v35  ;;  %v1022_v57 = vadd.f32 %v1021_v49, %v4677_v32  ;;  %v1279_v58 = vadd.f32 %v1278_v50, %v4679_v33 }
 0x1bf   : > { %v1023_v59 = vpop.f32.mrf.mxu1  ;;  %v1280_v60 = vpop.f32.mrf.mxu0  ;;  %3645 = vmatprep.subr.mxu1 %v2124_v48 }
 0x1c0   : > { %v1024_v61 = vadd.f32 %v1023_v59, %v4681_v52  ;;  %v1281_v62 = vadd.f32 %v1280_v60, %v4683_v34  ;;  %1721 = vmatprep.mubr.f32.mxu1 %v1454_v51  ;;  %1946 = vmatprep.mubr.f32.mxu0 %v1456_v53  ;;  %v1457_v4 = vmax.f32 %v1022_v57, 0.0  ;;  %v1459_v5 = vmax.f32 %v1279_v58, 0.0 }
 0x1c1   : > { %v1027_v0 = vpop.f32.mrf.mxu1  ;;  %v1284_v1 = vpop.f32.mrf.mxu0  ;;  %1722 = vmatmul.mubr.f32.gmra.mxu1 %v1453_v55  ;;  %1947 = vmatmul.mubr.f32.gmra.mxu0 %v1455_v56  ;;  %v2119_v55 = vld [vmem:[%s5457_s7 + $0x28] sm:$0xff] }
 0x1c2   : > { %v1458_v2 = vmax.f32 %v1024_v61, 0.0  ;;  %v1460_v3 = vmax.f32 %v1281_v62, 0.0  ;;  %3646 = vmatpush3.msra.mxu1 %v2124_v48  ;;  %v1028_v6 = vadd.f32 %v1027_v0, %v4677_v32  ;;  %v1285_v7 = vadd.f32 %v1284_v1, %v4679_v33 }
 0x1c3   : > { %v1029_v8 = vpop.f32.mrf.mxu1  ;;  %v1286_v9 = vpop.f32.mrf.mxu0  ;;  %3647 = vmatprep.subr.mxu1 %v2123_v63 }
 0x1c4   : > { %v1030_v10 = vadd.f32 %v1029_v8, %v4681_v52  ;;  %v1287_v11 = vadd.f32 %v1286_v9, %v4683_v34  ;;  %1726 = vmatprep.mubr.f32.mxu1 %v1458_v2  ;;  %1951 = vmatprep.mubr.f32.mxu0 %v1460_v3  ;;  %v1461_v17 = vmax.f32 %v1028_v6, 0.0  ;;  %v1463_v18 = vmax.f32 %v1285_v7, 0.0 }
 0x1c5   : > { %v1033_v13 = vpop.f32.mrf.mxu1  ;;  %v1290_v14 = vpop.f32.mrf.mxu0  ;;  %1727 = vmatmul.mubr.f32.gmra.mxu1 %v1457_v4  ;;  %1952 = vmatmul.mubr.f32.gmra.mxu0 %v1459_v5 }
 0x1c6   : > { %v1462_v15 = vmax.f32 %v1030_v10, 0.0  ;;  %v1464_v16 = vmax.f32 %v1287_v11, 0.0  ;;  %3648 = vmatpush3.msra.mxu1 %v2123_v63  ;;  %v1034_v19 = vadd.f32 %v1033_v13, %v4677_v32  ;;  %v1291_v20 = vadd.f32 %v1290_v14, %v4679_v33 }
 0x1c7   : > { %v1035_v21 = vpop.f32.mrf.mxu1  ;;  %v1292_v22 = vpop.f32.mrf.mxu0  ;;  %3649 = vmatprep.subr.mxu1 %v2122_v12 }
 0x1c8   : > { %v1036_v54 = vadd.f32 %v1035_v21, %v4681_v52  ;;  %v1293_v23 = vadd.f32 %v1292_v22, %v4683_v34  ;;  %1731 = vmatprep.mubr.f32.mxu1 %v1462_v15  ;;  %1956 = vmatprep.mubr.f32.mxu0 %v1464_v16  ;;  %v1465_v29 = vmax.f32 %v1034_v19, 0.0  ;;  %v1467_v30 = vmax.f32 %v1291_v20, 0.0 }
 0x1c9   : > { %v1039_v25 = vpop.f32.mrf.mxu1  ;;  %v1296_v26 = vpop.f32.mrf.mxu0  ;;  %1732 = vmatmul.mubr.f32.gmra.mxu1 %v1461_v17  ;;  %1957 = vmatmul.mubr.f32.gmra.mxu0 %v1463_v18 }
 0x1ca   : > { %v1466_v27 = vmax.f32 %v1036_v54, 0.0  ;;  %v1468_v28 = vmax.f32 %v1293_v23, 0.0  ;;  %3650 = vmatpush3.msra.mxu1 %v2122_v12  ;;  %v1040_v31 = vadd.f32 %v1039_v25, %v4677_v32  ;;  %v1297_v35 = vadd.f32 %v1296_v26, %v4679_v33 }
 0x1cb   : > { %v1041_v36 = vpop.f32.mrf.mxu1  ;;  %v1298_v37 = vpop.f32.mrf.mxu0  ;;  %3651 = vmatprep.subr.mxu1 %v2121_v24 }
 0x1cc   : > { %v1042_v38 = vadd.f32 %v1041_v36, %v4681_v52  ;;  %v1299_v39 = vadd.f32 %v1298_v37, %v4683_v34  ;;  %1736 = vmatprep.mubr.f32.mxu1 %v1466_v27  ;;  %1961 = vmatprep.mubr.f32.mxu0 %v1468_v28  ;;  %v1469_v45 = vmax.f32 %v1040_v31, 0.0  ;;  %v1471_v46 = vmax.f32 %v1297_v35, 0.0 }
 0x1cd   : > { %v1045_v41 = vpop.f32.mrf.mxu1  ;;  %v1302_v42 = vpop.f32.mrf.mxu0  ;;  %1737 = vmatmul.mubr.f32.gmra.mxu1 %v1465_v29  ;;  %1962 = vmatmul.mubr.f32.gmra.mxu0 %v1467_v30 }
 0x1ce   : > { %v1470_v43 = vmax.f32 %v1042_v38, 0.0  ;;  %v1472_v44 = vmax.f32 %v1299_v39, 0.0  ;;  %3652 = vmatpush3.msra.mxu1 %v2121_v24  ;;  %v1046_v47 = vadd.f32 %v1045_v41, %v4677_v32  ;;  %v1303_v48 = vadd.f32 %v1302_v42, %v4679_v33 }
 0x1cf   : > { %v1047_v49 = vpop.f32.mrf.mxu1  ;;  %v1304_v50 = vpop.f32.mrf.mxu0  ;;  %3653 = vmatprep.subr.mxu1 %v2120_v40 }
 0x1d0   : > { %v1048_v51 = vadd.f32 %v1047_v49, %v4681_v52  ;;  %v1305_v53 = vadd.f32 %v1304_v50, %v4683_v34  ;;  %1741 = vmatprep.mubr.f32.mxu1 %v1470_v43  ;;  %1966 = vmatprep.mubr.f32.mxu0 %v1472_v44  ;;  %v1473_v60 = vmax.f32 %v1046_v47, 0.0  ;;  %v1475_v61 = vmax.f32 %v1303_v48, 0.0 }
 0x1d1   : > { %v1051_v56 = vpop.f32.mrf.mxu1  ;;  %v1308_v57 = vpop.f32.mrf.mxu0  ;;  %1742 = vmatmul.mubr.f32.gmra.mxu1 %v1469_v45  ;;  %1967 = vmatmul.mubr.f32.gmra.mxu0 %v1471_v46 }
 0x1d2   : > { %v1474_v58 = vmax.f32 %v1048_v51, 0.0  ;;  %v1476_v59 = vmax.f32 %v1305_v53, 0.0  ;;  %3654 = vmatpush3.msra.mxu1 %v2120_v40  ;;  %v1052_v62 = vadd.f32 %v1051_v56, %v4677_v32  ;;  %v1309_v63 = vadd.f32 %v1308_v57, %v4679_v33 }
 0x1d3   : > { %v1053_v0 = vpop.f32.mrf.mxu1  ;;  %v1310_v1 = vpop.f32.mrf.mxu0  ;;  %3655 = vmatprep.subr.mxu1 %v2119_v55 }
 0x1d4   : > { %v1054_v2 = vadd.f32 %v1053_v0, %v4681_v52  ;;  %v1311_v3 = vadd.f32 %v1310_v1, %v4683_v34  ;;  %1746 = vmatprep.mubr.f32.mxu1 %v1474_v58  ;;  %1971 = vmatprep.mubr.f32.mxu0 %v1476_v59  ;;  %v1477_v8 = vmax.f32 %v1052_v62, 0.0  ;;  %v1479_v9 = vmax.f32 %v1309_v63, 0.0 }
 0x1d5   : > { %v1057_v4 = vpop.f32.mrf.mxu1  ;;  %v1314_v5 = vpop.f32.mrf.mxu0  ;;  %1747 = vmatmul.mubr.f32.gmra.mxu1 %v1473_v60  ;;  %1972 = vmatmul.mubr.f32.gmra.mxu0 %v1475_v61 }
 0x1d6   : > { %v1478_v6 = vmax.f32 %v1054_v2, 0.0  ;;  %v1480_v7 = vmax.f32 %v1311_v3, 0.0  ;;  %3656 = vmatpush3.msra.mxu1 %v2119_v55  ;;  %v1058_v10 = vadd.f32 %v1057_v4, %v4677_v32  ;;  %v1315_v11 = vadd.f32 %v1314_v5, %v4679_v33 }
 0x1d7   : > { %v1059_v12 = vpop.f32.mrf.mxu1  ;;  %v1316_v13 = vpop.f32.mrf.mxu0 }
 0x1d8   : > { %v1060_v14 = vadd.f32 %v1059_v12, %v4681_v52  ;;  %v1317_v15 = vadd.f32 %v1316_v13, %v4683_v34  ;;  %1751 = vmatprep.mubr.f32.mxu1 %v1478_v6  ;;  %1976 = vmatprep.mubr.f32.mxu0 %v1480_v7  ;;  %v1481_v20 = vmax.f32 %v1058_v10, 0.0  ;;  %v1483_v21 = vmax.f32 %v1315_v11, 0.0 }
 0x1d9   : > { %v1063_v16 = vpop.f32.mrf.mxu1  ;;  %v1320_v17 = vpop.f32.mrf.mxu0  ;;  %1752 = vmatmul.mubr.f32.gmra.mxu1 %v1477_v8  ;;  %1977 = vmatmul.mubr.f32.gmra.mxu0 %v1479_v9 }
 0x1da   : > { %v1482_v18 = vmax.f32 %v1060_v14, 0.0  ;;  %v1484_v19 = vmax.f32 %v1317_v15, 0.0  ;;  %v1064_v22 = vadd.f32 %v1063_v16, %v4677_v32  ;;  %v1321_v54 = vadd.f32 %v1320_v17, %v4679_v33 }
 0x1db   : > { %v1065_v23 = vpop.f32.mrf.mxu1  ;;  %v1322_v24 = vpop.f32.mrf.mxu0 }
 0x1dc   : > { %v1066_v25 = vadd.f32 %v1065_v23, %v4681_v52  ;;  %v1323_v26 = vadd.f32 %v1322_v24, %v4683_v34  ;;  %1756 = vmatprep.mubr.f32.mxu1 %v1482_v18  ;;  %1981 = vmatprep.mubr.f32.mxu0 %v1484_v19  ;;  %v1485_v31 = vmax.f32 %v1064_v22, 0.0  ;;  %v1487_v35 = vmax.f32 %v1321_v54, 0.0  ;;  %v2118_v18 = vld [vmem:[%s5457_s7 + $0x20] sm:$0xff] }
 0x1dd   : > { %v1069_v27 = vpop.f32.mrf.mxu1  ;;  %v1326_v28 = vpop.f32.mrf.mxu0  ;;  %1757 = vmatmul.mubr.f32.gmra.mxu1 %v1481_v20  ;;  %1982 = vmatmul.mubr.f32.gmra.mxu0 %v1483_v21 }
 0x1de   : > { %v1486_v29 = vmax.f32 %v1066_v25, 0.0  ;;  %v1488_v30 = vmax.f32 %v1323_v26, 0.0  ;;  %v1070_v36 = vadd.f32 %v1069_v27, %v4677_v32  ;;  %v1327_v37 = vadd.f32 %v1326_v28, %v4679_v33  ;;  %3657 = vmatprep.subr.mxu1 %v2118_v18  ;;  %v2117_v26 = vld [vmem:[%s5457_s7 + $0x18] sm:$0xff] }
 0x1df   : > { %v1071_v38 = vpop.f32.mrf.mxu1  ;;  %v1328_v39 = vpop.f32.mrf.mxu0  ;;  %3658 = vmatpush3.msra.mxu1 %v2118_v18 }
 0x1e0   : > { %v1072_v40 = vadd.f32 %v1071_v38, %v4681_v52  ;;  %v1329_v41 = vadd.f32 %v1328_v39, %v4683_v34  ;;  %1761 = vmatprep.mubr.f32.mxu1 %v1486_v29  ;;  %1986 = vmatprep.mubr.f32.mxu0 %v1488_v30  ;;  %v1489_v46 = vmax.f32 %v1070_v36, 0.0  ;;  %v1491_v47 = vmax.f32 %v1327_v37, 0.0 }
 0x1e1   : > { %v1075_v42 = vpop.f32.mrf.mxu1  ;;  %v1332_v43 = vpop.f32.mrf.mxu0  ;;  %1762 = vmatmul.mubr.f32.gmra.mxu1 %v1485_v31  ;;  %1987 = vmatmul.mubr.f32.gmra.mxu0 %v1487_v35 }
 0x1e2   : > { %v1490_v44 = vmax.f32 %v1072_v40, 0.0  ;;  %v1492_v45 = vmax.f32 %v1329_v41, 0.0  ;;  %v1076_v48 = vadd.f32 %v1075_v42, %v4677_v32  ;;  %v1333_v49 = vadd.f32 %v1332_v43, %v4679_v33  ;;  %3659 = vmatprep.subr.mxu1 %v2117_v26  ;;  %v2116_v42 = vld [vmem:[%s5457_s7 + $0x10] sm:$0xff] }
 0x1e3   : > { %v1077_v50 = vpop.f32.mrf.mxu1  ;;  %v1334_v51 = vpop.f32.mrf.mxu0  ;;  %3660 = vmatpush3.msra.mxu1 %v2117_v26 }
 0x1e4   : > { %v1078_v53 = vadd.f32 %v1077_v50, %v4681_v52  ;;  %v1335_v55 = vadd.f32 %v1334_v51, %v4683_v34  ;;  %1766 = vmatprep.mubr.f32.mxu1 %v1490_v44  ;;  %1991 = vmatprep.mubr.f32.mxu0 %v1492_v45  ;;  %v1493_v60 = vmax.f32 %v1076_v48, 0.0  ;;  %v1495_v61 = vmax.f32 %v1333_v49, 0.0 }
 0x1e5   : > { %v1081_v56 = vpop.f32.mrf.mxu1  ;;  %v1338_v57 = vpop.f32.mrf.mxu0  ;;  %1767 = vmatmul.mubr.f32.gmra.mxu1 %v1489_v46  ;;  %1992 = vmatmul.mubr.f32.gmra.mxu0 %v1491_v47 }
 0x1e6   : > { %v1494_v58 = vmax.f32 %v1078_v53, 0.0  ;;  %v1496_v59 = vmax.f32 %v1335_v55, 0.0  ;;  %v1082_v62 = vadd.f32 %v1081_v56, %v4677_v32  ;;  %v1339_v63 = vadd.f32 %v1338_v57, %v4679_v33  ;;  %3661 = vmatprep.subr.mxu1 %v2116_v42  ;;  %v2115_v57 = vld [vmem:[%s5457_s7 + $0x8] sm:$0xff] }
 0x1e7   : > { %v1083_v0 = vpop.f32.mrf.mxu1  ;;  %v1340_v1 = vpop.f32.mrf.mxu0  ;;  %3662 = vmatpush3.msra.mxu1 %v2116_v42 }
 0x1e8   : > { %v1084_v2 = vadd.f32 %v1083_v0, %v4681_v52  ;;  %v1341_v3 = vadd.f32 %v1340_v1, %v4683_v34  ;;  %1771 = vmatprep.mubr.f32.mxu1 %v1494_v58  ;;  %1996 = vmatprep.mubr.f32.mxu0 %v1496_v59  ;;  %v1497_v8 = vmax.f32 %v1082_v62, 0.0  ;;  %v1499_v9 = vmax.f32 %v1339_v63, 0.0 }
 0x1e9   : > { %v1087_v4 = vpop.f32.mrf.mxu1  ;;  %v1344_v5 = vpop.f32.mrf.mxu0  ;;  %1772 = vmatmul.mubr.f32.gmra.mxu1 %v1493_v60  ;;  %1997 = vmatmul.mubr.f32.gmra.mxu0 %v1495_v61 }
 0x1ea   : > { %v1498_v6 = vmax.f32 %v1084_v2, 0.0  ;;  %v1500_v7 = vmax.f32 %v1341_v3, 0.0  ;;  %v1088_v10 = vadd.f32 %v1087_v4, %v4677_v32  ;;  %v1345_v11 = vadd.f32 %v1344_v5, %v4679_v33  ;;  %3663 = vmatprep.subr.mxu1 %v2115_v57 }
 0x1eb   : > { %v1089_v12 = vpop.f32.mrf.mxu1  ;;  %v1346_v13 = vpop.f32.mrf.mxu0  ;;  %3664 = vmatpush3.msra.mxu1 %v2115_v57 }
 0x1ec   : > { %v1090_v14 = vadd.f32 %v1089_v12, %v4681_v52  ;;  %v1347_v15 = vadd.f32 %v1346_v13, %v4683_v34  ;;  %1776 = vmatprep.mubr.f32.mxu1 %v1498_v6  ;;  %2001 = vmatprep.mubr.f32.mxu0 %v1500_v7  ;;  %v1501_v21 = vmax.f32 %v1088_v10, 0.0  ;;  %v1503_v22 = vmax.f32 %v1345_v11, 0.0  ;;  %v2114_v6 = vld [vmem:[%s5457_s7] sm:$0xff] }
 0x1ed   : > { %v1093_v16 = vpop.f32.mrf.mxu1  ;;  %v1350_v17 = vpop.f32.mrf.mxu0  ;;  %1777 = vmatmul.mubr.f32.gmra.mxu1 %v1497_v8  ;;  %2002 = vmatmul.mubr.f32.gmra.mxu0 %v1499_v9 }
 0x1ee   : > { %v1502_v19 = vmax.f32 %v1090_v14, 0.0  ;;  %v1504_v20 = vmax.f32 %v1347_v15, 0.0  ;;  %v1094_v54 = vadd.f32 %v1093_v16, %v4677_v32  ;;  %v1351_v23 = vadd.f32 %v1350_v17, %v4679_v33  ;;  %3665 = vmatprep.subr.mxu1 %v2114_v6 }
 0x1ef   : > { %v1095_v24 = vpop.f32.mrf.mxu1  ;;  %v1352_v25 = vpop.f32.mrf.mxu0  ;;  %3666 = vmatpush3.msra.mxu1 %v2114_v6 }
 0x1f0   : > { %v1096_v27 = vadd.f32 %v1095_v24, %v4681_v52  ;;  %v1353_v28 = vadd.f32 %v1352_v25, %v4683_v34  ;;  %1781 = vmatprep.mubr.f32.mxu1 %v1502_v19  ;;  %2006 = vmatprep.mubr.f32.mxu0 %v1504_v20  ;;  %v1505_v36 = vmax.f32 %v1094_v54, 0.0  ;;  %v1507_v37 = vmax.f32 %v1351_v23, 0.0 }
 0x1f1   : > { %v1099_v29 = vpop.f32.mrf.mxu1  ;;  %v1356_v30 = vpop.f32.mrf.mxu0  ;;  %1782 = vmatmul.mubr.f32.gmra.mxu1 %v1501_v21  ;;  %2007 = vmatmul.mubr.f32.gmra.mxu0 %v1503_v22 }
 0x1f2   : > { %v1506_v31 = vmax.f32 %v1096_v27, 0.0  ;;  %v1508_v35 = vmax.f32 %v1353_v28, 0.0  ;;  %v1100_v38 = vadd.f32 %v1099_v29, %v4677_v32  ;;  %v1357_v39 = vadd.f32 %v1356_v30, %v4679_v33 }
 0x1f3   : > { %v1101_v40 = vpop.f32.mrf.mxu1  ;;  %v1358_v41 = vpop.f32.mrf.mxu0 }
 0x1f4   : > { %v1102_v43 = vadd.f32 %v1101_v40, %v4681_v52  ;;  %v1359_v44 = vadd.f32 %v1358_v41, %v4683_v34  ;;  %1786 = vmatprep.mubr.f32.mxu1 %v1506_v31  ;;  %2011 = vmatprep.mubr.f32.mxu0 %v1508_v35  ;;  %v1509_v49 = vmax.f32 %v1100_v38, 0.0  ;;  %v1511_v50 = vmax.f32 %v1357_v39, 0.0 }
 0x1f5   : > { %v1105_v45 = vpop.f32.mrf.mxu1  ;;  %v1362_v46 = vpop.f32.mrf.mxu0  ;;  %1787 = vmatmul.mubr.f32.gmra.mxu1 %v1505_v36  ;;  %2012 = vmatmul.mubr.f32.gmra.mxu0 %v1507_v37 }
 0x1f6   : > { %v1510_v47 = vmax.f32 %v1102_v43, 0.0  ;;  %v1512_v48 = vmax.f32 %v1359_v44, 0.0  ;;  %v1106_v51 = vadd.f32 %v1105_v45, %v4677_v32  ;;  %v1363_v53 = vadd.f32 %v1362_v46, %v4679_v33 }
 0x1f7   : > { %v1107_v55 = vpop.f32.mrf.mxu1  ;;  %v1364_v56 = vpop.f32.mrf.mxu0 }
 0x1f8   : > { %v1108_v58 = vadd.f32 %v1107_v55, %v4681_v52  ;;  %v1365_v59 = vadd.f32 %v1364_v56, %v4683_v34  ;;  %1791 = vmatprep.mubr.f32.mxu1 %v1510_v47  ;;  %2016 = vmatprep.mubr.f32.mxu0 %v1512_v48  ;;  %v1513_v0 = vmax.f32 %v1106_v51, 0.0  ;;  %v1515_v1 = vmax.f32 %v1363_v53, 0.0 }
 0x1f9   : > { %v1111_v60 = vpop.f32.mrf.mxu1  ;;  %v1368_v61 = vpop.f32.mrf.mxu0  ;;  %1792 = vmatmul.mubr.f32.gmra.mxu1 %v1509_v49  ;;  %2017 = vmatmul.mubr.f32.gmra.mxu0 %v1511_v50 }
 0x1fa   : > { %v1514_v62 = vmax.f32 %v1108_v58, 0.0  ;;  %v1516_v63 = vmax.f32 %v1365_v59, 0.0  ;;  %v1112_v2 = vadd.f32 %v1111_v60, %v4677_v32  ;;  %v1369_v3 = vadd.f32 %v1368_v61, %v4679_v33 }
 0x1fb   : > { %v1113_v4 = vpop.f32.mrf.mxu1  ;;  %v1370_v5 = vpop.f32.mrf.mxu0 }
 0x1fc   : > { %v1114_v7 = vadd.f32 %v1113_v4, %v4681_v52  ;;  %v1371_v8 = vadd.f32 %v1370_v5, %v4683_v34  ;;  %1796 = vmatprep.mubr.f32.mxu1 %v1514_v62  ;;  %2021 = vmatprep.mubr.f32.mxu0 %v1516_v63  ;;  %v1517_v13 = vmax.f32 %v1112_v2, 0.0  ;;  %v1519_v14 = vmax.f32 %v1369_v3, 0.0 }
 0x1fd   : > { %v1117_v9 = vpop.f32.mrf.mxu1  ;;  %v1374_v10 = vpop.f32.mrf.mxu0  ;;  %1797 = vmatmul.mubr.f32.gmra.mxu1 %v1513_v0  ;;  %2022 = vmatmul.mubr.f32.gmra.mxu0 %v1515_v1 }
 0x1fe   : > { %v1518_v11 = vmax.f32 %v1114_v7, 0.0  ;;  %v1520_v12 = vmax.f32 %v1371_v8, 0.0  ;;  %v1118_v15 = vadd.f32 %v1117_v9, %v4677_v32  ;;  %v1375_v16 = vadd.f32 %v1374_v10, %v4679_v33 }
 0x1ff   : > { %v1119_v17 = vpop.f32.mrf.mxu1  ;;  %v1376_v18 = vpop.f32.mrf.mxu0 }
 0x200   : > { %v1120_v19 = vadd.f32 %v1119_v17, %v4681_v52  ;;  %v1377_v20 = vadd.f32 %v1376_v18, %v4683_v34  ;;  %1801 = vmatprep.mubr.f32.mxu1 %v1518_v11  ;;  %2026 = vmatprep.mubr.f32.mxu0 %v1520_v12  ;;  %v1521_v24 = vmax.f32 %v1118_v15, 0.0  ;;  %v1523_v25 = vmax.f32 %v1375_v16, 0.0 }
 0x201   : > { %v1123_v21 = vpop.f32.mrf.mxu1  ;;  %v1380_v22 = vpop.f32.mrf.mxu0  ;;  %1802 = vmatmul.mubr.f32.gmra.mxu1 %v1517_v13  ;;  %2027 = vmatmul.mubr.f32.gmra.mxu0 %v1519_v14 }
 0x202   : > { %v1522_v54 = vmax.f32 %v1120_v19, 0.0  ;;  %v1524_v23 = vmax.f32 %v1377_v20, 0.0  ;;  %v1124_v26 = vadd.f32 %v1123_v21, %v4677_v32  ;;  %v1381_v27 = vadd.f32 %v1380_v22, %v4679_v33 }
 0x203   : > { %v1125_v28 = vpop.f32.mrf.mxu1  ;;  %v1382_v29 = vpop.f32.mrf.mxu0 }
 0x204   : > { %v1126_v30 = vadd.f32 %v1125_v28, %v4681_v52  ;;  %v1383_v31 = vadd.f32 %v1382_v29, %v4683_v34  ;;  %1806 = vmatprep.mubr.f32.mxu1 %v1522_v54  ;;  %2031 = vmatprep.mubr.f32.mxu0 %v1524_v23  ;;  %v1525_v39 = vmax.f32 %v1124_v26, 0.0  ;;  %v1527_v40 = vmax.f32 %v1381_v27, 0.0 }
 0x205   : > { %v1129_v35 = vpop.f32.mrf.mxu1  ;;  %v1386_v36 = vpop.f32.mrf.mxu0  ;;  %1807 = vmatmul.mubr.f32.gmra.mxu1 %v1521_v24  ;;  %2032 = vmatmul.mubr.f32.gmra.mxu0 %v1523_v25 }
 0x206   : > { %v1526_v37 = vmax.f32 %v1126_v30, 0.0  ;;  %v1528_v38 = vmax.f32 %v1383_v31, 0.0  ;;  %v1130_v41 = vadd.f32 %v1129_v35, %v4677_v32  ;;  %v1387_v42 = vadd.f32 %v1386_v36, %v4679_v33 }
 0x207   : > { %v1131_v43 = vpop.f32.mrf.mxu1  ;;  %v1388_v44 = vpop.f32.mrf.mxu0 }
 0x208   : > { %v1132_v45 = vadd.f32 %v1131_v43, %v4681_v52  ;;  %v1389_v46 = vadd.f32 %v1388_v44, %v4683_v34  ;;  %1811 = vmatprep.mubr.f32.mxu1 %v1526_v37  ;;  %2036 = vmatprep.mubr.f32.mxu0 %v1528_v38  ;;  %v1529_v51 = vmax.f32 %v1130_v41, 0.0  ;;  %v1531_v53 = vmax.f32 %v1387_v42, 0.0 }
 0x209   : > { %v1135_v47 = vpop.f32.mrf.mxu1  ;;  %v1392_v48 = vpop.f32.mrf.mxu0  ;;  %1812 = vmatmul.mubr.f32.gmra.mxu1 %v1525_v39  ;;  %2037 = vmatmul.mubr.f32.gmra.mxu0 %v1527_v40 }
 0x20a   : > { %v1530_v49 = vmax.f32 %v1132_v45, 0.0  ;;  %v1532_v50 = vmax.f32 %v1389_v46, 0.0  ;;  %v1136_v55 = vadd.f32 %v1135_v47, %v4677_v32  ;;  %v1393_v56 = vadd.f32 %v1392_v48, %v4679_v33 }
 0x20b   : > { %v1137_v57 = vpop.f32.mrf.mxu1  ;;  %v1394_v58 = vpop.f32.mrf.mxu0 }
 0x20c   : > { %v1138_v59 = vadd.f32 %v1137_v57, %v4681_v52  ;;  %v1395_v60 = vadd.f32 %v1394_v58, %v4683_v34  ;;  %1816 = vmatprep.mubr.f32.mxu1 %v1530_v49  ;;  %2041 = vmatprep.mubr.f32.mxu0 %v1532_v50  ;;  %v1533_v1 = vmax.f32 %v1136_v55, 0.0  ;;  %v1535_v2 = vmax.f32 %v1393_v56, 0.0 }
 0x20d   : > { %v1141_v61 = vpop.f32.mrf.mxu1  ;;  %v1398_v62 = vpop.f32.mrf.mxu0  ;;  %1817 = vmatmul.mubr.f32.gmra.mxu1 %v1529_v51  ;;  %2042 = vmatmul.mubr.f32.gmra.mxu0 %v1531_v53 }
 0x20e   : > { %v1534_v63 = vmax.f32 %v1138_v59, 0.0  ;;  %v1536_v0 = vmax.f32 %v1395_v60, 0.0  ;;  %v1142_v3 = vadd.f32 %v1141_v61, %v4677_v32  ;;  %v1399_v4 = vadd.f32 %v1398_v62, %v4679_v33 }
 0x20f   : > { %v1143_v5 = vpop.f32.mrf.mxu1  ;;  %v1400_v6 = vpop.f32.mrf.mxu0 }
 0x210   : > { %v1144_v7 = vadd.f32 %v1143_v5, %v4681_v52  ;;  %v1401_v8 = vadd.f32 %v1400_v6, %v4683_v34  ;;  %1821 = vmatprep.mubr.f32.mxu1 %v1534_v63  ;;  %2046 = vmatprep.mubr.f32.mxu0 %v1536_v0  ;;  %v1537_v13 = vmax.f32 %v1142_v3, 0.0  ;;  %v1539_v14 = vmax.f32 %v1399_v4, 0.0 }
 0x211   : > { %v1147_v9 = vpop.f32.mrf.mxu1  ;;  %v1404_v10 = vpop.f32.mrf.mxu0  ;;  %1822 = vmatmul.mubr.f32.gmra.mxu1 %v1533_v1  ;;  %2047 = vmatmul.mubr.f32.gmra.mxu0 %v1535_v2 }
 0x212   : > { %v1538_v11 = vmax.f32 %v1144_v7, 0.0  ;;  %v1540_v12 = vmax.f32 %v1401_v8, 0.0  ;;  %v1148_v15 = vadd.f32 %v1147_v9, %v4677_v32  ;;  %v1405_v16 = vadd.f32 %v1404_v10, %v4679_v33 }
 0x213   : > { %v1149_v17 = vpop.f32.mrf.mxu1  ;;  %v1406_v18 = vpop.f32.mrf.mxu0 }
 0x214   : > { %v1150_v19 = vadd.f32 %v1149_v17, %v4681_v52  ;;  %v1407_v20 = vadd.f32 %v1406_v18, %v4683_v34  ;;  %1826 = vmatprep.mubr.f32.mxu1 %v1538_v11  ;;  %2051 = vmatprep.mubr.f32.mxu0 %v1540_v12  ;;  %v1541_v24 = vmax.f32 %v1148_v15, 0.0  ;;  %v1543_v25 = vmax.f32 %v1405_v16, 0.0  ;;  %v2397_v16 = vld [vmem:[%s5459_s9 + $0x18] sm:$0xff]  ;;  %v2396_v17 = vld [vmem:[%s5459_s9 + $0x10] sm:$0xff] }
 0x215   : > { %v1153_v21 = vpop.f32.mrf.mxu1  ;;  %v1410_v22 = vpop.f32.mrf.mxu0  ;;  %1827 = vmatmul.mubr.f32.gmra.mxu1 %v1537_v13  ;;  %2052 = vmatmul.mubr.f32.gmra.mxu0 %v1539_v14 }
 0x216   : > { %v1542_v54 = vmax.f32 %v1150_v19, 0.0  ;;  %v1544_v23 = vmax.f32 %v1407_v20, 0.0  ;;  %v1154_v26 = vadd.f32 %v1153_v21, %v4677_v32  ;;  %v1411_v27 = vadd.f32 %v1410_v22, %v4679_v33  ;;  %3715 = vmatprep.subr.mxu0 %v2397_v16 }
 0x217   : > { %v1155_v28 = vpop.f32.mrf.mxu1  ;;  %v1412_v29 = vpop.f32.mrf.mxu0  ;;  %3716 = vmatpush3.msra.mxu0 %v2397_v16 }
 0x218   : > { %v1156_v30 = vadd.f32 %v1155_v28, %v4681_v52  ;;  %v1413_v31 = vadd.f32 %v1412_v29, %v4683_v34  ;;  %1831 = vmatprep.mubr.f32.mxu1 %v1542_v54  ;;  %2056 = vmatprep.mubr.f32.mxu0 %v1544_v23  ;;  %v1545_v39 = vmax.f32 %v1154_v26, 0.0  ;;  %v1547_v40 = vmax.f32 %v1411_v27, 0.0 }
 0x219   : > { %v1159_v35 = vpop.f32.mrf.mxu1  ;;  %v1416_v36 = vpop.f32.mrf.mxu0  ;;  %1832 = vmatmul.mubr.f32.gmra.mxu1 %v1541_v24  ;;  %2057 = vmatmul.mubr.f32.gmra.mxu0 %v1543_v25 }
 0x21a   : > { %v1546_v37 = vmax.f32 %v1156_v30, 0.0  ;;  %v1548_v38 = vmax.f32 %v1413_v31, 0.0  ;;  %v1160_v41 = vadd.f32 %v1159_v35, %v4677_v32  ;;  %v1417_v42 = vadd.f32 %v1416_v36, %v4679_v33  ;;  %3717 = vmatprep.subr.mxu0 %v2396_v17 }
 0x21b   : > { %v1161_v43 = vpop.f32.mrf.mxu1  ;;  %v1418_v44 = vpop.f32.mrf.mxu0  ;;  %3718 = vmatpush3.msra.mxu0 %v2396_v17 }
 0x21c   : > { %v1162_v45 = vadd.f32 %v1161_v43, %v4681_v52  ;;  %v1419_v46 = vadd.f32 %v1418_v44, %v4683_v34  ;;  %1836 = vmatprep.mubr.f32.mxu1 %v1546_v37  ;;  %2061 = vmatprep.mubr.f32.mxu0 %v1548_v38  ;;  %v1549_v51 = vmax.f32 %v1160_v41, 0.0  ;;  %v1551_v53 = vmax.f32 %v1417_v42, 0.0 }
 0x21d   : > { %v1165_v47 = vpop.f32.mrf.mxu1  ;;  %v1422_v48 = vpop.f32.mrf.mxu0  ;;  %1837 = vmatmul.mubr.f32.gmra.mxu1 %v1545_v39  ;;  %2062 = vmatmul.mubr.f32.gmra.mxu0 %v1547_v40 }
 0x21e   : > { %v1550_v49 = vmax.f32 %v1162_v45, 0.0  ;;  %v1552_v50 = vmax.f32 %v1419_v46, 0.0  ;;  %v1166_v55 = vadd.f32 %v1165_v47, %v4677_v32  ;;  %v1423_v56 = vadd.f32 %v1422_v48, %v4679_v33 }
 0x21f   : > { %v1167_v57 = vpop.f32.mrf.mxu1  ;;  %v1424_v58 = vpop.f32.mrf.mxu0 }
 0x220   : > { %v1168_v59 = vadd.f32 %v1167_v57, %v4681_v52  ;;  %v1425_v60 = vadd.f32 %v1424_v58, %v4683_v34  ;;  %1841 = vmatprep.mubr.f32.mxu1 %v1550_v49  ;;  %2066 = vmatprep.mubr.f32.mxu0 %v1552_v50  ;;  %v1553_v1 = vmax.f32 %v1166_v55, 0.0  ;;  %v1555_v2 = vmax.f32 %v1423_v56, 0.0 }
 0x221   : > { %v1171_v61 = vpop.f32.mrf.mxu1  ;;  %v1428_v62 = vpop.f32.mrf.mxu0  ;;  %1842 = vmatmul.mubr.f32.gmra.mxu1 %v1549_v51  ;;  %2067 = vmatmul.mubr.f32.gmra.mxu0 %v1551_v53 }
 0x222   : > { %v1554_v63 = vmax.f32 %v1168_v59, 0.0  ;;  %v1556_v0 = vmax.f32 %v1425_v60, 0.0  ;;  %v1172_v3 = vadd.f32 %v1171_v61, %v4677_v32  ;;  %v1429_v4 = vadd.f32 %v1428_v62, %v4679_v33  ;;  %v4864_v32 = vld [vmem:[%s5456_s6] ss:$0 sm:$0xff] }
 0x223   : > { %v1173_v5 = vpop.f32.mrf.mxu1  ;;  %v1430_v6 = vpop.f32.mrf.mxu0 }
 0x224   : > { %v1174_v7 = vadd.f32 %v1173_v5, %v4681_v52  ;;  %v1431_v8 = vadd.f32 %v1430_v6, %v4683_v34  ;;  %1846 = vmatprep.mubr.f32.mxu1 %v1554_v63  ;;  %2071 = vmatprep.mubr.f32.mxu0 %v1556_v0  ;;  %v1557_v11 = vmax.f32 %v1172_v3, 0.0  ;;  %v1559_v12 = vmax.f32 %v1429_v4, 0.0 }
 0x225   : > { %1847 = vmatmul.mubr.f32.gmra.mxu1 %v1553_v1  ;;  %2072 = vmatmul.mubr.f32.gmra.mxu0 %v1555_v2 }
 0x226   : > { %v1558_v9 = vmax.f32 %v1174_v7, 0.0  ;;  %v1560_v10 = vmax.f32 %v1431_v8, 0.0 }
 0x228   : > { %1851 = vmatprep.mubr.f32.mxu1 %v1558_v9  ;;  %2076 = vmatprep.mubr.f32.mxu0 %v1560_v10 }
 0x229   : > { %1852 = vmatmul.mubr.f32.gmra.mxu1 %v1557_v11  ;;  %2077 = vmatmul.mubr.f32.gmra.mxu0 %v1559_v12 }
 0x26d   : > { %v1698_v33 = vpop.f32.mrf.mxu1  ;;  %v1923_v52 = vpop.f32.mrf.mxu0 }
 0x26e   : > { %v1699_v34 = vadd.f32 %v4864_v32, %v1698_v33 }
 0x26f   : > { %v1700_v13 = vpop.f32.mrf.mxu1  ;;  %v1925_v14 = vpop.f32.mrf.mxu0 }
 0x270   : > { %v1924_v15 = vadd.f32 %v1923_v52, %v1699_v34 }
 0x271   : > { %v1703_v18 = vpop.f32.mrf.mxu1  ;;  %v1928_v19 = vpop.f32.mrf.mxu0 }
 0x272   : > { %v2082_v20 = vmax.f32 %v1924_v15, 0.0  ;;  %v1704_v21 = vadd.f32 %v4864_v32, %v1703_v18 }
 0x273   : > { %v1705_v22 = vpop.f32.mrf.mxu1  ;;  %v1930_v54 = vpop.f32.mrf.mxu0 }
 0x274   : > { %v1929_v23 = vadd.f32 %v1928_v19, %v1704_v21  ;;  %3667 = vmatprep.mubr.f32.mxu1 %v2082_v20 }
 0x275   : > { %v1708_v24 = vpop.f32.mrf.mxu1  ;;  %v1933_v25 = vpop.f32.mrf.mxu0 }
 0x276   : > { %v2083_v26 = vmax.f32 %v1929_v23, 0.0  ;;  %v1709_v27 = vadd.f32 %v4864_v32, %v1708_v24 }
 0x277   : > { %v1710_v28 = vpop.f32.mrf.mxu1  ;;  %v1935_v29 = vpop.f32.mrf.mxu0 }
 0x278   : > { %v1934_v30 = vadd.f32 %v1933_v25, %v1709_v27  ;;  %3668 = vmatmul.mubr.f32.vlgmr.msra.gmra.mxu1 %v2083_v26 }
 0x279   : > { %v1713_v31 = vpop.f32.mrf.mxu1  ;;  %v1938_v35 = vpop.f32.mrf.mxu0 }
 0x27a   : > { %v2084_v36 = vmax.f32 %v1934_v30, 0.0  ;;  %v1714_v37 = vadd.f32 %v4864_v32, %v1713_v31 }
 0x27b   : > { %v1715_v38 = vpop.f32.mrf.mxu1  ;;  %v1940_v39 = vpop.f32.mrf.mxu0 }
 0x27c   : > { %v1939_v40 = vadd.f32 %v1938_v35, %v1714_v37  ;;  %3670 = vmatprep.mubr.f32.mxu1 %v2084_v36 }
 0x27d   : > { %v1718_v41 = vpop.f32.mrf.mxu1  ;;  %v1943_v42 = vpop.f32.mrf.mxu0 }
 0x27e   : > { %v2085_v43 = vmax.f32 %v1939_v40, 0.0  ;;  %v1719_v44 = vadd.f32 %v4864_v32, %v1718_v41 }
 0x27f   : > { %v1720_v45 = vpop.f32.mrf.mxu1  ;;  %v1945_v46 = vpop.f32.mrf.mxu0 }
 0x280   : > { %v1944_v47 = vadd.f32 %v1943_v42, %v1719_v44  ;;  %3671 = vmatmul.mubr.f32.gmra.mxu1 %v2085_v43 }
 0x281   : > { %v1723_v48 = vpop.f32.mrf.mxu1  ;;  %v1948_v49 = vpop.f32.mrf.mxu0 }
 0x282   : > { %v2086_v50 = vmax.f32 %v1944_v47, 0.0  ;;  %v1724_v51 = vadd.f32 %v4864_v32, %v1723_v48 }
 0x283   : > { %v1725_v53 = vpop.f32.mrf.mxu1  ;;  %v1950_v55 = vpop.f32.mrf.mxu0 }
 0x284   : > { %v1949_v56 = vadd.f32 %v1948_v49, %v1724_v51  ;;  %3673 = vmatprep.mubr.f32.mxu1 %v2086_v50 }
 0x285   : > { %v1728_v57 = vpop.f32.mrf.mxu1  ;;  %v1953_v58 = vpop.f32.mrf.mxu0 }
 0x286   : > { %v2087_v59 = vmax.f32 %v1949_v56, 0.0  ;;  %v1729_v60 = vadd.f32 %v4864_v32, %v1728_v57 }
 0x287   : > { %v1730_v61 = vpop.f32.mrf.mxu1  ;;  %v1955_v62 = vpop.f32.mrf.mxu0 }
 0x288   : > { %v1954_v63 = vadd.f32 %v1953_v58, %v1729_v60  ;;  %3674 = vmatmul.mubr.f32.gmra.mxu1 %v2087_v59 }
 0x289   : > { %v1733_v0 = vpop.f32.mrf.mxu1  ;;  %v1958_v1 = vpop.f32.mrf.mxu0 }
 0x28a   : > { %v2088_v2 = vmax.f32 %v1954_v63, 0.0  ;;  %v1734_v3 = vadd.f32 %v4864_v32, %v1733_v0 }
 0x28b   : > { %v1735_v4 = vpop.f32.mrf.mxu1  ;;  %v1960_v5 = vpop.f32.mrf.mxu0 }
 0x28c   : > { %v1959_v6 = vadd.f32 %v1958_v1, %v1734_v3  ;;  %3676 = vmatprep.mubr.f32.mxu1 %v2088_v2 }
 0x28d   : > { %v1738_v7 = vpop.f32.mrf.mxu1  ;;  %v1963_v8 = vpop.f32.mrf.mxu0 }
 0x28e   : > { %v2089_v9 = vmax.f32 %v1959_v6, 0.0  ;;  %v1739_v10 = vadd.f32 %v4864_v32, %v1738_v7 }
 0x28f   : > { %v1740_v11 = vpop.f32.mrf.mxu1  ;;  %v1965_v12 = vpop.f32.mrf.mxu0 }
 0x290   : > { %v1964_v33 = vadd.f32 %v1963_v8, %v1739_v10  ;;  %3677 = vmatmul.mubr.f32.gmra.mxu1 %v2089_v9 }
 0x291   : > { %v1743_v52 = vpop.f32.mrf.mxu1  ;;  %v1968_v34 = vpop.f32.mrf.mxu0 }
 0x292   : > { %v2090_v13 = vmax.f32 %v1964_v33, 0.0  ;;  %v1744_v14 = vadd.f32 %v4864_v32, %v1743_v52 }
 0x293   : > { %v1745_v15 = vpop.f32.mrf.mxu1  ;;  %v1970_v16 = vpop.f32.mrf.mxu0 }
 0x294   : > { %v1969_v17 = vadd.f32 %v1968_v34, %v1744_v14  ;;  %3679 = vmatprep.mubr.f32.mxu1 %v2090_v13 }
 0x295   : > { %v1748_v18 = vpop.f32.mrf.mxu1  ;;  %v1973_v19 = vpop.f32.mrf.mxu0 }
 0x296   : > { %v2091_v20 = vmax.f32 %v1969_v17, 0.0  ;;  %v1749_v21 = vadd.f32 %v4864_v32, %v1748_v18 }
 0x297   : > { %v1750_v22 = vpop.f32.mrf.mxu1  ;;  %v1975_v54 = vpop.f32.mrf.mxu0 }
 0x298   : > { %v1974_v23 = vadd.f32 %v1973_v19, %v1749_v21  ;;  %3680 = vmatmul.mubr.f32.gmra.mxu1 %v2091_v20 }
 0x299   : > { %v1753_v24 = vpop.f32.mrf.mxu1  ;;  %v1978_v25 = vpop.f32.mrf.mxu0 }
 0x29a   : > { %v2092_v26 = vmax.f32 %v1974_v23, 0.0  ;;  %v1754_v27 = vadd.f32 %v4864_v32, %v1753_v24  ;;  %v2395_v23 = vld [vmem:[%s5459_s9 + $0x8] sm:$0xff] }
 0x29b   : > { %v1755_v28 = vpop.f32.mrf.mxu1  ;;  %v1980_v29 = vpop.f32.mrf.mxu0  ;;  %3719 = vmatprep.subr.mxu0 %v2395_v23 }
 0x29c   : > { %v1979_v30 = vadd.f32 %v1978_v25, %v1754_v27  ;;  %3682 = vmatprep.mubr.f32.mxu1 %v2092_v26  ;;  %3720 = vmatpush3.msra.mxu0 %v2395_v23  ;;  %v2394_v27 = vld [vmem:[%s5459_s9] sm:$0xff] }
 0x29d   : > { %v1758_v31 = vpop.f32.mrf.mxu1  ;;  %v1983_v35 = vpop.f32.mrf.mxu0  ;;  %3721 = vmatprep.subr.mxu0 %v2394_v27 }
 0x29e   : > { %v2093_v36 = vmax.f32 %v1979_v30, 0.0  ;;  %v1759_v37 = vadd.f32 %v4864_v32, %v1758_v31  ;;  %3722 = vmatpush3.msra.mxu0 %v2394_v27 }
 0x29f   : > { %v1760_v38 = vpop.f32.mrf.mxu1  ;;  %v1985_v39 = vpop.f32.mrf.mxu0 }
 0x2a0   : > { %v1984_v40 = vadd.f32 %v1983_v35, %v1759_v37  ;;  %3683 = vmatmul.mubr.f32.gmra.mxu1 %v2093_v36 }
 0x2a1   : > { %v1763_v41 = vpop.f32.mrf.mxu1  ;;  %v1988_v42 = vpop.f32.mrf.mxu0 }
 0x2a2   : > { %v2094_v43 = vmax.f32 %v1984_v40, 0.0  ;;  %v1764_v44 = vadd.f32 %v4864_v32, %v1763_v41 }
 0x2a3   : > { %v1765_v45 = vpop.f32.mrf.mxu1  ;;  %v1990_v46 = vpop.f32.mrf.mxu0 }
 0x2a4   : > { %v1989_v47 = vadd.f32 %v1988_v42, %v1764_v44  ;;  %3685 = vmatprep.mubr.f32.mxu1 %v2094_v43 }
 0x2a5   : > { %v1768_v48 = vpop.f32.mrf.mxu1  ;;  %v1993_v49 = vpop.f32.mrf.mxu0 }
 0x2a6   : > { %v2095_v50 = vmax.f32 %v1989_v47, 0.0  ;;  %v1769_v51 = vadd.f32 %v4864_v32, %v1768_v48 }
 0x2a7   : > { %v1770_v53 = vpop.f32.mrf.mxu1  ;;  %v1995_v55 = vpop.f32.mrf.mxu0 }
 0x2a8   : > { %v1994_v56 = vadd.f32 %v1993_v49, %v1769_v51  ;;  %3686 = vmatmul.mubr.f32.gmra.mxu1 %v2095_v50 }
 0x2a9   : > { %v1773_v57 = vpop.f32.mrf.mxu1  ;;  %v1998_v58 = vpop.f32.mrf.mxu0 }
 0x2aa   : > { %v2096_v59 = vmax.f32 %v1994_v56, 0.0  ;;  %v1774_v60 = vadd.f32 %v4864_v32, %v1773_v57 }
 0x2ab   : > { %v1775_v61 = vpop.f32.mrf.mxu1  ;;  %v2000_v62 = vpop.f32.mrf.mxu0 }
 0x2ac   : > { %v1999_v63 = vadd.f32 %v1998_v58, %v1774_v60  ;;  %3688 = vmatprep.mubr.f32.mxu1 %v2096_v59 }
 0x2ad   : > { %v1778_v0 = vpop.f32.mrf.mxu1  ;;  %v2003_v1 = vpop.f32.mrf.mxu0 }
 0x2ae   : > { %v2097_v2 = vmax.f32 %v1999_v63, 0.0  ;;  %v1779_v3 = vadd.f32 %v4864_v32, %v1778_v0 }
 0x2af   : > { %v1780_v4 = vpop.f32.mrf.mxu1  ;;  %v2005_v5 = vpop.f32.mrf.mxu0 }
 0x2b0   : > { %v2004_v6 = vadd.f32 %v2003_v1, %v1779_v3  ;;  %3689 = vmatmul.mubr.f32.gmra.mxu1 %v2097_v2 }
 0x2b1   : > { %v1783_v7 = vpop.f32.mrf.mxu1  ;;  %v2008_v8 = vpop.f32.mrf.mxu0 }
 0x2b2   : > { %v2098_v9 = vmax.f32 %v2004_v6, 0.0  ;;  %v1784_v10 = vadd.f32 %v4864_v32, %v1783_v7 }
 0x2b3   : > { %v1785_v11 = vpop.f32.mrf.mxu1  ;;  %v2010_v12 = vpop.f32.mrf.mxu0 }
 0x2b4   : > { %v2009_v33 = vadd.f32 %v2008_v8, %v1784_v10  ;;  %3691 = vmatprep.mubr.f32.mxu1 %v2098_v9 }
 0x2b5   : > { %v1788_v52 = vpop.f32.mrf.mxu1  ;;  %v2013_v34 = vpop.f32.mrf.mxu0 }
 0x2b6   : > { %v2099_v13 = vmax.f32 %v2009_v33, 0.0  ;;  %v1789_v14 = vadd.f32 %v4864_v32, %v1788_v52 }
 0x2b7   : > { %v1790_v15 = vpop.f32.mrf.mxu1  ;;  %v2015_v16 = vpop.f32.mrf.mxu0 }
 0x2b8   : > { %v2014_v17 = vadd.f32 %v2013_v34, %v1789_v14  ;;  %3692 = vmatmul.mubr.f32.gmra.mxu1 %v2099_v13 }
 0x2b9   : > { %v1793_v18 = vpop.f32.mrf.mxu1  ;;  %v2018_v19 = vpop.f32.mrf.mxu0 }
 0x2ba   : > { %v2100_v20 = vmax.f32 %v2014_v17, 0.0  ;;  %v1794_v21 = vadd.f32 %v4864_v32, %v1793_v18 }
 0x2bb   : > { %v1795_v22 = vpop.f32.mrf.mxu1  ;;  %v2020_v54 = vpop.f32.mrf.mxu0 }
 0x2bc   : > { %v2019_v24 = vadd.f32 %v2018_v19, %v1794_v21  ;;  %3694 = vmatprep.mubr.f32.mxu1 %v2100_v20 }
 0x2bd   : > { %v1798_v25 = vpop.f32.mrf.mxu1  ;;  %v2023_v26 = vpop.f32.mrf.mxu0 }
 0x2be   : > { %v2101_v28 = vmax.f32 %v2019_v24, 0.0  ;;  %v1799_v29 = vadd.f32 %v4864_v32, %v1798_v25 }
 0x2bf   : > { %v1800_v30 = vpop.f32.mrf.mxu1  ;;  %v2025_v31 = vpop.f32.mrf.mxu0 }
 0x2c0   : > { %v2024_v35 = vadd.f32 %v2023_v26, %v1799_v29  ;;  %3695 = vmatmul.mubr.f32.gmra.mxu1 %v2101_v28 }
 0x2c1   : > { %v1803_v36 = vpop.f32.mrf.mxu1  ;;  %v2028_v37 = vpop.f32.mrf.mxu0 }
 0x2c2   : > { %v2102_v38 = vmax.f32 %v2024_v35, 0.0  ;;  %v1804_v39 = vadd.f32 %v4864_v32, %v1803_v36 }
 0x2c3   : > { %v1805_v40 = vpop.f32.mrf.mxu1  ;;  %v2030_v41 = vpop.f32.mrf.mxu0 }
 0x2c4   : > { %v2029_v42 = vadd.f32 %v2028_v37, %v1804_v39  ;;  %3697 = vmatprep.mubr.f32.mxu1 %v2102_v38 }
 0x2c5   : > { %v1808_v43 = vpop.f32.mrf.mxu1  ;;  %v2033_v44 = vpop.f32.mrf.mxu0 }
 0x2c6   : > { %v2103_v45 = vmax.f32 %v2029_v42, 0.0  ;;  %v1809_v46 = vadd.f32 %v4864_v32, %v1808_v43 }
 0x2c7   : > { %v1810_v47 = vpop.f32.mrf.mxu1  ;;  %v2035_v48 = vpop.f32.mrf.mxu0 }
 0x2c8   : > { %v2034_v49 = vadd.f32 %v2033_v44, %v1809_v46  ;;  %3698 = vmatmul.mubr.f32.gmra.mxu1 %v2103_v45 }
 0x2c9   : > { %v1813_v50 = vpop.f32.mrf.mxu1  ;;  %v2038_v51 = vpop.f32.mrf.mxu0 }
 0x2ca   : > { %v2104_v53 = vmax.f32 %v2034_v49, 0.0  ;;  %v1814_v55 = vadd.f32 %v4864_v32, %v1813_v50 }
 0x2cb   : > { %v1815_v56 = vpop.f32.mrf.mxu1  ;;  %v2040_v57 = vpop.f32.mrf.mxu0 }
 0x2cc   : > { %v2039_v58 = vadd.f32 %v2038_v51, %v1814_v55  ;;  %3700 = vmatprep.mubr.f32.mxu1 %v2104_v53  ;;  %v4913_v51 = vld [vmem:[%s5458_s8] ss:$0 sm:$0xff] }
 0x2cd   : > { %v1818_v59 = vpop.f32.mrf.mxu1  ;;  %v2043_v60 = vpop.f32.mrf.mxu0 }
 0x2ce   : > { %v2105_v61 = vmax.f32 %v2039_v58, 0.0  ;;  %v1819_v62 = vadd.f32 %v4864_v32, %v1818_v59 }
 0x2cf   : > { %v1820_v63 = vpop.f32.mrf.mxu1  ;;  %v2045_v0 = vpop.f32.mrf.mxu0 }
 0x2d0   : > { %v2044_v1 = vadd.f32 %v2043_v60, %v1819_v62  ;;  %3701 = vmatmul.mubr.f32.gmra.mxu1 %v2105_v61 }
 0x2d1   : > { %v1823_v2 = vpop.f32.mrf.mxu1  ;;  %v2048_v3 = vpop.f32.mrf.mxu0 }
 0x2d2   : > { %v2106_v4 = vmax.f32 %v2044_v1, 0.0  ;;  %v1824_v5 = vadd.f32 %v4864_v32, %v1823_v2 }
 0x2d3   : > { %v1825_v6 = vpop.f32.mrf.mxu1  ;;  %v2050_v7 = vpop.f32.mrf.mxu0 }
 0x2d4   : > { %v2049_v8 = vadd.f32 %v2048_v3, %v1824_v5  ;;  %3703 = vmatprep.mubr.f32.mxu1 %v2106_v4 }
 0x2d5   : > { %v1828_v9 = vpop.f32.mrf.mxu1  ;;  %v2053_v10 = vpop.f32.mrf.mxu0 }
 0x2d6   : > { %v2107_v11 = vmax.f32 %v2049_v8, 0.0  ;;  %v1829_v12 = vadd.f32 %v4864_v32, %v1828_v9 }
 0x2d7   : > { %v1830_v33 = vpop.f32.mrf.mxu1  ;;  %v2055_v52 = vpop.f32.mrf.mxu0 }
 0x2d8   : > { %v2054_v34 = vadd.f32 %v2053_v10, %v1829_v12  ;;  %3704 = vmatmul.mubr.f32.gmra.mxu1 %v2107_v11 }
 0x2d9   : > { %v1833_v13 = vpop.f32.mrf.mxu1  ;;  %v2058_v14 = vpop.f32.mrf.mxu0 }
 0x2da   : > { %v2108_v15 = vmax.f32 %v2054_v34, 0.0  ;;  %v1834_v16 = vadd.f32 %v4864_v32, %v1833_v13 }
 0x2db   : > { %v1835_v17 = vpop.f32.mrf.mxu1  ;;  %v2060_v18 = vpop.f32.mrf.mxu0 }
 0x2dc   : > { %v2059_v19 = vadd.f32 %v2058_v14, %v1834_v16  ;;  %3706 = vmatprep.mubr.f32.mxu1 %v2108_v15 }
 0x2dd   : > { %v1838_v20 = vpop.f32.mrf.mxu1  ;;  %v2063_v21 = vpop.f32.mrf.mxu0 }
 0x2de   : > { %v2109_v22 = vmax.f32 %v2059_v19, 0.0  ;;  %v1839_v54 = vadd.f32 %v4864_v32, %v1838_v20 }
 0x2df   : > { %v1840_v23 = vpop.f32.mrf.mxu1  ;;  %v2065_v24 = vpop.f32.mrf.mxu0 }
 0x2e0   : > { %v2064_v25 = vadd.f32 %v2063_v21, %v1839_v54  ;;  %3707 = vmatmul.mubr.f32.gmra.mxu1 %v2109_v22 }
 0x2e1   : > { %v1843_v26 = vpop.f32.mrf.mxu1  ;;  %v2068_v27 = vpop.f32.mrf.mxu0 }
 0x2e2   : > { %v2110_v28 = vmax.f32 %v2064_v25, 0.0  ;;  %v1844_v29 = vadd.f32 %v4864_v32, %v1843_v26 }
 0x2e3   : > { %v1845_v30 = vpop.f32.mrf.mxu1  ;;  %v2070_v31 = vpop.f32.mrf.mxu0 }
 0x2e4   : > { %v2069_v35 = vadd.f32 %v2068_v27, %v1844_v29  ;;  %3709 = vmatprep.mubr.f32.mxu1 %v2110_v28 }
 0x2e5   : > { %v1848_v36 = vpop.f32.mrf.mxu1  ;;  %v2073_v37 = vpop.f32.mrf.mxu0 }
 0x2e6   : > { %v2111_v38 = vmax.f32 %v2069_v35, 0.0  ;;  %v1849_v39 = vadd.f32 %v4864_v32, %v1848_v36 }
 0x2e7   : > { %v1850_v40 = vpop.f32.mrf.mxu1  ;;  %v2075_v41 = vpop.f32.mrf.mxu0 }
 0x2e8   : > { %v2074_v42 = vadd.f32 %v2073_v37, %v1849_v39  ;;  %3710 = vmatmul.mubr.f32.gmra.mxu1 %v2111_v38 }
 0x2e9   : > { %v1853_v43 = vpop.f32.mrf.mxu1  ;;  %v2078_v44 = vpop.f32.mrf.mxu0 }
 0x2ea   : > { %v2112_v45 = vmax.f32 %v2074_v42, 0.0  ;;  %v1854_v46 = vadd.f32 %v4864_v32, %v1853_v43 }
 0x2eb   : > { %v1855_v47 = vpop.f32.mrf.mxu1  ;;  %v2080_v48 = vpop.f32.mrf.mxu0 }
 0x2ec   : > { %v2079_v49 = vadd.f32 %v2078_v44, %v1854_v46  ;;  %3712 = vmatprep.mubr.f32.mxu1 %v2112_v45 }
 0x2ee   : > { %v2113_v50 = vmax.f32 %v2079_v49, 0.0 }
 0x2f0   : > { %3713 = vmatmul.mubr.f32.gmra.mxu1 %v2113_v50 }
 0x338   : > { %v3669_v53 = vpop.f32.mrf.mxu1 }
 0x339   : > { %v2209_v55 = vadd.f32 %v3669_v53, %v4913_v51 }
 0x33a   : > { %v2203_v56 = vpop.f32.mrf.mxu1 }
 0x33b   : > { %v2204_v57 = vadd.f32 %v4913_v51, %v2203_v56  ;;  %v2363_v59 = vmax.f32 %v2209_v55, 0.0 }
 0x33d   : > { %v2362_v58 = vmax.f32 %v2204_v57, 0.0 }
 0x33f   : > { %3723 = vmatprep.mubr.msk.f32.mxu0 %vm431_vm0, %v2362_v58 }
 0x340   : > { %v3672_v32 = vpop.f32.mrf.mxu1  ;;  %3724 = vmatmul.mubr.msk.f32.vlgmr.msra.gmra.mxu0 %vm431_vm0, %v2363_v59 }
 0x341   : > { %v2219_v60 = vadd.f32 %v3672_v32, %v4913_v51 }
 0x342   : > { %v2213_v61 = vpop.f32.mrf.mxu1 }
 0x343   : > { %v2214_v62 = vadd.f32 %v4913_v51, %v2213_v61  ;;  %v2365_v0 = vmax.f32 %v2219_v60, 0.0 }
 0x345   : > { %v2364_v63 = vmax.f32 %v2214_v62, 0.0 }
 0x347   : > { %3726 = vmatprep.mubr.msk.f32.mxu0 %vm431_vm0, %v2364_v63 }
 0x348   : > { %v3675_v1 = vpop.f32.mrf.mxu1  ;;  %3727 = vmatmul.mubr.msk.f32.gmra.mxu0 %vm431_vm0, %v2365_v0 }
 0x349   : > { %v2229_v2 = vadd.f32 %v3675_v1, %v4913_v51 }
 0x34a   : > { %v2223_v3 = vpop.f32.mrf.mxu1 }
 0x34b   : > { %v2224_v4 = vadd.f32 %v4913_v51, %v2223_v3  ;;  %v2367_v6 = vmax.f32 %v2229_v2, 0.0 }
 0x34d   : > { %v2366_v5 = vmax.f32 %v2224_v4, 0.0 }
 0x34f   : > { %3729 = vmatprep.mubr.msk.f32.mxu0 %vm431_vm0, %v2366_v5 }
 0x350   : > { %v3678_v7 = vpop.f32.mrf.mxu1  ;;  %3730 = vmatmul.mubr.msk.f32.gmra.mxu0 %vm431_vm0, %v2367_v6 }
 0x351   : > { %v2239_v8 = vadd.f32 %v3678_v7, %v4913_v51 }
 0x352   : > { %v2233_v9 = vpop.f32.mrf.mxu1 }
 0x353   : > { %v2234_v10 = vadd.f32 %v4913_v51, %v2233_v9  ;;  %v2369_v12 = vmax.f32 %v2239_v8, 0.0 }
 0x355   : > { %v2368_v11 = vmax.f32 %v2234_v10, 0.0 }
 0x357   : > { %3732 = vmatprep.mubr.msk.f32.mxu0 %vm431_vm0, %v2368_v11 }
 0x358   : > { %v3681_v33 = vpop.f32.mrf.mxu1  ;;  %3733 = vmatmul.mubr.msk.f32.gmra.mxu0 %vm431_vm0, %v2369_v12 }
 0x359   : > { %v2249_v52 = vadd.f32 %v3681_v33, %v4913_v51 }
 0x35a   : > { %v2243_v34 = vpop.f32.mrf.mxu1 }
 0x35b   : > { %v2244_v13 = vadd.f32 %v4913_v51, %v2243_v34  ;;  %v2371_v15 = vmax.f32 %v2249_v52, 0.0 }
 0x35d   : > { %v2370_v14 = vmax.f32 %v2244_v13, 0.0 }
 0x35f   : > { %3735 = vmatprep.mubr.msk.f32.mxu0 %vm431_vm0, %v2370_v14 }
 0x360   : > { %v3684_v16 = vpop.f32.mrf.mxu1  ;;  %3736 = vmatmul.mubr.msk.f32.gmra.mxu0 %vm431_vm0, %v2371_v15 }
 0x361   : > { %v2259_v17 = vadd.f32 %v3684_v16, %v4913_v51 }
 0x362   : > { %v2253_v18 = vpop.f32.mrf.mxu1 }
 0x363   : > { %v2254_v19 = vadd.f32 %v4913_v51, %v2253_v18  ;;  %v2373_v21 = vmax.f32 %v2259_v17, 0.0 }
 0x365   : > { %v2372_v20 = vmax.f32 %v2254_v19, 0.0  ;;  %v4982_v19 = vld [vmem:[%s5460_s10] ss:$0 sm:$0xff] }
 0x367   : > { %3738 = vmatprep.mubr.msk.f32.mxu0 %vm431_vm0, %v2372_v20 }
 0x368   : > { %v3687_v22 = vpop.f32.mrf.mxu1  ;;  %3739 = vmatmul.mubr.msk.f32.gmra.mxu0 %vm431_vm0, %v2373_v21 }
 0x369   : > { %v2269_v54 = vadd.f32 %v3687_v22, %v4913_v51 }
 0x36a   : > { %v2263_v23 = vpop.f32.mrf.mxu1 }
 0x36b   : > { %v2264_v24 = vadd.f32 %v4913_v51, %v2263_v23  ;;  %v2375_v26 = vmax.f32 %v2269_v54, 0.0 }
 0x36d   : > { %v2374_v25 = vmax.f32 %v2264_v24, 0.0 }
 0x36f   : > { %3741 = vmatprep.mubr.msk.f32.mxu0 %vm431_vm0, %v2374_v25 }
 0x370   : > { %v3690_v27 = vpop.f32.mrf.mxu1  ;;  %3742 = vmatmul.mubr.msk.f32.gmra.mxu0 %vm431_vm0, %v2375_v26 }
 0x371   : > { %v2279_v28 = vadd.f32 %v3690_v27, %v4913_v51 }
 0x372   : > { %v2273_v29 = vpop.f32.mrf.mxu1 }
 0x373   : > { %v2274_v30 = vadd.f32 %v4913_v51, %v2273_v29  ;;  %v2377_v35 = vmax.f32 %v2279_v28, 0.0 }
 0x375   : > { %v2376_v31 = vmax.f32 %v2274_v30, 0.0 }
 0x377   : > { %3744 = vmatprep.mubr.msk.f32.mxu0 %vm431_vm0, %v2376_v31 }
 0x378   : > { %v3693_v36 = vpop.f32.mrf.mxu1  ;;  %3745 = vmatmul.mubr.msk.f32.gmra.mxu0 %vm431_vm0, %v2377_v35 }
 0x379   : > { %v2289_v37 = vadd.f32 %v3693_v36, %v4913_v51 }
 0x37a   : > { %v2283_v38 = vpop.f32.mrf.mxu1 }
 0x37b   : > { %v2284_v39 = vadd.f32 %v4913_v51, %v2283_v38  ;;  %v2379_v41 = vmax.f32 %v2289_v37, 0.0 }
 0x37d   : > { %v2378_v40 = vmax.f32 %v2284_v39, 0.0 }
 0x37f   : > { %3747 = vmatprep.mubr.msk.f32.mxu0 %vm431_vm0, %v2378_v40 }
 0x380   : > { %v3696_v42 = vpop.f32.mrf.mxu1  ;;  %3748 = vmatmul.mubr.msk.f32.gmra.mxu0 %vm431_vm0, %v2379_v41 }
 0x381   : > { %v2299_v43 = vadd.f32 %v3696_v42, %v4913_v51 }
 0x382   : > { %v2293_v44 = vpop.f32.mrf.mxu1 }
 0x383   : > { %v2294_v45 = vadd.f32 %v4913_v51, %v2293_v44  ;;  %v2381_v47 = vmax.f32 %v2299_v43, 0.0 }
 0x385   : > { %v2380_v46 = vmax.f32 %v2294_v45, 0.0 }
 0x387   : > { %3750 = vmatprep.mubr.msk.f32.mxu0 %vm431_vm0, %v2380_v46 }
 0x388   : > { %v3699_v48 = vpop.f32.mrf.mxu1  ;;  %3751 = vmatmul.mubr.msk.f32.gmra.mxu0 %vm431_vm0, %v2381_v47 }
 0x389   : > { %v2309_v49 = vadd.f32 %v3699_v48, %v4913_v51 }
 0x38a   : > { %v2303_v50 = vpop.f32.mrf.mxu1 }
 0x38b   : > { %v2304_v53 = vadd.f32 %v4913_v51, %v2303_v50  ;;  %v2383_v56 = vmax.f32 %v2309_v49, 0.0 }
 0x38d   : > { %v2382_v55 = vmax.f32 %v2304_v53, 0.0 }
 0x38f   : > { %3753 = vmatprep.mubr.msk.f32.mxu0 %vm431_vm0, %v2382_v55 }
 0x390   : > { %v3702_v57 = vpop.f32.mrf.mxu1  ;;  %3754 = vmatmul.mubr.msk.f32.gmra.mxu0 %vm431_vm0, %v2383_v56 }
 0x391   : > { %v2319_v58 = vadd.f32 %v3702_v57, %v4913_v51 }
 0x392   : > { %v2313_v59 = vpop.f32.mrf.mxu1 }
 0x393   : > { %v2314_v32 = vadd.f32 %v4913_v51, %v2313_v59  ;;  %v2385_v61 = vmax.f32 %v2319_v58, 0.0 }
 0x395   : > { %v2384_v60 = vmax.f32 %v2314_v32, 0.0 }
 0x397   : > { %3756 = vmatprep.mubr.msk.f32.mxu0 %vm431_vm0, %v2384_v60 }
 0x398   : > { %v3705_v62 = vpop.f32.mrf.mxu1  ;;  %3757 = vmatmul.mubr.msk.f32.gmra.mxu0 %vm431_vm0, %v2385_v61 }
 0x399   : > { %v2329_v63 = vadd.f32 %v3705_v62, %v4913_v51 }
 0x39a   : > { %v2323_v0 = vpop.f32.mrf.mxu1 }
 0x39b   : > { %v2324_v1 = vadd.f32 %v4913_v51, %v2323_v0  ;;  %v2387_v3 = vmax.f32 %v2329_v63, 0.0 }
 0x39d   : > { %v2386_v2 = vmax.f32 %v2324_v1, 0.0 }
 0x39f   : > { %3759 = vmatprep.mubr.msk.f32.mxu0 %vm431_vm0, %v2386_v2 }
 0x3a0   : > { %v3708_v4 = vpop.f32.mrf.mxu1  ;;  %3760 = vmatmul.mubr.msk.f32.gmra.mxu0 %vm431_vm0, %v2387_v3 }
 0x3a1   : > { %v2339_v5 = vadd.f32 %v3708_v4, %v4913_v51 }
 0x3a2   : > { %v2333_v6 = vpop.f32.mrf.mxu1 }
 0x3a3   : > { %v2334_v7 = vadd.f32 %v4913_v51, %v2333_v6  ;;  %v2389_v9 = vmax.f32 %v2339_v5, 0.0 }
 0x3a5   : > { %v2388_v8 = vmax.f32 %v2334_v7, 0.0 }
 0x3a7   : > { %3762 = vmatprep.mubr.msk.f32.mxu0 %vm431_vm0, %v2388_v8 }
 0x3a8   : > { %v3711_v10 = vpop.f32.mrf.mxu1  ;;  %3763 = vmatmul.mubr.msk.f32.gmra.mxu0 %vm431_vm0, %v2389_v9 }
 0x3a9   : > { %v2349_v11 = vadd.f32 %v3711_v10, %v4913_v51 }
 0x3aa   : > { %v2343_v12 = vpop.f32.mrf.mxu1 }
 0x3ab   : > { %v2344_v33 = vadd.f32 %v4913_v51, %v2343_v12  ;;  %v2391_v34 = vmax.f32 %v2349_v11, 0.0 }
 0x3ad   : > { %v2390_v52 = vmax.f32 %v2344_v33, 0.0 }
 0x3af   : > { %3765 = vmatprep.mubr.msk.f32.mxu0 %vm431_vm0, %v2390_v52 }
 0x3b0   : > { %v3714_v13 = vpop.f32.mrf.mxu1  ;;  %3766 = vmatmul.mubr.msk.f32.gmra.mxu0 %vm431_vm0, %v2391_v34 }
 0x3b1   : > { %v2359_v14 = vadd.f32 %v3714_v13, %v4913_v51 }
 0x3b2   : > { %v2353_v15 = vpop.f32.mrf.mxu1 }
 0x3b3   : > { %v2354_v16 = vadd.f32 %v4913_v51, %v2353_v15  ;;  %v2393_v18 = vmax.f32 %v2359_v14, 0.0 }
 0x3b5   : > { %v2392_v17 = vmax.f32 %v2354_v16, 0.0 }
 0x3b7   : > { %3768 = vmatprep.mubr.msk.f32.mxu0 %vm431_vm0, %v2392_v17 }
 0x3b8   : > { %3769 = vmatmul.mubr.msk.f32.gmra.mxu0 %vm431_vm0, %v2393_v18 }
 0x400   : > { %v3725_v20 = vpop.f32.mrf.mxu0 }
 0x401   : > { %v4985_v21 = vadd.f32 %v3725_v20, %v4982_v19 }
 0x402   : > { %v2567_v22 = vpop.f32.mrf.mxu0 }
 0x403   : > { %v2759_v54 = vand.u32 2147483647, %v4985_v21  ;;  %v4989_v51 = vadd.f32 %v4982_v19, %v2567_v22  ;;  %v2727_v17 = vmax.f32 %v4985_v21, 0.0 }
 0x405   : > { %v2791_v23 = vsub.f32 0.0, %v2759_v54  ;;  %v2758_v24 = vand.u32 2147483647, %v4989_v51  ;;  %v2726_v20 = vmax.f32 %v4989_v51, 0.0 }
 0x407   : > { %v2824_v25 = vmul.f32 1.442695, %v2791_v23  ;;  %v2790_v26 = vsub.f32 0.0, %v2758_v24 }
 0x408   : > { %v3728_v27 = vpop.f32.mrf.mxu0 }
 0x409   : > { %3821 = vpow2.f32 %v2824_v25  ;;  %v2822_v28 = vmul.f32 1.442695, %v2790_v26  ;;  %v4993_v29 = vadd.f32 %v3728_v27, %v4982_v19 }
 0x40a   : > { %v2577_v30 = vpop.f32.mrf.mxu0 }
 0x40b   : > { %3823 = vpow2.f32 %v2822_v28  ;;  %v2761_v31 = vand.u32 2147483647, %v4993_v29  ;;  %v4997_v35 = vadd.f32 %v4982_v19, %v2577_v30 }
 0x40d   : > { %v2793_v36 = vsub.f32 0.0, %v2761_v31  ;;  %v2760_v37 = vand.u32 2147483647, %v4997_v35 }
 0x40f   : > { %v2828_v38 = vmul.f32 1.442695, %v2793_v36  ;;  %v2792_v39 = vsub.f32 0.0, %v2760_v37 }
 0x410   : > { %v3731_v40 = vpop.f32.mrf.mxu0 }
 0x411   : > { %3825 = vpow2.f32 %v2828_v38  ;;  %v2826_v41 = vmul.f32 1.442695, %v2792_v39  ;;  %v5001_v42 = vadd.f32 %v3731_v40, %v4982_v19 }
 0x412   : > { %v2587_v43 = vpop.f32.mrf.mxu0 }
 0x413   : > { %3827 = vpow2.f32 %v2826_v41  ;;  %v2763_v44 = vand.u32 2147483647, %v5001_v42  ;;  %v5005_v45 = vadd.f32 %v4982_v19, %v2587_v43 }
 0x415   : > { %v2795_v46 = vsub.f32 0.0, %v2763_v44  ;;  %v2762_v47 = vand.u32 2147483647, %v5005_v45 }
 0x416   : > { %v3822_v48 = vpop.eup %3821 }
 0x417   : > { %v2895_v49 = vadd.f32 1.0, %v3822_v48  ;;  %v2832_v50 = vmul.f32 1.442695, %v2795_v46  ;;  %v2794_v55 = vsub.f32 0.0, %v2762_v47  ;;  %v2898_v0 = vmul.f32 -0.5, %v3822_v48 }
 0x418   : > { %v3824_v53 = vpop.eup %3823  ;;  %v3734_v56 = vpop.f32.mrf.mxu0  ;;  %v2901_v52 = vand.u32 2147483647, %v3822_v48 }
 0x419   : > { %3829 = vlog2.f32 %v2895_v49  ;;  %v2886_v57 = vadd.f32 1.0, %v3824_v53  ;;  %v2830_v58 = vmul.f32 1.442695, %v2794_v55  ;;  %v5009_v32 = vadd.f32 %v3734_v56, %v4982_v19 }
 0x41a   : > { %3831 = vpow2.f32 %v2832_v50  ;;  %v2597_v59 = vpop.f32.mrf.mxu0  ;;  %v2889_v6 = vmul.f32 -0.5, %v3824_v53  ;;  %v2899_v8 = vadd.f32 1.0, %v2898_v0  ;;  %v2892_v34 = vand.u32 2147483647, %v3824_v53 }
 0x41b   : > { %3833 = vlog2.f32 %v2886_v57  ;;  %v5012_v60 = vadd.f32 %v4982_v19, %v2597_v59  ;;  %v2765_v61 = vand.u32 2147483647, %v5009_v32  ;;  %vm2902_vm1 = vcmp.lt.f32.partialorder %v2901_v52, 0.0004427343 }
 0x41c   : > { %3835 = vpow2.f32 %v2830_v58  ;;  %v2890_v13 = vadd.f32 1.0, %v2889_v6  ;;  %v2900_v18 = vmul.f32 %v3822_v48, %v2899_v8  ;;  %vm5038_vm2 = vcmp.lt.f32.partialorder %v2892_v34, 0.0004427343 }
 0x41d   : > { %v2764_v62 = vand.u32 2147483647, %v5012_v60  ;;  %v2797_v2 = vsub.f32 0.0, %v2765_v61  ;;  %v2729_v57 = vmax.f32 %v4993_v29, 0.0 }
 0x41e   : > { %v5016_v63 = vpop.eup %3825  ;;  %v2891_v37 = vmul.f32 %v3824_v53, %v2890_v13 }
 0x41f   : > { %v2913_v1 = vadd.f32 1.0, %v5016_v63  ;;  %v2796_v4 = vsub.f32 0.0, %v2764_v62  ;;  %v2836_v9 = vmul.f32 1.442695, %v2797_v2  ;;  %v2916_v23 = vmul.f32 -0.5, %v5016_v63 }
 0x420   : > { %v5019_v3 = vpop.eup %3827  ;;  %v3737_v5 = vpop.f32.mrf.mxu0  ;;  %v2919_v40 = vand.u32 2147483647, %v5016_v63  ;;  %v2728_v62 = vmax.f32 %v4997_v35, 0.0 }
 0x421   : > { %3837 = vlog2.f32 %v2913_v1  ;;  %v2904_v7 = vadd.f32 1.0, %v5019_v3  ;;  %v5023_v10 = vadd.f32 %v3737_v5, %v4982_v19  ;;  %v2834_v12 = vmul.f32 1.442695, %v2796_v4 }
 0x422   : > { %v2607_v11 = vpop.f32.mrf.mxu0  ;;  %v2907_v28 = vmul.f32 -0.5, %v5019_v3  ;;  %v2917_v46 = vadd.f32 1.0, %v2916_v23  ;;  %v2910_v47 = vand.u32 2147483647, %v5019_v3  ;;  %vm2920_vm3 = vcmp.lt.f32.partialorder %v2919_v40, 0.0004427343 }
 0x423   : > { %3839 = vlog2.f32 %v2904_v7  ;;  %v5027_v33 = vadd.f32 %v4982_v19, %v2607_v11  ;;  %v2767_v14 = vand.u32 2147483647, %v5023_v10 }
 0x424   : > { %3841 = vpow2.f32 %v2836_v9  ;;  %v2908_v50 = vadd.f32 1.0, %v2907_v28  ;;  %v2918_v61 = vmul.f32 %v5016_v63, %v2917_v46  ;;  %vm5067_vm4 = vcmp.lt.f32.partialorder %v2910_v47, 0.0004427343 }
 0x425   : > { %3843 = vpow2.f32 %v2834_v12  ;;  %v2766_v15 = vand.u32 2147483647, %v5027_v33  ;;  %v2799_v24 = vsub.f32 0.0, %v2767_v14 }
 0x426   : > { %v3830_v16 = vpop.eup %3829  ;;  %v2909_v2 = vmul.f32 %v5019_v3, %v2908_v50 }
 0x427   : > { %v5035_v22 = vpop.eup %3831  ;;  %v2897_v54 = vmul.f32 0.6931472, %v3830_v16  ;;  %v2798_v25 = vsub.f32 0.0, %v2766_v15  ;;  %v2840_v38 = vmul.f32 1.442695, %v2799_v24 }
 0x428   : > { %v3834_v26 = vpop.eup %3833  ;;  %v2931_v21 = vadd.f32 1.0, %v5035_v22  ;;  %v3740_v30 = vpop.f32.mrf.mxu0  ;;  %v2934_v29 = vmul.f32 -0.5, %v5035_v22 }
 0x429   : > { %v5044_v31 = vpop.eup %3835  ;;  %v2903_v51 = vsel %vm2902_vm1, %v2900_v18, %v2897_v54  ;;  %v2888_v36 = vmul.f32 0.6931472, %v3834_v26  ;;  %v2838_v41 = vmul.f32 1.442695, %v2798_v25  ;;  %v5055_v53 = vadd.f32 %v3740_v30, %v4982_v19 }
 0x42a   : > { %v3175_v39 = vadd.f32 %v2903_v51, %v2727_v17  ;;  %3845 = vlog2.f32 %v2931_v21  ;;  %v2617_v43 = vpop.f32.mrf.mxu0  ;;  %v2922_v48 = vadd.f32 1.0, %v5044_v31  ;;  %v2925_v35 = vmul.f32 -0.5, %v5044_v31 }
 0x42b   : > { %v2894_v44 = vsel %vm5038_vm2, %v2891_v37, %v2888_v36  ;;  %3847 = vpow2.f32 %v2840_v38  ;;  %v5058_v55 = vadd.f32 %v4982_v19, %v2617_v43  ;;  %v2769_v58 = vand.u32 2147483647, %v5055_v53 }
 0x42c   : > { %3207 = vst [vmem:[%s5051_s12 + $0x8] sm:$0xff] %v3175_v39  ;;  %v3174_v49 = vadd.f32 %v2894_v44, %v2726_v20  ;;  %3849 = vlog2.f32 %v2922_v48  ;;  %v2935_v15 = vadd.f32 1.0, %v2934_v29  ;;  %v2937_v17 = vand.u32 2147483647, %v5035_v22 }
 0x42d   : > { %3851 = vpow2.f32 %v2838_v41  ;;  %v2768_v0 = vand.u32 2147483647, %v5058_v55  ;;  %v2801_v8 = vsub.f32 0.0, %v2769_v58  ;;  %v2926_v18 = vadd.f32 1.0, %v2925_v35 }
 0x42e   : > { %v3838_v56 = vpop.eup %3837  ;;  %3206 = vst [vmem:[%s5051_s12] sm:$0xff] %v3174_v49  ;;  %v2731_v25 = vmax.f32 %v5001_v42, 0.0  ;;  %v2928_v26 = vand.u32 2147483647, %v5044_v31  ;;  %v2936_v21 = vmul.f32 %v5035_v22, %v2935_v15  ;;  %vm2938_vm5 = vcmp.lt.f32.partialorder %v2937_v17, 0.0004427343 }
 0x42f   : > { %v2915_v59 = vmul.f32 0.6931472, %v3838_v56  ;;  %v2800_v12 = vsub.f32 0.0, %v2768_v0  ;;  %v2844_v20 = vmul.f32 1.442695, %v2801_v8  ;;  %v2927_v37 = vmul.f32 %v5044_v31, %v2926_v18 }
 0x430   : > { %v3840_v1 = vpop.eup %3839  ;;  %v3743_v5 = vpop.f32.mrf.mxu0  ;;  %v2730_v49 = vmax.f32 %v5005_v45, 0.0  ;;  %vm2929_vm6 = vcmp.lt.f32.partialorder %v2928_v26, 0.0004427343 }
 0x431   : > { %v5072_v6 = vpop.eup %3841  ;;  %v2921_v7 = vsel %vm2920_vm3, %v2918_v61, %v2915_v59  ;;  %v2906_v63 = vmul.f32 0.6931472, %v3840_v1  ;;  %v5079_v52 = vadd.f32 %v3743_v5, %v4982_v19  ;;  %v2842_v54 = vmul.f32 1.442695, %v2800_v12 }
 0x432   : > { %v5075_v9 = vpop.eup %3843  ;;  %v3177_v11 = vadd.f32 %v2921_v7, %v2729_v57  ;;  %v2949_v3 = vadd.f32 1.0, %v5072_v6  ;;  %v2627_v16 = vpop.f32.mrf.mxu0  ;;  %v2952_v38 = vmul.f32 -0.5, %v5072_v6  ;;  %v2733_v5 = vmax.f32 %v5009_v32, 0.0 }
 0x433   : > { %v2912_v34 = vsel %vm5067_vm4, %v2909_v2, %v2906_v63  ;;  %v2940_v13 = vadd.f32 1.0, %v5075_v9  ;;  %v2771_v23 = vand.u32 2147483647, %v5079_v52  ;;  %v5091_v27 = vadd.f32 %v4982_v19, %v2627_v16 }
 0x434   : > { %3209 = vst [vmem:[%s5051_s12 + $0x18] sm:$0xff] %v3177_v11  ;;  %v3176_v14 = vadd.f32 %v2912_v34, %v2728_v62  ;;  %3853 = vlog2.f32 %v2949_v3  ;;  %v2943_v41 = vmul.f32 -0.5, %v5075_v9  ;;  %v2953_v59 = vadd.f32 1.0, %v2952_v38 }
 0x435   : > { %3855 = vlog2.f32 %v2940_v13  ;;  %v2803_v30 = vsub.f32 0.0, %v2771_v23  ;;  %v2770_v42 = vand.u32 2147483647, %v5091_v27  ;;  %v2955_v62 = vand.u32 2147483647, %v5072_v6 }
 0x436   : > { %3208 = vst [vmem:[%s5051_s12 + $0x10] sm:$0xff] %v3176_v14  ;;  %3857 = vpow2.f32 %v2844_v20  ;;  %v2944_v0 = vadd.f32 1.0, %v2943_v41  ;;  %v2946_v45 = vand.u32 2147483647, %v5075_v9  ;;  %v2732_v7 = vmax.f32 %v5012_v60, 0.0 }
 0x437   : > { %v3846_v24 = vpop.eup %3845  ;;  %3859 = vpow2.f32 %v2842_v54  ;;  %v2848_v48 = vmul.f32 1.442695, %v2803_v30  ;;  %v2802_v31 = vsub.f32 0.0, %v2770_v42  ;;  %v2954_v3 = vmul.f32 %v5072_v6, %v2953_v59 }
 0x438   : > { %v2933_v28 = vmul.f32 0.6931472, %v3846_v24  ;;  %v3746_v51 = vpop.f32.mrf.mxu0  ;;  %v5094_v36 = vpop.eup %3847  ;;  %vm2956_vm7 = vcmp.lt.f32.partialorder %v2955_v62, 0.0004427343  ;;  %v2945_v14 = vmul.f32 %v5075_v9, %v2944_v0  ;;  %vm2947_vm8 = vcmp.lt.f32.partialorder %v2946_v45, 0.0004427343 }
 0x439   : > { %v3850_v39 = vpop.eup %3849  ;;  %v2967_v43 = vadd.f32 1.0, %v5094_v36  ;;  %v5102_v22 = vadd.f32 %v3746_v51, %v4982_v19  ;;  %v2846_v61 = vmul.f32 1.442695, %v2802_v31  ;;  %v2970_v12 = vmul.f32 -0.5, %v5094_v36 }
 0x43a   : > { %v2939_v40 = vsel %vm2938_vm5, %v2936_v21, %v2933_v28  ;;  %v5104_v44 = vpop.eup %3851  ;;  %v2924_v47 = vmul.f32 0.6931472, %v3850_v39  ;;  %v2637_v57 = vpop.f32.mrf.mxu0  ;;  %v2973_v26 = vand.u32 2147483647, %v5094_v36  ;;  %v2735_v42 = vmax.f32 %v5023_v10, 0.0 }
 0x43b   : > { %v3179_v46 = vadd.f32 %v2939_v40, %v2731_v25  ;;  %3861 = vlog2.f32 %v2967_v43  ;;  %v2958_v50 = vadd.f32 1.0, %v5104_v44  ;;  %v2773_v1 = vand.u32 2147483647, %v5102_v22 }
 0x43c   : > { %v2930_v56 = vsel %vm2929_vm6, %v2927_v37, %v2924_v47  ;;  %3863 = vpow2.f32 %v2848_v48  ;;  %v5114_v2 = vadd.f32 %v4982_v19, %v2637_v57  ;;  %v2961_v32 = vmul.f32 -0.5, %v5104_v44 }
 0x43d   : > { %3211 = vst [vmem:[%s5051_s12 + $0x28] sm:$0xff] %v3179_v46  ;;  %v3178_v58 = vadd.f32 %v2930_v56, %v2730_v49  ;;  %3865 = vlog2.f32 %v2958_v50  ;;  %v2805_v63 = vsub.f32 0.0, %v2773_v1  ;;  %v2971_v25 = vadd.f32 1.0, %v2970_v12 }
 0x43e   : > { %3867 = vpow2.f32 %v2846_v61  ;;  %v2772_v34 = vand.u32 2147483647, %v5114_v2  ;;  %v2962_v21 = vadd.f32 1.0, %v2961_v32  ;;  %v2734_v39 = vmax.f32 %v5027_v33, 0.0 }
 0x43f   : > { %3210 = vst [vmem:[%s5051_s12 + $0x20] sm:$0xff] %v3178_v58  ;;  %v2852_v24 = vmul.f32 1.442695, %v2805_v63  ;;  %v2964_v40 = vand.u32 2147483647, %v5104_v44  ;;  %v2972_v47 = vmul.f32 %v5094_v36, %v2971_v25  ;;  %v2737_v12 = vmax.f32 %v5055_v53, 0.0 }
 0x440   : > { %v3749_v4 = vpop.f32.mrf.mxu0  ;;  %v2804_v16 = vsub.f32 0.0, %v2772_v34  ;;  %vm2974_vm9 = vcmp.lt.f32.partialorder %v2973_v26, 0.0004427343  ;;  %v2963_v49 = vmul.f32 %v5104_v44, %v2962_v21  ;;  %v2736_v32 = vmax.f32 %v5058_v55, 0.0 }
 0x441   : > { %v3854_v29 = vpop.eup %3853  ;;  %v5119_v35 = vadd.f32 %v3749_v4, %v4982_v19  ;;  %vm2965_vm10 = vcmp.lt.f32.partialorder %v2964_v40, 0.0004427343 }
 0x442   : > { %v3856_v8 = vpop.eup %3855  ;;  %v2951_v11 = vmul.f32 0.6931472, %v3854_v29  ;;  %v2647_v6 = vpop.f32.mrf.mxu0  ;;  %v2850_v30 = vmul.f32 1.442695, %v2804_v16 }
 0x443   : > { %v2942_v13 = vmul.f32 0.6931472, %v3856_v8  ;;  %v5126_v60 = vpop.eup %3857  ;;  %v2775_v17 = vand.u32 2147483647, %v5119_v35  ;;  %v5136_v51 = vadd.f32 %v4982_v19, %v2647_v6 }
 0x444   : > { %v2957_v15 = vsel %vm2956_vm7, %v2954_v3, %v2951_v11  ;;  %v5129_v18 = vpop.eup %3859  ;;  %v2985_v23 = vadd.f32 1.0, %v5126_v60  ;;  %v2988_v59 = vmul.f32 -0.5, %v5126_v60  ;;  %v2991_v45 = vand.u32 2147483647, %v5126_v60 }
 0x445   : > { %v3181_v20 = vadd.f32 %v2957_v15, %v2733_v5  ;;  %v2948_v54 = vsel %vm2947_vm8, %v2945_v14, %v2942_v13  ;;  %v2976_v28 = vadd.f32 1.0, %v5129_v18  ;;  %v2807_v37 = vsub.f32 0.0, %v2775_v17 }
 0x446   : > { %v3180_v9 = vadd.f32 %v2948_v54, %v2732_v7  ;;  %3869 = vlog2.f32 %v2985_v23  ;;  %v2774_v33 = vand.u32 2147483647, %v5136_v51  ;;  %v2979_v61 = vmul.f32 -0.5, %v5129_v18 }
 0x447   : > { %3213 = vst [vmem:[%s5051_s12 + $0x38] sm:$0xff] %v3181_v20  ;;  %3871 = vlog2.f32 %v2976_v28  ;;  %v2856_v48 = vmul.f32 1.442695, %v2807_v37  ;;  %v2982_v29 = vand.u32 2147483647, %v5129_v18  ;;  %v2989_v63 = vadd.f32 1.0, %v2988_v59 }
 0x448   : > { %3212 = vst [vmem:[%s5051_s12 + $0x30] sm:$0xff] %v3180_v9  ;;  %v3862_v38 = vpop.eup %3861  ;;  %3873 = vpow2.f32 %v2852_v24  ;;  %v3752_v41 = vpop.f32.mrf.mxu0  ;;  %v2806_v4 = vsub.f32 0.0, %v2774_v33  ;;  %v2980_v34 = vadd.f32 1.0, %v2979_v61  ;;  %vm5168_vm11 = vcmp.lt.f32.partialorder %v2991_v45, 0.0004427343 }
 0x449   : > { %v5142_v43 = vpop.eup %3863  ;;  %v2969_v46 = vmul.f32 0.6931472, %v3862_v38  ;;  %3875 = vpow2.f32 %v2850_v30  ;;  %v5149_v57 = vadd.f32 %v3752_v41, %v4982_v19  ;;  %vm5174_vm12 = vcmp.lt.f32.partialorder %v2982_v29, 0.0004427343 }
 0x44a   : > { %v3866_v31 = vpop.eup %3865  ;;  %v3003_v10 = vadd.f32 1.0, %v5142_v43  ;;  %3877 = vpow2.f32 %v2856_v48  ;;  %v2657_v0 = vpop.f32.mrf.mxu0  ;;  %v2854_v8 = vmul.f32 1.442695, %v2806_v4  ;;  %v3006_v15 = vmul.f32 -0.5, %v5142_v43 }
 0x44b   : > { %v2975_v50 = vsel %vm2974_vm9, %v2972_v47, %v2969_v46  ;;  %v2960_v56 = vmul.f32 0.6931472, %v3866_v31  ;;  %v5151_v58 = vpop.eup %3867  ;;  %v2777_v5 = vand.u32 2147483647, %v5149_v57  ;;  %v5162_v11 = vadd.f32 %v4982_v19, %v2657_v0 }
 0x44c   : > { %v3183_v36 = vadd.f32 %v2975_v50, %v2735_v42  ;;  %3879 = vlog2.f32 %v3003_v10  ;;  %v2994_v62 = vadd.f32 1.0, %v5151_v58  ;;  %v2990_v23 = vmul.f32 %v5126_v60, %v2989_v63 }
 0x44d   : > { %v2966_v44 = vsel %vm2965_vm10, %v2963_v49, %v2960_v56  ;;  %v2809_v13 = vsub.f32 0.0, %v2777_v5  ;;  %v2776_v20 = vand.u32 2147483647, %v5162_v11  ;;  %v2997_v24 = vmul.f32 -0.5, %v5151_v58 }
 0x44e   : > { %3215 = vst [vmem:[%s5051_s12 + $0x48] sm:$0xff] %v3183_v36  ;;  %v3182_v1 = vadd.f32 %v2966_v44, %v2734_v39  ;;  %3881 = vlog2.f32 %v2994_v62  ;;  %v2981_v26 = vmul.f32 %v5129_v18, %v2980_v34  ;;  %v3009_v28 = vand.u32 2147483647, %v5142_v43 }
 0x44f   : > { %3883 = vpow2.f32 %v2854_v8  ;;  %v2860_v6 = vmul.f32 1.442695, %v2809_v13  ;;  %v3007_v60 = vadd.f32 1.0, %v3006_v15  ;;  %v3000_v38 = vand.u32 2147483647, %v5151_v58 }
 0x450   : > { %v3755_v7 = vpop.f32.mrf.mxu0  ;;  %3214 = vst [vmem:[%s5051_s12 + $0x40] sm:$0xff] %v3182_v1  ;;  %v2808_v41 = vsub.f32 0.0, %v2776_v20  ;;  %v2998_v31 = vadd.f32 1.0, %v2997_v24  ;;  %v2739_v33 = vmax.f32 %v5079_v52, 0.0  ;;  %v2738_v44 = vmax.f32 %v5091_v27, 0.0 }
 0x451   : > { %v5165_v3 = vadd.f32 %v3755_v7, %v4982_v19  ;;  %3885 = vpow2.f32 %v2860_v6  ;;  %v3008_v59 = vmul.f32 %v5142_v43, %v3007_v60  ;;  %v2741_v61 = vmax.f32 %v5102_v22, 0.0 }
 0x452   : > { %v2667_v21 = vpop.f32.mrf.mxu0  ;;  %vm3010_vm13 = vcmp.lt.f32.partialorder %v3009_v28, 0.0004427343  ;;  %vm5207_vm14 = vcmp.lt.f32.partialorder %v3000_v38, 0.0004427343  ;;  %v2858_v52 = vmul.f32 1.442695, %v2808_v41  ;;  %v2999_v4 = vmul.f32 %v5151_v58, %v2998_v31 }
 0x453   : > { %v3870_v16 = vpop.eup %3869  ;;  %v2779_v9 = vand.u32 2147483647, %v5165_v3  ;;  %v5201_v56 = vadd.f32 %v4982_v19, %v2667_v21  ;;  %v2740_v6 = vmax.f32 %v5114_v2, 0.0 }
 0x454   : > { %v3872_v53 = vpop.eup %3871  ;;  %v2987_v54 = vmul.f32 0.6931472, %v3870_v16 }
 0x455   : > { %v5182_v55 = vpop.eup %3873  ;;  %v2978_v25 = vmul.f32 0.6931472, %v3872_v53  ;;  %v2811_v49 = vsub.f32 0.0, %v2779_v9  ;;  %v2778_v7 = vand.u32 2147483647, %v5201_v56 }
 0x456   : > { %v5186_v30 = vpop.eup %3875  ;;  %v2993_v37 = vsel %vm5168_vm11, %v2990_v23, %v2987_v54  ;;  %v3021_v42 = vadd.f32 1.0, %v5182_v55  ;;  %v3024_v29 = vmul.f32 -0.5, %v5182_v55  ;;  %v3027_v13 = vand.u32 2147483647, %v5182_v55 }
 0x457   : > { %v3185_v39 = vadd.f32 %v2993_v37, %v2737_v12  ;;  %v2984_v18 = vsel %vm5174_vm12, %v2981_v26, %v2978_v25  ;;  %v3012_v40 = vadd.f32 1.0, %v5186_v30  ;;  %v5195_v47 = vpop.eup %3877  ;;  %v2864_v43 = vmul.f32 1.442695, %v2811_v49 }
 0x458   : > { %v3758_v46 = vpop.f32.mrf.mxu0  ;;  %v3184_v48 = vadd.f32 %v2984_v18, %v2736_v32  ;;  %3887 = vlog2.f32 %v3021_v42  ;;  %v3039_v50 = vadd.f32 1.0, %v5195_v47  ;;  %v3015_v63 = vmul.f32 -0.5, %v5186_v30 }
 0x459   : > { %v3880_v10 = vpop.eup %3879  ;;  %3217 = vst [vmem:[%s5051_s12 + $0x58] sm:$0xff] %v3185_v39  ;;  %3889 = vlog2.f32 %v3012_v40  ;;  %v5216_v8 = vadd.f32 %v3758_v46, %v4982_v19  ;;  %v3042_v14 = vmul.f32 -0.5, %v5195_v47  ;;  %v2810_v32 = vsub.f32 0.0, %v2778_v7 }
 0x45a   : > { %3216 = vst [vmem:[%s5051_s12 + $0x50] sm:$0xff] %v3184_v48  ;;  %v3005_v36 = vmul.f32 0.6931472, %v3880_v10  ;;  %3891 = vlog2.f32 %v3039_v50  ;;  %v2677_v0 = vpop.f32.mrf.mxu0  ;;  %v3025_v17 = vadd.f32 1.0, %v3024_v29  ;;  %v3018_v53 = vand.u32 2147483647, %v5186_v30 }
 0x45b   : > { %v3882_v1 = vpop.eup %3881  ;;  %3893 = vpow2.f32 %v2858_v52  ;;  %v5219_v12 = vadd.f32 %v4982_v19, %v2677_v0  ;;  %v2862_v54 = vmul.f32 1.442695, %v2810_v32  ;;  %v2781_v23 = vand.u32 2147483647, %v5216_v8 }
 0x45c   : > { %v3011_v45 = vsel %vm3010_vm13, %v3008_v59, %v3005_v36  ;;  %v2996_v27 = vmul.f32 0.6931472, %v3882_v1  ;;  %3895 = vpow2.f32 %v2864_v43  ;;  %v5221_v34 = vpop.eup %3883  ;;  %v3016_v9 = vadd.f32 1.0, %v3015_v63 }
 0x45d   : > { %v3187_v5 = vadd.f32 %v3011_v45, %v2739_v33  ;;  %v3030_v20 = vadd.f32 1.0, %v5221_v34  ;;  %v2743_v25 = vmax.f32 %v5119_v35, 0.0  ;;  %v2780_v26 = vand.u32 2147483647, %v5219_v12 }
 0x45e   : > { %v3002_v58 = vsel %vm5207_vm14, %v2999_v4, %v2996_v27  ;;  %v5232_v24 = vpop.eup %3885  ;;  %vm5237_vm15 = vcmp.lt.f32.partialorder %v3027_v13, 0.0004427343  ;;  %v3043_v2 = vadd.f32 1.0, %v3042_v14  ;;  %v3026_v60 = vmul.f32 %v5182_v55, %v3025_v17 }
 0x45f   : > { %3219 = vst [vmem:[%s5051_s12 + $0x68] sm:$0xff] %v3187_v5  ;;  %v3186_v16 = vadd.f32 %v3002_v58, %v2738_v44  ;;  %3897 = vlog2.f32 %v3030_v20  ;;  %v3057_v37 = vadd.f32 1.0, %v5232_v24  ;;  %v2813_v38 = vsub.f32 0.0, %v2781_v23 }
 0x460   : > { %v3761_v15 = vpop.f32.mrf.mxu0  ;;  %3899 = vpow2.f32 %v2862_v54  ;;  %v2812_v42 = vsub.f32 0.0, %v2780_v26  ;;  %vm5246_vm0 = vcmp.lt.f32.partialorder %v3018_v53, 0.0004427343  ;;  %v3045_v40 = vand.u32 2147483647, %v5195_v47 }
 0x461   : > { %3218 = vst [vmem:[%s5051_s12 + $0x60] sm:$0xff] %v3186_v16  ;;  %v5244_v39 = vadd.f32 %v3761_v15, %v4982_v19  ;;  %3901 = vlog2.f32 %v3057_v37  ;;  %v3017_v55 = vmul.f32 %v5186_v30, %v3016_v9  ;;  %v2868_v31 = vmul.f32 1.442695, %v2813_v38 }
 0x462   : > { %v2687_v28 = vpop.f32.mrf.mxu0  ;;  %v2866_v49 = vmul.f32 1.442695, %v2812_v42  ;;  %v3044_v33 = vmul.f32 %v5195_v47, %v3043_v2  ;;  %v3033_v50 = vmul.f32 -0.5, %v5221_v34  ;;  %v3060_v62 = vmul.f32 -0.5, %v5232_v24 }
 0x463   : > { %v5252_v41 = vadd.f32 %v4982_v19, %v2687_v28  ;;  %v2783_v36 = vand.u32 2147483647, %v5244_v39  ;;  %3903 = vpow2.f32 %v2868_v31  ;;  %vm3046_vm1 = vcmp.lt.f32.partialorder %v3045_v40, 0.0004427343 }
 0x464   : > { %3905 = vpow2.f32 %v2866_v49  ;;  %v3034_v63 = vadd.f32 1.0, %v3033_v50  ;;  %v3036_v13 = vand.u32 2147483647, %v5221_v34  ;;  %v3061_v14 = vadd.f32 1.0, %v3060_v62 }
 0x465   : > { %v3888_v35 = vpop.eup %3887  ;;  %v2782_v52 = vand.u32 2147483647, %v5252_v41  ;;  %v2815_v29 = vsub.f32 0.0, %v2783_v36  ;;  %v3063_v20 = vand.u32 2147483647, %v5232_v24 }
 0x466   : > { %v3890_v46 = vpop.eup %3889  ;;  %v3023_v48 = vmul.f32 0.6931472, %v3888_v35  ;;  %vm3037_vm2 = vcmp.lt.f32.partialorder %v3036_v13, 0.0004427343  ;;  %v3062_v28 = vmul.f32 %v5232_v24, %v3061_v14  ;;  %v2745_v24 = vmax.f32 %v5149_v57, 0.0 }
 0x467   : > { %v3014_v10 = vmul.f32 0.6931472, %v3890_v46  ;;  %v3892_v59 = vpop.eup %3891  ;;  %v2814_v43 = vsub.f32 0.0, %v2782_v52  ;;  %v2872_v32 = vmul.f32 1.442695, %v2815_v29 }
 0x468   : > { %v3029_v44 = vsel %vm5237_vm15, %v3026_v60, %v3023_v48  ;;  %v3764_v30 = vpop.f32.mrf.mxu0  ;;  %v3041_v1 = vmul.f32 0.6931472, %v3892_v59  ;;  %v5266_v45 = vpop.eup %3893  ;;  %vm3064_vm3 = vcmp.lt.f32.partialorder %v3063_v20, 0.0004427343 }
 0x469   : > { %v3189_v0 = vadd.f32 %v3029_v44, %v2741_v61  ;;  %v3020_v47 = vsel %vm5246_vm0, %v3017_v55, %v3014_v10  ;;  %v5268_v5 = vpop.eup %3895  ;;  %v3048_v7 = vadd.f32 1.0, %v5266_v45  ;;  %v5273_v22 = vadd.f32 %v3764_v30, %v4982_v19 }
 0x46a   : > { %v3188_v4 = vadd.f32 %v3020_v47, %v2740_v6  ;;  %v3047_v27 = vsel %vm3046_vm1, %v3044_v33, %v3041_v1  ;;  %v3075_v58 = vadd.f32 1.0, %v5268_v5  ;;  %v2697_v15 = vpop.f32.mrf.mxu0  ;;  %v2870_v16 = vmul.f32 1.442695, %v2814_v43 }
 0x46b   : > { %3221 = vst [vmem:[%s5051_s12 + $0x78] sm:$0xff] %v3189_v0  ;;  %v3191_v61 = vadd.f32 %v3047_v27, %v2743_v25  ;;  %3907 = vlog2.f32 %v3048_v7  ;;  %v2742_v6 = vmax.f32 %v5136_v51, 0.0  ;;  %v2785_v53 = vand.u32 2147483647, %v5273_v22 }
 0x46c   : > { %3220 = vst [vmem:[%s5051_s12 + $0x70] sm:$0xff] %v3188_v4  ;;  %3909 = vlog2.f32 %v3075_v58  ;;  %v3898_v17 = vpop.eup %3897  ;;  %v3035_v25 = vmul.f32 %v5221_v34, %v3034_v63  ;;  %v5286_v26 = vadd.f32 %v4982_v19, %v2697_v15  ;;  %v3051_v60 = vmul.f32 -0.5, %v5266_v45 }
 0x46d   : > { %3223 = vst [vmem:[%s5051_s12 + $0x88] sm:$0xff] %v3191_v61  ;;  %3911 = vpow2.f32 %v2872_v32  ;;  %v5282_v23 = vpop.eup %3899  ;;  %v3032_v9 = vmul.f32 0.6931472, %v3898_v17  ;;  %v2817_v21 = vsub.f32 0.0, %v2785_v53  ;;  %v3078_v18 = vmul.f32 -0.5, %v5268_v5 }
 0x46e   : > { %3913 = vpow2.f32 %v2870_v16  ;;  %v3066_v51 = vadd.f32 1.0, %v5282_v23  ;;  %v3902_v2 = vpop.eup %3901  ;;  %v2784_v38 = vand.u32 2147483647, %v5286_v26  ;;  %v3054_v49 = vand.u32 2147483647, %v5266_v45 }
 0x46f   : > { %v3038_v37 = vsel %vm3037_vm2, %v3035_v25, %v3032_v9  ;;  %v3059_v35 = vmul.f32 0.6931472, %v3902_v2  ;;  %v2876_v46 = vmul.f32 1.442695, %v2817_v21  ;;  %v3081_v36 = vand.u32 2147483647, %v5268_v5 }
 0x470   : > { %v3767_v54 = vpop.f32.mrf.mxu0  ;;  %v3190_v34 = vadd.f32 %v3038_v37, %v2742_v6  ;;  %3915 = vlog2.f32 %v3066_v51  ;;  %v2816_v48 = vsub.f32 0.0, %v2784_v38  ;;  %v5297_v55 = vpop.eup %3903  ;;  %v3052_v44 = vadd.f32 1.0, %v3051_v60 }
 0x471   : > { %v5293_v42 = vadd.f32 %v3767_v54, %v4982_v19  ;;  %v3065_v31 = vsel %vm3064_vm3, %v3062_v28, %v3059_v35  ;;  %v5302_v33 = vpop.eup %3905  ;;  %v3093_v59 = vadd.f32 1.0, %v5297_v55  ;;  %v3079_v62 = vadd.f32 1.0, %v3078_v18 }
 0x472   : > { %v2707_v40 = vpop.f32.mrf.mxu0  ;;  %3222 = vst [vmem:[%s5051_s12 + $0x80] sm:$0xff] %v3190_v34  ;;  %v3193_v50 = vadd.f32 %v3065_v31, %v2745_v24  ;;  %v3084_v52 = vadd.f32 1.0, %v5302_v33  ;;  %3917 = vpow2.f32 %v2876_v46  ;;  %v3069_v30 = vmul.f32 -0.5, %v5282_v23 }
 0x473   : > { %v2787_v10 = vand.u32 2147483647, %v5293_v42  ;;  %v5307_v57 = vadd.f32 %v4982_v19, %v2707_v40  ;;  %3919 = vlog2.f32 %v3093_v59  ;;  %v2874_v0 = vmul.f32 1.442695, %v2816_v48 }
 0x474   : > { %3225 = vst [vmem:[%s5051_s12 + $0x98] sm:$0xff] %v3193_v50  ;;  %v2744_v1 = vmax.f32 %v5162_v11, 0.0  ;;  %3921 = vlog2.f32 %v3084_v52  ;;  %vm5313_vm4 = vcmp.lt.f32.partialorder %v3054_v49, 0.0004427343  ;;  %v2747_v27 = vmax.f32 %v5165_v3, 0.0 }
 0x475   : > { %v2819_v4 = vsub.f32 0.0, %v2787_v10  ;;  %3923 = vpow2.f32 %v2874_v0  ;;  %v2786_v7 = vand.u32 2147483647, %v5307_v57  ;;  %v3053_v58 = vmul.f32 %v5266_v45, %v3052_v44 }
 0x476   : > { %v3080_v13 = vmul.f32 %v5268_v5, %v3079_v62  ;;  %vm5321_vm5 = vcmp.lt.f32.partialorder %v3081_v36, 0.0004427343  ;;  %v3070_v15 = vadd.f32 1.0, %v3069_v30  ;;  %v3072_v16 = vand.u32 2147483647, %v5282_v23 }
 0x477   : > { %v2818_v3 = vsub.f32 0.0, %v2786_v7  ;;  %v3096_v5 = vmul.f32 -0.5, %v5297_v55  ;;  %v2880_v53 = vmul.f32 1.442695, %v2819_v4  ;;  %v3087_v21 = vmul.f32 -0.5, %v5302_v33 }
 0x478   : > { %v3770_v47 = vpop.f32.mrf.mxu0  ;;  %v3908_v29 = vpop.eup %3907  ;;  %v2746_v60 = vmax.f32 %v5201_v56, 0.0  ;;  %v3071_v35 = vmul.f32 %v5282_v23, %v3070_v15  ;;  %v3099_v18 = vand.u32 2147483647, %v5297_v55  ;;  %vm3073_vm6 = vcmp.lt.f32.partialorder %v3072_v16, 0.0004427343 }
 0x479   : > { %v3910_v61 = vpop.eup %3909  ;;  %v3050_v63 = vmul.f32 0.6931472, %v3908_v29  ;;  %v5338_v28 = vadd.f32 %v3770_v47, %v4982_v19  ;;  %v2878_v38 = vmul.f32 1.442695, %v2818_v3  ;;  %v3097_v40 = vadd.f32 1.0, %v3096_v5 }
 0x47a   : > { %v5325_v14 = vpop.eup %3911  ;;  %v3077_v32 = vmul.f32 0.6931472, %v3910_v61  ;;  %v2717_v17 = vpop.f32.mrf.mxu0  ;;  %v3088_v46 = vadd.f32 1.0, %v3087_v21  ;;  %v3090_v49 = vand.u32 2147483647, %v5302_v33  ;;  %v2749_v50 = vmax.f32 %v5216_v8, 0.0 }
 0x47b   : > { %v5328_v6 = vpop.eup %3913  ;;  %v3056_v45 = vsel %vm5313_vm4, %v3053_v58, %v3050_v63  ;;  %v3111_v20 = vadd.f32 1.0, %v5325_v14  ;;  %v5342_v2 = vadd.f32 %v4982_v19, %v2717_v17  ;;  %v2789_v19 = vand.u32 2147483647, %v5338_v28 }
 0x47c   : > { %v3192_v54 = vadd.f32 %v3056_v45, %v2744_v1  ;;  %v3083_v9 = vsel %vm5321_vm5, %v3080_v13, %v3077_v32  ;;  %v3102_v25 = vadd.f32 1.0, %v5328_v6  ;;  %vm5355_vm7 = vcmp.lt.f32.partialorder %v3099_v18, 0.0004427343 }
 0x47d   : > { %v3195_v51 = vadd.f32 %v3083_v9, %v2747_v27  ;;  %3925 = vlog2.f32 %v3111_v20  ;;  %v3916_v37 = vpop.eup %3915  ;;  %v2788_v48 = vand.u32 2147483647, %v5342_v2  ;;  %v2821_v10 = vsub.f32 0.0, %v2789_v19 }
 0x47e   : > { %3224 = vst [vmem:[%s5051_s12 + $0x90] sm:$0xff] %v3192_v54  ;;  %3927 = vlog2.f32 %v3102_v25  ;;  %v3068_v34 = vmul.f32 0.6931472, %v3916_v37  ;;  %v3114_v59 = vmul.f32 -0.5, %v5325_v14  ;;  %v3098_v30 = vmul.f32 %v5297_v55, %v3097_v40 }
 0x47f   : > { %3227 = vst [vmem:[%s5051_s12 + $0xa8] sm:$0xff] %v3195_v51  ;;  %3929 = vpow2.f32 %v2880_v53  ;;  %v5351_v56 = vpop.eup %3917  ;;  %v3105_v0 = vmul.f32 -0.5, %v5328_v6  ;;  %v2884_v47 = vmul.f32 1.442695, %v2821_v10  ;;  %v3089_v8 = vmul.f32 %v5302_v33, %v3088_v46 }
 0x480   : > { %3931 = vpow2.f32 %v2878_v38  ;;  %v3074_v24 = vsel %vm3073_vm6, %v3071_v35, %v3068_v34  ;;  %v3920_v23 = vpop.eup %3919  ;;  %v3129_v44 = vadd.f32 1.0, %v5351_v56  ;;  %v2820_v29 = vsub.f32 0.0, %v2788_v48 }
 0x481   : > { %v3194_v31 = vadd.f32 %v3074_v24, %v2746_v60  ;;  %v3922_v62 = vpop.eup %3921  ;;  %v3095_v52 = vmul.f32 0.6931472, %v3920_v23  ;;  %v2748_v27 = vmax.f32 %v5219_v12, 0.0  ;;  %vm3091_vm8 = vcmp.lt.f32.partialorder %v3090_v49, 0.0004427343 }
 0x482   : > { %v5364_v1 = vpop.eup %3923  ;;  %v3086_v4 = vmul.f32 0.6931472, %v3922_v62  ;;  %3933 = vlog2.f32 %v3129_v44  ;;  %v3115_v63 = vadd.f32 1.0, %v3114_v59  ;;  %v3117_v13 = vand.u32 2147483647, %v5325_v14 }
 0x483   : > { %3226 = vst [vmem:[%s5051_s12 + $0xa0] sm:$0xff] %v3194_v31  ;;  %v3101_v43 = vsel %vm5355_vm7, %v3098_v30, %v3095_v52  ;;  %v3120_v55 = vadd.f32 1.0, %v5364_v1  ;;  %3935 = vpow2.f32 %v2884_v47  ;;  %v3106_v11 = vadd.f32 1.0, %v3105_v0 }
 0x484   : > { %v3197_v7 = vadd.f32 %v3101_v43, %v2749_v50  ;;  %v3092_v61 = vsel %vm3091_vm8, %v3089_v8, %v3086_v4  ;;  %v3108_v33 = vand.u32 2147483647, %v5328_v6  ;;  %v2882_v32 = vmul.f32 1.442695, %v2820_v29 }
 0x485   : > { %v3196_v58 = vadd.f32 %v3092_v61, %v2748_v27  ;;  %3937 = vlog2.f32 %v3120_v55  ;;  %v3116_v3 = vmul.f32 %v5325_v14, %v3115_v63  ;;  %v3132_v17 = vmul.f32 -0.5, %v5351_v56 }
 0x486   : > { %3229 = vst [vmem:[%s5051_s12 + $0xb8] sm:$0xff] %v3197_v7  ;;  %3939 = vpow2.f32 %v2882_v32  ;;  %v2751_v5 = vmax.f32 %v5244_v39, 0.0  ;;  %vm3118_vm9 = vcmp.lt.f32.partialorder %v3117_v13, 0.0004427343  ;;  %v3107_v53 = vmul.f32 %v5328_v6, %v3106_v11 }
 0x487   : > { %3228 = vst [vmem:[%s5051_s12 + $0xb0] sm:$0xff] %v3196_v58  ;;  %v2750_v25 = vmax.f32 %v5252_v41, 0.0  ;;  %vm3109_vm10 = vcmp.lt.f32.partialorder %v3108_v33, 0.0004427343  ;;  %v3123_v37 = vmul.f32 -0.5, %v5364_v1  ;;  %v3133_v34 = vadd.f32 1.0, %v3132_v17 }
 0x488   : > { %v3135_v39 = vand.u32 2147483647, %v5351_v56  ;;  %v3126_v40 = vand.u32 2147483647, %v5364_v1  ;;  %v2753_v24 = vmax.f32 %v5273_v22, 0.0  ;;  %v2752_v59 = vmax.f32 %v5286_v26, 0.0 }
 0x489   : > { %v3124_v35 = vadd.f32 1.0, %v3123_v37  ;;  %v3134_v41 = vmul.f32 %v5351_v56, %v3133_v34  ;;  %v2755_v43 = vmax.f32 %v5293_v42, 0.0  ;;  %v2754_v61 = vmax.f32 %v5307_v57, 0.0 }
 0x48a   : > { %v3926_v15 = vpop.eup %3925  ;;  %vm3136_vm11 = vcmp.lt.f32.partialorder %v3135_v39, 0.0004427343  ;;  %vm3127_vm12 = vcmp.lt.f32.partialorder %v3126_v40, 0.0004427343 }
 0x48b   : > { %v3928_v16 = vpop.eup %3927  ;;  %v3113_v12 = vmul.f32 0.6931472, %v3926_v15  ;;  %v3125_v50 = vmul.f32 %v5364_v1, %v3124_v35 }
 0x48c   : > { %v3930_v45 = vpop.eup %3929  ;;  %v3104_v20 = vmul.f32 0.6931472, %v3928_v16 }
 0x48d   : > { %v3932_v54 = vpop.eup %3931  ;;  %v3119_v9 = vsel %vm3118_vm9, %v3116_v3, %v3113_v12  ;;  %v3147_v51 = vadd.f32 1.0, %v3930_v45  ;;  %v3150_v31 = vmul.f32 -0.5, %v3930_v45  ;;  %v3153_v30 = vand.u32 2147483647, %v3930_v45 }
 0x48e   : > { %v3199_v21 = vadd.f32 %v3119_v9, %v2751_v5  ;;  %v3110_v14 = vsel %vm3109_vm10, %v3107_v53, %v3104_v20  ;;  %v3138_v60 = vadd.f32 1.0, %v3932_v54  ;;  %v3141_v36 = vmul.f32 -0.5, %v3932_v54 }
 0x48f   : > { %v3198_v38 = vadd.f32 %v3110_v14, %v2750_v25  ;;  %3941 = vlog2.f32 %v3147_v51  ;;  %v3934_v6 = vpop.eup %3933  ;;  %v3151_v22 = vadd.f32 1.0, %v3150_v31  ;;  %v3144_v47 = vand.u32 2147483647, %v3932_v54 }
 0x490   : > { %3231 = vst [vmem:[%s5051_s12 + $0xc8] sm:$0xff] %v3199_v21  ;;  %3943 = vlog2.f32 %v3138_v60  ;;  %v3131_v18 = vmul.f32 0.6931472, %v3934_v6  ;;  %v3936_v19 = vpop.eup %3935  ;;  %v3142_v0 = vadd.f32 1.0, %v3141_v36  ;;  %vm3154_vm13 = vcmp.lt.f32.partialorder %v3153_v30, 0.0004427343 }
 0x491   : > { %3230 = vst [vmem:[%s5051_s12 + $0xc0] sm:$0xff] %v3198_v38  ;;  %v3165_v49 = vadd.f32 1.0, %v3936_v19  ;;  %v3152_v29 = vmul.f32 %v3930_v45, %v3151_v22  ;;  %v3168_v26 = vmul.f32 -0.5, %v3936_v19  ;;  %vm3145_vm14 = vcmp.lt.f32.partialorder %v3144_v47, 0.0004427343 }
 0x492   : > { %v3938_v46 = vpop.eup %3937  ;;  %v3137_v48 = vsel %vm3136_vm11, %v3134_v41, %v3131_v18  ;;  %v3143_v55 = vmul.f32 %v3932_v54, %v3142_v0  ;;  %v3171_v32 = vand.u32 2147483647, %v3936_v19  ;;  %v2757_v3 = vmax.f32 %v5338_v28, 0.0 }
 0x493   : > { %v3201_v10 = vadd.f32 %v3137_v48, %v2753_v24  ;;  %v3122_v23 = vmul.f32 0.6931472, %v3938_v46  ;;  %3945 = vlog2.f32 %v3165_v49  ;;  %v3940_v56 = vpop.eup %3939  ;;  %v3169_v11 = vadd.f32 1.0, %v3168_v26 }
 0x494   : > { %v3156_v52 = vadd.f32 1.0, %v3940_v56  ;;  %v3159_v33 = vmul.f32 -0.5, %v3940_v56  ;;  %vm3172_vm15 = vcmp.lt.f32.partialorder %v3171_v32, 0.0004427343  ;;  %v3162_v57 = vand.u32 2147483647, %v3940_v56 }
 0x495   : > { %3233 = vst [vmem:[%s5051_s12 + $0xd8] sm:$0xff] %v3201_v10  ;;  %v3128_v44 = vsel %vm3127_vm12, %v3125_v50, %v3122_v23  ;;  %v3170_v16 = vmul.f32 %v3936_v19, %v3169_v11  ;;  %v2756_v54 = vmax.f32 %v5342_v2, 0.0 }
 0x496   : > { %v3200_v62 = vadd.f32 %v3128_v44, %v2752_v59  ;;  %3947 = vlog2.f32 %v3156_v52  ;;  %v3160_v12 = vadd.f32 1.0, %v3159_v33  ;;  %vm3163_vm0 = vcmp.lt.f32.partialorder %v3162_v57, 0.0004427343 }
 0x498   : > { %3232 = vst [vmem:[%s5051_s12 + $0xd0] sm:$0xff] %v3200_v62  ;;  %v3161_v53 = vmul.f32 %v3940_v56, %v3160_v12 }
 0x49c   : > { %v3942_v4 = vpop.eup %3941 }
 0x49d   : > { %v3944_v8 = vpop.eup %3943  ;;  %v3149_v1 = vmul.f32 0.6931472, %v3942_v4 }
 0x49e   : > { %v3140_v27 = vmul.f32 0.6931472, %v3944_v8 }
 0x49f   : > { %v3155_v7 = vsel %vm3154_vm13, %v3152_v29, %v3149_v1 }
 0x4a0   : > { %v3203_v63 = vadd.f32 %v3155_v7, %v2755_v43  ;;  %v3146_v58 = vsel %vm3145_vm14, %v3143_v55, %v3140_v27  ;;  %v3946_v15 = vpop.eup %3945 }
 0x4a1   : > { %v3202_v13 = vadd.f32 %v3146_v58, %v2754_v61  ;;  %v3167_v42 = vmul.f32 0.6931472, %v3946_v15 }
 0x4a2   : > { %3235 = vst [vmem:[%s5051_s12 + $0xe8] sm:$0xff] %v3203_v63 }
 0x4a3   : > { %3234 = vst [vmem:[%s5051_s12 + $0xe0] sm:$0xff] %v3202_v13  ;;  %v3173_v17 = vsel %vm3172_vm15, %v3170_v16, %v3167_v42  ;;  %v3948_v45 = vpop.eup %3947 }
 0x4a4   : > { %v3205_v5 = vadd.f32 %v3173_v17, %v2757_v3  ;;  %v3158_v20 = vmul.f32 0.6931472, %v3948_v45 }
 0x4a6   : > { %3237 = vst [vmem:[%s5051_s12 + $0xf8] sm:$0xff] %v3205_v5  ;;  %v3164_v9 = vsel %vm3163_vm0, %v3161_v53, %v3158_v20 }
 0x4a7   : > { %v3204_v28 = vadd.f32 %v3164_v9, %v2756_v54 }
 0x4a9   : > { %3236 = vst [vmem:[%s5051_s12 + $0xf0] sm:$0xff] %v3204_v28 }
 0x4aa   : > { %3962 = shalt.err (!%p3959_p3)
}
 0x4ab   : > { %s3963_s16 = scalar_lea.hbm %s5403_s13, 4096  ;;  %s3967_s30 = scalar_lea.hbm %s5461_s11, 8192 }
 0x4ac   : > { %p3964_p4 = scmp.ne.s32.totalorder %s5403_s13, %s3963_s16  ;;  %p3968_p9 = scmp.lt.s32.totalorder %s5403_s13, %s5461_s11 }
 0x4ad   : > { %p3969_p10 = scmp.lt.s32.totalorder %s3967_s30, %s3963_s16 }
 0x4ae   : > { %p3965_p7 = pnand %p3964_p4, %p4113_p5 }
 0x4af   : > { %p3970_p11 = por %p3969_p10, %p3968_p9 }
 0x4b0   : > { %p3966_p8 = pneg %p3965_p7 }
 0x4b2   : > { %p3971_p12 = pnand %p3970_p11, %p3966_p8 }
 0x4b4   : > { %3974 = shalt.err (!%p3971_p12)
}
 0x4b5   : > { %s4013_s15 = smov 128   ;;  %s4014_s22 = smov 8  }
 0x4b6   : > { %3779 = dma.vmem_to_hbm [thread:$0]  (%p4113_p5), %s5405_s25, 4096, %s5403_s13, %s5410_s21, %s4013_s15, %s4013_s15, %s4014_s22  }
 0x4b7 PF: > { %p3785_p13 = scmp.ge.s32.totalorder %s4009_s20, 2  ;;  %s3267_s24 = sand.u32 1, %s3997_s17  }
 0x4b8   : > { %s3268_s0 = scalar_lea.sflag [#allocation3], %s3267_s24 }
 0x4b9   : > { %p3782_p0 = pnand %p3785_p13, %p4117_p6 }
 0x4bb   : > { %p3783_p1 = pneg %p3782_p0 }
 0x4bd   : > { %3992 = dma.done.wait (%p3783_p1), %s3268_s0, 4096  }
 0x4be   : > { %3994 = vsyncadd (%p3783_p1), %s3268_s0, 4294963200  ;;  %p21_p2 = scmp.ge.s32.totalorder %s4100_s23, 4   ;;  %s5486_s17 = smov %s4001_s18 }
 0x4bf   : > { %s5487_s18 = smov %s4005_s19  ;;  %s5488_s19 = smov %s4111_s26 }
 0x4c0   : > { %s5489_s20 = smov %s4100_s23  ;;  %23 = sbr.rel (!%p21_p2) target bundleno = 5 (0x5), region = 99 }
 0x4c5   :  { %3273 = vsyncpa [#allocation3], 1 }
 0x4c6   :  { %3275 = vsyncpa [#allocation3 + $0x1], 1 }

// kernel: tpu_custom_call.1
= control target key start
LH: loop header
LB: loop body
LE: loop exit
PB: predicated region body
PF: predicated region fallthrough
CT: control target
= control target key end

     0   :  { %s5450_s0 = inlined_call_operand.vmem [shape: f32[512,32], index: 0, kind: input, shape index: {}]   ;;  %s5451_s1 = inlined_call_operand.vmem [shape: f32[32,32], index: 1, kind: input, shape index: {}]   ;;  %s5452_s2 = inlined_call_operand.vmem [shape: f32[1,32], index: 2, kind: input, shape index: {}]   ;;  %s5453_s3 = inlined_call_operand.vmem [shape: f32[32,512], index: 3, kind: input, shape index: {}]   ;;  %s5454_s4 = inlined_call_operand.vmem [shape: f32[1,512], index: 4, kind: input, shape index: {}]   ;;  %s5455_s5 = inlined_call_operand.vmem [shape: f32[512,128], index: 5, kind: input, shape index: {}]   ;;  %s5456_s6 = inlined_call_operand.vmem [shape: f32[1,128], index: 6, kind: input, shape index: {}]   ;;  %s5457_s7 = inlined_call_operand.vmem [shape: f32[128,32], index: 7, kind: input, shape index: {}]   ;;  %s5458_s8 = inlined_call_operand.vmem [shape: f32[1,32], index: 8, kind: input, shape index: {}]   ;;  %s5459_s9 = inlined_call_operand.vmem [shape: f32[32,128], index: 9, kind: input, shape index: {}]   ;;  %s5460_s10 = inlined_call_operand.vmem [shape: f32[1,128], index: 10, kind: input, shape index: {}]   ;;  %s5461_s11 = inlined_call_operand.hbm [shape: f32[512,128], index: 11, kind: output, shape index: {}]  }
   0x1   :  { %5462 = sst [smem:[#allocation5_spill]] %s5450_s0 }
   0x2   :  { %16 = vsyncpa [#allocation3], 0 }
   0x3   :  { %18 = vsyncpa [#allocation3 + $0x1], 0  ;;  %s4075_s17 = smov 0   ;;  %s4077_s18 = smov 0  }
   0x4   :  { %s4079_s19 = smov 0   ;;  %s4081_s20 = smov 0  }
   0x5 LB: > { %s4096_s21 = sadd.s32 4294967295, %s4009_s20   ;;  %s3314_s22 = sadd.s32 4294967294, %s4009_s20   ;;  %s4009_s20 = sphi %s4081_s20, %s5489_s20   ;;  %s4005_s19 = sphi %s4079_s19, %s5488_s19   ;;  %s4001_s18 = sphi %s4077_s18, %s5487_s18   ;;  %s3997_s17 = sphi %s4075_s17, %s5486_s17  }
   0x6   : > { %s4100_s23 = sadd.s32 1, %s4009_s20   ;;  %s267_s24 = sadd.s32 1, %s4005_s19 }
   0x7   : > { %s264_s25 = ssub.s32 %s4009_s20, %s4100_s23  ;;  %p277_p0 = scmp.ne.s32.totalorder %s4005_s19, %s4001_s18 }
   0x8   : > { %p265_p1 = scmp.eq.s32.totalorder %s264_s25, 0  ;;  %p278_p2 = scmp.eq.s32.totalorder %s4096_s21, 1 }
   0x9   : > { %p283_p3 = scmp.ne.s32.totalorder %s4001_s18, %s3997_s17  ;;  %p284_p4 = scmp.eq.s32.totalorder %s3314_s22, 1 }
   0xa   : > { %s4111_s26 = scalar_select %p265_p1, %s4005_s19, %s267_s24  }
   0xb   : > { %p4113_p5 = por %p278_p2, %p277_p0  ;;  %p4117_p6 = por %p284_p4, %p283_p3 }
   0xc   : > { %p3317_p7 = scmp.ge.s32.totalorder %s4009_s20, 1  ;;  %p341_p8 = scmp.lt.s32.totalorder %s4009_s20, 3 }
   0xe   : > { %p342_p9 = pnand %p3317_p7, %p341_p8 }
   0xf   : > { %s3319_s14 = sshll.u32 (!%p342_p9), %s4096_s21, 5  ;;  %s5465_s0 = sld [smem:[#allocation5_spill]] (!%p342_p9) }
  0x10   : > { %345 = sbr.rel (%p342_p9) target bundleno = 1207 (0x4b7), region = 64  ;;  %p382_p10 = scmp.lt.s32.totalorder (!%p342_p9), %s3319_s14, 63 }
  0x11   : > { %s378_s16 = sand.u32 (!%p342_p9), 1, %s4001_s18   ;;  %s3458_s24 = sshll.u32 (!%p342_p9), %s4096_s21, 12 }
  0x12   : > { %s3318_s22 = sshll.u32 (!%p342_p9), %s378_s16, 8  ;;  %s5403_s13 = scalar_lea.hbm (!%p342_p9), %s5461_s11, %s3458_s24 }
  0x13   : > { %s5410_s21 = scalar_lea.sflag (!%p342_p9), [#allocation3], %s378_s16 }
  0x15   : > { %v423_v0 = vld [vmem:[%s5451_s1 + $0x18] sm:$0xff]  ;;  %v422_v1 = vld [vmem:[%s5451_s1 + $0x10] sm:$0xff]  ;;  %v421_v2 = vld [vmem:[%s5451_s1 + $0x8] sm:$0xff]  ;;  %s5491_s14 = smov (!%p382_p10, %s3319_s14), 63  ;;  %vm431_vm0 = vcmask 261120   ;;  %v4011_v52 = vmov 0.0  }
  0x16   : > { %3579 = vmatprep.subr.mxu0 %v423_v0  ;;  %3771 = vmatprep.subr.mxu1 %v423_v0  ;;  %v420_v3 = vld [vmem:[%s5451_s1] sm:$0xff]  ;;  %s3320_s25 = sshll.u32 %s5491_s14, 3  ;;  %v798_v4 = vld [vmem:[%s5453_s3 + $0x68] sm:$0xff]  ;;  %v800_v8 = vld [vmem:[%s5453_s3 + $0x78] sm:$0xff]  ;;  %s4012_s14 = smov [#allocation2]  }
  0x17   : > { %3580 = vmatpush3.msra.mxu0 %v423_v0  ;;  %3775 = vmatpush3.msra.mxu1 %v423_v0  ;;  %s4139_s12 = scalar_lea.vmem %s5465_s0, %s3320_s25  ;;  %v799_v9 = vld [vmem:[%s5453_s3 + $0x70] sm:$0xff]  ;;  %v797_v14 = vld [vmem:[%s5453_s3 + $0x60] sm:$0xff]  ;;  %v794_v16 = vld [vmem:[%s5453_s3 + $0x48] sm:$0xff] }
  0x18   : > { %3581 = vmatprep.subr.mxu0 %v422_v1  ;;  %3772 = vmatprep.subr.mxu1 %v422_v1  ;;  %v388_v5 = vld [vmem:[%s4139_s12] sm:$0xff]  ;;  %v389_v6 = vld [vmem:[%s4139_s12 + $0x8] sm:$0xff]  ;;  %v390_v7 = vld [vmem:[%s4139_s12 + $0x10] sm:$0xff] }
  0x19   : > { %3582 = vmatpush3.msra.mxu0 %v422_v1  ;;  %3776 = vmatpush3.msra.mxu1 %v422_v1  ;;  %v391_v10 = vld [vmem:[%s4139_s12 + $0x18] sm:$0xff]  ;;  %v392_v11 = vld [vmem:[%s4139_s12 + $0x20] sm:$0xff]  ;;  %v405_v13 = vld [vmem:[%s4139_s12 + $0x88] sm:$0xff] }
  0x1a   : > { %3583 = vmatprep.subr.mxu0 %v421_v2  ;;  %3773 = vmatprep.subr.mxu1 %v421_v2  ;;  %v404_v12 = vld [vmem:[%s4139_s12 + $0x80] sm:$0xff]  ;;  %v406_v15 = vld [vmem:[%s4139_s12 + $0x90] sm:$0xff]  ;;  %v796_v17 = vld [vmem:[%s5453_s3 + $0x58] sm:$0xff] }
  0x1b   : > { %3584 = vmatpush3.msra.mxu0 %v421_v2  ;;  %3777 = vmatpush3.msra.mxu1 %v421_v2  ;;  %v393_v18 = vld [vmem:[%s4139_s12 + $0x28] sm:$0xff]  ;;  %v793_v19 = vld [vmem:[%s5453_s3 + $0x40] sm:$0xff]  ;;  %v394_v20 = vld [vmem:[%s4139_s12 + $0x30] sm:$0xff] }
  0x1c   : > { %3585 = vmatprep.subr.mxu0 %v420_v3  ;;  %3774 = vmatprep.subr.mxu1 %v420_v3  ;;  %v407_v21 = vld [vmem:[%s4139_s12 + $0x98] sm:$0xff]  ;;  %v408_v22 = vld [vmem:[%s4139_s12 + $0xa0] sm:$0xff]  ;;  %v795_v23 = vld [vmem:[%s5453_s3 + $0x50] sm:$0xff] }
  0x1d   : > { %3586 = vmatpush3.msra.mxu0 %v420_v3  ;;  %3587 = vmatprep.mubr.msk.f32.mxu0 %vm431_vm0, %v388_v5  ;;  %v790_v24 = vld [vmem:[%s5453_s3 + $0x28] sm:$0xff]  ;;  %v792_v25 = vld [vmem:[%s5453_s3 + $0x38] sm:$0xff]  ;;  %v789_v27 = vld [vmem:[%s5453_s3 + $0x20] sm:$0xff] }
  0x1e   : > { %3588 = vmatmul.mubr.msk.f32.vlgmr.msra.gmra.mxu0 %vm431_vm0, %v389_v6  ;;  %3778 = vmatpush3.msra.mxu1 %v420_v3  ;;  %v395_v26 = vld [vmem:[%s4139_s12 + $0x38] sm:$0xff]  ;;  %v396_v28 = vld [vmem:[%s4139_s12 + $0x40] sm:$0xff]  ;;  %v409_v29 = vld [vmem:[%s4139_s12 + $0xa8] sm:$0xff] }
  0x1f   : > { %3590 = vmatprep.mubr.msk.f32.mxu0 %vm431_vm0, %v390_v7  ;;  %943 = vmatprep.subr.mxu1 %v798_v4  ;;  %v410_v30 = vld [vmem:[%s4139_s12 + $0xb0] sm:$0xff]  ;;  %v786_v32 = vld [vmem:[%s5453_s3 + $0x8] sm:$0xff]  ;;  %v785_v34 = vld [vmem:[%s5453_s3] sm:$0xff] }
  0x20   : > { %1200 = vmatprep.subr.mxu0 %v800_v8  ;;  %3611 = vmatprep.mubr.msk.f32.mxu1 %vm431_vm0, %v404_v12  ;;  %v791_v31 = vld [vmem:[%s5453_s3 + $0x30] sm:$0xff]  ;;  %v397_v33 = vld [vmem:[%s4139_s12 + $0x48] sm:$0xff]  ;;  %v411_v36 = vld [vmem:[%s4139_s12 + $0xb8] sm:$0xff] }
  0x21   : > { %1201 = vmatpush1.msra.mxu0 %v799_v9  ;;  %3612 = vmatmul.mubr.msk.f32.vlgmr.msra.gmra.mxu1 %vm431_vm0, %v405_v13  ;;  %v398_v35 = vld [vmem:[%s4139_s12 + $0x50] sm:$0xff]  ;;  %v412_v37 = vld [vmem:[%s4139_s12 + $0xc0] sm:$0xff]  ;;  %v399_v38 = vld [vmem:[%s4139_s12 + $0x58] sm:$0xff] }
  0x22   : > { %3591 = vmatmul.mubr.msk.f32.gmra.mxu0 %vm431_vm0, %v391_v10  ;;  %3614 = vmatprep.mubr.msk.f32.mxu1 %vm431_vm0, %v406_v15  ;;  %v400_v39 = vld [vmem:[%s4139_s12 + $0x60] sm:$0xff]  ;;  %v413_v40 = vld [vmem:[%s4139_s12 + $0xc8] sm:$0xff]  ;;  %v414_v41 = vld [vmem:[%s4139_s12 + $0xd0] sm:$0xff] }
  0x23   : > { %3593 = vmatprep.mubr.msk.f32.mxu0 %vm431_vm0, %v392_v11  ;;  %944 = vmatpush1.msra.mxu1 %v797_v14  ;;  %v401_v42 = vld [vmem:[%s4139_s12 + $0x68] sm:$0xff]  ;;  %v402_v43 = vld [vmem:[%s4139_s12 + $0x70] sm:$0xff]  ;;  %v415_v44 = vld [vmem:[%s4139_s12 + $0xd8] sm:$0xff] }
  0x24   : > { %945 = vmatprep.subr.mxu1 %v794_v16  ;;  %1202 = vmatprep.subr.mxu0 %v796_v17  ;;  %v416_v45 = vld [vmem:[%s4139_s12 + $0xe0] sm:$0xff]  ;;  %v403_v46 = vld [vmem:[%s4139_s12 + $0x78] sm:$0xff]  ;;  %v417_v47 = vld [vmem:[%s4139_s12 + $0xe8] sm:$0xff] }
  0x25   : > { %946 = vmatpush1.msra.mxu1 %v793_v19  ;;  %1203 = vmatpush1.msra.mxu0 %v795_v23  ;;  %v418_v48 = vld [vmem:[%s4139_s12 + $0xf0] sm:$0xff]  ;;  %v419_v49 = vld [vmem:[%s4139_s12 + $0xf8] sm:$0xff]  ;;  %v4260_v54 = vld [vmem:[%s5452_s2] ss:$0 sm:$0xff]  ;;  %s5051_s12 = scalar_lea.vmem [#allocation2], %s3318_s22  ;;  %s3953_s22 = sshll.u32 %s4012_s14, 4  ;;  %s3954_s22 = int_to_ptr.vmem [resolvable:$false] %s3953_s22 }
  0x26   : > { %3594 = vmatmul.mubr.msk.f32.gmra.mxu0 %vm431_vm0, %v393_v18  ;;  %3615 = vmatmul.mubr.msk.f32.gmra.mxu1 %vm431_vm0, %v407_v21  ;;  %v788_v50 = vld [vmem:[%s5453_s3 + $0x18] sm:$0xff]  ;;  %v787_v51 = vld [vmem:[%s5453_s3 + $0x10] sm:$0xff]  ;;  %v1574_v7 = vld [vmem:[%s5455_s5 + $0x68] sm:$0xff]  ;;  %s3252_s25 = sshll.u32 %s5051_s12, 4  ;;  %s3955_s24 = scalar_lea.vmem %s3954_s22, 8192  ;;  %s5405_s25 = int_to_ptr.vmem [resolvable:$true] %s3252_s25 }
  0x27   : > { %3596 = vmatprep.mubr.msk.f32.mxu0 %vm431_vm0, %v394_v20  ;;  %3617 = vmatprep.mubr.msk.f32.mxu1 %vm431_vm0, %v408_v22  ;;  %v1576_v61 = vld [vmem:[%s5455_s5 + $0x78] sm:$0xff]  ;;  %v1575_v2 = vld [vmem:[%s5455_s5 + $0x70] sm:$0xff]  ;;  %v1606_v8 = vld [vmem:[%s5455_s5 + $0x168] sm:$0xff]  ;;  %s3949_s15 = scalar_lea.vmem %s5405_s25, 4096  ;;  %p3956_p0 = scmp.lt.s32.totalorder %s5405_s25, %s3954_s22 }
  0x28   : > { %947 = vmatprep.subr.mxu1 %v790_v24  ;;  %1204 = vmatprep.subr.mxu0 %v792_v25  ;;  %v1608_v62 = vld [vmem:[%s5455_s5 + $0x178] sm:$0xff]  ;;  %v1607_v3 = vld [vmem:[%s5455_s5 + $0x170] sm:$0xff]  ;;  %v1573_v12 = vld [vmem:[%s5455_s5 + $0x60] sm:$0xff]  ;;  %p3950_p11 = scmp.ne.s32.totalorder %s5405_s25, %s3949_s15  ;;  %p3957_p1 = scmp.lt.s32.totalorder %s3955_s24, %s3949_s15 }
  0x29   : > { %948 = vmatpush1.msra.mxu1 %v789_v27  ;;  %1205 = vmatpush1.msra.mxu0 %v791_v31  ;;  %v1605_v13 = vld [vmem:[%s5455_s5 + $0x160] sm:$0xff]  ;;  %v1572_v17 = vld [vmem:[%s5455_s5 + $0x58] sm:$0xff]  ;;  %v1571_v22 = vld [vmem:[%s5455_s5 + $0x50] sm:$0xff] }
  0x2a   : > { %3597 = vmatmul.mubr.msk.f32.gmra.mxu0 %vm431_vm0, %v395_v26  ;;  %3618 = vmatmul.mubr.msk.f32.gmra.mxu1 %vm431_vm0, %v409_v29  ;;  %v1604_v18 = vld [vmem:[%s5455_s5 + $0x158] sm:$0xff]  ;;  %v1603_v23 = vld [vmem:[%s5455_s5 + $0x150] sm:$0xff]  ;;  %v1570_v27 = vld [vmem:[%s5455_s5 + $0x48] sm:$0xff]  ;;  %p3951_p12 = pnand %p3950_p11, %p4113_p5  ;;  %p3958_p2 = por %p3957_p1, %p3956_p0 }
  0x2b   : > { %3599 = vmatprep.mubr.msk.f32.mxu0 %vm431_vm0, %v396_v28  ;;  %3620 = vmatprep.mubr.msk.f32.mxu1 %vm431_vm0, %v410_v30  ;;  %v1602_v28 = vld [vmem:[%s5455_s5 + $0x148] sm:$0xff] }
  0x2c   : > { %949 = vmatprep.subr.mxu1 %v786_v32  ;;  %1206 = vmatprep.subr.mxu0 %v788_v50  ;;  %v1569_v32 = vld [vmem:[%s5455_s5 + $0x40] sm:$0xff]  ;;  %p3952_p13 = pneg %p3951_p12 }
  0x2d   : > { %950 = vmatpush1.msra.mxu1 %v785_v34  ;;  %1207 = vmatpush1.msra.mxu0 %v787_v51 }
  0x2e   : > { %3600 = vmatmul.mubr.msk.f32.gmra.mxu0 %vm431_vm0, %v397_v33  ;;  %3621 = vmatmul.mubr.msk.f32.gmra.mxu1 %vm431_vm0, %v411_v36  ;;  %v1601_v33 = vld [vmem:[%s5455_s5 + $0x140] sm:$0xff]  ;;  %p3959_p3 = pnand %p3958_p2, %p3952_p13 }
  0x2f   : > { %3602 = vmatprep.mubr.msk.f32.mxu0 %vm431_vm0, %v398_v35  ;;  %3623 = vmatprep.mubr.msk.f32.mxu1 %vm431_vm0, %v412_v37  ;;  %v1568_v37 = vld [vmem:[%s5455_s5 + $0x38] sm:$0xff] }
  0x30   : > { %1632 = vmatprep.subr.mxu1 %v4011_v52  ;;  %1857 = vmatprep.subr.mxu0 %v4011_v52 }
  0x32   : > { %3603 = vmatmul.mubr.msk.f32.gmra.mxu0 %vm431_vm0, %v399_v38  ;;  %3624 = vmatmul.mubr.msk.f32.gmra.mxu1 %vm431_vm0, %v413_v40  ;;  %v1600_v38 = vld [vmem:[%s5455_s5 + $0x138] sm:$0xff] }
  0x33   : > { %3605 = vmatprep.mubr.msk.f32.mxu0 %vm431_vm0, %v400_v39  ;;  %3626 = vmatprep.mubr.msk.f32.mxu1 %vm431_vm0, %v414_v41 }
  0x36   : > { %3606 = vmatmul.mubr.msk.f32.gmra.mxu0 %vm431_vm0, %v401_v42  ;;  %3627 = vmatmul.mubr.msk.f32.gmra.mxu1 %vm431_vm0, %v415_v44  ;;  %v1567_v42 = vld [vmem:[%s5455_s5 + $0x30] sm:$0xff] }
  0x37   : > { %3608 = vmatprep.mubr.msk.f32.mxu0 %vm431_vm0, %v402_v43  ;;  %3629 = vmatprep.mubr.msk.f32.mxu1 %vm431_vm0, %v416_v45  ;;  %v1599_v43 = vld [vmem:[%s5455_s5 + $0x130] sm:$0xff] }
  0x3a   : > { %3609 = vmatmul.mubr.msk.f32.gmra.mxu0 %vm431_vm0, %v403_v46  ;;  %3630 = vmatmul.mubr.msk.f32.gmra.mxu1 %vm431_vm0, %v417_v47  ;;  %v1566_v47 = vld [vmem:[%s5455_s5 + $0x28] sm:$0xff] }
  0x3b   : > { %3632 = vmatprep.mubr.msk.f32.mxu1 %vm431_vm0, %v418_v48  ;;  %1240 = vmatprep.mubr.f32.mxu0 %v4011_v52  ;;  %v1598_v48 = vld [vmem:[%s5455_s5 + $0x128] sm:$0xff] }
  0x3e   : > { %3633 = vmatmul.mubr.msk.f32.gmra.mxu1 %vm431_vm0, %v419_v49 }
  0x3f   : > { %983 = vmatprep.mubr.f32.mxu1 %v4011_v52 }
  0xde   : > { %v3589_v53 = vpop.f32.mrf.mxu0 }
  0xdf   : > { %v600_v58 = vadd.f32 %v3589_v53, %v4260_v54  ;;  %v1565_v53 = vld [vmem:[%s5455_s5 + $0x20] sm:$0xff] }
  0xe0   : > { %v594_v55 = vpop.f32.mrf.mxu0 }
  0xe1   : > { %v595_v56 = vadd.f32 %v4260_v54, %v594_v55  ;;  %v754_v63 = vmax.f32 %v600_v58, 0.0  ;;  %v1597_v55 = vld [vmem:[%s5455_s5 + $0x120] sm:$0xff] }
  0xe2   : > { %v3592_v57 = vpop.f32.mrf.mxu0 }
  0xe3   : > { %v753_v59 = vmax.f32 %v595_v56, 0.0  ;;  %v610_v4 = vadd.f32 %v3592_v57, %v4260_v54 }
  0xe4   : > { %v604_v60 = vpop.f32.mrf.mxu0 }
  0xe5   : > { %3354 = vmatmul.mubr.msk.f32.vlgmr.msra.gmra.mxu1 %vm431_vm0, %v753_v59  ;;  %3386 = vmatmul.mubr.msk.f32.vlgmr.msra.gmra.mxu0 %vm431_vm0, %v753_v59  ;;  %v605_v0 = vadd.f32 %v4260_v54, %v604_v60  ;;  %v756_v9 = vmax.f32 %v610_v4, 0.0  ;;  %v1564_v59 = vld [vmem:[%s5455_s5 + $0x18] sm:$0xff] }
  0xe6   : > { %989 = vmatprep.mubr.f32.mxu1 %v4011_v52  ;;  %1246 = vmatprep.mubr.f32.mxu0 %v4011_v52  ;;  %v3595_v1 = vpop.f32.mrf.mxu0  ;;  %v1596_v60 = vld [vmem:[%s5455_s5 + $0x118] sm:$0xff] }
  0xe7   : > { %1633 = vmatpush1.msra.mxu1 %v1576_v61  ;;  %1858 = vmatpush1.msra.mxu0 %v1608_v62  ;;  %v755_v5 = vmax.f32 %v605_v0, 0.0  ;;  %v620_v14 = vadd.f32 %v3595_v1, %v4260_v54  ;;  %v1563_v0 = vld [vmem:[%s5455_s5 + $0x10] sm:$0xff] }
  0xe8   : > { %1634 = vmatprep.subr.mxu1 %v4011_v52  ;;  %1859 = vmatprep.subr.mxu0 %v4011_v52  ;;  %v614_v6 = vpop.f32.mrf.mxu0  ;;  %v1595_v1 = vld [vmem:[%s5455_s5 + $0x110] sm:$0xff] }
  0xe9   : > { %3355 = vmatmul.mubr.msk.f32.gmra.mxu1 %vm431_vm0, %v754_v63  ;;  %3387 = vmatmul.mubr.msk.f32.gmra.mxu0 %vm431_vm0, %v754_v63  ;;  %v615_v10 = vadd.f32 %v4260_v54, %v614_v6  ;;  %v758_v19 = vmax.f32 %v620_v14, 0.0  ;;  %v3613_v63 = vpop.f32.mrf.mxu1  ;;  %v1594_v6 = vld [vmem:[%s5455_s5 + $0x108] sm:$0xff] }
  0xea   : > { %995 = vmatprep.mubr.f32.mxu1 %v4011_v52  ;;  %1252 = vmatprep.mubr.f32.mxu0 %v4011_v52  ;;  %v3598_v11 = vpop.f32.mrf.mxu0 }
  0xeb   : > { %1635 = vmatpush1.msra.mxu1 %v1575_v2  ;;  %1860 = vmatpush1.msra.mxu0 %v1607_v3  ;;  %v757_v15 = vmax.f32 %v615_v10, 0.0  ;;  %v630_v24 = vadd.f32 %v3598_v11, %v4260_v54  ;;  %v674_v4 = vpop.f32.mrf.mxu1  ;;  %v1561_v10 = vld [vmem:[%s5455_s5] sm:$0xff] }
  0xec   : > { %1636 = vmatprep.subr.mxu1 %v4011_v52  ;;  %1861 = vmatprep.subr.mxu0 %v4011_v52  ;;  %v624_v16 = vpop.f32.mrf.mxu0  ;;  %v1593_v11 = vld [vmem:[%s5455_s5 + $0x100] sm:$0xff] }
  0xed   : > { %3356 = vmatmul.mubr.msk.f32.gmra.mxu1 %vm431_vm0, %v755_v5  ;;  %3388 = vmatmul.mubr.msk.f32.gmra.mxu0 %vm431_vm0, %v755_v5  ;;  %v625_v20 = vadd.f32 %v4260_v54, %v624_v16  ;;  %v760_v29 = vmax.f32 %v630_v24, 0.0  ;;  %v1562_v5 = vld [vmem:[%s5455_s5 + $0x8] sm:$0xff]  ;;  %v1624_v16 = vld [vmem:[%s5455_s5 + $0x1f8] sm:$0xff] }
  0xee   : > { %1001 = vmatprep.mubr.f32.mxu1 %v4011_v52  ;;  %1258 = vmatprep.mubr.f32.mxu0 %v4011_v52  ;;  %v3601_v21 = vpop.f32.mrf.mxu0 }
  0xef   : > { %1637 = vmatpush1.msra.mxu1 %v1574_v7  ;;  %1862 = vmatpush1.msra.mxu0 %v1606_v8  ;;  %v759_v25 = vmax.f32 %v625_v20, 0.0  ;;  %v640_v34 = vadd.f32 %v3601_v21, %v4260_v54  ;;  %v675_v8 = vadd.f32 %v4260_v54, %v674_v4  ;;  %v1591_v20 = vld [vmem:[%s5455_s5 + $0xf0] sm:$0xff]  ;;  %v1614_v4 = vld [vmem:[%s5455_s5 + $0x1a8] sm:$0xff] }
  0xf0   : > { %1638 = vmatprep.subr.mxu1 %v4011_v52  ;;  %1863 = vmatprep.subr.mxu0 %v4011_v52  ;;  %v634_v26 = vpop.f32.mrf.mxu0  ;;  %v1623_v21 = vld [vmem:[%s5455_s5 + $0x1f0] sm:$0xff] }
  0xf1   : > { %3357 = vmatmul.mubr.msk.f32.gmra.mxu1 %vm431_vm0, %v756_v9  ;;  %3389 = vmatmul.mubr.msk.f32.gmra.mxu0 %vm431_vm0, %v756_v9  ;;  %v635_v30 = vadd.f32 %v4260_v54, %v634_v26  ;;  %v762_v39 = vmax.f32 %v640_v34, 0.0  ;;  %v3616_v9 = vpop.f32.mrf.mxu1  ;;  %v1622_v26 = vld [vmem:[%s5455_s5 + $0x1e8] sm:$0xff] }
  0xf2   : > { %1007 = vmatprep.mubr.f32.mxu1 %v4011_v52  ;;  %1264 = vmatprep.mubr.f32.mxu0 %v4011_v52  ;;  %v3604_v31 = vpop.f32.mrf.mxu0 }
  0xf3   : > { %1639 = vmatpush1.msra.mxu1 %v1573_v12  ;;  %1864 = vmatpush1.msra.mxu0 %v1605_v13  ;;  %v761_v35 = vmax.f32 %v635_v30, 0.0  ;;  %v650_v44 = vadd.f32 %v3604_v31, %v4260_v54  ;;  %v680_v12 = vadd.f32 %v3613_v63, %v4260_v54  ;;  %v769_v13 = vmax.f32 %v675_v8, 0.0  ;;  %v684_v14 = vpop.f32.mrf.mxu1  ;;  %v1589_v30 = vld [vmem:[%s5455_s5 + $0xe0] sm:$0xff]  ;;  %v1615_v63 = vld [vmem:[%s5455_s5 + $0x1b0] sm:$0xff] }
  0xf4   : > { %1640 = vmatprep.subr.mxu1 %v4011_v52  ;;  %1865 = vmatprep.subr.mxu0 %v4011_v52  ;;  %v644_v36 = vpop.f32.mrf.mxu0  ;;  %v1621_v31 = vld [vmem:[%s5455_s5 + $0x1e0] sm:$0xff] }
  0xf5   : > { %3358 = vmatmul.mubr.msk.f32.gmra.mxu1 %vm431_vm0, %v757_v15  ;;  %3390 = vmatmul.mubr.msk.f32.gmra.mxu0 %vm431_vm0, %v757_v15  ;;  %v645_v40 = vadd.f32 %v4260_v54, %v644_v36  ;;  %v764_v49 = vmax.f32 %v650_v44, 0.0  ;;  %v1592_v15 = vld [vmem:[%s5455_s5 + $0xf8] sm:$0xff]  ;;  %v1581_v8 = vld [vmem:[%s5455_s5 + $0xa0] sm:$0xff] }
  0xf6   : > { %1013 = vmatprep.mubr.f32.mxu1 %v4011_v52  ;;  %1270 = vmatprep.mubr.f32.mxu0 %v4011_v52  ;;  %v3607_v41 = vpop.f32.mrf.mxu0  ;;  %v1620_v36 = vld [vmem:[%s5455_s5 + $0x1d8] sm:$0xff] }
  0xf7   : > { %1641 = vmatpush1.msra.mxu1 %v1572_v17  ;;  %1866 = vmatpush1.msra.mxu0 %v1604_v18  ;;  %v763_v45 = vmax.f32 %v645_v40, 0.0  ;;  %v660_v56 = vadd.f32 %v3607_v41, %v4260_v54  ;;  %v770_v17 = vmax.f32 %v680_v12, 0.0  ;;  %v685_v18 = vadd.f32 %v4260_v54, %v684_v14  ;;  %v1587_v40 = vld [vmem:[%s5455_s5 + $0xd0] sm:$0xff]  ;;  %v1612_v14 = vld [vmem:[%s5455_s5 + $0x198] sm:$0xff] }
  0xf8   : > { %1642 = vmatprep.subr.mxu1 %v4011_v52  ;;  %1867 = vmatprep.subr.mxu0 %v4011_v52  ;;  %v654_v46 = vpop.f32.mrf.mxu0  ;;  %v1619_v41 = vld [vmem:[%s5455_s5 + $0x1d0] sm:$0xff] }
  0xf9   : > { %3359 = vmatmul.mubr.msk.f32.gmra.mxu1 %vm431_vm0, %v758_v19  ;;  %3391 = vmatmul.mubr.msk.f32.gmra.mxu0 %vm431_vm0, %v758_v19  ;;  %v655_v50 = vadd.f32 %v4260_v54, %v654_v46  ;;  %v766_v61 = vmax.f32 %v660_v56, 0.0  ;;  %v3619_v19 = vpop.f32.mrf.mxu1  ;;  %v1618_v46 = vld [vmem:[%s5455_s5 + $0x1c8] sm:$0xff] }
  0xfa   : > { %1019 = vmatprep.mubr.f32.mxu1 %v4011_v52  ;;  %1276 = vmatprep.mubr.f32.mxu0 %v4011_v52  ;;  %v3610_v51 = vpop.f32.mrf.mxu0 }
  0xfb   : > { %1643 = vmatpush1.msra.mxu1 %v1571_v22  ;;  %1868 = vmatpush1.msra.mxu0 %v1603_v23  ;;  %v765_v57 = vmax.f32 %v655_v50, 0.0  ;;  %v670_v2 = vadd.f32 %v3610_v51, %v4260_v54  ;;  %v690_v22 = vadd.f32 %v3616_v9, %v4260_v54  ;;  %v771_v23 = vmax.f32 %v685_v18, 0.0  ;;  %v694_v24 = vpop.f32.mrf.mxu1  ;;  %v1585_v50 = vld [vmem:[%s5455_s5 + $0xc0] sm:$0xff]  ;;  %v1611_v18 = vld [vmem:[%s5455_s5 + $0x190] sm:$0xff] }
  0xfc   : > { %1644 = vmatprep.subr.mxu1 %v4011_v52  ;;  %1869 = vmatprep.subr.mxu0 %v4011_v52  ;;  %v664_v58 = vpop.f32.mrf.mxu0  ;;  %v1617_v51 = vld [vmem:[%s5455_s5 + $0x1c0] sm:$0xff] }
  0xfd   : > { %3360 = vmatmul.mubr.msk.f32.gmra.mxu1 %vm431_vm0, %v759_v25  ;;  %3392 = vmatmul.mubr.msk.f32.gmra.mxu0 %vm431_vm0, %v759_v25  ;;  %v665_v62 = vadd.f32 %v4260_v54, %v664_v58  ;;  %v768_v7 = vmax.f32 %v670_v2, 0.0  ;;  %v1590_v25 = vld [vmem:[%s5455_s5 + $0xe8] sm:$0xff]  ;;  %v1616_v58 = vld [vmem:[%s5455_s5 + $0x1b8] sm:$0xff]  ;;  %v1613_v9 = vld [vmem:[%s5455_s5 + $0x1a0] sm:$0xff] }
  0xfe   : > { %1025 = vmatprep.mubr.f32.mxu1 %v4011_v52  ;;  %1282 = vmatprep.mubr.f32.mxu0 %v4011_v52 }
  0xff   : > { %1645 = vmatpush1.msra.mxu1 %v1570_v27  ;;  %1870 = vmatpush1.msra.mxu0 %v1602_v28  ;;  %v767_v3 = vmax.f32 %v665_v62, 0.0  ;;  %v772_v27 = vmax.f32 %v690_v22, 0.0  ;;  %v695_v28 = vadd.f32 %v4260_v54, %v694_v24  ;;  %v1583_v62 = vld [vmem:[%s5455_s5 + $0xb0] sm:$0xff]  ;;  %v1610_v22 = vld [vmem:[%s5455_s5 + $0x188] sm:$0xff]  ;;  %v1609_v24 = vld [vmem:[%s5455_s5 + $0x180] sm:$0xff] }
 0x100   : > { %1646 = vmatprep.subr.mxu1 %v4011_v52  ;;  %1871 = vmatprep.subr.mxu0 %v4011_v52 }
 0x101   : > { %3361 = vmatmul.mubr.msk.f32.gmra.mxu1 %vm431_vm0, %v760_v29  ;;  %3393 = vmatmul.mubr.msk.f32.gmra.mxu0 %vm431_vm0, %v760_v29  ;;  %v3622_v29 = vpop.f32.mrf.mxu1 }
 0x102   : > { %1031 = vmatprep.mubr.f32.mxu1 %v4011_v52  ;;  %1288 = vmatprep.mubr.f32.mxu0 %v4011_v52 }
 0x103   : > { %1647 = vmatpush1.msra.mxu1 %v1569_v32  ;;  %1872 = vmatpush1.msra.mxu0 %v1601_v33  ;;  %v700_v32 = vadd.f32 %v3619_v19, %v4260_v54  ;;  %v773_v33 = vmax.f32 %v695_v28, 0.0  ;;  %v704_v34 = vpop.f32.mrf.mxu1 }
 0x104   : > { %1648 = vmatprep.subr.mxu1 %v4011_v52  ;;  %1873 = vmatprep.subr.mxu0 %v4011_v52 }
 0x105   : > { %3362 = vmatmul.mubr.msk.f32.gmra.mxu1 %vm431_vm0, %v761_v35  ;;  %3394 = vmatmul.mubr.msk.f32.gmra.mxu0 %vm431_vm0, %v761_v35  ;;  %v1588_v35 = vld [vmem:[%s5455_s5 + $0xd8] sm:$0xff] }
 0x106   : > { %1037 = vmatprep.mubr.f32.mxu1 %v4011_v52  ;;  %1294 = vmatprep.mubr.f32.mxu0 %v4011_v52 }
 0x107   : > { %1649 = vmatpush1.msra.mxu1 %v1568_v37  ;;  %1874 = vmatpush1.msra.mxu0 %v1600_v38  ;;  %v774_v37 = vmax.f32 %v700_v32, 0.0  ;;  %v705_v38 = vadd.f32 %v4260_v54, %v704_v34 }
 0x108   : > { %1650 = vmatprep.subr.mxu1 %v4011_v52  ;;  %1875 = vmatprep.subr.mxu0 %v4011_v52 }
 0x109   : > { %3363 = vmatmul.mubr.msk.f32.gmra.mxu1 %vm431_vm0, %v762_v39  ;;  %3395 = vmatmul.mubr.msk.f32.gmra.mxu0 %vm431_vm0, %v762_v39  ;;  %v3625_v39 = vpop.f32.mrf.mxu1 }
 0x10a   : > { %1043 = vmatprep.mubr.f32.mxu1 %v4011_v52  ;;  %1300 = vmatprep.mubr.f32.mxu0 %v4011_v52 }
 0x10b   : > { %1651 = vmatpush1.msra.mxu1 %v1567_v42  ;;  %1876 = vmatpush1.msra.mxu0 %v1599_v43  ;;  %v710_v42 = vadd.f32 %v3622_v29, %v4260_v54  ;;  %v775_v43 = vmax.f32 %v705_v38, 0.0  ;;  %v714_v44 = vpop.f32.mrf.mxu1  ;;  %v801_v29 = vld [vmem:[%s5454_s4] sm:$0xf] }
 0x10c   : > { %1652 = vmatprep.subr.mxu1 %v4011_v52  ;;  %1877 = vmatprep.subr.mxu0 %v4011_v52 }
 0x10d   : > { %3364 = vmatmul.mubr.msk.f32.gmra.mxu1 %vm431_vm0, %v763_v45  ;;  %3396 = vmatmul.mubr.msk.f32.gmra.mxu0 %vm431_vm0, %v763_v45  ;;  %v1586_v45 = vld [vmem:[%s5455_s5 + $0xc8] sm:$0xff] }
 0x10e   : > { %1049 = vmatprep.mubr.f32.mxu1 %v4011_v52  ;;  %1306 = vmatprep.mubr.f32.mxu0 %v4011_v52 }
 0x10f   : > { %1653 = vmatpush1.msra.mxu1 %v1566_v47  ;;  %1878 = vmatpush1.msra.mxu0 %v1598_v48  ;;  %v776_v47 = vmax.f32 %v710_v42, 0.0  ;;  %v715_v48 = vadd.f32 %v4260_v54, %v714_v44 }
 0x110   : > { %1654 = vmatprep.subr.mxu1 %v4011_v52  ;;  %1879 = vmatprep.subr.mxu0 %v4011_v52 }
 0x111   : > { %3365 = vmatmul.mubr.msk.f32.gmra.mxu1 %vm431_vm0, %v764_v49  ;;  %3397 = vmatmul.mubr.msk.f32.gmra.mxu0 %vm431_vm0, %v764_v49  ;;  %v3628_v49 = vpop.f32.mrf.mxu1 }
 0x112   : > { %1055 = vmatprep.mubr.f32.mxu1 %v4011_v52  ;;  %1312 = vmatprep.mubr.f32.mxu0 %v4011_v52 }
 0x113   : > { %1655 = vmatpush1.msra.mxu1 %v1565_v53  ;;  %1880 = vmatpush1.msra.mxu0 %v1597_v55  ;;  %v720_v53 = vadd.f32 %v3625_v39, %v4260_v54  ;;  %v777_v55 = vmax.f32 %v715_v48, 0.0  ;;  %v724_v56 = vpop.f32.mrf.mxu1 }
 0x114   : > { %1656 = vmatprep.subr.mxu1 %v4011_v52  ;;  %1881 = vmatprep.subr.mxu0 %v4011_v52 }
 0x115   : > { %3366 = vmatmul.mubr.msk.f32.gmra.mxu1 %vm431_vm0, %v765_v57  ;;  %3398 = vmatmul.mubr.msk.f32.gmra.mxu0 %vm431_vm0, %v765_v57  ;;  %v1584_v57 = vld [vmem:[%s5455_s5 + $0xb8] sm:$0xff] }
 0x116   : > { %1061 = vmatprep.mubr.f32.mxu1 %v4011_v52  ;;  %1318 = vmatprep.mubr.f32.mxu0 %v4011_v52 }
 0x117   : > { %1657 = vmatpush1.msra.mxu1 %v1564_v59  ;;  %1882 = vmatpush1.msra.mxu0 %v1596_v60  ;;  %v778_v59 = vmax.f32 %v720_v53, 0.0  ;;  %v725_v60 = vadd.f32 %v4260_v54, %v724_v56 }
 0x118   : > { %1658 = vmatprep.subr.mxu1 %v4011_v52  ;;  %1883 = vmatprep.subr.mxu0 %v4011_v52 }
 0x119   : > { %3367 = vmatmul.mubr.msk.f32.gmra.mxu1 %vm431_vm0, %v766_v61  ;;  %3399 = vmatmul.mubr.msk.f32.gmra.mxu0 %vm431_vm0, %v766_v61  ;;  %v3631_v61 = vpop.f32.mrf.mxu1 }
 0x11a   : > { %1067 = vmatprep.mubr.f32.mxu1 %v4011_v52  ;;  %1324 = vmatprep.mubr.f32.mxu0 %v4011_v52 }
 0x11b   : > { %1659 = vmatpush1.msra.mxu1 %v1563_v0  ;;  %1884 = vmatpush1.msra.mxu0 %v1595_v1  ;;  %v730_v0 = vadd.f32 %v3628_v49, %v4260_v54  ;;  %v779_v1 = vmax.f32 %v725_v60, 0.0  ;;  %v734_v2 = vpop.f32.mrf.mxu1 }
 0x11c   : > { %1660 = vmatprep.subr.mxu1 %v4011_v52  ;;  %1885 = vmatprep.subr.mxu0 %v4011_v52 }
 0x11d   : > { %3368 = vmatmul.mubr.msk.f32.gmra.mxu1 %vm431_vm0, %v767_v3  ;;  %3400 = vmatmul.mubr.msk.f32.gmra.mxu0 %vm431_vm0, %v767_v3  ;;  %v1582_v3 = vld [vmem:[%s5455_s5 + $0xa8] sm:$0xff] }
 0x11e   : > { %1073 = vmatprep.mubr.f32.mxu1 %v4011_v52  ;;  %1330 = vmatprep.mubr.f32.mxu0 %v4011_v52 }
 0x11f   : > { %1661 = vmatpush1.msra.mxu1 %v1562_v5  ;;  %1886 = vmatpush1.msra.mxu0 %v1594_v6  ;;  %v780_v5 = vmax.f32 %v730_v0, 0.0  ;;  %v735_v6 = vadd.f32 %v4260_v54, %v734_v2 }
 0x120   : > { %1662 = vmatprep.subr.mxu1 %v4011_v52  ;;  %1887 = vmatprep.subr.mxu0 %v4011_v52 }
 0x121   : > { %3369 = vmatmul.mubr.msk.f32.gmra.mxu1 %vm431_vm0, %v768_v7  ;;  %3401 = vmatmul.mubr.msk.f32.gmra.mxu0 %vm431_vm0, %v768_v7  ;;  %v3634_v7 = vpop.f32.mrf.mxu1 }
 0x122   : > { %1079 = vmatprep.mubr.f32.mxu1 %v4011_v52  ;;  %1336 = vmatprep.mubr.f32.mxu0 %v4011_v52  ;;  %v750_v19 = vadd.f32 %v3634_v7, %v4260_v54  ;;  %v2127_v7 = vld [vmem:[%s5457_s7 + $0x68] sm:$0xff] }
 0x123   : > { %1663 = vmatpush1.msra.mxu1 %v1561_v10  ;;  %1888 = vmatpush1.msra.mxu0 %v1593_v11  ;;  %v740_v10 = vadd.f32 %v3631_v61, %v4260_v54  ;;  %v781_v11 = vmax.f32 %v735_v6, 0.0  ;;  %v744_v12 = vpop.f32.mrf.mxu1 }
 0x124   : > { %1664 = vmatprep.subr.mxu1 %v4011_v52  ;;  %1889 = vmatprep.subr.mxu0 %v4011_v52 }
 0x125   : > { %3370 = vmatmul.mubr.msk.f32.gmra.mxu1 %vm431_vm0, %v769_v13  ;;  %3402 = vmatmul.mubr.msk.f32.gmra.mxu0 %vm431_vm0, %v769_v13  ;;  %v1580_v13 = vld [vmem:[%s5455_s5 + $0x98] sm:$0xff] }
 0x126   : > { %1085 = vmatprep.mubr.f32.mxu1 %v4011_v52  ;;  %1342 = vmatprep.mubr.f32.mxu0 %v4011_v52 }
 0x127   : > { %1665 = vmatpush2.msra.mxu1 %v1592_v15  ;;  %1890 = vmatpush2.msra.mxu0 %v1624_v16  ;;  %v782_v15 = vmax.f32 %v740_v10, 0.0  ;;  %v745_v16 = vadd.f32 %v4260_v54, %v744_v12  ;;  %v784_v54 = vmax.f32 %v750_v19, 0.0 }
 0x128   : > { %1666 = vmatprep.subr.mxu1 %v4011_v52  ;;  %1891 = vmatprep.subr.mxu0 %v4011_v52 }
 0x129   : > { %3371 = vmatmul.mubr.msk.f32.gmra.mxu1 %vm431_vm0, %v770_v17  ;;  %3403 = vmatmul.mubr.msk.f32.gmra.mxu0 %vm431_vm0, %v770_v17  ;;  %v1579_v17 = vld [vmem:[%s5455_s5 + $0x90] sm:$0xff] }
 0x12a   : > { %1091 = vmatprep.mubr.f32.mxu1 %v4011_v52  ;;  %1348 = vmatprep.mubr.f32.mxu0 %v4011_v52 }
 0x12b   : > { %1667 = vmatpush2.msra.mxu1 %v1591_v20  ;;  %1892 = vmatpush2.msra.mxu0 %v1623_v21  ;;  %v783_v20 = vmax.f32 %v745_v16, 0.0  ;;  %v1578_v21 = vld [vmem:[%s5455_s5 + $0x88] sm:$0xff] }
 0x12c   : > { %1668 = vmatprep.subr.mxu1 %v4011_v52  ;;  %1893 = vmatprep.subr.mxu0 %v4011_v52 }
 0x12d   : > { %3372 = vmatmul.mubr.msk.f32.gmra.mxu1 %vm431_vm0, %v771_v23  ;;  %3404 = vmatmul.mubr.msk.f32.gmra.mxu0 %vm431_vm0, %v771_v23  ;;  %v1577_v23 = vld [vmem:[%s5455_s5 + $0x80] sm:$0xff] }
 0x12e   : > { %1097 = vmatprep.mubr.f32.mxu1 %v4011_v52  ;;  %1354 = vmatprep.mubr.f32.mxu0 %v4011_v52 }
 0x12f   : > { %1669 = vmatpush2.msra.mxu1 %v1590_v25  ;;  %1894 = vmatpush2.msra.mxu0 %v1622_v26  ;;  %v803_v25 = vlaneseq }
 0x130   : > { %1670 = vmatprep.subr.mxu1 %v4011_v52  ;;  %1895 = vmatprep.subr.mxu0 %v4011_v52 }
 0x131   : > { %3373 = vmatmul.mubr.msk.f32.gmra.mxu1 %vm431_vm0, %v772_v27  ;;  %3405 = vmatmul.mubr.msk.f32.gmra.mxu0 %vm431_vm0, %v772_v27  ;;  %v804_v26 = vshrl.u32 %v803_v25, 7 }
 0x132   : > { %1103 = vmatprep.mubr.f32.mxu1 %v4011_v52  ;;  %1360 = vmatprep.mubr.f32.mxu0 %v4011_v52 }
 0x133   : > { %1671 = vmatpush2.msra.mxu1 %v1589_v30  ;;  %1896 = vmatpush2.msra.mxu0 %v1621_v31  ;;  %v805_v27 = vsub.s32 0, %v804_v26  ;;  %v813_v28 = vsub.s32 2, %v804_v26  ;;  %v809_v30 = vsub.s32 1, %v804_v26  ;;  %v817_v31 = vsub.s32 3, %v804_v26 }
 0x134   : > { %1672 = vmatprep.subr.mxu1 %v4011_v52  ;;  %1897 = vmatprep.subr.mxu0 %v4011_v52 }
 0x135   : > { %3374 = vmatmul.mubr.msk.f32.gmra.mxu1 %vm431_vm0, %v773_v33  ;;  %3406 = vmatmul.mubr.msk.f32.gmra.mxu0 %vm431_vm0, %v773_v33  ;;  %v4677_v32 = vrot.slane %v801_v29, %v805_v27  ;;  %v4679_v33 = vrot.slane %v801_v29, %v813_v28  ;;  %v4683_v34 = vrot.slane %v801_v29, %v817_v31 }
 0x136   : > { %1109 = vmatprep.mubr.f32.mxu1 %v4011_v52  ;;  %1366 = vmatprep.mubr.f32.mxu0 %v4011_v52 }
 0x137   : > { %1673 = vmatpush2.msra.mxu1 %v1588_v35  ;;  %1898 = vmatpush2.msra.mxu0 %v1620_v36 }
 0x138   : > { %1674 = vmatprep.subr.mxu1 %v4011_v52  ;;  %1899 = vmatprep.subr.mxu0 %v4011_v52 }
 0x139   : > { %3375 = vmatmul.mubr.msk.f32.gmra.mxu1 %vm431_vm0, %v774_v37  ;;  %3407 = vmatmul.mubr.msk.f32.gmra.mxu0 %vm431_vm0, %v774_v37 }
 0x13a   : > { %1115 = vmatprep.mubr.f32.mxu1 %v4011_v52  ;;  %1372 = vmatprep.mubr.f32.mxu0 %v4011_v52 }
 0x13b   : > { %1675 = vmatpush2.msra.mxu1 %v1587_v40  ;;  %1900 = vmatpush2.msra.mxu0 %v1619_v41 }
 0x13c   : > { %1676 = vmatprep.subr.mxu1 %v4011_v52  ;;  %1901 = vmatprep.subr.mxu0 %v4011_v52 }
 0x13d   : > { %3376 = vmatmul.mubr.msk.f32.gmra.mxu1 %vm431_vm0, %v775_v43  ;;  %3408 = vmatmul.mubr.msk.f32.gmra.mxu0 %vm431_vm0, %v775_v43 }
 0x13e   : > { %1121 = vmatprep.mubr.f32.mxu1 %v4011_v52  ;;  %1378 = vmatprep.mubr.f32.mxu0 %v4011_v52 }
 0x13f   : > { %1677 = vmatpush2.msra.mxu1 %v1586_v45  ;;  %1902 = vmatpush2.msra.mxu0 %v1618_v46  ;;  %v2129_v45 = vld [vmem:[%s5457_s7 + $0x78] sm:$0xff] }
 0x140   : > { %1678 = vmatprep.subr.mxu1 %v4011_v52  ;;  %1903 = vmatprep.subr.mxu0 %v4011_v52 }
 0x141   : > { %3377 = vmatmul.mubr.msk.f32.gmra.mxu1 %vm431_vm0, %v776_v47  ;;  %3409 = vmatmul.mubr.msk.f32.gmra.mxu0 %vm431_vm0, %v776_v47 }
 0x142   : > { %1127 = vmatprep.mubr.f32.mxu1 %v4011_v52  ;;  %1384 = vmatprep.mubr.f32.mxu0 %v4011_v52 }
 0x143   : > { %1679 = vmatpush2.msra.mxu1 %v1585_v50  ;;  %1904 = vmatpush2.msra.mxu0 %v1617_v51 }
 0x144   : > { %1680 = vmatprep.subr.mxu1 %v4011_v52  ;;  %1905 = vmatprep.subr.mxu0 %v4011_v52 }
 0x145   : > { %3378 = vmatmul.mubr.msk.f32.gmra.mxu1 %vm431_vm0, %v777_v55  ;;  %3410 = vmatmul.mubr.msk.f32.gmra.mxu0 %vm431_vm0, %v777_v55 }
 0x146   : > { %1133 = vmatprep.mubr.f32.mxu1 %v4011_v52  ;;  %1390 = vmatprep.mubr.f32.mxu0 %v4011_v52 }
 0x147   : > { %1681 = vmatpush2.msra.mxu1 %v1584_v57  ;;  %1906 = vmatpush2.msra.mxu0 %v1616_v58  ;;  %v2128_v58 = vld [vmem:[%s5457_s7 + $0x70] sm:$0xff] }
 0x148   : > { %1682 = vmatprep.subr.mxu1 %v4011_v52  ;;  %1907 = vmatprep.subr.mxu0 %v4011_v52 }
 0x149   : > { %3379 = vmatmul.mubr.msk.f32.gmra.mxu1 %vm431_vm0, %v778_v59  ;;  %3411 = vmatmul.mubr.msk.f32.gmra.mxu0 %vm431_vm0, %v778_v59 }
 0x14a   : > { %1139 = vmatprep.mubr.f32.mxu1 %v4011_v52  ;;  %1396 = vmatprep.mubr.f32.mxu0 %v4011_v52 }
 0x14b   : > { %1683 = vmatpush2.msra.mxu1 %v1583_v62  ;;  %1908 = vmatpush2.msra.mxu0 %v1615_v63 }
 0x14c   : > { %1684 = vmatprep.subr.mxu1 %v4011_v52  ;;  %1909 = vmatprep.subr.mxu0 %v4011_v52 }
 0x14d   : > { %3380 = vmatmul.mubr.msk.f32.gmra.mxu1 %vm431_vm0, %v779_v1  ;;  %3412 = vmatmul.mubr.msk.f32.gmra.mxu0 %vm431_vm0, %v779_v1 }
 0x14e   : > { %1145 = vmatprep.mubr.f32.mxu1 %v4011_v52  ;;  %1402 = vmatprep.mubr.f32.mxu0 %v4011_v52 }
 0x14f   : > { %1685 = vmatpush2.msra.mxu1 %v1582_v3  ;;  %1910 = vmatpush2.msra.mxu0 %v1614_v4 }
 0x150   : > { %1686 = vmatprep.subr.mxu1 %v4011_v52  ;;  %1911 = vmatprep.subr.mxu0 %v4011_v52 }
 0x151   : > { %3381 = vmatmul.mubr.msk.f32.gmra.mxu1 %vm431_vm0, %v780_v5  ;;  %3413 = vmatmul.mubr.msk.f32.gmra.mxu0 %vm431_vm0, %v780_v5 }
 0x152   : > { %1151 = vmatprep.mubr.f32.mxu1 %v4011_v52  ;;  %1408 = vmatprep.mubr.f32.mxu0 %v4011_v52 }
 0x153   : > { %1687 = vmatpush2.msra.mxu1 %v1581_v8  ;;  %1912 = vmatpush2.msra.mxu0 %v1613_v9 }
 0x154   : > { %1688 = vmatprep.subr.mxu1 %v4011_v52  ;;  %1913 = vmatprep.subr.mxu0 %v4011_v52 }
 0x155   : > { %3382 = vmatmul.mubr.msk.f32.gmra.mxu1 %vm431_vm0, %v781_v11  ;;  %3414 = vmatmul.mubr.msk.f32.gmra.mxu0 %vm431_vm0, %v781_v11 }
 0x156   : > { %1157 = vmatprep.mubr.f32.mxu1 %v4011_v52  ;;  %1414 = vmatprep.mubr.f32.mxu0 %v4011_v52 }
 0x157   : > { %1689 = vmatpush2.msra.mxu1 %v1580_v13  ;;  %1914 = vmatpush2.msra.mxu0 %v1612_v14 }
 0x158   : > { %1690 = vmatprep.subr.mxu1 %v4011_v52  ;;  %1915 = vmatprep.subr.mxu0 %v4011_v52 }
 0x159   : > { %3383 = vmatmul.mubr.msk.f32.gmra.mxu1 %vm431_vm0, %v782_v15  ;;  %3415 = vmatmul.mubr.msk.f32.gmra.mxu0 %vm431_vm0, %v782_v15 }
 0x15a   : > { %1163 = vmatprep.mubr.f32.mxu1 %v4011_v52  ;;  %1420 = vmatprep.mubr.f32.mxu0 %v4011_v52 }
 0x15b   : > { %1691 = vmatpush2.msra.mxu1 %v1579_v17  ;;  %1916 = vmatpush2.msra.mxu0 %v1611_v18 }
 0x15c   : > { %1692 = vmatprep.subr.mxu1 %v4011_v52  ;;  %1917 = vmatprep.subr.mxu0 %v4011_v52 }
 0x15d   : > { %3384 = vmatmul.mubr.msk.f32.gmra.mxu1 %vm431_vm0, %v783_v20  ;;  %3416 = vmatmul.mubr.msk.f32.gmra.mxu0 %vm431_vm0, %v783_v20  ;;  %v2126_v20 = vld [vmem:[%s5457_s7 + $0x60] sm:$0xff] }
 0x15e   : > { %1169 = vmatprep.mubr.f32.mxu1 %v4011_v52  ;;  %1426 = vmatprep.mubr.f32.mxu0 %v4011_v52 }
 0x15f   : > { %1693 = vmatpush2.msra.mxu1 %v1578_v21  ;;  %1918 = vmatpush2.msra.mxu0 %v1610_v22 }
 0x160   : > { %1694 = vmatprep.subr.mxu1 %v4011_v52  ;;  %1919 = vmatprep.subr.mxu0 %v4011_v52  ;;  %v4681_v52 = vrot.slane %v801_v29, %v809_v30 }
 0x161   : > { %3385 = vmatmul.mubr.msk.f32.gmra.mxu1 %vm431_vm0, %v784_v54  ;;  %3417 = vmatmul.mubr.msk.f32.gmra.mxu0 %vm431_vm0, %v784_v54 }
 0x162   : > { %1695 = vmatpush2.msra.mxu1 %v1577_v23  ;;  %1920 = vmatpush2.msra.mxu0 %v1609_v24 }
 0x163   : > { %3635 = vmatprep.subr.mxu1 %v2129_v45 }
 0x1a5   : > { %v985_v35 = vpop.f32.mrf.mxu1  ;;  %v1242_v36 = vpop.f32.mrf.mxu0 }
 0x1a6   : > { %v986_v37 = vadd.f32 %v985_v35, %v4677_v32  ;;  %v1243_v38 = vadd.f32 %v1242_v36, %v4679_v33  ;;  %v2125_v35 = vld [vmem:[%s5457_s7 + $0x58] sm:$0xff] }
 0x1a7   : > { %v987_v39 = vpop.f32.mrf.mxu1  ;;  %v1244_v40 = vpop.f32.mrf.mxu0 }
 0x1a8   : > { %v988_v41 = vadd.f32 %v987_v39, %v4681_v52  ;;  %v1245_v42 = vadd.f32 %v1244_v40, %v4683_v34  ;;  %v1433_v48 = vmax.f32 %v986_v37, 0.0  ;;  %v1435_v49 = vmax.f32 %v1243_v38, 0.0 }
 0x1a9   : > { %v991_v43 = vpop.f32.mrf.mxu1  ;;  %v1248_v44 = vpop.f32.mrf.mxu0 }
 0x1aa   : > { %v1434_v46 = vmax.f32 %v988_v41, 0.0  ;;  %v1436_v47 = vmax.f32 %v1245_v42, 0.0  ;;  %v992_v50 = vadd.f32 %v991_v43, %v4677_v32  ;;  %v1249_v51 = vadd.f32 %v1248_v44, %v4679_v33 }
 0x1ab   : > { %v993_v53 = vpop.f32.mrf.mxu1  ;;  %v1250_v55 = vpop.f32.mrf.mxu0 }
 0x1ac   : > { %v994_v56 = vadd.f32 %v993_v53, %v4681_v52  ;;  %v1251_v57 = vadd.f32 %v1250_v55, %v4683_v34  ;;  %1696 = vmatprep.mubr.f32.mxu1 %v1434_v46  ;;  %1921 = vmatprep.mubr.f32.mxu0 %v1436_v47  ;;  %v1437_v63 = vmax.f32 %v992_v50, 0.0  ;;  %v1439_v0 = vmax.f32 %v1249_v51, 0.0 }
 0x1ad   : > { %v997_v59 = vpop.f32.mrf.mxu1  ;;  %v1254_v60 = vpop.f32.mrf.mxu0  ;;  %1697 = vmatmul.mubr.f32.vlgmr.msra.gmra.mxu1 %v1433_v48  ;;  %1922 = vmatmul.mubr.f32.vlgmr.msra.gmra.mxu0 %v1435_v49  ;;  %v2124_v48 = vld [vmem:[%s5457_s7 + $0x50] sm:$0xff] }
 0x1ae   : > { %v1438_v61 = vmax.f32 %v994_v56, 0.0  ;;  %v1440_v62 = vmax.f32 %v1251_v57, 0.0  ;;  %3636 = vmatpush3.msra.mxu1 %v2129_v45  ;;  %v998_v1 = vadd.f32 %v997_v59, %v4677_v32  ;;  %v1255_v2 = vadd.f32 %v1254_v60, %v4679_v33 }
 0x1af   : > { %v999_v3 = vpop.f32.mrf.mxu1  ;;  %v1256_v4 = vpop.f32.mrf.mxu0  ;;  %3637 = vmatprep.subr.mxu1 %v2128_v58 }
 0x1b0   : > { %v1000_v5 = vadd.f32 %v999_v3, %v4681_v52  ;;  %v1257_v6 = vadd.f32 %v1256_v4, %v4683_v34  ;;  %1701 = vmatprep.mubr.f32.mxu1 %v1438_v61  ;;  %1926 = vmatprep.mubr.f32.mxu0 %v1440_v62  ;;  %v1441_v12 = vmax.f32 %v998_v1, 0.0  ;;  %v1443_v13 = vmax.f32 %v1255_v2, 0.0 }
 0x1b1   : > { %v1003_v8 = vpop.f32.mrf.mxu1  ;;  %v1260_v9 = vpop.f32.mrf.mxu0  ;;  %1702 = vmatmul.mubr.f32.gmra.mxu1 %v1437_v63  ;;  %1927 = vmatmul.mubr.f32.gmra.mxu0 %v1439_v0  ;;  %v2123_v63 = vld [vmem:[%s5457_s7 + $0x48] sm:$0xff] }
 0x1b2   : > { %v1442_v10 = vmax.f32 %v1000_v5, 0.0  ;;  %v1444_v11 = vmax.f32 %v1257_v6, 0.0  ;;  %3638 = vmatpush3.msra.mxu1 %v2128_v58  ;;  %v1004_v14 = vadd.f32 %v1003_v8, %v4677_v32  ;;  %v1261_v15 = vadd.f32 %v1260_v9, %v4679_v33 }
 0x1b3   : > { %v1005_v16 = vpop.f32.mrf.mxu1  ;;  %v1262_v17 = vpop.f32.mrf.mxu0  ;;  %3639 = vmatprep.subr.mxu1 %v2127_v7 }
 0x1b4   : > { %v1006_v18 = vadd.f32 %v1005_v16, %v4681_v52  ;;  %v1263_v19 = vadd.f32 %v1262_v17, %v4683_v34  ;;  %1706 = vmatprep.mubr.f32.mxu1 %v1442_v10  ;;  %1931 = vmatprep.mubr.f32.mxu0 %v1444_v11  ;;  %v1445_v24 = vmax.f32 %v1004_v14, 0.0  ;;  %v1447_v25 = vmax.f32 %v1261_v15, 0.0 }
 0x1b5   : > { %v1009_v21 = vpop.f32.mrf.mxu1  ;;  %v1266_v22 = vpop.f32.mrf.mxu0  ;;  %1707 = vmatmul.mubr.f32.gmra.mxu1 %v1441_v12  ;;  %1932 = vmatmul.mubr.f32.gmra.mxu0 %v1443_v13  ;;  %v2122_v12 = vld [vmem:[%s5457_s7 + $0x40] sm:$0xff] }
 0x1b6   : > { %v1446_v54 = vmax.f32 %v1006_v18, 0.0  ;;  %v1448_v23 = vmax.f32 %v1263_v19, 0.0  ;;  %3640 = vmatpush3.msra.mxu1 %v2127_v7  ;;  %v1010_v26 = vadd.f32 %v1009_v21, %v4677_v32  ;;  %v1267_v27 = vadd.f32 %v1266_v22, %v4679_v33 }
 0x1b7   : > { %v1011_v28 = vpop.f32.mrf.mxu1  ;;  %v1268_v29 = vpop.f32.mrf.mxu0  ;;  %3641 = vmatprep.subr.mxu1 %v2126_v20 }
 0x1b8   : > { %v1012_v30 = vadd.f32 %v1011_v28, %v4681_v52  ;;  %v1269_v31 = vadd.f32 %v1268_v29, %v4683_v34  ;;  %1711 = vmatprep.mubr.f32.mxu1 %v1446_v54  ;;  %1936 = vmatprep.mubr.f32.mxu0 %v1448_v23  ;;  %v1449_v40 = vmax.f32 %v1010_v26, 0.0  ;;  %v1451_v41 = vmax.f32 %v1267_v27, 0.0 }
 0x1b9   : > { %v1015_v36 = vpop.f32.mrf.mxu1  ;;  %v1272_v37 = vpop.f32.mrf.mxu0  ;;  %1712 = vmatmul.mubr.f32.gmra.mxu1 %v1445_v24  ;;  %1937 = vmatmul.mubr.f32.gmra.mxu0 %v1447_v25  ;;  %v2121_v24 = vld [vmem:[%s5457_s7 + $0x38] sm:$0xff] }
 0x1ba   : > { %v1450_v38 = vmax.f32 %v1012_v30, 0.0  ;;  %v1452_v39 = vmax.f32 %v1269_v31, 0.0  ;;  %3642 = vmatpush3.msra.mxu1 %v2126_v20  ;;  %v1016_v42 = vadd.f32 %v1015_v36, %v4677_v32  ;;  %v1273_v43 = vadd.f32 %v1272_v37, %v4679_v33 }
 0x1bb   : > { %v1017_v44 = vpop.f32.mrf.mxu1  ;;  %v1274_v45 = vpop.f32.mrf.mxu0  ;;  %3643 = vmatprep.subr.mxu1 %v2125_v35 }
 0x1bc   : > { %v1018_v46 = vadd.f32 %v1017_v44, %v4681_v52  ;;  %v1275_v47 = vadd.f32 %v1274_v45, %v4683_v34  ;;  %1716 = vmatprep.mubr.f32.mxu1 %v1450_v38  ;;  %1941 = vmatprep.mubr.f32.mxu0 %v1452_v39  ;;  %v1453_v55 = vmax.f32 %v1016_v42, 0.0  ;;  %v1455_v56 = vmax.f32 %v1273_v43, 0.0 }
 0x1bd   : > { %v1021_v49 = vpop.f32.mrf.mxu1  ;;  %v1278_v50 = vpop.f32.mrf.mxu0  ;;  %1717 = vmatmul.mubr.f32.gmra.mxu1 %v1449_v40  ;;  %1942 = vmatmul.mubr.f32.gmra.mxu0 %v1451_v41  ;;  %v2120_v40 = vld [vmem:[%s5457_s7 + $0x30] sm:$0xff] }
 0x1be   : > { %v1454_v51 = vmax.f32 %v1018_v46, 0.0  ;;  %v1456_v53 = vmax.f32 %v1275_v47, 0.0  ;;  %3644 = vmatpush3.msra.mxu1 %v2125_v35  ;;  %v1022_v57 = vadd.f32 %v1021_v49, %v4677_v32  ;;  %v1279_v58 = vadd.f32 %v1278_v50, %v4679_v33 }
 0x1bf   : > { %v1023_v59 = vpop.f32.mrf.mxu1  ;;  %v1280_v60 = vpop.f32.mrf.mxu0  ;;  %3645 = vmatprep.subr.mxu1 %v2124_v48 }
 0x1c0   : > { %v1024_v61 = vadd.f32 %v1023_v59, %v4681_v52  ;;  %v1281_v62 = vadd.f32 %v1280_v60, %v4683_v34  ;;  %1721 = vmatprep.mubr.f32.mxu1 %v1454_v51  ;;  %1946 = vmatprep.mubr.f32.mxu0 %v1456_v53  ;;  %v1457_v4 = vmax.f32 %v1022_v57, 0.0  ;;  %v1459_v5 = vmax.f32 %v1279_v58, 0.0 }
 0x1c1   : > { %v1027_v0 = vpop.f32.mrf.mxu1  ;;  %v1284_v1 = vpop.f32.mrf.mxu0  ;;  %1722 = vmatmul.mubr.f32.gmra.mxu1 %v1453_v55  ;;  %1947 = vmatmul.mubr.f32.gmra.mxu0 %v1455_v56  ;;  %v2119_v55 = vld [vmem:[%s5457_s7 + $0x28] sm:$0xff] }
 0x1c2   : > { %v1458_v2 = vmax.f32 %v1024_v61, 0.0  ;;  %v1460_v3 = vmax.f32 %v1281_v62, 0.0  ;;  %3646 = vmatpush3.msra.mxu1 %v2124_v48  ;;  %v1028_v6 = vadd.f32 %v1027_v0, %v4677_v32  ;;  %v1285_v7 = vadd.f32 %v1284_v1, %v4679_v33 }
 0x1c3   : > { %v1029_v8 = vpop.f32.mrf.mxu1  ;;  %v1286_v9 = vpop.f32.mrf.mxu0  ;;  %3647 = vmatprep.subr.mxu1 %v2123_v63 }
 0x1c4   : > { %v1030_v10 = vadd.f32 %v1029_v8, %v4681_v52  ;;  %v1287_v11 = vadd.f32 %v1286_v9, %v4683_v34  ;;  %1726 = vmatprep.mubr.f32.mxu1 %v1458_v2  ;;  %1951 = vmatprep.mubr.f32.mxu0 %v1460_v3  ;;  %v1461_v17 = vmax.f32 %v1028_v6, 0.0  ;;  %v1463_v18 = vmax.f32 %v1285_v7, 0.0 }
 0x1c5   : > { %v1033_v13 = vpop.f32.mrf.mxu1  ;;  %v1290_v14 = vpop.f32.mrf.mxu0  ;;  %1727 = vmatmul.mubr.f32.gmra.mxu1 %v1457_v4  ;;  %1952 = vmatmul.mubr.f32.gmra.mxu0 %v1459_v5 }
 0x1c6   : > { %v1462_v15 = vmax.f32 %v1030_v10, 0.0  ;;  %v1464_v16 = vmax.f32 %v1287_v11, 0.0  ;;  %3648 = vmatpush3.msra.mxu1 %v2123_v63  ;;  %v1034_v19 = vadd.f32 %v1033_v13, %v4677_v32  ;;  %v1291_v20 = vadd.f32 %v1290_v14, %v4679_v33 }
 0x1c7   : > { %v1035_v21 = vpop.f32.mrf.mxu1  ;;  %v1292_v22 = vpop.f32.mrf.mxu0  ;;  %3649 = vmatprep.subr.mxu1 %v2122_v12 }
 0x1c8   : > { %v1036_v54 = vadd.f32 %v1035_v21, %v4681_v52  ;;  %v1293_v23 = vadd.f32 %v1292_v22, %v4683_v34  ;;  %1731 = vmatprep.mubr.f32.mxu1 %v1462_v15  ;;  %1956 = vmatprep.mubr.f32.mxu0 %v1464_v16  ;;  %v1465_v29 = vmax.f32 %v1034_v19, 0.0  ;;  %v1467_v30 = vmax.f32 %v1291_v20, 0.0 }
 0x1c9   : > { %v1039_v25 = vpop.f32.mrf.mxu1  ;;  %v1296_v26 = vpop.f32.mrf.mxu0  ;;  %1732 = vmatmul.mubr.f32.gmra.mxu1 %v1461_v17  ;;  %1957 = vmatmul.mubr.f32.gmra.mxu0 %v1463_v18 }
 0x1ca   : > { %v1466_v27 = vmax.f32 %v1036_v54, 0.0  ;;  %v1468_v28 = vmax.f32 %v1293_v23, 0.0  ;;  %3650 = vmatpush3.msra.mxu1 %v2122_v12  ;;  %v1040_v31 = vadd.f32 %v1039_v25, %v4677_v32  ;;  %v1297_v35 = vadd.f32 %v1296_v26, %v4679_v33 }
 0x1cb   : > { %v1041_v36 = vpop.f32.mrf.mxu1  ;;  %v1298_v37 = vpop.f32.mrf.mxu0  ;;  %3651 = vmatprep.subr.mxu1 %v2121_v24 }
 0x1cc   : > { %v1042_v38 = vadd.f32 %v1041_v36, %v4681_v52  ;;  %v1299_v39 = vadd.f32 %v1298_v37, %v4683_v34  ;;  %1736 = vmatprep.mubr.f32.mxu1 %v1466_v27  ;;  %1961 = vmatprep.mubr.f32.mxu0 %v1468_v28  ;;  %v1469_v45 = vmax.f32 %v1040_v31, 0.0  ;;  %v1471_v46 = vmax.f32 %v1297_v35, 0.0 }
 0x1cd   : > { %v1045_v41 = vpop.f32.mrf.mxu1  ;;  %v1302_v42 = vpop.f32.mrf.mxu0  ;;  %1737 = vmatmul.mubr.f32.gmra.mxu1 %v1465_v29  ;;  %1962 = vmatmul.mubr.f32.gmra.mxu0 %v1467_v30 }
 0x1ce   : > { %v1470_v43 = vmax.f32 %v1042_v38, 0.0  ;;  %v1472_v44 = vmax.f32 %v1299_v39, 0.0  ;;  %3652 = vmatpush3.msra.mxu1 %v2121_v24  ;;  %v1046_v47 = vadd.f32 %v1045_v41, %v4677_v32  ;;  %v1303_v48 = vadd.f32 %v1302_v42, %v4679_v33 }
 0x1cf   : > { %v1047_v49 = vpop.f32.mrf.mxu1  ;;  %v1304_v50 = vpop.f32.mrf.mxu0  ;;  %3653 = vmatprep.subr.mxu1 %v2120_v40 }
 0x1d0   : > { %v1048_v51 = vadd.f32 %v1047_v49, %v4681_v52  ;;  %v1305_v53 = vadd.f32 %v1304_v50, %v4683_v34  ;;  %1741 = vmatprep.mubr.f32.mxu1 %v1470_v43  ;;  %1966 = vmatprep.mubr.f32.mxu0 %v1472_v44  ;;  %v1473_v60 = vmax.f32 %v1046_v47, 0.0  ;;  %v1475_v61 = vmax.f32 %v1303_v48, 0.0 }
 0x1d1   : > { %v1051_v56 = vpop.f32.mrf.mxu1  ;;  %v1308_v57 = vpop.f32.mrf.mxu0  ;;  %1742 = vmatmul.mubr.f32.gmra.mxu1 %v1469_v45  ;;  %1967 = vmatmul.mubr.f32.gmra.mxu0 %v1471_v46 }
 0x1d2   : > { %v1474_v58 = vmax.f32 %v1048_v51, 0.0  ;;  %v1476_v59 = vmax.f32 %v1305_v53, 0.0  ;;  %3654 = vmatpush3.msra.mxu1 %v2120_v40  ;;  %v1052_v62 = vadd.f32 %v1051_v56, %v4677_v32  ;;  %v1309_v63 = vadd.f32 %v1308_v57, %v4679_v33 }
 0x1d3   : > { %v1053_v0 = vpop.f32.mrf.mxu1  ;;  %v1310_v1 = vpop.f32.mrf.mxu0  ;;  %3655 = vmatprep.subr.mxu1 %v2119_v55 }
 0x1d4   : > { %v1054_v2 = vadd.f32 %v1053_v0, %v4681_v52  ;;  %v1311_v3 = vadd.f32 %v1310_v1, %v4683_v34  ;;  %1746 = vmatprep.mubr.f32.mxu1 %v1474_v58  ;;  %1971 = vmatprep.mubr.f32.mxu0 %v1476_v59  ;;  %v1477_v8 = vmax.f32 %v1052_v62, 0.0  ;;  %v1479_v9 = vmax.f32 %v1309_v63, 0.0 }
 0x1d5   : > { %v1057_v4 = vpop.f32.mrf.mxu1  ;;  %v1314_v5 = vpop.f32.mrf.mxu0  ;;  %1747 = vmatmul.mubr.f32.gmra.mxu1 %v1473_v60  ;;  %1972 = vmatmul.mubr.f32.gmra.mxu0 %v1475_v61 }
 0x1d6   : > { %v1478_v6 = vmax.f32 %v1054_v2, 0.0  ;;  %v1480_v7 = vmax.f32 %v1311_v3, 0.0  ;;  %3656 = vmatpush3.msra.mxu1 %v2119_v55  ;;  %v1058_v10 = vadd.f32 %v1057_v4, %v4677_v32  ;;  %v1315_v11 = vadd.f32 %v1314_v5, %v4679_v33 }
 0x1d7   : > { %v1059_v12 = vpop.f32.mrf.mxu1  ;;  %v1316_v13 = vpop.f32.mrf.mxu0 }
 0x1d8   : > { %v1060_v14 = vadd.f32 %v1059_v12, %v4681_v52  ;;  %v1317_v15 = vadd.f32 %v1316_v13, %v4683_v34  ;;  %1751 = vmatprep.mubr.f32.mxu1 %v1478_v6  ;;  %1976 = vmatprep.mubr.f32.mxu0 %v1480_v7  ;;  %v1481_v20 = vmax.f32 %v1058_v10, 0.0  ;;  %v1483_v21 = vmax.f32 %v1315_v11, 0.0 }
 0x1d9   : > { %v1063_v16 = vpop.f32.mrf.mxu1  ;;  %v1320_v17 = vpop.f32.mrf.mxu0  ;;  %1752 = vmatmul.mubr.f32.gmra.mxu1 %v1477_v8  ;;  %1977 = vmatmul.mubr.f32.gmra.mxu0 %v1479_v9 }
 0x1da   : > { %v1482_v18 = vmax.f32 %v1060_v14, 0.0  ;;  %v1484_v19 = vmax.f32 %v1317_v15, 0.0  ;;  %v1064_v22 = vadd.f32 %v1063_v16, %v4677_v32  ;;  %v1321_v54 = vadd.f32 %v1320_v17, %v4679_v33 }
 0x1db   : > { %v1065_v23 = vpop.f32.mrf.mxu1  ;;  %v1322_v24 = vpop.f32.mrf.mxu0 }
 0x1dc   : > { %v1066_v25 = vadd.f32 %v1065_v23, %v4681_v52  ;;  %v1323_v26 = vadd.f32 %v1322_v24, %v4683_v34  ;;  %1756 = vmatprep.mubr.f32.mxu1 %v1482_v18  ;;  %1981 = vmatprep.mubr.f32.mxu0 %v1484_v19  ;;  %v1485_v31 = vmax.f32 %v1064_v22, 0.0  ;;  %v1487_v35 = vmax.f32 %v1321_v54, 0.0  ;;  %v2118_v18 = vld [vmem:[%s5457_s7 + $0x20] sm:$0xff] }
 0x1dd   : > { %v1069_v27 = vpop.f32.mrf.mxu1  ;;  %v1326_v28 = vpop.f32.mrf.mxu0  ;;  %1757 = vmatmul.mubr.f32.gmra.mxu1 %v1481_v20  ;;  %1982 = vmatmul.mubr.f32.gmra.mxu0 %v1483_v21 }
 0x1de   : > { %v1486_v29 = vmax.f32 %v1066_v25, 0.0  ;;  %v1488_v30 = vmax.f32 %v1323_v26, 0.0  ;;  %v1070_v36 = vadd.f32 %v1069_v27, %v4677_v32  ;;  %v1327_v37 = vadd.f32 %v1326_v28, %v4679_v33  ;;  %3657 = vmatprep.subr.mxu1 %v2118_v18  ;;  %v2117_v26 = vld [vmem:[%s5457_s7 + $0x18] sm:$0xff] }
 0x1df   : > { %v1071_v38 = vpop.f32.mrf.mxu1  ;;  %v1328_v39 = vpop.f32.mrf.mxu0  ;;  %3658 = vmatpush3.msra.mxu1 %v2118_v18 }
 0x1e0   : > { %v1072_v40 = vadd.f32 %v1071_v38, %v4681_v52  ;;  %v1329_v41 = vadd.f32 %v1328_v39, %v4683_v34  ;;  %1761 = vmatprep.mubr.f32.mxu1 %v1486_v29  ;;  %1986 = vmatprep.mubr.f32.mxu0 %v1488_v30  ;;  %v1489_v46 = vmax.f32 %v1070_v36, 0.0  ;;  %v1491_v47 = vmax.f32 %v1327_v37, 0.0 }
 0x1e1   : > { %v1075_v42 = vpop.f32.mrf.mxu1  ;;  %v1332_v43 = vpop.f32.mrf.mxu0  ;;  %1762 = vmatmul.mubr.f32.gmra.mxu1 %v1485_v31  ;;  %1987 = vmatmul.mubr.f32.gmra.mxu0 %v1487_v35 }
 0x1e2   : > { %v1490_v44 = vmax.f32 %v1072_v40, 0.0  ;;  %v1492_v45 = vmax.f32 %v1329_v41, 0.0  ;;  %v1076_v48 = vadd.f32 %v1075_v42, %v4677_v32  ;;  %v1333_v49 = vadd.f32 %v1332_v43, %v4679_v33  ;;  %3659 = vmatprep.subr.mxu1 %v2117_v26  ;;  %v2116_v42 = vld [vmem:[%s5457_s7 + $0x10] sm:$0xff] }
 0x1e3   : > { %v1077_v50 = vpop.f32.mrf.mxu1  ;;  %v1334_v51 = vpop.f32.mrf.mxu0  ;;  %3660 = vmatpush3.msra.mxu1 %v2117_v26 }
 0x1e4   : > { %v1078_v53 = vadd.f32 %v1077_v50, %v4681_v52  ;;  %v1335_v55 = vadd.f32 %v1334_v51, %v4683_v34  ;;  %1766 = vmatprep.mubr.f32.mxu1 %v1490_v44  ;;  %1991 = vmatprep.mubr.f32.mxu0 %v1492_v45  ;;  %v1493_v60 = vmax.f32 %v1076_v48, 0.0  ;;  %v1495_v61 = vmax.f32 %v1333_v49, 0.0 }
 0x1e5   : > { %v1081_v56 = vpop.f32.mrf.mxu1  ;;  %v1338_v57 = vpop.f32.mrf.mxu0  ;;  %1767 = vmatmul.mubr.f32.gmra.mxu1 %v1489_v46  ;;  %1992 = vmatmul.mubr.f32.gmra.mxu0 %v1491_v47 }
 0x1e6   : > { %v1494_v58 = vmax.f32 %v1078_v53, 0.0  ;;  %v1496_v59 = vmax.f32 %v1335_v55, 0.0  ;;  %v1082_v62 = vadd.f32 %v1081_v56, %v4677_v32  ;;  %v1339_v63 = vadd.f32 %v1338_v57, %v4679_v33  ;;  %3661 = vmatprep.subr.mxu1 %v2116_v42  ;;  %v2115_v57 = vld [vmem:[%s5457_s7 + $0x8] sm:$0xff] }
 0x1e7   : > { %v1083_v0 = vpop.f32.mrf.mxu1  ;;  %v1340_v1 = vpop.f32.mrf.mxu0  ;;  %3662 = vmatpush3.msra.mxu1 %v2116_v42 }
 0x1e8   : > { %v1084_v2 = vadd.f32 %v1083_v0, %v4681_v52  ;;  %v1341_v3 = vadd.f32 %v1340_v1, %v4683_v34  ;;  %1771 = vmatprep.mubr.f32.mxu1 %v1494_v58  ;;  %1996 = vmatprep.mubr.f32.mxu0 %v1496_v59  ;;  %v1497_v8 = vmax.f32 %v1082_v62, 0.0  ;;  %v1499_v9 = vmax.f32 %v1339_v63, 0.0 }
 0x1e9   : > { %v1087_v4 = vpop.f32.mrf.mxu1  ;;  %v1344_v5 = vpop.f32.mrf.mxu0  ;;  %1772 = vmatmul.mubr.f32.gmra.mxu1 %v1493_v60  ;;  %1997 = vmatmul.mubr.f32.gmra.mxu0 %v1495_v61 }
 0x1ea   : > { %v1498_v6 = vmax.f32 %v1084_v2, 0.0  ;;  %v1500_v7 = vmax.f32 %v1341_v3, 0.0  ;;  %v1088_v10 = vadd.f32 %v1087_v4, %v4677_v32  ;;  %v1345_v11 = vadd.f32 %v1344_v5, %v4679_v33  ;;  %3663 = vmatprep.subr.mxu1 %v2115_v57 }
 0x1eb   : > { %v1089_v12 = vpop.f32.mrf.mxu1  ;;  %v1346_v13 = vpop.f32.mrf.mxu0  ;;  %3664 = vmatpush3.msra.mxu1 %v2115_v57 }
 0x1ec   : > { %v1090_v14 = vadd.f32 %v1089_v12, %v4681_v52  ;;  %v1347_v15 = vadd.f32 %v1346_v13, %v4683_v34  ;;  %1776 = vmatprep.mubr.f32.mxu1 %v1498_v6  ;;  %2001 = vmatprep.mubr.f32.mxu0 %v1500_v7  ;;  %v1501_v21 = vmax.f32 %v1088_v10, 0.0  ;;  %v1503_v22 = vmax.f32 %v1345_v11, 0.0  ;;  %v2114_v6 = vld [vmem:[%s5457_s7] sm:$0xff] }
 0x1ed   : > { %v1093_v16 = vpop.f32.mrf.mxu1  ;;  %v1350_v17 = vpop.f32.mrf.mxu0  ;;  %1777 = vmatmul.mubr.f32.gmra.mxu1 %v1497_v8  ;;  %2002 = vmatmul.mubr.f32.gmra.mxu0 %v1499_v9 }
 0x1ee   : > { %v1502_v19 = vmax.f32 %v1090_v14, 0.0  ;;  %v1504_v20 = vmax.f32 %v1347_v15, 0.0  ;;  %v1094_v54 = vadd.f32 %v1093_v16, %v4677_v32  ;;  %v1351_v23 = vadd.f32 %v1350_v17, %v4679_v33  ;;  %3665 = vmatprep.subr.mxu1 %v2114_v6 }
 0x1ef   : > { %v1095_v24 = vpop.f32.mrf.mxu1  ;;  %v1352_v25 = vpop.f32.mrf.mxu0  ;;  %3666 = vmatpush3.msra.mxu1 %v2114_v6 }
 0x1f0   : > { %v1096_v27 = vadd.f32 %v1095_v24, %v4681_v52  ;;  %v1353_v28 = vadd.f32 %v1352_v25, %v4683_v34  ;;  %1781 = vmatprep.mubr.f32.mxu1 %v1502_v19  ;;  %2006 = vmatprep.mubr.f32.mxu0 %v1504_v20  ;;  %v1505_v36 = vmax.f32 %v1094_v54, 0.0  ;;  %v1507_v37 = vmax.f32 %v1351_v23, 0.0 }
 0x1f1   : > { %v1099_v29 = vpop.f32.mrf.mxu1  ;;  %v1356_v30 = vpop.f32.mrf.mxu0  ;;  %1782 = vmatmul.mubr.f32.gmra.mxu1 %v1501_v21  ;;  %2007 = vmatmul.mubr.f32.gmra.mxu0 %v1503_v22 }
 0x1f2   : > { %v1506_v31 = vmax.f32 %v1096_v27, 0.0  ;;  %v1508_v35 = vmax.f32 %v1353_v28, 0.0  ;;  %v1100_v38 = vadd.f32 %v1099_v29, %v4677_v32  ;;  %v1357_v39 = vadd.f32 %v1356_v30, %v4679_v33 }
 0x1f3   : > { %v1101_v40 = vpop.f32.mrf.mxu1  ;;  %v1358_v41 = vpop.f32.mrf.mxu0 }
 0x1f4   : > { %v1102_v43 = vadd.f32 %v1101_v40, %v4681_v52  ;;  %v1359_v44 = vadd.f32 %v1358_v41, %v4683_v34  ;;  %1786 = vmatprep.mubr.f32.mxu1 %v1506_v31  ;;  %2011 = vmatprep.mubr.f32.mxu0 %v1508_v35  ;;  %v1509_v49 = vmax.f32 %v1100_v38, 0.0  ;;  %v1511_v50 = vmax.f32 %v1357_v39, 0.0 }
 0x1f5   : > { %v1105_v45 = vpop.f32.mrf.mxu1  ;;  %v1362_v46 = vpop.f32.mrf.mxu0  ;;  %1787 = vmatmul.mubr.f32.gmra.mxu1 %v1505_v36  ;;  %2012 = vmatmul.mubr.f32.gmra.mxu0 %v1507_v37 }
 0x1f6   : > { %v1510_v47 = vmax.f32 %v1102_v43, 0.0  ;;  %v1512_v48 = vmax.f32 %v1359_v44, 0.0  ;;  %v1106_v51 = vadd.f32 %v1105_v45, %v4677_v32  ;;  %v1363_v53 = vadd.f32 %v1362_v46, %v4679_v33 }
 0x1f7   : > { %v1107_v55 = vpop.f32.mrf.mxu1  ;;  %v1364_v56 = vpop.f32.mrf.mxu0 }
 0x1f8   : > { %v1108_v58 = vadd.f32 %v1107_v55, %v4681_v52  ;;  %v1365_v59 = vadd.f32 %v1364_v56, %v4683_v34  ;;  %1791 = vmatprep.mubr.f32.mxu1 %v1510_v47  ;;  %2016 = vmatprep.mubr.f32.mxu0 %v1512_v48  ;;  %v1513_v0 = vmax.f32 %v1106_v51, 0.0  ;;  %v1515_v1 = vmax.f32 %v1363_v53, 0.0 }
 0x1f9   : > { %v1111_v60 = vpop.f32.mrf.mxu1  ;;  %v1368_v61 = vpop.f32.mrf.mxu0  ;;  %1792 = vmatmul.mubr.f32.gmra.mxu1 %v1509_v49  ;;  %2017 = vmatmul.mubr.f32.gmra.mxu0 %v1511_v50 }
 0x1fa   : > { %v1514_v62 = vmax.f32 %v1108_v58, 0.0  ;;  %v1516_v63 = vmax.f32 %v1365_v59, 0.0  ;;  %v1112_v2 = vadd.f32 %v1111_v60, %v4677_v32  ;;  %v1369_v3 = vadd.f32 %v1368_v61, %v4679_v33 }
 0x1fb   : > { %v1113_v4 = vpop.f32.mrf.mxu1  ;;  %v1370_v5 = vpop.f32.mrf.mxu0 }
 0x1fc   : > { %v1114_v7 = vadd.f32 %v1113_v4, %v4681_v52  ;;  %v1371_v8 = vadd.f32 %v1370_v5, %v4683_v34  ;;  %1796 = vmatprep.mubr.f32.mxu1 %v1514_v62  ;;  %2021 = vmatprep.mubr.f32.mxu0 %v1516_v63  ;;  %v1517_v13 = vmax.f32 %v1112_v2, 0.0  ;;  %v1519_v14 = vmax.f32 %v1369_v3, 0.0 }
 0x1fd   : > { %v1117_v9 = vpop.f32.mrf.mxu1  ;;  %v1374_v10 = vpop.f32.mrf.mxu0  ;;  %1797 = vmatmul.mubr.f32.gmra.mxu1 %v1513_v0  ;;  %2022 = vmatmul.mubr.f32.gmra.mxu0 %v1515_v1 }
 0x1fe   : > { %v1518_v11 = vmax.f32 %v1114_v7, 0.0  ;;  %v1520_v12 = vmax.f32 %v1371_v8, 0.0  ;;  %v1118_v15 = vadd.f32 %v1117_v9, %v4677_v32  ;;  %v1375_v16 = vadd.f32 %v1374_v10, %v4679_v33 }
 0x1ff   : > { %v1119_v17 = vpop.f32.mrf.mxu1  ;;  %v1376_v18 = vpop.f32.mrf.mxu0 }
 0x200   : > { %v1120_v19 = vadd.f32 %v1119_v17, %v4681_v52  ;;  %v1377_v20 = vadd.f32 %v1376_v18, %v4683_v34  ;;  %1801 = vmatprep.mubr.f32.mxu1 %v1518_v11  ;;  %2026 = vmatprep.mubr.f32.mxu0 %v1520_v12  ;;  %v1521_v24 = vmax.f32 %v1118_v15, 0.0  ;;  %v1523_v25 = vmax.f32 %v1375_v16, 0.0 }
 0x201   : > { %v1123_v21 = vpop.f32.mrf.mxu1  ;;  %v1380_v22 = vpop.f32.mrf.mxu0  ;;  %1802 = vmatmul.mubr.f32.gmra.mxu1 %v1517_v13  ;;  %2027 = vmatmul.mubr.f32.gmra.mxu0 %v1519_v14 }
 0x202   : > { %v1522_v54 = vmax.f32 %v1120_v19, 0.0  ;;  %v1524_v23 = vmax.f32 %v1377_v20, 0.0  ;;  %v1124_v26 = vadd.f32 %v1123_v21, %v4677_v32  ;;  %v1381_v27 = vadd.f32 %v1380_v22, %v4679_v33 }
 0x203   : > { %v1125_v28 = vpop.f32.mrf.mxu1  ;;  %v1382_v29 = vpop.f32.mrf.mxu0 }
 0x204   : > { %v1126_v30 = vadd.f32 %v1125_v28, %v4681_v52  ;;  %v1383_v31 = vadd.f32 %v1382_v29, %v4683_v34  ;;  %1806 = vmatprep.mubr.f32.mxu1 %v1522_v54  ;;  %2031 = vmatprep.mubr.f32.mxu0 %v1524_v23  ;;  %v1525_v39 = vmax.f32 %v1124_v26, 0.0  ;;  %v1527_v40 = vmax.f32 %v1381_v27, 0.0 }
 0x205   : > { %v1129_v35 = vpop.f32.mrf.mxu1  ;;  %v1386_v36 = vpop.f32.mrf.mxu0  ;;  %1807 = vmatmul.mubr.f32.gmra.mxu1 %v1521_v24  ;;  %2032 = vmatmul.mubr.f32.gmra.mxu0 %v1523_v25 }
 0x206   : > { %v1526_v37 = vmax.f32 %v1126_v30, 0.0  ;;  %v1528_v38 = vmax.f32 %v1383_v31, 0.0  ;;  %v1130_v41 = vadd.f32 %v1129_v35, %v4677_v32  ;;  %v1387_v42 = vadd.f32 %v1386_v36, %v4679_v33 }
 0x207   : > { %v1131_v43 = vpop.f32.mrf.mxu1  ;;  %v1388_v44 = vpop.f32.mrf.mxu0 }
 0x208   : > { %v1132_v45 = vadd.f32 %v1131_v43, %v4681_v52  ;;  %v1389_v46 = vadd.f32 %v1388_v44, %v4683_v34  ;;  %1811 = vmatprep.mubr.f32.mxu1 %v1526_v37  ;;  %2036 = vmatprep.mubr.f32.mxu0 %v1528_v38  ;;  %v1529_v51 = vmax.f32 %v1130_v41, 0.0  ;;  %v1531_v53 = vmax.f32 %v1387_v42, 0.0 }
 0x209   : > { %v1135_v47 = vpop.f32.mrf.mxu1  ;;  %v1392_v48 = vpop.f32.mrf.mxu0  ;;  %1812 = vmatmul.mubr.f32.gmra.mxu1 %v1525_v39  ;;  %2037 = vmatmul.mubr.f32.gmra.mxu0 %v1527_v40 }
 0x20a   : > { %v1530_v49 = vmax.f32 %v1132_v45, 0.0  ;;  %v1532_v50 = vmax.f32 %v1389_v46, 0.0  ;;  %v1136_v55 = vadd.f32 %v1135_v47, %v4677_v32  ;;  %v1393_v56 = vadd.f32 %v1392_v48, %v4679_v33 }
 0x20b   : > { %v1137_v57 = vpop.f32.mrf.mxu1  ;;  %v1394_v58 = vpop.f32.mrf.mxu0 }
 0x20c   : > { %v1138_v59 = vadd.f32 %v1137_v57, %v4681_v52  ;;  %v1395_v60 = vadd.f32 %v1394_v58, %v4683_v34  ;;  %1816 = vmatprep.mubr.f32.mxu1 %v1530_v49  ;;  %2041 = vmatprep.mubr.f32.mxu0 %v1532_v50  ;;  %v1533_v1 = vmax.f32 %v1136_v55, 0.0  ;;  %v1535_v2 = vmax.f32 %v1393_v56, 0.0 }
 0x20d   : > { %v1141_v61 = vpop.f32.mrf.mxu1  ;;  %v1398_v62 = vpop.f32.mrf.mxu0  ;;  %1817 = vmatmul.mubr.f32.gmra.mxu1 %v1529_v51  ;;  %2042 = vmatmul.mubr.f32.gmra.mxu0 %v1531_v53 }
 0x20e   : > { %v1534_v63 = vmax.f32 %v1138_v59, 0.0  ;;  %v1536_v0 = vmax.f32 %v1395_v60, 0.0  ;;  %v1142_v3 = vadd.f32 %v1141_v61, %v4677_v32  ;;  %v1399_v4 = vadd.f32 %v1398_v62, %v4679_v33 }
 0x20f   : > { %v1143_v5 = vpop.f32.mrf.mxu1  ;;  %v1400_v6 = vpop.f32.mrf.mxu0 }
 0x210   : > { %v1144_v7 = vadd.f32 %v1143_v5, %v4681_v52  ;;  %v1401_v8 = vadd.f32 %v1400_v6, %v4683_v34  ;;  %1821 = vmatprep.mubr.f32.mxu1 %v1534_v63  ;;  %2046 = vmatprep.mubr.f32.mxu0 %v1536_v0  ;;  %v1537_v13 = vmax.f32 %v1142_v3, 0.0  ;;  %v1539_v14 = vmax.f32 %v1399_v4, 0.0 }
 0x211   : > { %v1147_v9 = vpop.f32.mrf.mxu1  ;;  %v1404_v10 = vpop.f32.mrf.mxu0  ;;  %1822 = vmatmul.mubr.f32.gmra.mxu1 %v1533_v1  ;;  %2047 = vmatmul.mubr.f32.gmra.mxu0 %v1535_v2 }
 0x212   : > { %v1538_v11 = vmax.f32 %v1144_v7, 0.0  ;;  %v1540_v12 = vmax.f32 %v1401_v8, 0.0  ;;  %v1148_v15 = vadd.f32 %v1147_v9, %v4677_v32  ;;  %v1405_v16 = vadd.f32 %v1404_v10, %v4679_v33 }
 0x213   : > { %v1149_v17 = vpop.f32.mrf.mxu1  ;;  %v1406_v18 = vpop.f32.mrf.mxu0 }
 0x214   : > { %v1150_v19 = vadd.f32 %v1149_v17, %v4681_v52  ;;  %v1407_v20 = vadd.f32 %v1406_v18, %v4683_v34  ;;  %1826 = vmatprep.mubr.f32.mxu1 %v1538_v11  ;;  %2051 = vmatprep.mubr.f32.mxu0 %v1540_v12  ;;  %v1541_v24 = vmax.f32 %v1148_v15, 0.0  ;;  %v1543_v25 = vmax.f32 %v1405_v16, 0.0  ;;  %v2397_v16 = vld [vmem:[%s5459_s9 + $0x18] sm:$0xff]  ;;  %v2396_v17 = vld [vmem:[%s5459_s9 + $0x10] sm:$0xff] }
 0x215   : > { %v1153_v21 = vpop.f32.mrf.mxu1  ;;  %v1410_v22 = vpop.f32.mrf.mxu0  ;;  %1827 = vmatmul.mubr.f32.gmra.mxu1 %v1537_v13  ;;  %2052 = vmatmul.mubr.f32.gmra.mxu0 %v1539_v14 }
 0x216   : > { %v1542_v54 = vmax.f32 %v1150_v19, 0.0  ;;  %v1544_v23 = vmax.f32 %v1407_v20, 0.0  ;;  %v1154_v26 = vadd.f32 %v1153_v21, %v4677_v32  ;;  %v1411_v27 = vadd.f32 %v1410_v22, %v4679_v33  ;;  %3715 = vmatprep.subr.mxu0 %v2397_v16 }
 0x217   : > { %v1155_v28 = vpop.f32.mrf.mxu1  ;;  %v1412_v29 = vpop.f32.mrf.mxu0  ;;  %3716 = vmatpush3.msra.mxu0 %v2397_v16 }
 0x218   : > { %v1156_v30 = vadd.f32 %v1155_v28, %v4681_v52  ;;  %v1413_v31 = vadd.f32 %v1412_v29, %v4683_v34  ;;  %1831 = vmatprep.mubr.f32.mxu1 %v1542_v54  ;;  %2056 = vmatprep.mubr.f32.mxu0 %v1544_v23  ;;  %v1545_v39 = vmax.f32 %v1154_v26, 0.0  ;;  %v1547_v40 = vmax.f32 %v1411_v27, 0.0 }
 0x219   : > { %v1159_v35 = vpop.f32.mrf.mxu1  ;;  %v1416_v36 = vpop.f32.mrf.mxu0  ;;  %1832 = vmatmul.mubr.f32.gmra.mxu1 %v1541_v24  ;;  %2057 = vmatmul.mubr.f32.gmra.mxu0 %v1543_v25 }
 0x21a   : > { %v1546_v37 = vmax.f32 %v1156_v30, 0.0  ;;  %v1548_v38 = vmax.f32 %v1413_v31, 0.0  ;;  %v1160_v41 = vadd.f32 %v1159_v35, %v4677_v32  ;;  %v1417_v42 = vadd.f32 %v1416_v36, %v4679_v33  ;;  %3717 = vmatprep.subr.mxu0 %v2396_v17 }
 0x21b   : > { %v1161_v43 = vpop.f32.mrf.mxu1  ;;  %v1418_v44 = vpop.f32.mrf.mxu0  ;;  %3718 = vmatpush3.msra.mxu0 %v2396_v17 }
 0x21c   : > { %v1162_v45 = vadd.f32 %v1161_v43, %v4681_v52  ;;  %v1419_v46 = vadd.f32 %v1418_v44, %v4683_v34  ;;  %1836 = vmatprep.mubr.f32.mxu1 %v1546_v37  ;;  %2061 = vmatprep.mubr.f32.mxu0 %v1548_v38  ;;  %v1549_v51 = vmax.f32 %v1160_v41, 0.0  ;;  %v1551_v53 = vmax.f32 %v1417_v42, 0.0 }
 0x21d   : > { %v1165_v47 = vpop.f32.mrf.mxu1  ;;  %v1422_v48 = vpop.f32.mrf.mxu0  ;;  %1837 = vmatmul.mubr.f32.gmra.mxu1 %v1545_v39  ;;  %2062 = vmatmul.mubr.f32.gmra.mxu0 %v1547_v40 }
 0x21e   : > { %v1550_v49 = vmax.f32 %v1162_v45, 0.0  ;;  %v1552_v50 = vmax.f32 %v1419_v46, 0.0  ;;  %v1166_v55 = vadd.f32 %v1165_v47, %v4677_v32  ;;  %v1423_v56 = vadd.f32 %v1422_v48, %v4679_v33 }
 0x21f   : > { %v1167_v57 = vpop.f32.mrf.mxu1  ;;  %v1424_v58 = vpop.f32.mrf.mxu0 }
 0x220   : > { %v1168_v59 = vadd.f32 %v1167_v57, %v4681_v52  ;;  %v1425_v60 = vadd.f32 %v1424_v58, %v4683_v34  ;;  %1841 = vmatprep.mubr.f32.mxu1 %v1550_v49  ;;  %2066 = vmatprep.mubr.f32.mxu0 %v1552_v50  ;;  %v1553_v1 = vmax.f32 %v1166_v55, 0.0  ;;  %v1555_v2 = vmax.f32 %v1423_v56, 0.0 }
 0x221   : > { %v1171_v61 = vpop.f32.mrf.mxu1  ;;  %v1428_v62 = vpop.f32.mrf.mxu0  ;;  %1842 = vmatmul.mubr.f32.gmra.mxu1 %v1549_v51  ;;  %2067 = vmatmul.mubr.f32.gmra.mxu0 %v1551_v53 }
 0x222   : > { %v1554_v63 = vmax.f32 %v1168_v59, 0.0  ;;  %v1556_v0 = vmax.f32 %v1425_v60, 0.0  ;;  %v1172_v3 = vadd.f32 %v1171_v61, %v4677_v32  ;;  %v1429_v4 = vadd.f32 %v1428_v62, %v4679_v33  ;;  %v4864_v32 = vld [vmem:[%s5456_s6] ss:$0 sm:$0xff] }
 0x223   : > { %v1173_v5 = vpop.f32.mrf.mxu1  ;;  %v1430_v6 = vpop.f32.mrf.mxu0 }
 0x224   : > { %v1174_v7 = vadd.f32 %v1173_v5, %v4681_v52  ;;  %v1431_v8 = vadd.f32 %v1430_v6, %v4683_v34  ;;  %1846 = vmatprep.mubr.f32.mxu1 %v1554_v63  ;;  %2071 = vmatprep.mubr.f32.mxu0 %v1556_v0  ;;  %v1557_v11 = vmax.f32 %v1172_v3, 0.0  ;;  %v1559_v12 = vmax.f32 %v1429_v4, 0.0 }
 0x225   : > { %1847 = vmatmul.mubr.f32.gmra.mxu1 %v1553_v1  ;;  %2072 = vmatmul.mubr.f32.gmra.mxu0 %v1555_v2 }
 0x226   : > { %v1558_v9 = vmax.f32 %v1174_v7, 0.0  ;;  %v1560_v10 = vmax.f32 %v1431_v8, 0.0 }
 0x228   : > { %1851 = vmatprep.mubr.f32.mxu1 %v1558_v9  ;;  %2076 = vmatprep.mubr.f32.mxu0 %v1560_v10 }
 0x229   : > { %1852 = vmatmul.mubr.f32.gmra.mxu1 %v1557_v11  ;;  %2077 = vmatmul.mubr.f32.gmra.mxu0 %v1559_v12 }
 0x26d   : > { %v1698_v33 = vpop.f32.mrf.mxu1  ;;  %v1923_v52 = vpop.f32.mrf.mxu0 }
 0x26e   : > { %v1699_v34 = vadd.f32 %v4864_v32, %v1698_v33 }
 0x26f   : > { %v1700_v13 = vpop.f32.mrf.mxu1  ;;  %v1925_v14 = vpop.f32.mrf.mxu0 }
 0x270   : > { %v1924_v15 = vadd.f32 %v1923_v52, %v1699_v34 }
 0x271   : > { %v1703_v18 = vpop.f32.mrf.mxu1  ;;  %v1928_v19 = vpop.f32.mrf.mxu0 }
 0x272   : > { %v2082_v20 = vmax.f32 %v1924_v15, 0.0  ;;  %v1704_v21 = vadd.f32 %v4864_v32, %v1703_v18 }
 0x273   : > { %v1705_v22 = vpop.f32.mrf.mxu1  ;;  %v1930_v54 = vpop.f32.mrf.mxu0 }
 0x274   : > { %v1929_v23 = vadd.f32 %v1928_v19, %v1704_v21  ;;  %3667 = vmatprep.mubr.f32.mxu1 %v2082_v20 }
 0x275   : > { %v1708_v24 = vpop.f32.mrf.mxu1  ;;  %v1933_v25 = vpop.f32.mrf.mxu0 }
 0x276   : > { %v2083_v26 = vmax.f32 %v1929_v23, 0.0  ;;  %v1709_v27 = vadd.f32 %v4864_v32, %v1708_v24 }
 0x277   : > { %v1710_v28 = vpop.f32.mrf.mxu1  ;;  %v1935_v29 = vpop.f32.mrf.mxu0 }
 0x278   : > { %v1934_v30 = vadd.f32 %v1933_v25, %v1709_v27  ;;  %3668 = vmatmul.mubr.f32.vlgmr.msra.gmra.mxu1 %v2083_v26 }
 0x279   : > { %v1713_v31 = vpop.f32.mrf.mxu1  ;;  %v1938_v35 = vpop.f32.mrf.mxu0 }
 0x27a   : > { %v2084_v36 = vmax.f32 %v1934_v30, 0.0  ;;  %v1714_v37 = vadd.f32 %v4864_v32, %v1713_v31 }
 0x27b   : > { %v1715_v38 = vpop.f32.mrf.mxu1  ;;  %v1940_v39 = vpop.f32.mrf.mxu0 }
 0x27c   : > { %v1939_v40 = vadd.f32 %v1938_v35, %v1714_v37  ;;  %3670 = vmatprep.mubr.f32.mxu1 %v2084_v36 }
 0x27d   : > { %v1718_v41 = vpop.f32.mrf.mxu1  ;;  %v1943_v42 = vpop.f32.mrf.mxu0 }
 0x27e   : > { %v2085_v43 = vmax.f32 %v1939_v40, 0.0  ;;  %v1719_v44 = vadd.f32 %v4864_v32, %v1718_v41 }
 0x27f   : > { %v1720_v45 = vpop.f32.mrf.mxu1  ;;  %v1945_v46 = vpop.f32.mrf.mxu0 }
 0x280   : > { %v1944_v47 = vadd.f32 %v1943_v42, %v1719_v44  ;;  %3671 = vmatmul.mubr.f32.gmra.mxu1 %v2085_v43 }
 0x281   : > { %v1723_v48 = vpop.f32.mrf.mxu1  ;;  %v1948_v49 = vpop.f32.mrf.mxu0 }
 0x282   : > { %v2086_v50 = vmax.f32 %v1944_v47, 0.0  ;;  %v1724_v51 = vadd.f32 %v4864_v32, %v1723_v48 }
 0x283   : > { %v1725_v53 = vpop.f32.mrf.mxu1  ;;  %v1950_v55 = vpop.f32.mrf.mxu0 }
 0x284   : > { %v1949_v56 = vadd.f32 %v1948_v49, %v1724_v51  ;;  %3673 = vmatprep.mubr.f32.mxu1 %v2086_v50 }
 0x285   : > { %v1728_v57 = vpop.f32.mrf.mxu1  ;;  %v1953_v58 = vpop.f32.mrf.mxu0 }
 0x286   : > { %v2087_v59 = vmax.f32 %v1949_v56, 0.0  ;;  %v1729_v60 = vadd.f32 %v4864_v32, %v1728_v57 }
 0x287   : > { %v1730_v61 = vpop.f32.mrf.mxu1  ;;  %v1955_v62 = vpop.f32.mrf.mxu0 }
 0x288   : > { %v1954_v63 = vadd.f32 %v1953_v58, %v1729_v60  ;;  %3674 = vmatmul.mubr.f32.gmra.mxu1 %v2087_v59 }
 0x289   : > { %v1733_v0 = vpop.f32.mrf.mxu1  ;;  %v1958_v1 = vpop.f32.mrf.mxu0 }
 0x28a   : > { %v2088_v2 = vmax.f32 %v1954_v63, 0.0  ;;  %v1734_v3 = vadd.f32 %v4864_v32, %v1733_v0 }
 0x28b   : > { %v1735_v4 = vpop.f32.mrf.mxu1  ;;  %v1960_v5 = vpop.f32.mrf.mxu0 }
 0x28c   : > { %v1959_v6 = vadd.f32 %v1958_v1, %v1734_v3  ;;  %3676 = vmatprep.mubr.f32.mxu1 %v2088_v2 }
 0x28d   : > { %v1738_v7 = vpop.f32.mrf.mxu1  ;;  %v1963_v8 = vpop.f32.mrf.mxu0 }
 0x28e   : > { %v2089_v9 = vmax.f32 %v1959_v6, 0.0  ;;  %v1739_v10 = vadd.f32 %v4864_v32, %v1738_v7 }
 0x28f   : > { %v1740_v11 = vpop.f32.mrf.mxu1  ;;  %v1965_v12 = vpop.f32.mrf.mxu0 }
 0x290   : > { %v1964_v33 = vadd.f32 %v1963_v8, %v1739_v10  ;;  %3677 = vmatmul.mubr.f32.gmra.mxu1 %v2089_v9 }
 0x291   : > { %v1743_v52 = vpop.f32.mrf.mxu1  ;;  %v1968_v34 = vpop.f32.mrf.mxu0 }
 0x292   : > { %v2090_v13 = vmax.f32 %v1964_v33, 0.0  ;;  %v1744_v14 = vadd.f32 %v4864_v32, %v1743_v52 }
 0x293   : > { %v1745_v15 = vpop.f32.mrf.mxu1  ;;  %v1970_v16 = vpop.f32.mrf.mxu0 }
 0x294   : > { %v1969_v17 = vadd.f32 %v1968_v34, %v1744_v14  ;;  %3679 = vmatprep.mubr.f32.mxu1 %v2090_v13 }
 0x295   : > { %v1748_v18 = vpop.f32.mrf.mxu1  ;;  %v1973_v19 = vpop.f32.mrf.mxu0 }
 0x296   : > { %v2091_v20 = vmax.f32 %v1969_v17, 0.0  ;;  %v1749_v21 = vadd.f32 %v4864_v32, %v1748_v18 }
 0x297   : > { %v1750_v22 = vpop.f32.mrf.mxu1  ;;  %v1975_v54 = vpop.f32.mrf.mxu0 }
 0x298   : > { %v1974_v23 = vadd.f32 %v1973_v19, %v1749_v21  ;;  %3680 = vmatmul.mubr.f32.gmra.mxu1 %v2091_v20 }
 0x299   : > { %v1753_v24 = vpop.f32.mrf.mxu1  ;;  %v1978_v25 = vpop.f32.mrf.mxu0 }
 0x29a   : > { %v2092_v26 = vmax.f32 %v1974_v23, 0.0  ;;  %v1754_v27 = vadd.f32 %v4864_v32, %v1753_v24  ;;  %v2395_v23 = vld [vmem:[%s5459_s9 + $0x8] sm:$0xff] }
 0x29b   : > { %v1755_v28 = vpop.f32.mrf.mxu1  ;;  %v1980_v29 = vpop.f32.mrf.mxu0  ;;  %3719 = vmatprep.subr.mxu0 %v2395_v23 }
 0x29c   : > { %v1979_v30 = vadd.f32 %v1978_v25, %v1754_v27  ;;  %3682 = vmatprep.mubr.f32.mxu1 %v2092_v26  ;;  %3720 = vmatpush3.msra.mxu0 %v2395_v23  ;;  %v2394_v27 = vld [vmem:[%s5459_s9] sm:$0xff] }
 0x29d   : > { %v1758_v31 = vpop.f32.mrf.mxu1  ;;  %v1983_v35 = vpop.f32.mrf.mxu0  ;;  %3721 = vmatprep.subr.mxu0 %v2394_v27 }
 0x29e   : > { %v2093_v36 = vmax.f32 %v1979_v30, 0.0  ;;  %v1759_v37 = vadd.f32 %v4864_v32, %v1758_v31  ;;  %3722 = vmatpush3.msra.mxu0 %v2394_v27 }
 0x29f   : > { %v1760_v38 = vpop.f32.mrf.mxu1  ;;  %v1985_v39 = vpop.f32.mrf.mxu0 }
 0x2a0   : > { %v1984_v40 = vadd.f32 %v1983_v35, %v1759_v37  ;;  %3683 = vmatmul.mubr.f32.gmra.mxu1 %v2093_v36 }
 0x2a1   : > { %v1763_v41 = vpop.f32.mrf.mxu1  ;;  %v1988_v42 = vpop.f32.mrf.mxu0 }
 0x2a2   : > { %v2094_v43 = vmax.f32 %v1984_v40, 0.0  ;;  %v1764_v44 = vadd.f32 %v4864_v32, %v1763_v41 }
 0x2a3   : > { %v1765_v45 = vpop.f32.mrf.mxu1  ;;  %v1990_v46 = vpop.f32.mrf.mxu0 }
 0x2a4   : > { %v1989_v47 = vadd.f32 %v1988_v42, %v1764_v44  ;;  %3685 = vmatprep.mubr.f32.mxu1 %v2094_v43 }
 0x2a5   : > { %v1768_v48 = vpop.f32.mrf.mxu1  ;;  %v1993_v49 = vpop.f32.mrf.mxu0 }
 0x2a6   : > { %v2095_v50 = vmax.f32 %v1989_v47, 0.0  ;;  %v1769_v51 = vadd.f32 %v4864_v32, %v1768_v48 }
 0x2a7   : > { %v1770_v53 = vpop.f32.mrf.mxu1  ;;  %v1995_v55 = vpop.f32.mrf.mxu0 }
 0x2a8   : > { %v1994_v56 = vadd.f32 %v1993_v49, %v1769_v51  ;;  %3686 = vmatmul.mubr.f32.gmra.mxu1 %v2095_v50 }
 0x2a9   : > { %v1773_v57 = vpop.f32.mrf.mxu1  ;;  %v1998_v58 = vpop.f32.mrf.mxu0 }
 0x2aa   : > { %v2096_v59 = vmax.f32 %v1994_v56, 0.0  ;;  %v1774_v60 = vadd.f32 %v4864_v32, %v1773_v57 }
 0x2ab   : > { %v1775_v61 = vpop.f32.mrf.mxu1  ;;  %v2000_v62 = vpop.f32.mrf.mxu0 }
 0x2ac   : > { %v1999_v63 = vadd.f32 %v1998_v58, %v1774_v60  ;;  %3688 = vmatprep.mubr.f32.mxu1 %v2096_v59 }
 0x2ad   : > { %v1778_v0 = vpop.f32.mrf.mxu1  ;;  %v2003_v1 = vpop.f32.mrf.mxu0 }
 0x2ae   : > { %v2097_v2 = vmax.f32 %v1999_v63, 0.0  ;;  %v1779_v3 = vadd.f32 %v4864_v32, %v1778_v0 }
 0x2af   : > { %v1780_v4 = vpop.f32.mrf.mxu1  ;;  %v2005_v5 = vpop.f32.mrf.mxu0 }
 0x2b0   : > { %v2004_v6 = vadd.f32 %v2003_v1, %v1779_v3  ;;  %3689 = vmatmul.mubr.f32.gmra.mxu1 %v2097_v2 }
 0x2b1   : > { %v1783_v7 = vpop.f32.mrf.mxu1  ;;  %v2008_v8 = vpop.f32.mrf.mxu0 }
 0x2b2   : > { %v2098_v9 = vmax.f32 %v2004_v6, 0.0  ;;  %v1784_v10 = vadd.f32 %v4864_v32, %v1783_v7 }
 0x2b3   : > { %v1785_v11 = vpop.f32.mrf.mxu1  ;;  %v2010_v12 = vpop.f32.mrf.mxu0 }
 0x2b4   : > { %v2009_v33 = vadd.f32 %v2008_v8, %v1784_v10  ;;  %3691 = vmatprep.mubr.f32.mxu1 %v2098_v9 }
 0x2b5   : > { %v1788_v52 = vpop.f32.mrf.mxu1  ;;  %v2013_v34 = vpop.f32.mrf.mxu0 }
 0x2b6   : > { %v2099_v13 = vmax.f32 %v2009_v33, 0.0  ;;  %v1789_v14 = vadd.f32 %v4864_v32, %v1788_v52 }
 0x2b7   : > { %v1790_v15 = vpop.f32.mrf.mxu1  ;;  %v2015_v16 = vpop.f32.mrf.mxu0 }
 0x2b8   : > { %v2014_v17 = vadd.f32 %v2013_v34, %v1789_v14  ;;  %3692 = vmatmul.mubr.f32.gmra.mxu1 %v2099_v13 }
 0x2b9   : > { %v1793_v18 = vpop.f32.mrf.mxu1  ;;  %v2018_v19 = vpop.f32.mrf.mxu0 }
 0x2ba   : > { %v2100_v20 = vmax.f32 %v2014_v17, 0.0  ;;  %v1794_v21 = vadd.f32 %v4864_v32, %v1793_v18 }
 0x2bb   : > { %v1795_v22 = vpop.f32.mrf.mxu1  ;;  %v2020_v54 = vpop.f32.mrf.mxu0 }
 0x2bc   : > { %v2019_v24 = vadd.f32 %v2018_v19, %v1794_v21  ;;  %3694 = vmatprep.mubr.f32.mxu1 %v2100_v20 }
 0x2bd   : > { %v1798_v25 = vpop.f32.mrf.mxu1  ;;  %v2023_v26 = vpop.f32.mrf.mxu0 }
 0x2be   : > { %v2101_v28 = vmax.f32 %v2019_v24, 0.0  ;;  %v1799_v29 = vadd.f32 %v4864_v32, %v1798_v25 }
 0x2bf   : > { %v1800_v30 = vpop.f32.mrf.mxu1  ;;  %v2025_v31 = vpop.f32.mrf.mxu0 }
 0x2c0   : > { %v2024_v35 = vadd.f32 %v2023_v26, %v1799_v29  ;;  %3695 = vmatmul.mubr.f32.gmra.mxu1 %v2101_v28 }
 0x2c1   : > { %v1803_v36 = vpop.f32.mrf.mxu1  ;;  %v2028_v37 = vpop.f32.mrf.mxu0 }
 0x2c2   : > { %v2102_v38 = vmax.f32 %v2024_v35, 0.0  ;;  %v1804_v39 = vadd.f32 %v4864_v32, %v1803_v36 }
 0x2c3   : > { %v1805_v40 = vpop.f32.mrf.mxu1  ;;  %v2030_v41 = vpop.f32.mrf.mxu0 }
 0x2c4   : > { %v2029_v42 = vadd.f32 %v2028_v37, %v1804_v39  ;;  %3697 = vmatprep.mubr.f32.mxu1 %v2102_v38 }
 0x2c5   : > { %v1808_v43 = vpop.f32.mrf.mxu1  ;;  %v2033_v44 = vpop.f32.mrf.mxu0 }
 0x2c6   : > { %v2103_v45 = vmax.f32 %v2029_v42, 0.0  ;;  %v1809_v46 = vadd.f32 %v4864_v32, %v1808_v43 }
 0x2c7   : > { %v1810_v47 = vpop.f32.mrf.mxu1  ;;  %v2035_v48 = vpop.f32.mrf.mxu0 }
 0x2c8   : > { %v2034_v49 = vadd.f32 %v2033_v44, %v1809_v46  ;;  %3698 = vmatmul.mubr.f32.gmra.mxu1 %v2103_v45 }
 0x2c9   : > { %v1813_v50 = vpop.f32.mrf.mxu1  ;;  %v2038_v51 = vpop.f32.mrf.mxu0 }
 0x2ca   : > { %v2104_v53 = vmax.f32 %v2034_v49, 0.0  ;;  %v1814_v55 = vadd.f32 %v4864_v32, %v1813_v50 }
 0x2cb   : > { %v1815_v56 = vpop.f32.mrf.mxu1  ;;  %v2040_v57 = vpop.f32.mrf.mxu0 }
 0x2cc   : > { %v2039_v58 = vadd.f32 %v2038_v51, %v1814_v55  ;;  %3700 = vmatprep.mubr.f32.mxu1 %v2104_v53  ;;  %v4913_v51 = vld [vmem:[%s5458_s8] ss:$0 sm:$0xff] }
 0x2cd   : > { %v1818_v59 = vpop.f32.mrf.mxu1  ;;  %v2043_v60 = vpop.f32.mrf.mxu0 }
 0x2ce   : > { %v2105_v61 = vmax.f32 %v2039_v58, 0.0  ;;  %v1819_v62 = vadd.f32 %v4864_v32, %v1818_v59 }
 0x2cf   : > { %v1820_v63 = vpop.f32.mrf.mxu1  ;;  %v2045_v0 = vpop.f32.mrf.mxu0 }
 0x2d0   : > { %v2044_v1 = vadd.f32 %v2043_v60, %v1819_v62  ;;  %3701 = vmatmul.mubr.f32.gmra.mxu1 %v2105_v61 }
 0x2d1   : > { %v1823_v2 = vpop.f32.mrf.mxu1  ;;  %v2048_v3 = vpop.f32.mrf.mxu0 }
 0x2d2   : > { %v2106_v4 = vmax.f32 %v2044_v1, 0.0  ;;  %v1824_v5 = vadd.f32 %v4864_v32, %v1823_v2 }
 0x2d3   : > { %v1825_v6 = vpop.f32.mrf.mxu1  ;;  %v2050_v7 = vpop.f32.mrf.mxu0 }
 0x2d4   : > { %v2049_v8 = vadd.f32 %v2048_v3, %v1824_v5  ;;  %3703 = vmatprep.mubr.f32.mxu1 %v2106_v4 }
 0x2d5   : > { %v1828_v9 = vpop.f32.mrf.mxu1  ;;  %v2053_v10 = vpop.f32.mrf.mxu0 }
 0x2d6   : > { %v2107_v11 = vmax.f32 %v2049_v8, 0.0  ;;  %v1829_v12 = vadd.f32 %v4864_v32, %v1828_v9 }
 0x2d7   : > { %v1830_v33 = vpop.f32.mrf.mxu1  ;;  %v2055_v52 = vpop.f32.mrf.mxu0 }
 0x2d8   : > { %v2054_v34 = vadd.f32 %v2053_v10, %v1829_v12  ;;  %3704 = vmatmul.mubr.f32.gmra.mxu1 %v2107_v11 }
 0x2d9   : > { %v1833_v13 = vpop.f32.mrf.mxu1  ;;  %v2058_v14 = vpop.f32.mrf.mxu0 }
 0x2da   : > { %v2108_v15 = vmax.f32 %v2054_v34, 0.0  ;;  %v1834_v16 = vadd.f32 %v4864_v32, %v1833_v13 }
 0x2db   : > { %v1835_v17 = vpop.f32.mrf.mxu1  ;;  %v2060_v18 = vpop.f32.mrf.mxu0 }
 0x2dc   : > { %v2059_v19 = vadd.f32 %v2058_v14, %v1834_v16  ;;  %3706 = vmatprep.mubr.f32.mxu1 %v2108_v15 }
 0x2dd   : > { %v1838_v20 = vpop.f32.mrf.mxu1  ;;  %v2063_v21 = vpop.f32.mrf.mxu0 }
 0x2de   : > { %v2109_v22 = vmax.f32 %v2059_v19, 0.0  ;;  %v1839_v54 = vadd.f32 %v4864_v32, %v1838_v20 }
 0x2df   : > { %v1840_v23 = vpop.f32.mrf.mxu1  ;;  %v2065_v24 = vpop.f32.mrf.mxu0 }
 0x2e0   : > { %v2064_v25 = vadd.f32 %v2063_v21, %v1839_v54  ;;  %3707 = vmatmul.mubr.f32.gmra.mxu1 %v2109_v22 }
 0x2e1   : > { %v1843_v26 = vpop.f32.mrf.mxu1  ;;  %v2068_v27 = vpop.f32.mrf.mxu0 }
 0x2e2   : > { %v2110_v28 = vmax.f32 %v2064_v25, 0.0  ;;  %v1844_v29 = vadd.f32 %v4864_v32, %v1843_v26 }
 0x2e3   : > { %v1845_v30 = vpop.f32.mrf.mxu1  ;;  %v2070_v31 = vpop.f32.mrf.mxu0 }
 0x2e4   : > { %v2069_v35 = vadd.f32 %v2068_v27, %v1844_v29  ;;  %3709 = vmatprep.mubr.f32.mxu1 %v2110_v28 }
 0x2e5   : > { %v1848_v36 = vpop.f32.mrf.mxu1  ;;  %v2073_v37 = vpop.f32.mrf.mxu0 }
 0x2e6   : > { %v2111_v38 = vmax.f32 %v2069_v35, 0.0  ;;  %v1849_v39 = vadd.f32 %v4864_v32, %v1848_v36 }
 0x2e7   : > { %v1850_v40 = vpop.f32.mrf.mxu1  ;;  %v2075_v41 = vpop.f32.mrf.mxu0 }
 0x2e8   : > { %v2074_v42 = vadd.f32 %v2073_v37, %v1849_v39  ;;  %3710 = vmatmul.mubr.f32.gmra.mxu1 %v2111_v38 }
 0x2e9   : > { %v1853_v43 = vpop.f32.mrf.mxu1  ;;  %v2078_v44 = vpop.f32.mrf.mxu0 }
 0x2ea   : > { %v2112_v45 = vmax.f32 %v2074_v42, 0.0  ;;  %v1854_v46 = vadd.f32 %v4864_v32, %v1853_v43 }
 0x2eb   : > { %v1855_v47 = vpop.f32.mrf.mxu1  ;;  %v2080_v48 = vpop.f32.mrf.mxu0 }
 0x2ec   : > { %v2079_v49 = vadd.f32 %v2078_v44, %v1854_v46  ;;  %3712 = vmatprep.mubr.f32.mxu1 %v2112_v45 }
 0x2ee   : > { %v2113_v50 = vmax.f32 %v2079_v49, 0.0 }
 0x2f0   : > { %3713 = vmatmul.mubr.f32.gmra.mxu1 %v2113_v50 }
 0x338   : > { %v3669_v53 = vpop.f32.mrf.mxu1 }
 0x339   : > { %v2209_v55 = vadd.f32 %v3669_v53, %v4913_v51 }
 0x33a   : > { %v2203_v56 = vpop.f32.mrf.mxu1 }
 0x33b   : > { %v2204_v57 = vadd.f32 %v4913_v51, %v2203_v56  ;;  %v2363_v59 = vmax.f32 %v2209_v55, 0.0 }
 0x33d   : > { %v2362_v58 = vmax.f32 %v2204_v57, 0.0 }
 0x33f   : > { %3723 = vmatprep.mubr.msk.f32.mxu0 %vm431_vm0, %v2362_v58 }
 0x340   : > { %v3672_v32 = vpop.f32.mrf.mxu1  ;;  %3724 = vmatmul.mubr.msk.f32.vlgmr.msra.gmra.mxu0 %vm431_vm0, %v2363_v59 }
 0x341   : > { %v2219_v60 = vadd.f32 %v3672_v32, %v4913_v51 }
 0x342   : > { %v2213_v61 = vpop.f32.mrf.mxu1 }
 0x343   : > { %v2214_v62 = vadd.f32 %v4913_v51, %v2213_v61  ;;  %v2365_v0 = vmax.f32 %v2219_v60, 0.0 }
 0x345   : > { %v2364_v63 = vmax.f32 %v2214_v62, 0.0 }
 0x347   : > { %3726 = vmatprep.mubr.msk.f32.mxu0 %vm431_vm0, %v2364_v63 }
 0x348   : > { %v3675_v1 = vpop.f32.mrf.mxu1  ;;  %3727 = vmatmul.mubr.msk.f32.gmra.mxu0 %vm431_vm0, %v2365_v0 }
 0x349   : > { %v2229_v2 = vadd.f32 %v3675_v1, %v4913_v51 }
 0x34a   : > { %v2223_v3 = vpop.f32.mrf.mxu1 }
 0x34b   : > { %v2224_v4 = vadd.f32 %v4913_v51, %v2223_v3  ;;  %v2367_v6 = vmax.f32 %v2229_v2, 0.0 }
 0x34d   : > { %v2366_v5 = vmax.f32 %v2224_v4, 0.0 }
 0x34f   : > { %3729 = vmatprep.mubr.msk.f32.mxu0 %vm431_vm0, %v2366_v5 }
 0x350   : > { %v3678_v7 = vpop.f32.mrf.mxu1  ;;  %3730 = vmatmul.mubr.msk.f32.gmra.mxu0 %vm431_vm0, %v2367_v6 }
 0x351   : > { %v2239_v8 = vadd.f32 %v3678_v7, %v4913_v51 }
 0x352   : > { %v2233_v9 = vpop.f32.mrf.mxu1 }
 0x353   : > { %v2234_v10 = vadd.f32 %v4913_v51, %v2233_v9  ;;  %v2369_v12 = vmax.f32 %v2239_v8, 0.0 }
 0x355   : > { %v2368_v11 = vmax.f32 %v2234_v10, 0.0 }
 0x357   : > { %3732 = vmatprep.mubr.msk.f32.mxu0 %vm431_vm0, %v2368_v11 }
 0x358   : > { %v3681_v33 = vpop.f32.mrf.mxu1  ;;  %3733 = vmatmul.mubr.msk.f32.gmra.mxu0 %vm431_vm0, %v2369_v12 }
 0x359   : > { %v2249_v52 = vadd.f32 %v3681_v33, %v4913_v51 }
 0x35a   : > { %v2243_v34 = vpop.f32.mrf.mxu1 }
 0x35b   : > { %v2244_v13 = vadd.f32 %v4913_v51, %v2243_v34  ;;  %v2371_v15 = vmax.f32 %v2249_v52, 0.0 }
 0x35d   : > { %v2370_v14 = vmax.f32 %v2244_v13, 0.0 }
 0x35f   : > { %3735 = vmatprep.mubr.msk.f32.mxu0 %vm431_vm0, %v2370_v14 }
 0x360   : > { %v3684_v16 = vpop.f32.mrf.mxu1  ;;  %3736 = vmatmul.mubr.msk.f32.gmra.mxu0 %vm431_vm0, %v2371_v15 }
 0x361   : > { %v2259_v17 = vadd.f32 %v3684_v16, %v4913_v51 }
 0x362   : > { %v2253_v18 = vpop.f32.mrf.mxu1 }
 0x363   : > { %v2254_v19 = vadd.f32 %v4913_v51, %v2253_v18  ;;  %v2373_v21 = vmax.f32 %v2259_v17, 0.0 }
 0x365   : > { %v2372_v20 = vmax.f32 %v2254_v19, 0.0  ;;  %v4982_v19 = vld [vmem:[%s5460_s10] ss:$0 sm:$0xff] }
 0x367   : > { %3738 = vmatprep.mubr.msk.f32.mxu0 %vm431_vm0, %v2372_v20 }
 0x368   : > { %v3687_v22 = vpop.f32.mrf.mxu1  ;;  %3739 = vmatmul.mubr.msk.f32.gmra.mxu0 %vm431_vm0, %v2373_v21 }
 0x369   : > { %v2269_v54 = vadd.f32 %v3687_v22, %v4913_v51 }
 0x36a   : > { %v2263_v23 = vpop.f32.mrf.mxu1 }
 0x36b   : > { %v2264_v24 = vadd.f32 %v4913_v51, %v2263_v23  ;;  %v2375_v26 = vmax.f32 %v2269_v54, 0.0 }
 0x36d   : > { %v2374_v25 = vmax.f32 %v2264_v24, 0.0 }
 0x36f   : > { %3741 = vmatprep.mubr.msk.f32.mxu0 %vm431_vm0, %v2374_v25 }
 0x370   : > { %v3690_v27 = vpop.f32.mrf.mxu1  ;;  %3742 = vmatmul.mubr.msk.f32.gmra.mxu0 %vm431_vm0, %v2375_v26 }
 0x371   : > { %v2279_v28 = vadd.f32 %v3690_v27, %v4913_v51 }
 0x372   : > { %v2273_v29 = vpop.f32.mrf.mxu1 }
 0x373   : > { %v2274_v30 = vadd.f32 %v4913_v51, %v2273_v29  ;;  %v2377_v35 = vmax.f32 %v2279_v28, 0.0 }
 0x375   : > { %v2376_v31 = vmax.f32 %v2274_v30, 0.0 }
 0x377   : > { %3744 = vmatprep.mubr.msk.f32.mxu0 %vm431_vm0, %v2376_v31 }
 0x378   : > { %v3693_v36 = vpop.f32.mrf.mxu1  ;;  %3745 = vmatmul.mubr.msk.f32.gmra.mxu0 %vm431_vm0, %v2377_v35 }
 0x379   : > { %v2289_v37 = vadd.f32 %v3693_v36, %v4913_v51 }
 0x37a   : > { %v2283_v38 = vpop.f32.mrf.mxu1 }
 0x37b   : > { %v2284_v39 = vadd.f32 %v4913_v51, %v2283_v38  ;;  %v2379_v41 = vmax.f32 %v2289_v37, 0.0 }
 0x37d   : > { %v2378_v40 = vmax.f32 %v2284_v39, 0.0 }
 0x37f   : > { %3747 = vmatprep.mubr.msk.f32.mxu0 %vm431_vm0, %v2378_v40 }
 0x380   : > { %v3696_v42 = vpop.f32.mrf.mxu1  ;;  %3748 = vmatmul.mubr.msk.f32.gmra.mxu0 %vm431_vm0, %v2379_v41 }
 0x381   : > { %v2299_v43 = vadd.f32 %v3696_v42, %v4913_v51 }
 0x382   : > { %v2293_v44 = vpop.f32.mrf.mxu1 }
 0x383   : > { %v2294_v45 = vadd.f32 %v4913_v51, %v2293_v44  ;;  %v2381_v47 = vmax.f32 %v2299_v43, 0.0 }
 0x385   : > { %v2380_v46 = vmax.f32 %v2294_v45, 0.0 }
 0x387   : > { %3750 = vmatprep.mubr.msk.f32.mxu0 %vm431_vm0, %v2380_v46 }
 0x388   : > { %v3699_v48 = vpop.f32.mrf.mxu1  ;;  %3751 = vmatmul.mubr.msk.f32.gmra.mxu0 %vm431_vm0, %v2381_v47 }
 0x389   : > { %v2309_v49 = vadd.f32 %v3699_v48, %v4913_v51 }
 0x38a   : > { %v2303_v50 = vpop.f32.mrf.mxu1 }
 0x38b   : > { %v2304_v53 = vadd.f32 %v4913_v51, %v2303_v50  ;;  %v2383_v56 = vmax.f32 %v2309_v49, 0.0 }
 0x38d   : > { %v2382_v55 = vmax.f32 %v2304_v53, 0.0 }
 0x38f   : > { %3753 = vmatprep.mubr.msk.f32.mxu0 %vm431_vm0, %v2382_v55 }
 0x390   : > { %v3702_v57 = vpop.f32.mrf.mxu1  ;;  %3754 = vmatmul.mubr.msk.f32.gmra.mxu0 %vm431_vm0, %v2383_v56 }
 0x391   : > { %v2319_v58 = vadd.f32 %v3702_v57, %v4913_v51 }
 0x392   : > { %v2313_v59 = vpop.f32.mrf.mxu1 }
 0x393   : > { %v2314_v32 = vadd.f32 %v4913_v51, %v2313_v59  ;;  %v2385_v61 = vmax.f32 %v2319_v58, 0.0 }
 0x395   : > { %v2384_v60 = vmax.f32 %v2314_v32, 0.0 }
 0x397   : > { %3756 = vmatprep.mubr.msk.f32.mxu0 %vm431_vm0, %v2384_v60 }
 0x398   : > { %v3705_v62 = vpop.f32.mrf.mxu1  ;;  %3757 = vmatmul.mubr.msk.f32.gmra.mxu0 %vm431_vm0, %v2385_v61 }
 0x399   : > { %v2329_v63 = vadd.f32 %v3705_v62, %v4913_v51 }
 0x39a   : > { %v2323_v0 = vpop.f32.mrf.mxu1 }
 0x39b   : > { %v2324_v1 = vadd.f32 %v4913_v51, %v2323_v0  ;;  %v2387_v3 = vmax.f32 %v2329_v63, 0.0 }
 0x39d   : > { %v2386_v2 = vmax.f32 %v2324_v1, 0.0 }
 0x39f   : > { %3759 = vmatprep.mubr.msk.f32.mxu0 %vm431_vm0, %v2386_v2 }
 0x3a0   : > { %v3708_v4 = vpop.f32.mrf.mxu1  ;;  %3760 = vmatmul.mubr.msk.f32.gmra.mxu0 %vm431_vm0, %v2387_v3 }
 0x3a1   : > { %v2339_v5 = vadd.f32 %v3708_v4, %v4913_v51 }
 0x3a2   : > { %v2333_v6 = vpop.f32.mrf.mxu1 }
 0x3a3   : > { %v2334_v7 = vadd.f32 %v4913_v51, %v2333_v6  ;;  %v2389_v9 = vmax.f32 %v2339_v5, 0.0 }
 0x3a5   : > { %v2388_v8 = vmax.f32 %v2334_v7, 0.0 }
 0x3a7   : > { %3762 = vmatprep.mubr.msk.f32.mxu0 %vm431_vm0, %v2388_v8 }
 0x3a8   : > { %v3711_v10 = vpop.f32.mrf.mxu1  ;;  %3763 = vmatmul.mubr.msk.f32.gmra.mxu0 %vm431_vm0, %v2389_v9 }
 0x3a9   : > { %v2349_v11 = vadd.f32 %v3711_v10, %v4913_v51 }
 0x3aa   : > { %v2343_v12 = vpop.f32.mrf.mxu1 }
 0x3ab   : > { %v2344_v33 = vadd.f32 %v4913_v51, %v2343_v12  ;;  %v2391_v34 = vmax.f32 %v2349_v11, 0.0 }
 0x3ad   : > { %v2390_v52 = vmax.f32 %v2344_v33, 0.0 }
 0x3af   : > { %3765 = vmatprep.mubr.msk.f32.mxu0 %vm431_vm0, %v2390_v52 }
 0x3b0   : > { %v3714_v13 = vpop.f32.mrf.mxu1  ;;  %3766 = vmatmul.mubr.msk.f32.gmra.mxu0 %vm431_vm0, %v2391_v34 }
 0x3b1   : > { %v2359_v14 = vadd.f32 %v3714_v13, %v4913_v51 }
 0x3b2   : > { %v2353_v15 = vpop.f32.mrf.mxu1 }
 0x3b3   : > { %v2354_v16 = vadd.f32 %v4913_v51, %v2353_v15  ;;  %v2393_v18 = vmax.f32 %v2359_v14, 0.0 }
 0x3b5   : > { %v2392_v17 = vmax.f32 %v2354_v16, 0.0 }
 0x3b7   : > { %3768 = vmatprep.mubr.msk.f32.mxu0 %vm431_vm0, %v2392_v17 }
 0x3b8   : > { %3769 = vmatmul.mubr.msk.f32.gmra.mxu0 %vm431_vm0, %v2393_v18 }
 0x400   : > { %v3725_v20 = vpop.f32.mrf.mxu0 }
 0x401   : > { %v4985_v21 = vadd.f32 %v3725_v20, %v4982_v19 }
 0x402   : > { %v2567_v22 = vpop.f32.mrf.mxu0 }
 0x403   : > { %v2759_v54 = vand.u32 2147483647, %v4985_v21  ;;  %v4989_v51 = vadd.f32 %v4982_v19, %v2567_v22  ;;  %v2727_v17 = vmax.f32 %v4985_v21, 0.0 }
 0x405   : > { %v2791_v23 = vsub.f32 0.0, %v2759_v54  ;;  %v2758_v24 = vand.u32 2147483647, %v4989_v51  ;;  %v2726_v20 = vmax.f32 %v4989_v51, 0.0 }
 0x407   : > { %v2824_v25 = vmul.f32 1.442695, %v2791_v23  ;;  %v2790_v26 = vsub.f32 0.0, %v2758_v24 }
 0x408   : > { %v3728_v27 = vpop.f32.mrf.mxu0 }
 0x409   : > { %3821 = vpow2.f32 %v2824_v25  ;;  %v2822_v28 = vmul.f32 1.442695, %v2790_v26  ;;  %v4993_v29 = vadd.f32 %v3728_v27, %v4982_v19 }
 0x40a   : > { %v2577_v30 = vpop.f32.mrf.mxu0 }
 0x40b   : > { %3823 = vpow2.f32 %v2822_v28  ;;  %v2761_v31 = vand.u32 2147483647, %v4993_v29  ;;  %v4997_v35 = vadd.f32 %v4982_v19, %v2577_v30 }
 0x40d   : > { %v2793_v36 = vsub.f32 0.0, %v2761_v31  ;;  %v2760_v37 = vand.u32 2147483647, %v4997_v35 }
 0x40f   : > { %v2828_v38 = vmul.f32 1.442695, %v2793_v36  ;;  %v2792_v39 = vsub.f32 0.0, %v2760_v37 }
 0x410   : > { %v3731_v40 = vpop.f32.mrf.mxu0 }
 0x411   : > { %3825 = vpow2.f32 %v2828_v38  ;;  %v2826_v41 = vmul.f32 1.442695, %v2792_v39  ;;  %v5001_v42 = vadd.f32 %v3731_v40, %v4982_v19 }
 0x412   : > { %v2587_v43 = vpop.f32.mrf.mxu0 }
 0x413   : > { %3827 = vpow2.f32 %v2826_v41  ;;  %v2763_v44 = vand.u32 2147483647, %v5001_v42  ;;  %v5005_v45 = vadd.f32 %v4982_v19, %v2587_v43 }
 0x415   : > { %v2795_v46 = vsub.f32 0.0, %v2763_v44  ;;  %v2762_v47 = vand.u32 2147483647, %v5005_v45 }
 0x416   : > { %v3822_v48 = vpop.eup %3821 }
 0x417   : > { %v2895_v49 = vadd.f32 1.0, %v3822_v48  ;;  %v2832_v50 = vmul.f32 1.442695, %v2795_v46  ;;  %v2794_v55 = vsub.f32 0.0, %v2762_v47  ;;  %v2898_v0 = vmul.f32 -0.5, %v3822_v48 }
 0x418   : > { %v3824_v53 = vpop.eup %3823  ;;  %v3734_v56 = vpop.f32.mrf.mxu0  ;;  %v2901_v52 = vand.u32 2147483647, %v3822_v48 }
 0x419   : > { %3829 = vlog2.f32 %v2895_v49  ;;  %v2886_v57 = vadd.f32 1.0, %v3824_v53  ;;  %v2830_v58 = vmul.f32 1.442695, %v2794_v55  ;;  %v5009_v32 = vadd.f32 %v3734_v56, %v4982_v19 }
 0x41a   : > { %3831 = vpow2.f32 %v2832_v50  ;;  %v2597_v59 = vpop.f32.mrf.mxu0  ;;  %v2889_v6 = vmul.f32 -0.5, %v3824_v53  ;;  %v2899_v8 = vadd.f32 1.0, %v2898_v0  ;;  %v2892_v34 = vand.u32 2147483647, %v3824_v53 }
 0x41b   : > { %3833 = vlog2.f32 %v2886_v57  ;;  %v5012_v60 = vadd.f32 %v4982_v19, %v2597_v59  ;;  %v2765_v61 = vand.u32 2147483647, %v5009_v32  ;;  %vm2902_vm1 = vcmp.lt.f32.partialorder %v2901_v52, 0.0004427343 }
 0x41c   : > { %3835 = vpow2.f32 %v2830_v58  ;;  %v2890_v13 = vadd.f32 1.0, %v2889_v6  ;;  %v2900_v18 = vmul.f32 %v3822_v48, %v2899_v8  ;;  %vm5038_vm2 = vcmp.lt.f32.partialorder %v2892_v34, 0.0004427343 }
 0x41d   : > { %v2764_v62 = vand.u32 2147483647, %v5012_v60  ;;  %v2797_v2 = vsub.f32 0.0, %v2765_v61  ;;  %v2729_v57 = vmax.f32 %v4993_v29, 0.0 }
 0x41e   : > { %v5016_v63 = vpop.eup %3825  ;;  %v2891_v37 = vmul.f32 %v3824_v53, %v2890_v13 }
 0x41f   : > { %v2913_v1 = vadd.f32 1.0, %v5016_v63  ;;  %v2796_v4 = vsub.f32 0.0, %v2764_v62  ;;  %v2836_v9 = vmul.f32 1.442695, %v2797_v2  ;;  %v2916_v23 = vmul.f32 -0.5, %v5016_v63 }
 0x420   : > { %v5019_v3 = vpop.eup %3827  ;;  %v3737_v5 = vpop.f32.mrf.mxu0  ;;  %v2919_v40 = vand.u32 2147483647, %v5016_v63  ;;  %v2728_v62 = vmax.f32 %v4997_v35, 0.0 }
 0x421   : > { %3837 = vlog2.f32 %v2913_v1  ;;  %v2904_v7 = vadd.f32 1.0, %v5019_v3  ;;  %v5023_v10 = vadd.f32 %v3737_v5, %v4982_v19  ;;  %v2834_v12 = vmul.f32 1.442695, %v2796_v4 }
 0x422   : > { %v2607_v11 = vpop.f32.mrf.mxu0  ;;  %v2907_v28 = vmul.f32 -0.5, %v5019_v3  ;;  %v2917_v46 = vadd.f32 1.0, %v2916_v23  ;;  %v2910_v47 = vand.u32 2147483647, %v5019_v3  ;;  %vm2920_vm3 = vcmp.lt.f32.partialorder %v2919_v40, 0.0004427343 }
 0x423   : > { %3839 = vlog2.f32 %v2904_v7  ;;  %v5027_v33 = vadd.f32 %v4982_v19, %v2607_v11  ;;  %v2767_v14 = vand.u32 2147483647, %v5023_v10 }
 0x424   : > { %3841 = vpow2.f32 %v2836_v9  ;;  %v2908_v50 = vadd.f32 1.0, %v2907_v28  ;;  %v2918_v61 = vmul.f32 %v5016_v63, %v2917_v46  ;;  %vm5067_vm4 = vcmp.lt.f32.partialorder %v2910_v47, 0.0004427343 }
 0x425   : > { %3843 = vpow2.f32 %v2834_v12  ;;  %v2766_v15 = vand.u32 2147483647, %v5027_v33  ;;  %v2799_v24 = vsub.f32 0.0, %v2767_v14 }
 0x426   : > { %v3830_v16 = vpop.eup %3829  ;;  %v2909_v2 = vmul.f32 %v5019_v3, %v2908_v50 }
 0x427   : > { %v5035_v22 = vpop.eup %3831  ;;  %v2897_v54 = vmul.f32 0.6931472, %v3830_v16  ;;  %v2798_v25 = vsub.f32 0.0, %v2766_v15  ;;  %v2840_v38 = vmul.f32 1.442695, %v2799_v24 }
 0x428   : > { %v3834_v26 = vpop.eup %3833  ;;  %v2931_v21 = vadd.f32 1.0, %v5035_v22  ;;  %v3740_v30 = vpop.f32.mrf.mxu0  ;;  %v2934_v29 = vmul.f32 -0.5, %v5035_v22 }
 0x429   : > { %v5044_v31 = vpop.eup %3835  ;;  %v2903_v51 = vsel %vm2902_vm1, %v2900_v18, %v2897_v54  ;;  %v2888_v36 = vmul.f32 0.6931472, %v3834_v26  ;;  %v2838_v41 = vmul.f32 1.442695, %v2798_v25  ;;  %v5055_v53 = vadd.f32 %v3740_v30, %v4982_v19 }
 0x42a   : > { %v3175_v39 = vadd.f32 %v2903_v51, %v2727_v17  ;;  %3845 = vlog2.f32 %v2931_v21  ;;  %v2617_v43 = vpop.f32.mrf.mxu0  ;;  %v2922_v48 = vadd.f32 1.0, %v5044_v31  ;;  %v2925_v35 = vmul.f32 -0.5, %v5044_v31 }
 0x42b   : > { %v2894_v44 = vsel %vm5038_vm2, %v2891_v37, %v2888_v36  ;;  %3847 = vpow2.f32 %v2840_v38  ;;  %v5058_v55 = vadd.f32 %v4982_v19, %v2617_v43  ;;  %v2769_v58 = vand.u32 2147483647, %v5055_v53 }
 0x42c   : > { %3207 = vst [vmem:[%s5051_s12 + $0x8] sm:$0xff] %v3175_v39  ;;  %v3174_v49 = vadd.f32 %v2894_v44, %v2726_v20  ;;  %3849 = vlog2.f32 %v2922_v48  ;;  %v2935_v15 = vadd.f32 1.0, %v2934_v29  ;;  %v2937_v17 = vand.u32 2147483647, %v5035_v22 }
 0x42d   : > { %3851 = vpow2.f32 %v2838_v41  ;;  %v2768_v0 = vand.u32 2147483647, %v5058_v55  ;;  %v2801_v8 = vsub.f32 0.0, %v2769_v58  ;;  %v2926_v18 = vadd.f32 1.0, %v2925_v35 }
 0x42e   : > { %v3838_v56 = vpop.eup %3837  ;;  %3206 = vst [vmem:[%s5051_s12] sm:$0xff] %v3174_v49  ;;  %v2731_v25 = vmax.f32 %v5001_v42, 0.0  ;;  %v2928_v26 = vand.u32 2147483647, %v5044_v31  ;;  %v2936_v21 = vmul.f32 %v5035_v22, %v2935_v15  ;;  %vm2938_vm5 = vcmp.lt.f32.partialorder %v2937_v17, 0.0004427343 }
 0x42f   : > { %v2915_v59 = vmul.f32 0.6931472, %v3838_v56  ;;  %v2800_v12 = vsub.f32 0.0, %v2768_v0  ;;  %v2844_v20 = vmul.f32 1.442695, %v2801_v8  ;;  %v2927_v37 = vmul.f32 %v5044_v31, %v2926_v18 }
 0x430   : > { %v3840_v1 = vpop.eup %3839  ;;  %v3743_v5 = vpop.f32.mrf.mxu0  ;;  %v2730_v49 = vmax.f32 %v5005_v45, 0.0  ;;  %vm2929_vm6 = vcmp.lt.f32.partialorder %v2928_v26, 0.0004427343 }
 0x431   : > { %v5072_v6 = vpop.eup %3841  ;;  %v2921_v7 = vsel %vm2920_vm3, %v2918_v61, %v2915_v59  ;;  %v2906_v63 = vmul.f32 0.6931472, %v3840_v1  ;;  %v5079_v52 = vadd.f32 %v3743_v5, %v4982_v19  ;;  %v2842_v54 = vmul.f32 1.442695, %v2800_v12 }
 0x432   : > { %v5075_v9 = vpop.eup %3843  ;;  %v3177_v11 = vadd.f32 %v2921_v7, %v2729_v57  ;;  %v2949_v3 = vadd.f32 1.0, %v5072_v6  ;;  %v2627_v16 = vpop.f32.mrf.mxu0  ;;  %v2952_v38 = vmul.f32 -0.5, %v5072_v6  ;;  %v2733_v5 = vmax.f32 %v5009_v32, 0.0 }
 0x433   : > { %v2912_v34 = vsel %vm5067_vm4, %v2909_v2, %v2906_v63  ;;  %v2940_v13 = vadd.f32 1.0, %v5075_v9  ;;  %v2771_v23 = vand.u32 2147483647, %v5079_v52  ;;  %v5091_v27 = vadd.f32 %v4982_v19, %v2627_v16 }
 0x434   : > { %3209 = vst [vmem:[%s5051_s12 + $0x18] sm:$0xff] %v3177_v11  ;;  %v3176_v14 = vadd.f32 %v2912_v34, %v2728_v62  ;;  %3853 = vlog2.f32 %v2949_v3  ;;  %v2943_v41 = vmul.f32 -0.5, %v5075_v9  ;;  %v2953_v59 = vadd.f32 1.0, %v2952_v38 }
 0x435   : > { %3855 = vlog2.f32 %v2940_v13  ;;  %v2803_v30 = vsub.f32 0.0, %v2771_v23  ;;  %v2770_v42 = vand.u32 2147483647, %v5091_v27  ;;  %v2955_v62 = vand.u32 2147483647, %v5072_v6 }
 0x436   : > { %3208 = vst [vmem:[%s5051_s12 + $0x10] sm:$0xff] %v3176_v14  ;;  %3857 = vpow2.f32 %v2844_v20  ;;  %v2944_v0 = vadd.f32 1.0, %v2943_v41  ;;  %v2946_v45 = vand.u32 2147483647, %v5075_v9  ;;  %v2732_v7 = vmax.f32 %v5012_v60, 0.0 }
 0x437   : > { %v3846_v24 = vpop.eup %3845  ;;  %3859 = vpow2.f32 %v2842_v54  ;;  %v2848_v48 = vmul.f32 1.442695, %v2803_v30  ;;  %v2802_v31 = vsub.f32 0.0, %v2770_v42  ;;  %v2954_v3 = vmul.f32 %v5072_v6, %v2953_v59 }
 0x438   : > { %v2933_v28 = vmul.f32 0.6931472, %v3846_v24  ;;  %v3746_v51 = vpop.f32.mrf.mxu0  ;;  %v5094_v36 = vpop.eup %3847  ;;  %vm2956_vm7 = vcmp.lt.f32.partialorder %v2955_v62, 0.0004427343  ;;  %v2945_v14 = vmul.f32 %v5075_v9, %v2944_v0  ;;  %vm2947_vm8 = vcmp.lt.f32.partialorder %v2946_v45, 0.0004427343 }
 0x439   : > { %v3850_v39 = vpop.eup %3849  ;;  %v2967_v43 = vadd.f32 1.0, %v5094_v36  ;;  %v5102_v22 = vadd.f32 %v3746_v51, %v4982_v19  ;;  %v2846_v61 = vmul.f32 1.442695, %v2802_v31  ;;  %v2970_v12 = vmul.f32 -0.5, %v5094_v36 }
 0x43a   : > { %v2939_v40 = vsel %vm2938_vm5, %v2936_v21, %v2933_v28  ;;  %v5104_v44 = vpop.eup %3851  ;;  %v2924_v47 = vmul.f32 0.6931472, %v3850_v39  ;;  %v2637_v57 = vpop.f32.mrf.mxu0  ;;  %v2973_v26 = vand.u32 2147483647, %v5094_v36  ;;  %v2735_v42 = vmax.f32 %v5023_v10, 0.0 }
 0x43b   : > { %v3179_v46 = vadd.f32 %v2939_v40, %v2731_v25  ;;  %3861 = vlog2.f32 %v2967_v43  ;;  %v2958_v50 = vadd.f32 1.0, %v5104_v44  ;;  %v2773_v1 = vand.u32 2147483647, %v5102_v22 }
 0x43c   : > { %v2930_v56 = vsel %vm2929_vm6, %v2927_v37, %v2924_v47  ;;  %3863 = vpow2.f32 %v2848_v48  ;;  %v5114_v2 = vadd.f32 %v4982_v19, %v2637_v57  ;;  %v2961_v32 = vmul.f32 -0.5, %v5104_v44 }
 0x43d   : > { %3211 = vst [vmem:[%s5051_s12 + $0x28] sm:$0xff] %v3179_v46  ;;  %v3178_v58 = vadd.f32 %v2930_v56, %v2730_v49  ;;  %3865 = vlog2.f32 %v2958_v50  ;;  %v2805_v63 = vsub.f32 0.0, %v2773_v1  ;;  %v2971_v25 = vadd.f32 1.0, %v2970_v12 }
 0x43e   : > { %3867 = vpow2.f32 %v2846_v61  ;;  %v2772_v34 = vand.u32 2147483647, %v5114_v2  ;;  %v2962_v21 = vadd.f32 1.0, %v2961_v32  ;;  %v2734_v39 = vmax.f32 %v5027_v33, 0.0 }
 0x43f   : > { %3210 = vst [vmem:[%s5051_s12 + $0x20] sm:$0xff] %v3178_v58  ;;  %v2852_v24 = vmul.f32 1.442695, %v2805_v63  ;;  %v2964_v40 = vand.u32 2147483647, %v5104_v44  ;;  %v2972_v47 = vmul.f32 %v5094_v36, %v2971_v25  ;;  %v2737_v12 = vmax.f32 %v5055_v53, 0.0 }
 0x440   : > { %v3749_v4 = vpop.f32.mrf.mxu0  ;;  %v2804_v16 = vsub.f32 0.0, %v2772_v34  ;;  %vm2974_vm9 = vcmp.lt.f32.partialorder %v2973_v26, 0.0004427343  ;;  %v2963_v49 = vmul.f32 %v5104_v44, %v2962_v21  ;;  %v2736_v32 = vmax.f32 %v5058_v55, 0.0 }
 0x441   : > { %v3854_v29 = vpop.eup %3853  ;;  %v5119_v35 = vadd.f32 %v3749_v4, %v4982_v19  ;;  %vm2965_vm10 = vcmp.lt.f32.partialorder %v2964_v40, 0.0004427343 }
 0x442   : > { %v3856_v8 = vpop.eup %3855  ;;  %v2951_v11 = vmul.f32 0.6931472, %v3854_v29  ;;  %v2647_v6 = vpop.f32.mrf.mxu0  ;;  %v2850_v30 = vmul.f32 1.442695, %v2804_v16 }
 0x443   : > { %v2942_v13 = vmul.f32 0.6931472, %v3856_v8  ;;  %v5126_v60 = vpop.eup %3857  ;;  %v2775_v17 = vand.u32 2147483647, %v5119_v35  ;;  %v5136_v51 = vadd.f32 %v4982_v19, %v2647_v6 }
 0x444   : > { %v2957_v15 = vsel %vm2956_vm7, %v2954_v3, %v2951_v11  ;;  %v5129_v18 = vpop.eup %3859  ;;  %v2985_v23 = vadd.f32 1.0, %v5126_v60  ;;  %v2988_v59 = vmul.f32 -0.5, %v5126_v60  ;;  %v2991_v45 = vand.u32 2147483647, %v5126_v60 }
 0x445   : > { %v3181_v20 = vadd.f32 %v2957_v15, %v2733_v5  ;;  %v2948_v54 = vsel %vm2947_vm8, %v2945_v14, %v2942_v13  ;;  %v2976_v28 = vadd.f32 1.0, %v5129_v18  ;;  %v2807_v37 = vsub.f32 0.0, %v2775_v17 }
 0x446   : > { %v3180_v9 = vadd.f32 %v2948_v54, %v2732_v7  ;;  %3869 = vlog2.f32 %v2985_v23  ;;  %v2774_v33 = vand.u32 2147483647, %v5136_v51  ;;  %v2979_v61 = vmul.f32 -0.5, %v5129_v18 }
 0x447   : > { %3213 = vst [vmem:[%s5051_s12 + $0x38] sm:$0xff] %v3181_v20  ;;  %3871 = vlog2.f32 %v2976_v28  ;;  %v2856_v48 = vmul.f32 1.442695, %v2807_v37  ;;  %v2982_v29 = vand.u32 2147483647, %v5129_v18  ;;  %v2989_v63 = vadd.f32 1.0, %v2988_v59 }
 0x448   : > { %3212 = vst [vmem:[%s5051_s12 + $0x30] sm:$0xff] %v3180_v9  ;;  %v3862_v38 = vpop.eup %3861  ;;  %3873 = vpow2.f32 %v2852_v24  ;;  %v3752_v41 = vpop.f32.mrf.mxu0  ;;  %v2806_v4 = vsub.f32 0.0, %v2774_v33  ;;  %v2980_v34 = vadd.f32 1.0, %v2979_v61  ;;  %vm5168_vm11 = vcmp.lt.f32.partialorder %v2991_v45, 0.0004427343 }
 0x449   : > { %v5142_v43 = vpop.eup %3863  ;;  %v2969_v46 = vmul.f32 0.6931472, %v3862_v38  ;;  %3875 = vpow2.f32 %v2850_v30  ;;  %v5149_v57 = vadd.f32 %v3752_v41, %v4982_v19  ;;  %vm5174_vm12 = vcmp.lt.f32.partialorder %v2982_v29, 0.0004427343 }
 0x44a   : > { %v3866_v31 = vpop.eup %3865  ;;  %v3003_v10 = vadd.f32 1.0, %v5142_v43  ;;  %3877 = vpow2.f32 %v2856_v48  ;;  %v2657_v0 = vpop.f32.mrf.mxu0  ;;  %v2854_v8 = vmul.f32 1.442695, %v2806_v4  ;;  %v3006_v15 = vmul.f32 -0.5, %v5142_v43 }
 0x44b   : > { %v2975_v50 = vsel %vm2974_vm9, %v2972_v47, %v2969_v46  ;;  %v2960_v56 = vmul.f32 0.6931472, %v3866_v31  ;;  %v5151_v58 = vpop.eup %3867  ;;  %v2777_v5 = vand.u32 2147483647, %v5149_v57  ;;  %v5162_v11 = vadd.f32 %v4982_v19, %v2657_v0 }
 0x44c   : > { %v3183_v36 = vadd.f32 %v2975_v50, %v2735_v42  ;;  %3879 = vlog2.f32 %v3003_v10  ;;  %v2994_v62 = vadd.f32 1.0, %v5151_v58  ;;  %v2990_v23 = vmul.f32 %v5126_v60, %v2989_v63 }
 0x44d   : > { %v2966_v44 = vsel %vm2965_vm10, %v2963_v49, %v2960_v56  ;;  %v2809_v13 = vsub.f32 0.0, %v2777_v5  ;;  %v2776_v20 = vand.u32 2147483647, %v5162_v11  ;;  %v2997_v24 = vmul.f32 -0.5, %v5151_v58 }
 0x44e   : > { %3215 = vst [vmem:[%s5051_s12 + $0x48] sm:$0xff] %v3183_v36  ;;  %v3182_v1 = vadd.f32 %v2966_v44, %v2734_v39  ;;  %3881 = vlog2.f32 %v2994_v62  ;;  %v2981_v26 = vmul.f32 %v5129_v18, %v2980_v34  ;;  %v3009_v28 = vand.u32 2147483647, %v5142_v43 }
 0x44f   : > { %3883 = vpow2.f32 %v2854_v8  ;;  %v2860_v6 = vmul.f32 1.442695, %v2809_v13  ;;  %v3007_v60 = vadd.f32 1.0, %v3006_v15  ;;  %v3000_v38 = vand.u32 2147483647, %v5151_v58 }
 0x450   : > { %v3755_v7 = vpop.f32.mrf.mxu0  ;;  %3214 = vst [vmem:[%s5051_s12 + $0x40] sm:$0xff] %v3182_v1  ;;  %v2808_v41 = vsub.f32 0.0, %v2776_v20  ;;  %v2998_v31 = vadd.f32 1.0, %v2997_v24  ;;  %v2739_v33 = vmax.f32 %v5079_v52, 0.0  ;;  %v2738_v44 = vmax.f32 %v5091_v27, 0.0 }
 0x451   : > { %v5165_v3 = vadd.f32 %v3755_v7, %v4982_v19  ;;  %3885 = vpow2.f32 %v2860_v6  ;;  %v3008_v59 = vmul.f32 %v5142_v43, %v3007_v60  ;;  %v2741_v61 = vmax.f32 %v5102_v22, 0.0 }
 0x452   : > { %v2667_v21 = vpop.f32.mrf.mxu0  ;;  %vm3010_vm13 = vcmp.lt.f32.partialorder %v3009_v28, 0.0004427343  ;;  %vm5207_vm14 = vcmp.lt.f32.partialorder %v3000_v38, 0.0004427343  ;;  %v2858_v52 = vmul.f32 1.442695, %v2808_v41  ;;  %v2999_v4 = vmul.f32 %v5151_v58, %v2998_v31 }
 0x453   : > { %v3870_v16 = vpop.eup %3869  ;;  %v2779_v9 = vand.u32 2147483647, %v5165_v3  ;;  %v5201_v56 = vadd.f32 %v4982_v19, %v2667_v21  ;;  %v2740_v6 = vmax.f32 %v5114_v2, 0.0 }
 0x454   : > { %v3872_v53 = vpop.eup %3871  ;;  %v2987_v54 = vmul.f32 0.6931472, %v3870_v16 }
 0x455   : > { %v5182_v55 = vpop.eup %3873  ;;  %v2978_v25 = vmul.f32 0.6931472, %v3872_v53  ;;  %v2811_v49 = vsub.f32 0.0, %v2779_v9  ;;  %v2778_v7 = vand.u32 2147483647, %v5201_v56 }
 0x456   : > { %v5186_v30 = vpop.eup %3875  ;;  %v2993_v37 = vsel %vm5168_vm11, %v2990_v23, %v2987_v54  ;;  %v3021_v42 = vadd.f32 1.0, %v5182_v55  ;;  %v3024_v29 = vmul.f32 -0.5, %v5182_v55  ;;  %v3027_v13 = vand.u32 2147483647, %v5182_v55 }
 0x457   : > { %v3185_v39 = vadd.f32 %v2993_v37, %v2737_v12  ;;  %v2984_v18 = vsel %vm5174_vm12, %v2981_v26, %v2978_v25  ;;  %v3012_v40 = vadd.f32 1.0, %v5186_v30  ;;  %v5195_v47 = vpop.eup %3877  ;;  %v2864_v43 = vmul.f32 1.442695, %v2811_v49 }
 0x458   : > { %v3758_v46 = vpop.f32.mrf.mxu0  ;;  %v3184_v48 = vadd.f32 %v2984_v18, %v2736_v32  ;;  %3887 = vlog2.f32 %v3021_v42  ;;  %v3039_v50 = vadd.f32 1.0, %v5195_v47  ;;  %v3015_v63 = vmul.f32 -0.5, %v5186_v30 }
 0x459   : > { %v3880_v10 = vpop.eup %3879  ;;  %3217 = vst [vmem:[%s5051_s12 + $0x58] sm:$0xff] %v3185_v39  ;;  %3889 = vlog2.f32 %v3012_v40  ;;  %v5216_v8 = vadd.f32 %v3758_v46, %v4982_v19  ;;  %v3042_v14 = vmul.f32 -0.5, %v5195_v47  ;;  %v2810_v32 = vsub.f32 0.0, %v2778_v7 }
 0x45a   : > { %3216 = vst [vmem:[%s5051_s12 + $0x50] sm:$0xff] %v3184_v48  ;;  %v3005_v36 = vmul.f32 0.6931472, %v3880_v10  ;;  %3891 = vlog2.f32 %v3039_v50  ;;  %v2677_v0 = vpop.f32.mrf.mxu0  ;;  %v3025_v17 = vadd.f32 1.0, %v3024_v29  ;;  %v3018_v53 = vand.u32 2147483647, %v5186_v30 }
 0x45b   : > { %v3882_v1 = vpop.eup %3881  ;;  %3893 = vpow2.f32 %v2858_v52  ;;  %v5219_v12 = vadd.f32 %v4982_v19, %v2677_v0  ;;  %v2862_v54 = vmul.f32 1.442695, %v2810_v32  ;;  %v2781_v23 = vand.u32 2147483647, %v5216_v8 }
 0x45c   : > { %v3011_v45 = vsel %vm3010_vm13, %v3008_v59, %v3005_v36  ;;  %v2996_v27 = vmul.f32 0.6931472, %v3882_v1  ;;  %3895 = vpow2.f32 %v2864_v43  ;;  %v5221_v34 = vpop.eup %3883  ;;  %v3016_v9 = vadd.f32 1.0, %v3015_v63 }
 0x45d   : > { %v3187_v5 = vadd.f32 %v3011_v45, %v2739_v33  ;;  %v3030_v20 = vadd.f32 1.0, %v5221_v34  ;;  %v2743_v25 = vmax.f32 %v5119_v35, 0.0  ;;  %v2780_v26 = vand.u32 2147483647, %v5219_v12 }
 0x45e   : > { %v3002_v58 = vsel %vm5207_vm14, %v2999_v4, %v2996_v27  ;;  %v5232_v24 = vpop.eup %3885  ;;  %vm5237_vm15 = vcmp.lt.f32.partialorder %v3027_v13, 0.0004427343  ;;  %v3043_v2 = vadd.f32 1.0, %v3042_v14  ;;  %v3026_v60 = vmul.f32 %v5182_v55, %v3025_v17 }
 0x45f   : > { %3219 = vst [vmem:[%s5051_s12 + $0x68] sm:$0xff] %v3187_v5  ;;  %v3186_v16 = vadd.f32 %v3002_v58, %v2738_v44  ;;  %3897 = vlog2.f32 %v3030_v20  ;;  %v3057_v37 = vadd.f32 1.0, %v5232_v24  ;;  %v2813_v38 = vsub.f32 0.0, %v2781_v23 }
 0x460   : > { %v3761_v15 = vpop.f32.mrf.mxu0  ;;  %3899 = vpow2.f32 %v2862_v54  ;;  %v2812_v42 = vsub.f32 0.0, %v2780_v26  ;;  %vm5246_vm0 = vcmp.lt.f32.partialorder %v3018_v53, 0.0004427343  ;;  %v3045_v40 = vand.u32 2147483647, %v5195_v47 }
 0x461   : > { %3218 = vst [vmem:[%s5051_s12 + $0x60] sm:$0xff] %v3186_v16  ;;  %v5244_v39 = vadd.f32 %v3761_v15, %v4982_v19  ;;  %3901 = vlog2.f32 %v3057_v37  ;;  %v3017_v55 = vmul.f32 %v5186_v30, %v3016_v9  ;;  %v2868_v31 = vmul.f32 1.442695, %v2813_v38 }
 0x462   : > { %v2687_v28 = vpop.f32.mrf.mxu0  ;;  %v2866_v49 = vmul.f32 1.442695, %v2812_v42  ;;  %v3044_v33 = vmul.f32 %v5195_v47, %v3043_v2  ;;  %v3033_v50 = vmul.f32 -0.5, %v5221_v34  ;;  %v3060_v62 = vmul.f32 -0.5, %v5232_v24 }
 0x463   : > { %v5252_v41 = vadd.f32 %v4982_v19, %v2687_v28  ;;  %v2783_v36 = vand.u32 2147483647, %v5244_v39  ;;  %3903 = vpow2.f32 %v2868_v31  ;;  %vm3046_vm1 = vcmp.lt.f32.partialorder %v3045_v40, 0.0004427343 }
 0x464   : > { %3905 = vpow2.f32 %v2866_v49  ;;  %v3034_v63 = vadd.f32 1.0, %v3033_v50  ;;  %v3036_v13 = vand.u32 2147483647, %v5221_v34  ;;  %v3061_v14 = vadd.f32 1.0, %v3060_v62 }
 0x465   : > { %v3888_v35 = vpop.eup %3887  ;;  %v2782_v52 = vand.u32 2147483647, %v5252_v41  ;;  %v2815_v29 = vsub.f32 0.0, %v2783_v36  ;;  %v3063_v20 = vand.u32 2147483647, %v5232_v24 }
 0x466   : > { %v3890_v46 = vpop.eup %3889  ;;  %v3023_v48 = vmul.f32 0.6931472, %v3888_v35  ;;  %vm3037_vm2 = vcmp.lt.f32.partialorder %v3036_v13, 0.0004427343  ;;  %v3062_v28 = vmul.f32 %v5232_v24, %v3061_v14  ;;  %v2745_v24 = vmax.f32 %v5149_v57, 0.0 }
 0x467   : > { %v3014_v10 = vmul.f32 0.6931472, %v3890_v46  ;;  %v3892_v59 = vpop.eup %3891  ;;  %v2814_v43 = vsub.f32 0.0, %v2782_v52  ;;  %v2872_v32 = vmul.f32 1.442695, %v2815_v29 }
 0x468   : > { %v3029_v44 = vsel %vm5237_vm15, %v3026_v60, %v3023_v48  ;;  %v3764_v30 = vpop.f32.mrf.mxu0  ;;  %v3041_v1 = vmul.f32 0.6931472, %v3892_v59  ;;  %v5266_v45 = vpop.eup %3893  ;;  %vm3064_vm3 = vcmp.lt.f32.partialorder %v3063_v20, 0.0004427343 }
 0x469   : > { %v3189_v0 = vadd.f32 %v3029_v44, %v2741_v61  ;;  %v3020_v47 = vsel %vm5246_vm0, %v3017_v55, %v3014_v10  ;;  %v5268_v5 = vpop.eup %3895  ;;  %v3048_v7 = vadd.f32 1.0, %v5266_v45  ;;  %v5273_v22 = vadd.f32 %v3764_v30, %v4982_v19 }
 0x46a   : > { %v3188_v4 = vadd.f32 %v3020_v47, %v2740_v6  ;;  %v3047_v27 = vsel %vm3046_vm1, %v3044_v33, %v3041_v1  ;;  %v3075_v58 = vadd.f32 1.0, %v5268_v5  ;;  %v2697_v15 = vpop.f32.mrf.mxu0  ;;  %v2870_v16 = vmul.f32 1.442695, %v2814_v43 }
 0x46b   : > { %3221 = vst [vmem:[%s5051_s12 + $0x78] sm:$0xff] %v3189_v0  ;;  %v3191_v61 = vadd.f32 %v3047_v27, %v2743_v25  ;;  %3907 = vlog2.f32 %v3048_v7  ;;  %v2742_v6 = vmax.f32 %v5136_v51, 0.0  ;;  %v2785_v53 = vand.u32 2147483647, %v5273_v22 }
 0x46c   : > { %3220 = vst [vmem:[%s5051_s12 + $0x70] sm:$0xff] %v3188_v4  ;;  %3909 = vlog2.f32 %v3075_v58  ;;  %v3898_v17 = vpop.eup %3897  ;;  %v3035_v25 = vmul.f32 %v5221_v34, %v3034_v63  ;;  %v5286_v26 = vadd.f32 %v4982_v19, %v2697_v15  ;;  %v3051_v60 = vmul.f32 -0.5, %v5266_v45 }
 0x46d   : > { %3223 = vst [vmem:[%s5051_s12 + $0x88] sm:$0xff] %v3191_v61  ;;  %3911 = vpow2.f32 %v2872_v32  ;;  %v5282_v23 = vpop.eup %3899  ;;  %v3032_v9 = vmul.f32 0.6931472, %v3898_v17  ;;  %v2817_v21 = vsub.f32 0.0, %v2785_v53  ;;  %v3078_v18 = vmul.f32 -0.5, %v5268_v5 }
 0x46e   : > { %3913 = vpow2.f32 %v2870_v16  ;;  %v3066_v51 = vadd.f32 1.0, %v5282_v23  ;;  %v3902_v2 = vpop.eup %3901  ;;  %v2784_v38 = vand.u32 2147483647, %v5286_v26  ;;  %v3054_v49 = vand.u32 2147483647, %v5266_v45 }
 0x46f   : > { %v3038_v37 = vsel %vm3037_vm2, %v3035_v25, %v3032_v9  ;;  %v3059_v35 = vmul.f32 0.6931472, %v3902_v2  ;;  %v2876_v46 = vmul.f32 1.442695, %v2817_v21  ;;  %v3081_v36 = vand.u32 2147483647, %v5268_v5 }
 0x470   : > { %v3767_v54 = vpop.f32.mrf.mxu0  ;;  %v3190_v34 = vadd.f32 %v3038_v37, %v2742_v6  ;;  %3915 = vlog2.f32 %v3066_v51  ;;  %v2816_v48 = vsub.f32 0.0, %v2784_v38  ;;  %v5297_v55 = vpop.eup %3903  ;;  %v3052_v44 = vadd.f32 1.0, %v3051_v60 }
 0x471   : > { %v5293_v42 = vadd.f32 %v3767_v54, %v4982_v19  ;;  %v3065_v31 = vsel %vm3064_vm3, %v3062_v28, %v3059_v35  ;;  %v5302_v33 = vpop.eup %3905  ;;  %v3093_v59 = vadd.f32 1.0, %v5297_v55  ;;  %v3079_v62 = vadd.f32 1.0, %v3078_v18 }
 0x472   : > { %v2707_v40 = vpop.f32.mrf.mxu0  ;;  %3222 = vst [vmem:[%s5051_s12 + $0x80] sm:$0xff] %v3190_v34  ;;  %v3193_v50 = vadd.f32 %v3065_v31, %v2745_v24  ;;  %v3084_v52 = vadd.f32 1.0, %v5302_v33  ;;  %3917 = vpow2.f32 %v2876_v46  ;;  %v3069_v30 = vmul.f32 -0.5, %v5282_v23 }
 0x473   : > { %v2787_v10 = vand.u32 2147483647, %v5293_v42  ;;  %v5307_v57 = vadd.f32 %v4982_v19, %v2707_v40  ;;  %3919 = vlog2.f32 %v3093_v59  ;;  %v2874_v0 = vmul.f32 1.442695, %v2816_v48 }
 0x474   : > { %3225 = vst [vmem:[%s5051_s12 + $0x98] sm:$0xff] %v3193_v50  ;;  %v2744_v1 = vmax.f32 %v5162_v11, 0.0  ;;  %3921 = vlog2.f32 %v3084_v52  ;;  %vm5313_vm4 = vcmp.lt.f32.partialorder %v3054_v49, 0.0004427343  ;;  %v2747_v27 = vmax.f32 %v5165_v3, 0.0 }
 0x475   : > { %v2819_v4 = vsub.f32 0.0, %v2787_v10  ;;  %3923 = vpow2.f32 %v2874_v0  ;;  %v2786_v7 = vand.u32 2147483647, %v5307_v57  ;;  %v3053_v58 = vmul.f32 %v5266_v45, %v3052_v44 }
 0x476   : > { %v3080_v13 = vmul.f32 %v5268_v5, %v3079_v62  ;;  %vm5321_vm5 = vcmp.lt.f32.partialorder %v3081_v36, 0.0004427343  ;;  %v3070_v15 = vadd.f32 1.0, %v3069_v30  ;;  %v3072_v16 = vand.u32 2147483647, %v5282_v23 }
 0x477   : > { %v2818_v3 = vsub.f32 0.0, %v2786_v7  ;;  %v3096_v5 = vmul.f32 -0.5, %v5297_v55  ;;  %v2880_v53 = vmul.f32 1.442695, %v2819_v4  ;;  %v3087_v21 = vmul.f32 -0.5, %v5302_v33 }
 0x478   : > { %v3770_v47 = vpop.f32.mrf.mxu0  ;;  %v3908_v29 = vpop.eup %3907  ;;  %v2746_v60 = vmax.f32 %v5201_v56, 0.0  ;;  %v3071_v35 = vmul.f32 %v5282_v23, %v3070_v15  ;;  %v3099_v18 = vand.u32 2147483647, %v5297_v55  ;;  %vm3073_vm6 = vcmp.lt.f32.partialorder %v3072_v16, 0.0004427343 }
 0x479   : > { %v3910_v61 = vpop.eup %3909  ;;  %v3050_v63 = vmul.f32 0.6931472, %v3908_v29  ;;  %v5338_v28 = vadd.f32 %v3770_v47, %v4982_v19  ;;  %v2878_v38 = vmul.f32 1.442695, %v2818_v3  ;;  %v3097_v40 = vadd.f32 1.0, %v3096_v5 }
 0x47a   : > { %v5325_v14 = vpop.eup %3911  ;;  %v3077_v32 = vmul.f32 0.6931472, %v3910_v61  ;;  %v2717_v17 = vpop.f32.mrf.mxu0  ;;  %v3088_v46 = vadd.f32 1.0, %v3087_v21  ;;  %v3090_v49 = vand.u32 2147483647, %v5302_v33  ;;  %v2749_v50 = vmax.f32 %v5216_v8, 0.0 }
 0x47b   : > { %v5328_v6 = vpop.eup %3913  ;;  %v3056_v45 = vsel %vm5313_vm4, %v3053_v58, %v3050_v63  ;;  %v3111_v20 = vadd.f32 1.0, %v5325_v14  ;;  %v5342_v2 = vadd.f32 %v4982_v19, %v2717_v17  ;;  %v2789_v19 = vand.u32 2147483647, %v5338_v28 }
 0x47c   : > { %v3192_v54 = vadd.f32 %v3056_v45, %v2744_v1  ;;  %v3083_v9 = vsel %vm5321_vm5, %v3080_v13, %v3077_v32  ;;  %v3102_v25 = vadd.f32 1.0, %v5328_v6  ;;  %vm5355_vm7 = vcmp.lt.f32.partialorder %v3099_v18, 0.0004427343 }
 0x47d   : > { %v3195_v51 = vadd.f32 %v3083_v9, %v2747_v27  ;;  %3925 = vlog2.f32 %v3111_v20  ;;  %v3916_v37 = vpop.eup %3915  ;;  %v2788_v48 = vand.u32 2147483647, %v5342_v2  ;;  %v2821_v10 = vsub.f32 0.0, %v2789_v19 }
 0x47e   : > { %3224 = vst [vmem:[%s5051_s12 + $0x90] sm:$0xff] %v3192_v54  ;;  %3927 = vlog2.f32 %v3102_v25  ;;  %v3068_v34 = vmul.f32 0.6931472, %v3916_v37  ;;  %v3114_v59 = vmul.f32 -0.5, %v5325_v14  ;;  %v3098_v30 = vmul.f32 %v5297_v55, %v3097_v40 }
 0x47f   : > { %3227 = vst [vmem:[%s5051_s12 + $0xa8] sm:$0xff] %v3195_v51  ;;  %3929 = vpow2.f32 %v2880_v53  ;;  %v5351_v56 = vpop.eup %3917  ;;  %v3105_v0 = vmul.f32 -0.5, %v5328_v6  ;;  %v2884_v47 = vmul.f32 1.442695, %v2821_v10  ;;  %v3089_v8 = vmul.f32 %v5302_v33, %v3088_v46 }
 0x480   : > { %3931 = vpow2.f32 %v2878_v38  ;;  %v3074_v24 = vsel %vm3073_vm6, %v3071_v35, %v3068_v34  ;;  %v3920_v23 = vpop.eup %3919  ;;  %v3129_v44 = vadd.f32 1.0, %v5351_v56  ;;  %v2820_v29 = vsub.f32 0.0, %v2788_v48 }
 0x481   : > { %v3194_v31 = vadd.f32 %v3074_v24, %v2746_v60  ;;  %v3922_v62 = vpop.eup %3921  ;;  %v3095_v52 = vmul.f32 0.6931472, %v3920_v23  ;;  %v2748_v27 = vmax.f32 %v5219_v12, 0.0  ;;  %vm3091_vm8 = vcmp.lt.f32.partialorder %v3090_v49, 0.0004427343 }
 0x482   : > { %v5364_v1 = vpop.eup %3923  ;;  %v3086_v4 = vmul.f32 0.6931472, %v3922_v62  ;;  %3933 = vlog2.f32 %v3129_v44  ;;  %v3115_v63 = vadd.f32 1.0, %v3114_v59  ;;  %v3117_v13 = vand.u32 2147483647, %v5325_v14 }
 0x483   : > { %3226 = vst [vmem:[%s5051_s12 + $0xa0] sm:$0xff] %v3194_v31  ;;  %v3101_v43 = vsel %vm5355_vm7, %v3098_v30, %v3095_v52  ;;  %v3120_v55 = vadd.f32 1.0, %v5364_v1  ;;  %3935 = vpow2.f32 %v2884_v47  ;;  %v3106_v11 = vadd.f32 1.0, %v3105_v0 }
 0x484   : > { %v3197_v7 = vadd.f32 %v3101_v43, %v2749_v50  ;;  %v3092_v61 = vsel %vm3091_vm8, %v3089_v8, %v3086_v4  ;;  %v3108_v33 = vand.u32 2147483647, %v5328_v6  ;;  %v2882_v32 = vmul.f32 1.442695, %v2820_v29 }
 0x485   : > { %v3196_v58 = vadd.f32 %v3092_v61, %v2748_v27  ;;  %3937 = vlog2.f32 %v3120_v55  ;;  %v3116_v3 = vmul.f32 %v5325_v14, %v3115_v63  ;;  %v3132_v17 = vmul.f32 -0.5, %v5351_v56 }
 0x486   : > { %3229 = vst [vmem:[%s5051_s12 + $0xb8] sm:$0xff] %v3197_v7  ;;  %3939 = vpow2.f32 %v2882_v32  ;;  %v2751_v5 = vmax.f32 %v5244_v39, 0.0  ;;  %vm3118_vm9 = vcmp.lt.f32.partialorder %v3117_v13, 0.0004427343  ;;  %v3107_v53 = vmul.f32 %v5328_v6, %v3106_v11 }
 0x487   : > { %3228 = vst [vmem:[%s5051_s12 + $0xb0] sm:$0xff] %v3196_v58  ;;  %v2750_v25 = vmax.f32 %v5252_v41, 0.0  ;;  %vm3109_vm10 = vcmp.lt.f32.partialorder %v3108_v33, 0.0004427343  ;;  %v3123_v37 = vmul.f32 -0.5, %v5364_v1  ;;  %v3133_v34 = vadd.f32 1.0, %v3132_v17 }
 0x488   : > { %v3135_v39 = vand.u32 2147483647, %v5351_v56  ;;  %v3126_v40 = vand.u32 2147483647, %v5364_v1  ;;  %v2753_v24 = vmax.f32 %v5273_v22, 0.0  ;;  %v2752_v59 = vmax.f32 %v5286_v26, 0.0 }
 0x489   : > { %v3124_v35 = vadd.f32 1.0, %v3123_v37  ;;  %v3134_v41 = vmul.f32 %v5351_v56, %v3133_v34  ;;  %v2755_v43 = vmax.f32 %v5293_v42, 0.0  ;;  %v2754_v61 = vmax.f32 %v5307_v57, 0.0 }
 0x48a   : > { %v3926_v15 = vpop.eup %3925  ;;  %vm3136_vm11 = vcmp.lt.f32.partialorder %v3135_v39, 0.0004427343  ;;  %vm3127_vm12 = vcmp.lt.f32.partialorder %v3126_v40, 0.0004427343 }
 0x48b   : > { %v3928_v16 = vpop.eup %3927  ;;  %v3113_v12 = vmul.f32 0.6931472, %v3926_v15  ;;  %v3125_v50 = vmul.f32 %v5364_v1, %v3124_v35 }
 0x48c   : > { %v3930_v45 = vpop.eup %3929  ;;  %v3104_v20 = vmul.f32 0.6931472, %v3928_v16 }
 0x48d   : > { %v3932_v54 = vpop.eup %3931  ;;  %v3119_v9 = vsel %vm3118_vm9, %v3116_v3, %v3113_v12  ;;  %v3147_v51 = vadd.f32 1.0, %v3930_v45  ;;  %v3150_v31 = vmul.f32 -0.5, %v3930_v45  ;;  %v3153_v30 = vand.u32 2147483647, %v3930_v45 }
 0x48e   : > { %v3199_v21 = vadd.f32 %v3119_v9, %v2751_v5  ;;  %v3110_v14 = vsel %vm3109_vm10, %v3107_v53, %v3104_v20  ;;  %v3138_v60 = vadd.f32 1.0, %v3932_v54  ;;  %v3141_v36 = vmul.f32 -0.5, %v3932_v54 }
 0x48f   : > { %v3198_v38 = vadd.f32 %v3110_v14, %v2750_v25  ;;  %3941 = vlog2.f32 %v3147_v51  ;;  %v3934_v6 = vpop.eup %3933  ;;  %v3151_v22 = vadd.f32 1.0, %v3150_v31  ;;  %v3144_v47 = vand.u32 2147483647, %v3932_v54 }
 0x490   : > { %3231 = vst [vmem:[%s5051_s12 + $0xc8] sm:$0xff] %v3199_v21  ;;  %3943 = vlog2.f32 %v3138_v60  ;;  %v3131_v18 = vmul.f32 0.6931472, %v3934_v6  ;;  %v3936_v19 = vpop.eup %3935  ;;  %v3142_v0 = vadd.f32 1.0, %v3141_v36  ;;  %vm3154_vm13 = vcmp.lt.f32.partialorder %v3153_v30, 0.0004427343 }
 0x491   : > { %3230 = vst [vmem:[%s5051_s12 + $0xc0] sm:$0xff] %v3198_v38  ;;  %v3165_v49 = vadd.f32 1.0, %v3936_v19  ;;  %v3152_v29 = vmul.f32 %v3930_v45, %v3151_v22  ;;  %v3168_v26 = vmul.f32 -0.5, %v3936_v19  ;;  %vm3145_vm14 = vcmp.lt.f32.partialorder %v3144_v47, 0.0004427343 }
 0x492   : > { %v3938_v46 = vpop.eup %3937  ;;  %v3137_v48 = vsel %vm3136_vm11, %v3134_v41, %v3131_v18  ;;  %v3143_v55 = vmul.f32 %v3932_v54, %v3142_v0  ;;  %v3171_v32 = vand.u32 2147483647, %v3936_v19  ;;  %v2757_v3 = vmax.f32 %v5338_v28, 0.0 }
 0x493   : > { %v3201_v10 = vadd.f32 %v3137_v48, %v2753_v24  ;;  %v3122_v23 = vmul.f32 0.6931472, %v3938_v46  ;;  %3945 = vlog2.f32 %v3165_v49  ;;  %v3940_v56 = vpop.eup %3939  ;;  %v3169_v11 = vadd.f32 1.0, %v3168_v26 }
 0x494   : > { %v3156_v52 = vadd.f32 1.0, %v3940_v56  ;;  %v3159_v33 = vmul.f32 -0.5, %v3940_v56  ;;  %vm3172_vm15 = vcmp.lt.f32.partialorder %v3171_v32, 0.0004427343  ;;  %v3162_v57 = vand.u32 2147483647, %v3940_v56 }
 0x495   : > { %3233 = vst [vmem:[%s5051_s12 + $0xd8] sm:$0xff] %v3201_v10  ;;  %v3128_v44 = vsel %vm3127_vm12, %v3125_v50, %v3122_v23  ;;  %v3170_v16 = vmul.f32 %v3936_v19, %v3169_v11  ;;  %v2756_v54 = vmax.f32 %v5342_v2, 0.0 }
 0x496   : > { %v3200_v62 = vadd.f32 %v3128_v44, %v2752_v59  ;;  %3947 = vlog2.f32 %v3156_v52  ;;  %v3160_v12 = vadd.f32 1.0, %v3159_v33  ;;  %vm3163_vm0 = vcmp.lt.f32.partialorder %v3162_v57, 0.0004427343 }
 0x498   : > { %3232 = vst [vmem:[%s5051_s12 + $0xd0] sm:$0xff] %v3200_v62  ;;  %v3161_v53 = vmul.f32 %v3940_v56, %v3160_v12 }
 0x49c   : > { %v3942_v4 = vpop.eup %3941 }
 0x49d   : > { %v3944_v8 = vpop.eup %3943  ;;  %v3149_v1 = vmul.f32 0.6931472, %v3942_v4 }
 0x49e   : > { %v3140_v27 = vmul.f32 0.6931472, %v3944_v8 }
 0x49f   : > { %v3155_v7 = vsel %vm3154_vm13, %v3152_v29, %v3149_v1 }
 0x4a0   : > { %v3203_v63 = vadd.f32 %v3155_v7, %v2755_v43  ;;  %v3146_v58 = vsel %vm3145_vm14, %v3143_v55, %v3140_v27  ;;  %v3946_v15 = vpop.eup %3945 }
 0x4a1   : > { %v3202_v13 = vadd.f32 %v3146_v58, %v2754_v61  ;;  %v3167_v42 = vmul.f32 0.6931472, %v3946_v15 }
 0x4a2   : > { %3235 = vst [vmem:[%s5051_s12 + $0xe8] sm:$0xff] %v3203_v63 }
 0x4a3   : > { %3234 = vst [vmem:[%s5051_s12 + $0xe0] sm:$0xff] %v3202_v13  ;;  %v3173_v17 = vsel %vm3172_vm15, %v3170_v16, %v3167_v42  ;;  %v3948_v45 = vpop.eup %3947 }
 0x4a4   : > { %v3205_v5 = vadd.f32 %v3173_v17, %v2757_v3  ;;  %v3158_v20 = vmul.f32 0.6931472, %v3948_v45 }
 0x4a6   : > { %3237 = vst [vmem:[%s5051_s12 + $0xf8] sm:$0xff] %v3205_v5  ;;  %v3164_v9 = vsel %vm3163_vm0, %v3161_v53, %v3158_v20 }
 0x4a7   : > { %v3204_v28 = vadd.f32 %v3164_v9, %v2756_v54 }
 0x4a9   : > { %3236 = vst [vmem:[%s5051_s12 + $0xf0] sm:$0xff] %v3204_v28 }
 0x4aa   : > { %3962 = shalt.err (!%p3959_p3)
}
 0x4ab   : > { %s3963_s16 = scalar_lea.hbm %s5403_s13, 4096  ;;  %s3967_s30 = scalar_lea.hbm %s5461_s11, 8192 }
 0x4ac   : > { %p3964_p4 = scmp.ne.s32.totalorder %s5403_s13, %s3963_s16  ;;  %p3968_p9 = scmp.lt.s32.totalorder %s5403_s13, %s5461_s11 }
 0x4ad   : > { %p3969_p10 = scmp.lt.s32.totalorder %s3967_s30, %s3963_s16 }
 0x4ae   : > { %p3965_p7 = pnand %p3964_p4, %p4113_p5 }
 0x4af   : > { %p3970_p11 = por %p3969_p10, %p3968_p9 }
 0x4b0   : > { %p3966_p8 = pneg %p3965_p7 }
 0x4b2   : > { %p3971_p12 = pnand %p3970_p11, %p3966_p8 }
 0x4b4   : > { %3974 = shalt.err (!%p3971_p12)
}
 0x4b5   : > { %s4013_s15 = smov 128   ;;  %s4014_s22 = smov 8  }
 0x4b6   : > { %3779 = dma.vmem_to_hbm [thread:$0]  (%p4113_p5), %s5405_s25, 4096, %s5403_s13, %s5410_s21, %s4013_s15, %s4013_s15, %s4014_s22  }
 0x4b7 PF: > { %p3785_p13 = scmp.ge.s32.totalorder %s4009_s20, 2  ;;  %s3267_s24 = sand.u32 1, %s3997_s17  }
 0x4b8   : > { %s3268_s0 = scalar_lea.sflag [#allocation3], %s3267_s24 }
 0x4b9   : > { %p3782_p0 = pnand %p3785_p13, %p4117_p6 }
 0x4bb   : > { %p3783_p1 = pneg %p3782_p0 }
 0x4bd   : > { %3992 = dma.done.wait (%p3783_p1), %s3268_s0, 4096  }
 0x4be   : > { %3994 = vsyncadd (%p3783_p1), %s3268_s0, 4294963200  ;;  %p21_p2 = scmp.ge.s32.totalorder %s4100_s23, 4   ;;  %s5486_s17 = smov %s4001_s18 }
 0x4bf   : > { %s5487_s18 = smov %s4005_s19  ;;  %s5488_s19 = smov %s4111_s26 }
 0x4c0   : > { %s5489_s20 = smov %s4100_s23  ;;  %23 = sbr.rel (!%p21_p2) target bundleno = 5 (0x5), region = 99 }
 0x4c5   :  { %3273 = vsyncpa [#allocation3], 1 }
 0x4c6   :  { %3275 = vsyncpa [#allocation3 + $0x1], 1 }

</bundles_post_ra>
